<compile_context>
chip_gen: v5e
topology: v5e:2x2
jax: 0.10.0
libtpu: 0.0.40
codegen_flags: <defaults>
</compile_context>

<pallas_src>
import functools

import jax
import jax.numpy as jnp
from jax.experimental import pallas as pl
from jax.experimental.pallas import tpu as pltpu


def _round_up(x, m):
    return (x + m - 1) // m * m


# ---------------------------------------------------------------------------
# Pallas kernels
# ---------------------------------------------------------------------------
def _conv_mm_kernel(w_ref, p_ref, b_ref, o_ref):
    # w: (OC, K) bf16, p: (K, TILE) bf16, b: (OC, 1) f32  ->  o: (OC, TILE)
    acc = jnp.dot(w_ref[...], p_ref[...], preferred_element_type=jnp.float32)
    acc = acc + b_ref[...]                      # broadcast over lanes
    o_ref[...] = jnp.maximum(acc, 0.0).astype(o_ref.dtype)


def _fc_kernel(x_ref, w_ref, b_ref, o_ref, *, apply_relu):
    # x: (TM, K) bf16, w: (K, N) bf16, b: (1, N) f32  ->  o: (TM, N)
    acc = jnp.dot(x_ref[...], w_ref[...], preferred_element_type=jnp.float32)
    acc = acc + b_ref[...]
    if apply_relu:
        acc = jnp.maximum(acc, 0.0)
    o_ref[...] = acc.astype(o_ref.dtype)


# ---------------------------------------------------------------------------
# Pallas wrappers
# ---------------------------------------------------------------------------
def conv_matmul_cm(w_cm, patches_t, b, *, out_dtype, lane_tile=512):
    """Channel-major conv matmul: relu(w_cm @ patches_t + b).

    w_cm: (OC, K), patches_t: (K, M) with M = N*OH*OW  ->  (OC, M)."""
    oc, k = w_cm.shape
    k2, m = patches_t.shape
    assert k == k2, (k, k2)

    m_pad = _round_up(m, 128)                   # lane-dense output blocks
    tile = min(lane_tile, m_pad)
    m_pad = _round_up(m_pad, tile)
    if m_pad != m:
        patches_t = jnp.pad(patches_t, ((0, 0), (0, m_pad - m)))

    out = pl.pallas_call(
        _conv_mm_kernel,
        out_shape=jax.ShapeDtypeStruct((oc, m_pad), out_dtype),
        grid=(m_pad // tile,),
        in_specs=[
            pl.BlockSpec((oc, k), lambda i: (0, 0)),       # weights resident
            pl.BlockSpec((k, tile), lambda i: (0, i)),     # stream patch tiles
            pl.BlockSpec((oc, 1), lambda i: (0, 0)),       # bias resident
        ],
        out_specs=pl.BlockSpec((oc, tile), lambda i: (0, i)),
        compiler_params=pltpu.CompilerParams(dimension_semantics=("parallel",)),
    )(
        w_cm.astype(jnp.bfloat16),
        patches_t.astype(jnp.bfloat16),
        b.reshape(oc, 1).astype(jnp.float32),
    )
    return out[:, :m] if m_pad != m else out


def matmul_bias_act(x, w, b, *, apply_relu, out_dtype, row_tile=256):
    """Row-major dense layer: act(x @ w + b). x: (M, K), w: (K, N), b: (N,)."""
    m, k = x.shape
    k2, n = w.shape
    assert k == k2, (k, k2)

    m_pad = _round_up(m, 8)
    tile = min(row_tile, m_pad)
    m_pad = _round_up(m_pad, tile)
    if m_pad != m:
        x = jnp.pad(x, ((0, m_pad - m), (0, 0)))

    kernel = functools.partial(_fc_kernel, apply_relu=apply_relu)
    out = pl.pallas_call(
        kernel,
        out_shape=jax.ShapeDtypeStruct((m_pad, n), out_dtype),
        grid=(m_pad // tile,),
        in_specs=[
            pl.BlockSpec((tile, k), lambda i: (i, 0)),
            pl.BlockSpec((k, n), lambda i: (0, 0)),
            pl.BlockSpec((1, n), lambda i: (0, 0)),
        ],
        out_specs=pl.BlockSpec((tile, n), lambda i: (i, 0)),
        compiler_params=pltpu.CompilerParams(dimension_semantics=("parallel",)),
    )(
        x.astype(jnp.bfloat16),
        w.astype(jnp.bfloat16),
        b.reshape(1, n).astype(jnp.float32),
    )
    return out[:m] if m_pad != m else out


# ---------------------------------------------------------------------------
# Conv2d + ReLU = channel-major im2col (fused by XLA under jit) + Pallas matmul
# ---------------------------------------------------------------------------
def conv2d_relu_cm(x_cnhw, w_oihw, b, stride):
    """x_cnhw: (C, N, H, W) channel-major activations; w_oihw: (OC, IC, KH, KW)."""
    c, n, h, w = x_cnhw.shape
    oc, ic, kh, kw = w_oihw.shape
    assert ic == c, (ic, c)
    oh = (h - kh) // stride + 1
    ow = (w - kw) // stride + 1

    taps = []
    for i in range(kh):
        for j in range(kw):
            taps.append(
                x_cnhw[:, :, i:i + stride * oh:stride, j:j + stride * ow:stride]
            )  # each (C, N, OH, OW)
    # K ordering = (C, KH, KW) to match w_oihw.reshape(OC, IC*KH*KW)
    patches_t = jnp.stack(taps, axis=1).reshape(c * kh * kw, n * oh * ow)
    w_cm = w_oihw.reshape(oc, ic * kh * kw)

    y = conv_matmul_cm(w_cm, patches_t, b, out_dtype=jnp.bfloat16)  # (OC, N*OH*OW)
    return y.reshape(oc, n, oh, ow)


# ---------------------------------------------------------------------------
# Parameters (deterministic PyTorch-style uniform fan-in init).
# Weights stored in bf16 (MXU operand dtype), biases in f32.
# fc weights stored PRE-TRANSPOSED to (in, out).
# ---------------------------------------------------------------------------
def _uniform(key, shape, fan_in):
    bound = 1.0 / (float(fan_in) ** 0.5)
    return jax.random.uniform(key, shape, jnp.float32, -bound, bound)


def build_cnn_params(key, c, output_dim):
    ks = jax.random.split(key, 10)
    p = {}
    p["conv1_w"] = _uniform(ks[0], (32, c, 8, 8), c * 64).astype(jnp.bfloat16)
    p["conv1_b"] = _uniform(ks[1], (32,), c * 64)
    p["conv2_w"] = _uniform(ks[2], (64, 32, 4, 4), 32 * 16).astype(jnp.bfloat16)
    p["conv2_b"] = _uniform(ks[3], (64,), 32 * 16)
    p["conv3_w"] = _uniform(ks[4], (64, 64, 3, 3), 64 * 9).astype(jnp.bfloat16)
    p["conv3_b"] = _uniform(ks[5], (64,), 64 * 9)
    # PyTorch Linear weight is (out, in); store transposed (in, out) once.
    p["fc1_wT"] = jnp.transpose(_uniform(ks[6], (512, 3136), 3136)).astype(jnp.bfloat16)
    p["fc1_b"] = _uniform(ks[7], (512,), 3136)
    p["fc2_wT"] = jnp.transpose(_uniform(ks[8], (output_dim, 512), 512)).astype(jnp.bfloat16)
    p["fc2_b"] = _uniform(ks[9], (output_dim,), 512)
    return p


# ---------------------------------------------------------------------------
# Forward pass (jitted): (conv+relu) x3 -> flatten -> (dense+relu) -> dense
# ---------------------------------------------------------------------------
def _cnn_forward(params, x_nchw):
    x = jnp.transpose(x_nchw, (1, 0, 2, 3)).astype(jnp.float32)        # (C, N, 84, 84)
    x = conv2d_relu_cm(x, params["conv1_w"], params["conv1_b"], stride=4)  # (32, N, 20, 20)
    x = conv2d_relu_cm(x, params["conv2_w"], params["conv2_b"], stride=2)  # (64, N, 9, 9)
    x = conv2d_relu_cm(x, params["conv3_w"], params["conv3_b"], stride=1)  # (64, N, 7, 7)
    n = x.shape[1]
    # PyTorch Flatten works on NCHW -> channel-major layout transposes straight into it.
    flat = jnp.transpose(x, (1, 0, 2, 3)).reshape(n, -1)                   # (N, 3136)
    h = matmul_bias_act(flat, params["fc1_wT"], params["fc1_b"],
                        apply_relu=True, out_dtype=jnp.bfloat16)           # (N, 512)
    out = matmul_bias_act(h, params["fc2_wT"], params["fc2_b"],
                          apply_relu=False, out_dtype=jnp.float32)         # (N, out)
    return out


cnn_forward = jax.jit(_cnn_forward)


class MarioNet:
    """JAX/Pallas port of the PyTorch MarioNet (online + frozen target copy)."""

    def __init__(self, input_dim, output_dim, key):
        c, h, w = input_dim
        if h != 84:
            raise ValueError(f"Expecting input height: 84, got: {h}")
        if w != 84:
            raise ValueError(f"Expecting input width: 84, got: {w}")
        self.online = build_cnn_params(key, c, output_dim)
        # target.load_state_dict(online.state_dict()) -> identical copy
        self.target = dict(self.online)

    def forward(self, x_nchw, model):
        if model == "online":
            return cnn_forward(self.online, x_nchw)
        elif model == "target":
            return cnn_forward(self.target, x_nchw)


if __name__ == "__main__":
    key = jax.random.PRNGKey(0)
    pkey, xkey = jax.random.split(key)

    batch, channels, height, width = 2, 4, 84, 84   # module mandates 84x84
    output_dim = 5                                   # small action space

    net = MarioNet((channels, height, width), output_dim, pkey)
    x = jax.random.uniform(xkey, (batch, channels, height, width), jnp.float32)

    out_online = net.forward(x, "online")
    out_target = net.forward(x, "target")
    jax.block_until_ready(out_online)
    jax.block_until_ready(out_target)

    assert out_online.shape == (batch, output_dim)
    assert out_target.shape == (batch, output_dim)
    assert bool(jnp.all(jnp.isfinite(out_online)))
    # target is an exact copy of online at init -> identical outputs
    assert bool(jnp.allclose(out_online, out_target))

    print("KERNEL_OK")
</pallas_src>

<mosaic_0001>
module attributes {stable_mosaic.version = 11 : i64} {
  func.func @_conv_mm_kernel(%arg0: i32, %arg1: memref<32x256xbf16, #tpu.memory_space<vmem>>, %arg2: memref<256x512xbf16, #tpu.memory_space<vmem>>, %arg3: memref<32x1xf32, #tpu.memory_space<vmem>>, %arg4: memref<32x512xbf16, #tpu.memory_space<vmem>>) attributes {dimension_semantics = [#tpu.dimension_semantics<parallel>], iteration_bounds = array<i64: 2>, scalar_prefetch = 0 : i64, scratch_operands = 0 : i64, tpu.core_type = #tpu.core_type<tc>, window_params = [{pipeline_mode = #tpu.pipeline_mode<synchronous>, transform_indices = @transform_0, window_bounds = array<i64: 32, 256>}, {transform_indices = @transform_1, window_bounds = array<i64: 256, 512>}, {pipeline_mode = #tpu.pipeline_mode<synchronous>, transform_indices = @transform_2, window_bounds = array<i64: 32, 1>}, {transform_indices = @transform_3, window_bounds = array<i64: 32, 512>}]} {
    %c0 = arith.constant 0 : index
    %c0_0 = arith.constant 0 : index
    %0 = vector.load %arg1[%c0, %c0_0] : memref<32x256xbf16, #tpu.memory_space<vmem>>, vector<32x256xbf16>
    %c0_1 = arith.constant 0 : index
    %c0_2 = arith.constant 0 : index
    %1 = vector.load %arg2[%c0_1, %c0_2] : memref<256x512xbf16, #tpu.memory_space<vmem>>, vector<256x512xbf16>
    %cst = arith.constant dense<0.000000e+00> : vector<32x512xf32>
    %2 = tpu.matmul %0, %1, %cst {dimension_numbers = #tpu.dot_dimension_numbers<[1], [0], [0], [1], [0, 0, 1, 1], [], []>} : vector<32x256xbf16>, vector<256x512xbf16>, vector<32x512xf32> -> vector<32x512xf32>
    %c0_3 = arith.constant 0 : index
    %c0_4 = arith.constant 0 : index
    %3 = vector.load %arg3[%c0_3, %c0_4] : memref<32x1xf32, #tpu.memory_space<vmem>>, vector<32x1xf32>
    %4 = vector.broadcast %3 : vector<32x1xf32> to vector<32x512xf32>
    %5 = arith.addf %2, %4 : vector<32x512xf32>
    %cst_5 = arith.constant 0.000000e+00 : f32
    %6 = vector.broadcast %cst_5 : f32 to vector<32x512xf32>
    %7 = arith.maximumf %5, %6 : vector<32x512xf32>
    %8 = arith.truncf %7 : vector<32x512xf32> to vector<32x512xbf16>
    %c0_6 = arith.constant 0 : index
    %c0_7 = arith.constant 0 : index
    %9 = vector.load %arg4[%c0_6, %c0_7] : memref<32x512xbf16, #tpu.memory_space<vmem>>, vector<32x512xbf16>
    tpu.vector_store %arg4[%c0_6, %c0_7], %8 {strides = array<i32>} : memref<32x512xbf16, #tpu.memory_space<vmem>>, vector<32x512xbf16>,
    return
  }
  func.func @transform_0(%arg0: i32) -> (i32, i32) {
    %c0_i32 = arith.constant 0 : i32
    %c0_i32_0 = arith.constant 0 : i32
    %c0_i32_1 = arith.constant 0 : i32
    return %c0_i32, %c0_i32_0 : i32, i32
  }
  func.func @transform_1(%arg0: i32) -> (i32, i32) {
    %c0_i32 = arith.constant 0 : i32
    %c0_i32_0 = arith.constant 0 : i32
    return %c0_i32, %arg0 : i32, i32
  }
  func.func @transform_2(%arg0: i32) -> (i32, i32) {
    %c0_i32 = arith.constant 0 : i32
    %c0_i32_0 = arith.constant 0 : i32
    %c0_i32_1 = arith.constant 0 : i32
    return %c0_i32, %c0_i32_0 : i32, i32
  }
  func.func @transform_3(%arg0: i32) -> (i32, i32) {
    %c0_i32 = arith.constant 0 : i32
    %c0_i32_0 = arith.constant 0 : i32
    return %c0_i32, %arg0 : i32, i32
  }
}

module attributes {stable_mosaic.version = 11 : i64} {
  func.func @_conv_mm_kernel(%arg0: i32, %arg1: memref<64x512xbf16, #tpu.memory_space<vmem>>, %arg2: memref<512x256xbf16, #tpu.memory_space<vmem>>, %arg3: memref<64x1xf32, #tpu.memory_space<vmem>>, %arg4: memref<64x256xbf16, #tpu.memory_space<vmem>>) attributes {dimension_semantics = [#tpu.dimension_semantics<parallel>], iteration_bounds = array<i64: 1>, scalar_prefetch = 0 : i64, scratch_operands = 0 : i64, tpu.core_type = #tpu.core_type<tc>, window_params = [{pipeline_mode = #tpu.pipeline_mode<synchronous>, transform_indices = @transform_0, window_bounds = array<i64: 64, 512>}, {transform_indices = @transform_1, window_bounds = array<i64: 512, 256>}, {pipeline_mode = #tpu.pipeline_mode<synchronous>, transform_indices = @transform_2, window_bounds = array<i64: 64, 1>}, {transform_indices = @transform_3, window_bounds = array<i64: 64, 256>}]} {
    %c0 = arith.constant 0 : index
    %c0_0 = arith.constant 0 : index
    %0 = vector.load %arg1[%c0, %c0_0] : memref<64x512xbf16, #tpu.memory_space<vmem>>, vector<64x512xbf16>
    %c0_1 = arith.constant 0 : index
    %c0_2 = arith.constant 0 : index
    %1 = vector.load %arg2[%c0_1, %c0_2] : memref<512x256xbf16, #tpu.memory_space<vmem>>, vector<512x256xbf16>
    %cst = arith.constant dense<0.000000e+00> : vector<64x256xf32>
    %2 = tpu.matmul %0, %1, %cst {dimension_numbers = #tpu.dot_dimension_numbers<[1], [0], [0], [1], [0, 0, 1, 1], [], []>} : vector<64x512xbf16>, vector<512x256xbf16>, vector<64x256xf32> -> vector<64x256xf32>
    %c0_3 = arith.constant 0 : index
    %c0_4 = arith.constant 0 : index
    %3 = vector.load %arg3[%c0_3, %c0_4] : memref<64x1xf32, #tpu.memory_space<vmem>>, vector<64x1xf32>
    %4 = vector.broadcast %3 : vector<64x1xf32> to vector<64x256xf32>
    %5 = arith.addf %2, %4 : vector<64x256xf32>
    %cst_5 = arith.constant 0.000000e+00 : f32
    %6 = vector.broadcast %cst_5 : f32 to vector<64x256xf32>
    %7 = arith.maximumf %5, %6 : vector<64x256xf32>
    %8 = arith.truncf %7 : vector<64x256xf32> to vector<64x256xbf16>
    %c0_6 = arith.constant 0 : index
    %c0_7 = arith.constant 0 : index
    %9 = vector.load %arg4[%c0_6, %c0_7] : memref<64x256xbf16, #tpu.memory_space<vmem>>, vector<64x256xbf16>
    tpu.vector_store %arg4[%c0_6, %c0_7], %8 {strides = array<i32>} : memref<64x256xbf16, #tpu.memory_space<vmem>>, vector<64x256xbf16>,
    return
  }
  func.func @transform_0(%arg0: i32) -> (i32, i32) {
    %c0_i32 = arith.constant 0 : i32
    %c0_i32_0 = arith.constant 0 : i32
    %c0_i32_1 = arith.constant 0 : i32
    return %c0_i32, %c0_i32_0 : i32, i32
  }
  func.func @transform_1(%arg0: i32) -> (i32, i32) {
    %c0_i32 = arith.constant 0 : i32
    %c0_i32_0 = arith.constant 0 : i32
    return %c0_i32, %arg0 : i32, i32
  }
  func.func @transform_2(%arg0: i32) -> (i32, i32) {
    %c0_i32 = arith.constant 0 : i32
    %c0_i32_0 = arith.constant 0 : i32
    %c0_i32_1 = arith.constant 0 : i32
    return %c0_i32, %c0_i32_0 : i32, i32
  }
  func.func @transform_3(%arg0: i32) -> (i32, i32) {
    %c0_i32 = arith.constant 0 : i32
    %c0_i32_0 = arith.constant 0 : i32
    return %c0_i32, %arg0 : i32, i32
  }
}

module attributes {stable_mosaic.version = 11 : i64} {
  func.func @_conv_mm_kernel(%arg0: i32, %arg1: memref<64x576xbf16, #tpu.memory_space<vmem>>, %arg2: memref<576x128xbf16, #tpu.memory_space<vmem>>, %arg3: memref<64x1xf32, #tpu.memory_space<vmem>>, %arg4: memref<64x128xbf16, #tpu.memory_space<vmem>>) attributes {dimension_semantics = [#tpu.dimension_semantics<parallel>], iteration_bounds = array<i64: 1>, scalar_prefetch = 0 : i64, scratch_operands = 0 : i64, tpu.core_type = #tpu.core_type<tc>, window_params = [{pipeline_mode = #tpu.pipeline_mode<synchronous>, transform_indices = @transform_0, window_bounds = array<i64: 64, 576>}, {transform_indices = @transform_1, window_bounds = array<i64: 576, 128>}, {pipeline_mode = #tpu.pipeline_mode<synchronous>, transform_indices = @transform_2, window_bounds = array<i64: 64, 1>}, {transform_indices = @transform_3, window_bounds = array<i64: 64, 128>}]} {
    %c0 = arith.constant 0 : index
    %c0_0 = arith.constant 0 : index
    %0 = vector.load %arg1[%c0, %c0_0] : memref<64x576xbf16, #tpu.memory_space<vmem>>, vector<64x576xbf16>
    %c0_1 = arith.constant 0 : index
    %c0_2 = arith.constant 0 : index
    %1 = vector.load %arg2[%c0_1, %c0_2] : memref<576x128xbf16, #tpu.memory_space<vmem>>, vector<576x128xbf16>
    %cst = arith.constant dense<0.000000e+00> : vector<64x128xf32>
    %2 = tpu.matmul %0, %1, %cst {dimension_numbers = #tpu.dot_dimension_numbers<[1], [0], [0], [1], [0, 0, 1, 1], [], []>} : vector<64x576xbf16>, vector<576x128xbf16>, vector<64x128xf32> -> vector<64x128xf32>
    %c0_3 = arith.constant 0 : index
    %c0_4 = arith.constant 0 : index
    %3 = vector.load %arg3[%c0_3, %c0_4] : memref<64x1xf32, #tpu.memory_space<vmem>>, vector<64x1xf32>
    %4 = vector.broadcast %3 : vector<64x1xf32> to vector<64x128xf32>
    %5 = arith.addf %2, %4 : vector<64x128xf32>
    %cst_5 = arith.constant 0.000000e+00 : f32
    %6 = vector.broadcast %cst_5 : f32 to vector<64x128xf32>
    %7 = arith.maximumf %5, %6 : vector<64x128xf32>
    %8 = arith.truncf %7 : vector<64x128xf32> to vector<64x128xbf16>
    %c0_6 = arith.constant 0 : index
    %c0_7 = arith.constant 0 : index
    %9 = vector.load %arg4[%c0_6, %c0_7] : memref<64x128xbf16, #tpu.memory_space<vmem>>, vector<64x128xbf16>
    tpu.vector_store %arg4[%c0_6, %c0_7], %8 {strides = array<i32>} : memref<64x128xbf16, #tpu.memory_space<vmem>>, vector<64x128xbf16>,
    return
  }
  func.func @transform_0(%arg0: i32) -> (i32, i32) {
    %c0_i32 = arith.constant 0 : i32
    %c0_i32_0 = arith.constant 0 : i32
    %c0_i32_1 = arith.constant 0 : i32
    return %c0_i32, %c0_i32_0 : i32, i32
  }
  func.func @transform_1(%arg0: i32) -> (i32, i32) {
    %c0_i32 = arith.constant 0 : i32
    %c0_i32_0 = arith.constant 0 : i32
    return %c0_i32, %arg0 : i32, i32
  }
  func.func @transform_2(%arg0: i32) -> (i32, i32) {
    %c0_i32 = arith.constant 0 : i32
    %c0_i32_0 = arith.constant 0 : i32
    %c0_i32_1 = arith.constant 0 : i32
    return %c0_i32, %c0_i32_0 : i32, i32
  }
  func.func @transform_3(%arg0: i32) -> (i32, i32) {
    %c0_i32 = arith.constant 0 : i32
    %c0_i32_0 = arith.constant 0 : i32
    return %c0_i32, %arg0 : i32, i32
  }
}

module attributes {stable_mosaic.version = 11 : i64} {
  func.func @_fc_kernel(%arg0: i32, %arg1: memref<8x3136xbf16, #tpu.memory_space<vmem>>, %arg2: memref<3136x512xbf16, #tpu.memory_space<vmem>>, %arg3: memref<1x512xf32, #tpu.memory_space<vmem>>, %arg4: memref<8x512xbf16, #tpu.memory_space<vmem>>) attributes {dimension_semantics = [#tpu.dimension_semantics<parallel>], iteration_bounds = array<i64: 1>, scalar_prefetch = 0 : i64, scratch_operands = 0 : i64, tpu.core_type = #tpu.core_type<tc>, window_params = [{transform_indices = @transform_0, window_bounds = array<i64: 8, 3136>}, {pipeline_mode = #tpu.pipeline_mode<synchronous>, transform_indices = @transform_1, window_bounds = array<i64: 3136, 512>}, {pipeline_mode = #tpu.pipeline_mode<synchronous>, transform_indices = @transform_2, window_bounds = array<i64: 1, 512>}, {transform_indices = @transform_3, window_bounds = array<i64: 8, 512>}]} {
    %c0 = arith.constant 0 : index
    %c0_0 = arith.constant 0 : index
    %0 = vector.load %arg1[%c0, %c0_0] : memref<8x3136xbf16, #tpu.memory_space<vmem>>, vector<8x3136xbf16>
    %c0_1 = arith.constant 0 : index
    %c0_2 = arith.constant 0 : index
    %1 = vector.load %arg2[%c0_1, %c0_2] : memref<3136x512xbf16, #tpu.memory_space<vmem>>, vector<3136x512xbf16>
    %cst = arith.constant dense<0.000000e+00> : vector<8x512xf32>
    %2 = tpu.matmul %0, %1, %cst {dimension_numbers = #tpu.dot_dimension_numbers<[1], [0], [0], [1], [0, 0, 1, 1], [], []>} : vector<8x3136xbf16>, vector<3136x512xbf16>, vector<8x512xf32> -> vector<8x512xf32>
    %c0_3 = arith.constant 0 : index
    %c0_4 = arith.constant 0 : index
    %3 = vector.load %arg3[%c0_3, %c0_4] : memref<1x512xf32, #tpu.memory_space<vmem>>, vector<1x512xf32>
    %4 = vector.broadcast %3 : vector<1x512xf32> to vector<8x512xf32>
    %5 = arith.addf %2, %4 : vector<8x512xf32>
    %cst_5 = arith.constant 0.000000e+00 : f32
    %6 = vector.broadcast %cst_5 : f32 to vector<8x512xf32>
    %7 = arith.maximumf %5, %6 : vector<8x512xf32>
    %8 = arith.truncf %7 : vector<8x512xf32> to vector<8x512xbf16>
    %c0_6 = arith.constant 0 : index
    %c0_7 = arith.constant 0 : index
    %9 = vector.load %arg4[%c0_6, %c0_7] : memref<8x512xbf16, #tpu.memory_space<vmem>>, vector<8x512xbf16>
    tpu.vector_store %arg4[%c0_6, %c0_7], %8 {strides = array<i32>} : memref<8x512xbf16, #tpu.memory_space<vmem>>, vector<8x512xbf16>,
    return
  }
  func.func @transform_0(%arg0: i32) -> (i32, i32) {
    %c0_i32 = arith.constant 0 : i32
    %c0_i32_0 = arith.constant 0 : i32
    return %arg0, %c0_i32 : i32, i32
  }
  func.func @transform_1(%arg0: i32) -> (i32, i32) {
    %c0_i32 = arith.constant 0 : i32
    %c0_i32_0 = arith.constant 0 : i32
    %c0_i32_1 = arith.constant 0 : i32
    return %c0_i32, %c0_i32_0 : i32, i32
  }
  func.func @transform_2(%arg0: i32) -> (i32, i32) {
    %c0_i32 = arith.constant 0 : i32
    %c0_i32_0 = arith.constant 0 : i32
    %c0_i32_1 = arith.constant 0 : i32
    return %c0_i32, %c0_i32_0 : i32, i32
  }
  func.func @transform_3(%arg0: i32) -> (i32, i32) {
    %c0_i32 = arith.constant 0 : i32
    %c0_i32_0 = arith.constant 0 : i32
    return %arg0, %c0_i32 : i32, i32
  }
}

module attributes {stable_mosaic.version = 11 : i64} {
  func.func @_fc_kernel(%arg0: i32, %arg1: memref<8x512xbf16, #tpu.memory_space<vmem>>, %arg2: memref<512x5xbf16, #tpu.memory_space<vmem>>, %arg3: memref<1x5xf32, #tpu.memory_space<vmem>>, %arg4: memref<8x5xf32, #tpu.memory_space<vmem>>) attributes {dimension_semantics = [#tpu.dimension_semantics<parallel>], iteration_bounds = array<i64: 1>, scalar_prefetch = 0 : i64, scratch_operands = 0 : i64, tpu.core_type = #tpu.core_type<tc>, window_params = [{transform_indices = @transform_0, window_bounds = array<i64: 8, 512>}, {pipeline_mode = #tpu.pipeline_mode<synchronous>, transform_indices = @transform_1, window_bounds = array<i64: 512, 5>}, {pipeline_mode = #tpu.pipeline_mode<synchronous>, transform_indices = @transform_2, window_bounds = array<i64: 1, 5>}, {transform_indices = @transform_3, window_bounds = array<i64: 8, 5>}]} {
    %c0 = arith.constant 0 : index
    %c0_0 = arith.constant 0 : index
    %0 = vector.load %arg1[%c0, %c0_0] : memref<8x512xbf16, #tpu.memory_space<vmem>>, vector<8x512xbf16>
    %c0_1 = arith.constant 0 : index
    %c0_2 = arith.constant 0 : index
    %1 = vector.load %arg2[%c0_1, %c0_2] : memref<512x5xbf16, #tpu.memory_space<vmem>>, vector<512x5xbf16>
    %cst = arith.constant dense<0.000000e+00> : vector<8x5xf32>
    %2 = tpu.matmul %0, %1, %cst {dimension_numbers = #tpu.dot_dimension_numbers<[1], [0], [0], [1], [0, 0, 1, 1], [], []>} : vector<8x512xbf16>, vector<512x5xbf16>, vector<8x5xf32> -> vector<8x5xf32>
    %c0_3 = arith.constant 0 : index
    %c0_4 = arith.constant 0 : index
    %3 = vector.load %arg3[%c0_3, %c0_4] : memref<1x5xf32, #tpu.memory_space<vmem>>, vector<1x5xf32>
    %4 = vector.broadcast %3 : vector<1x5xf32> to vector<8x5xf32>
    %5 = arith.addf %2, %4 : vector<8x5xf32>
    %c0_5 = arith.constant 0 : index
    %c0_6 = arith.constant 0 : index
    %6 = vector.load %arg4[%c0_5, %c0_6] : memref<8x5xf32, #tpu.memory_space<vmem>>, vector<8x5xf32>
    tpu.vector_store %arg4[%c0_5, %c0_6], %5 {strides = array<i32>} : memref<8x5xf32, #tpu.memory_space<vmem>>, vector<8x5xf32>,
    return
  }
  func.func @transform_0(%arg0: i32) -> (i32, i32) {
    %c0_i32 = arith.constant 0 : i32
    %c0_i32_0 = arith.constant 0 : i32
    return %arg0, %c0_i32 : i32, i32
  }
  func.func @transform_1(%arg0: i32) -> (i32, i32) {
    %c0_i32 = arith.constant 0 : i32
    %c0_i32_0 = arith.constant 0 : i32
    %c0_i32_1 = arith.constant 0 : i32
    return %c0_i32, %c0_i32_0 : i32, i32
  }
  func.func @transform_2(%arg0: i32) -> (i32, i32) {
    %c0_i32 = arith.constant 0 : i32
    %c0_i32_0 = arith.constant 0 : i32
    %c0_i32_1 = arith.constant 0 : i32
    return %c0_i32, %c0_i32_0 : i32, i32
  }
  func.func @transform_3(%arg0: i32) -> (i32, i32) {
    %c0_i32 = arith.constant 0 : i32
    %c0_i32_0 = arith.constant 0 : i32
    return %arg0, %c0_i32 : i32, i32
  }
}

</mosaic_0001>

<bundles_post_ra>
// kernel: _cnn_forward.5
= control target key start
LH: loop header
LB: loop body
LE: loop exit
PB: predicated region body
PF: predicated region fallthrough
CT: control target
= control target key end

     0   :  { %s1455_s12 = smov 0   ;;  %s1457_s13 = smov 0   ;;  %s1871_s0 = inlined_call_operand.vmem [shape: bf16[32,256], index: 0, kind: input, shape index: {}]   ;;  %s1872_s1 = inlined_call_operand.vmem [shape: bf16[256,1024], index: 1, kind: input, shape index: {}]   ;;  %s1873_s2 = inlined_call_operand.vmem [shape: f32[32,1], index: 2, kind: input, shape index: {}]   ;;  %s1874_s3 = inlined_call_operand.vmem [shape: bf16[32,1024], index: 3, kind: output, shape index: {}]  }
   0x1   :  { %s1459_s14 = smov 0  }
   0x2 LB: > { %s1026_s15 = sadd.s32 4294967295, %s1432_s14   ;;  %s1472_s16 = sadd.s32 1, %s1432_s14   ;;  %s1432_s14 = sphi %s1459_s14, %s1878_s14   ;;  %s1428_s13 = sphi %s1457_s13, %s1877_s13   ;;  %s1424_s12 = sphi %s1455_s12, %s1876_s12  }
   0x3   : > { %s38_s17 = ssub.s32 %s1432_s14, %s1472_s16  ;;  %s41_s18 = sadd.s32 1, %s1428_s13 }
   0x4   : > { %p39_p0 = scmp.eq.s32.totalorder %s38_s17, 0  ;;  %p48_p1 = scmp.ne.s32.totalorder %s1428_s13, %s1424_s12 }
   0x5   : > { %p49_p2 = scmp.eq.s32.totalorder %s1432_s14, 0  ;;  %p99_p3 = scmp.eq.s32.totalorder %s1026_s15, 1 }
   0x6   : > { %s1483_s19 = scalar_select %p39_p0, %s1428_s13, %s41_s18  }
   0x7   : > { %p50_p4 = por %p49_p2, %p48_p1  ;;  %p1485_p5 = por %p99_p3, %p48_p1 }
   0x8   : > { %p1029_p6 = scmp.ge.s32.totalorder %s1432_s14, 2 }
   0xa   : > { %127 = sbr.rel (%p1029_p6) target bundleno = 83 (0x53), region = 24 }
   0xf   : > { %130 = sbr.rel (!%p50_p4) target bundleno = 83 (0x53), region = 28  ;;  %s132_s21 = sand.u32 (%p50_p4), 1, %s1428_s13  }
  0x10   : > { %s1313_s22 = sshll.u32 (%p50_p4), %s1432_s14, 4  ;;  %s1030_s23 = sshll.u32 (%p50_p4), %s132_s21, 9 }
  0x11   : > { %s1495_s26 = scalar_lea.vmem (%p50_p4), %s1872_s1, %s1313_s22  ;;  %s1500_s27 = scalar_lea.vmem (%p50_p4), [#allocation2], %s1030_s23 }
  0x12   : > { %v150_v0 = vld [vmem:[%s1495_s26] sm:$0xff] (%p50_p4)  ;;  %v152_v1 = vld [vmem:[%s1495_s26 + $0x8] sm:$0xff] (%p50_p4) }
  0x13   : > { %v154_v2 = vld [vmem:[%s1495_s26 + $0x20] sm:$0xff] (%p50_p4)  ;;  %151 = vst [vmem:[%s1500_s27] sm:$0xff] (%p50_p4), %v150_v0  ;;  %v156_v3 = vld [vmem:[%s1495_s26 + $0x28] sm:$0xff] (%p50_p4) }
  0x14   : > { %153 = vst [vmem:[%s1500_s27 + $0x8] sm:$0xff] %v152_v1  ;;  %v158_v4 = vld [vmem:[%s1495_s26 + $0x40] sm:$0xff]  ;;  %v160_v5 = vld [vmem:[%s1495_s26 + $0x48] sm:$0xff] }
  0x15   : > { %155 = vst [vmem:[%s1500_s27 + $0x10] sm:$0xff] %v154_v2  ;;  %v162_v6 = vld [vmem:[%s1495_s26 + $0x60] sm:$0xff]  ;;  %v164_v7 = vld [vmem:[%s1495_s26 + $0x68] sm:$0xff] }
  0x16   : > { %157 = vst [vmem:[%s1500_s27 + $0x18] sm:$0xff] %v156_v3  ;;  %v166_v8 = vld [vmem:[%s1495_s26 + $0x80] sm:$0xff]  ;;  %v168_v9 = vld [vmem:[%s1495_s26 + $0x88] sm:$0xff] }
  0x17   : > { %159 = vst [vmem:[%s1500_s27 + $0x20] sm:$0xff] %v158_v4  ;;  %v170_v10 = vld [vmem:[%s1495_s26 + $0xa0] sm:$0xff]  ;;  %v172_v11 = vld [vmem:[%s1495_s26 + $0xa8] sm:$0xff] }
  0x18   : > { %161 = vst [vmem:[%s1500_s27 + $0x28] sm:$0xff] %v160_v5  ;;  %v174_v12 = vld [vmem:[%s1495_s26 + $0xc0] sm:$0xff]  ;;  %v176_v13 = vld [vmem:[%s1495_s26 + $0xc8] sm:$0xff] }
  0x19   : > { %163 = vst [vmem:[%s1500_s27 + $0x30] sm:$0xff] %v162_v6  ;;  %v178_v14 = vld [vmem:[%s1495_s26 + $0xe0] sm:$0xff]  ;;  %v180_v15 = vld [vmem:[%s1495_s26 + $0xe8] sm:$0xff] }
  0x1a   : > { %165 = vst [vmem:[%s1500_s27 + $0x38] sm:$0xff] %v164_v7  ;;  %v182_v16 = vld [vmem:[%s1495_s26 + $0x100] sm:$0xff]  ;;  %v184_v17 = vld [vmem:[%s1495_s26 + $0x108] sm:$0xff] }
  0x1b   : > { %167 = vst [vmem:[%s1500_s27 + $0x40] sm:$0xff] %v166_v8  ;;  %v186_v18 = vld [vmem:[%s1495_s26 + $0x120] sm:$0xff]  ;;  %v188_v19 = vld [vmem:[%s1495_s26 + $0x128] sm:$0xff] }
  0x1c   : > { %169 = vst [vmem:[%s1500_s27 + $0x48] sm:$0xff] %v168_v9  ;;  %v190_v20 = vld [vmem:[%s1495_s26 + $0x140] sm:$0xff]  ;;  %v192_v21 = vld [vmem:[%s1495_s26 + $0x148] sm:$0xff] }
  0x1d   : > { %171 = vst [vmem:[%s1500_s27 + $0x50] sm:$0xff] %v170_v10  ;;  %v194_v22 = vld [vmem:[%s1495_s26 + $0x160] sm:$0xff]  ;;  %v196_v23 = vld [vmem:[%s1495_s26 + $0x168] sm:$0xff] }
  0x1e   : > { %173 = vst [vmem:[%s1500_s27 + $0x58] sm:$0xff] %v172_v11  ;;  %v198_v24 = vld [vmem:[%s1495_s26 + $0x180] sm:$0xff]  ;;  %v200_v25 = vld [vmem:[%s1495_s26 + $0x188] sm:$0xff] }
  0x1f   : > { %175 = vst [vmem:[%s1500_s27 + $0x60] sm:$0xff] %v174_v12  ;;  %v202_v26 = vld [vmem:[%s1495_s26 + $0x1a0] sm:$0xff]  ;;  %v204_v27 = vld [vmem:[%s1495_s26 + $0x1a8] sm:$0xff] }
  0x20   : > { %177 = vst [vmem:[%s1500_s27 + $0x68] sm:$0xff] %v176_v13  ;;  %v206_v28 = vld [vmem:[%s1495_s26 + $0x1c0] sm:$0xff]  ;;  %v208_v29 = vld [vmem:[%s1495_s26 + $0x1c8] sm:$0xff] }
  0x21   : > { %179 = vst [vmem:[%s1500_s27 + $0x70] sm:$0xff] %v178_v14  ;;  %v210_v30 = vld [vmem:[%s1495_s26 + $0x1e0] sm:$0xff]  ;;  %v212_v31 = vld [vmem:[%s1495_s26 + $0x1e8] sm:$0xff] }
  0x22   : > { %181 = vst [vmem:[%s1500_s27 + $0x78] sm:$0xff] %v180_v15  ;;  %v214_v32 = vld [vmem:[%s1495_s26 + $0x200] sm:$0xff]  ;;  %v216_v33 = vld [vmem:[%s1495_s26 + $0x208] sm:$0xff] }
  0x23   : > { %183 = vst [vmem:[%s1500_s27 + $0x80] sm:$0xff] %v182_v16  ;;  %v218_v34 = vld [vmem:[%s1495_s26 + $0x220] sm:$0xff]  ;;  %v220_v35 = vld [vmem:[%s1495_s26 + $0x228] sm:$0xff] }
  0x24   : > { %185 = vst [vmem:[%s1500_s27 + $0x88] sm:$0xff] %v184_v17  ;;  %v222_v36 = vld [vmem:[%s1495_s26 + $0x240] sm:$0xff]  ;;  %v224_v37 = vld [vmem:[%s1495_s26 + $0x248] sm:$0xff] }
  0x25   : > { %187 = vst [vmem:[%s1500_s27 + $0x90] sm:$0xff] %v186_v18  ;;  %v226_v38 = vld [vmem:[%s1495_s26 + $0x260] sm:$0xff]  ;;  %v228_v39 = vld [vmem:[%s1495_s26 + $0x268] sm:$0xff] }
  0x26   : > { %189 = vst [vmem:[%s1500_s27 + $0x98] sm:$0xff] %v188_v19  ;;  %v230_v40 = vld [vmem:[%s1495_s26 + $0x280] sm:$0xff]  ;;  %v232_v41 = vld [vmem:[%s1495_s26 + $0x288] sm:$0xff] }
  0x27   : > { %191 = vst [vmem:[%s1500_s27 + $0xa0] sm:$0xff] %v190_v20  ;;  %v234_v42 = vld [vmem:[%s1495_s26 + $0x2a0] sm:$0xff]  ;;  %v236_v43 = vld [vmem:[%s1495_s26 + $0x2a8] sm:$0xff] }
  0x28   : > { %193 = vst [vmem:[%s1500_s27 + $0xa8] sm:$0xff] %v192_v21  ;;  %v238_v44 = vld [vmem:[%s1495_s26 + $0x2c0] sm:$0xff]  ;;  %v240_v45 = vld [vmem:[%s1495_s26 + $0x2c8] sm:$0xff] }
  0x29   : > { %195 = vst [vmem:[%s1500_s27 + $0xb0] sm:$0xff] %v194_v22  ;;  %v242_v46 = vld [vmem:[%s1495_s26 + $0x2e0] sm:$0xff]  ;;  %v244_v47 = vld [vmem:[%s1495_s26 + $0x2e8] sm:$0xff] }
  0x2a   : > { %197 = vst [vmem:[%s1500_s27 + $0xb8] sm:$0xff] %v196_v23  ;;  %v246_v48 = vld [vmem:[%s1495_s26 + $0x300] sm:$0xff]  ;;  %v248_v49 = vld [vmem:[%s1495_s26 + $0x308] sm:$0xff] }
  0x2b   : > { %199 = vst [vmem:[%s1500_s27 + $0xc0] sm:$0xff] %v198_v24  ;;  %v250_v50 = vld [vmem:[%s1495_s26 + $0x320] sm:$0xff]  ;;  %v252_v51 = vld [vmem:[%s1495_s26 + $0x328] sm:$0xff] }
  0x2c   : > { %201 = vst [vmem:[%s1500_s27 + $0xc8] sm:$0xff] %v200_v25  ;;  %v254_v52 = vld [vmem:[%s1495_s26 + $0x340] sm:$0xff]  ;;  %v256_v53 = vld [vmem:[%s1495_s26 + $0x348] sm:$0xff] }
  0x2d   : > { %203 = vst [vmem:[%s1500_s27 + $0xd0] sm:$0xff] %v202_v26  ;;  %v258_v54 = vld [vmem:[%s1495_s26 + $0x360] sm:$0xff]  ;;  %v260_v55 = vld [vmem:[%s1495_s26 + $0x368] sm:$0xff] }
  0x2e   : > { %205 = vst [vmem:[%s1500_s27 + $0xd8] sm:$0xff] %v204_v27  ;;  %v262_v56 = vld [vmem:[%s1495_s26 + $0x380] sm:$0xff]  ;;  %v264_v57 = vld [vmem:[%s1495_s26 + $0x388] sm:$0xff] }
  0x2f   : > { %207 = vst [vmem:[%s1500_s27 + $0xe0] sm:$0xff] %v206_v28  ;;  %v266_v58 = vld [vmem:[%s1495_s26 + $0x3a0] sm:$0xff]  ;;  %v268_v59 = vld [vmem:[%s1495_s26 + $0x3a8] sm:$0xff] }
  0x30   : > { %209 = vst [vmem:[%s1500_s27 + $0xe8] sm:$0xff] %v208_v29  ;;  %v270_v60 = vld [vmem:[%s1495_s26 + $0x3c0] sm:$0xff]  ;;  %v272_v61 = vld [vmem:[%s1495_s26 + $0x3c8] sm:$0xff] }
  0x31   : > { %211 = vst [vmem:[%s1500_s27 + $0xf0] sm:$0xff] %v210_v30  ;;  %v274_v62 = vld [vmem:[%s1495_s26 + $0x3e0] sm:$0xff]  ;;  %v276_v63 = vld [vmem:[%s1495_s26 + $0x3e8] sm:$0xff] }
  0x32   : > { %213 = vst [vmem:[%s1500_s27 + $0xf8] sm:$0xff] %v212_v31 }
  0x33   : > { %215 = vst [vmem:[%s1500_s27 + $0x100] sm:$0xff] %v214_v32 }
  0x34   : > { %217 = vst [vmem:[%s1500_s27 + $0x108] sm:$0xff] %v216_v33 }
  0x35   : > { %219 = vst [vmem:[%s1500_s27 + $0x110] sm:$0xff] %v218_v34 }
  0x36   : > { %221 = vst [vmem:[%s1500_s27 + $0x118] sm:$0xff] %v220_v35 }
  0x37   : > { %223 = vst [vmem:[%s1500_s27 + $0x120] sm:$0xff] %v222_v36 }
  0x38   : > { %225 = vst [vmem:[%s1500_s27 + $0x128] sm:$0xff] %v224_v37 }
  0x39   : > { %227 = vst [vmem:[%s1500_s27 + $0x130] sm:$0xff] %v226_v38 }
  0x3a   : > { %229 = vst [vmem:[%s1500_s27 + $0x138] sm:$0xff] %v228_v39 }
  0x3b   : > { %231 = vst [vmem:[%s1500_s27 + $0x140] sm:$0xff] %v230_v40 }
  0x3c   : > { %233 = vst [vmem:[%s1500_s27 + $0x148] sm:$0xff] %v232_v41 }
  0x3d   : > { %235 = vst [vmem:[%s1500_s27 + $0x150] sm:$0xff] %v234_v42 }
  0x3e   : > { %237 = vst [vmem:[%s1500_s27 + $0x158] sm:$0xff] %v236_v43 }
  0x3f   : > { %239 = vst [vmem:[%s1500_s27 + $0x160] sm:$0xff] %v238_v44 }
  0x40   : > { %241 = vst [vmem:[%s1500_s27 + $0x168] sm:$0xff] %v240_v45 }
  0x41   : > { %243 = vst [vmem:[%s1500_s27 + $0x170] sm:$0xff] %v242_v46 }
  0x42   : > { %245 = vst [vmem:[%s1500_s27 + $0x178] sm:$0xff] %v244_v47 }
  0x43   : > { %247 = vst [vmem:[%s1500_s27 + $0x180] sm:$0xff] %v246_v48 }
  0x44   : > { %249 = vst [vmem:[%s1500_s27 + $0x188] sm:$0xff] %v248_v49 }
  0x45   : > { %251 = vst [vmem:[%s1500_s27 + $0x190] sm:$0xff] %v250_v50 }
  0x46   : > { %253 = vst [vmem:[%s1500_s27 + $0x198] sm:$0xff] %v252_v51 }
  0x47   : > { %255 = vst [vmem:[%s1500_s27 + $0x1a0] sm:$0xff] %v254_v52 }
  0x48   : > { %257 = vst [vmem:[%s1500_s27 + $0x1a8] sm:$0xff] %v256_v53 }
  0x49   : > { %259 = vst [vmem:[%s1500_s27 + $0x1b0] sm:$0xff] %v258_v54 }
  0x4a   : > { %261 = vst [vmem:[%s1500_s27 + $0x1b8] sm:$0xff] %v260_v55 }
  0x4b   : > { %263 = vst [vmem:[%s1500_s27 + $0x1c0] sm:$0xff] %v262_v56 }
  0x4c   : > { %265 = vst [vmem:[%s1500_s27 + $0x1c8] sm:$0xff] %v264_v57 }
  0x4d   : > { %267 = vst [vmem:[%s1500_s27 + $0x1d0] sm:$0xff] %v266_v58 }
  0x4e   : > { %269 = vst [vmem:[%s1500_s27 + $0x1d8] sm:$0xff] %v268_v59 }
  0x4f   : > { %271 = vst [vmem:[%s1500_s27 + $0x1e0] sm:$0xff] %v270_v60 }
  0x50   : > { %273 = vst [vmem:[%s1500_s27 + $0x1e8] sm:$0xff] %v272_v61 }
  0x51   : > { %275 = vst [vmem:[%s1500_s27 + $0x1f0] sm:$0xff] %v274_v62 }
  0x52   : > { %277 = vst [vmem:[%s1500_s27 + $0x1f8] sm:$0xff] %v276_v63 }
  0x53 PF: > { %p1033_p7 = scmp.ge.s32.totalorder %s1432_s14, 1  ;;  %p282_p8 = scmp.lt.s32.totalorder %s1432_s14, 3 }
  0x55   : > { %p283_p9 = pnand %p1033_p7, %p282_p8 }
  0x56   : > { %s289_s28 = sand.u32 (!%p283_p9), 1, %s1424_s12  }
  0x57   : > { %286 = sbr.rel (%p283_p9) target bundleno = 332 (0x14c), region = 51  ;;  %s1034_s29 = sshll.u32 (!%p283_p9), %s289_s28, 9 }
  0x58   : > { %s1632_s30 = scalar_lea.vmem (!%p283_p9), [#allocation2], %s1034_s29 }
  0x5c   : > { %v1166_v0 = vld [vmem:[%s1632_s30 + $0xe0] sm:$0xf]  ;;  %v1348_v1 = vld [vmem:[%s1632_s30 + $0xec] sm:$0xf0]  ;;  %v1346_v5 = vld [vmem:[%s1632_s30 + $0xe4] sm:$0xf] }
  0x5d   : > { %v1294_v2 = vld [vmem:[%s1632_s30 + $0x1e0] sm:$0xf]  ;;  %v1167_v3 = vor.u32 %v1348_v1, %v1166_v0  ;;  %v1380_v4 = vld [vmem:[%s1632_s30 + $0x1ec] sm:$0xf0]  ;;  %v1168_v6 = vld [vmem:[%s1632_s30 + $0xf0] sm:$0xf0] }
  0x5e   : > { %v1295_v7 = vor.u32 %v1380_v4, %v1294_v2  ;;  %v1171_v8 = vor.u32 %v1346_v5, %v1168_v6  ;;  %v1378_v9 = vld [vmem:[%s1632_s30 + $0x1e4] sm:$0xf]  ;;  %v1296_v10 = vld [vmem:[%s1632_s30 + $0x1f0] sm:$0xf0]  ;;  %v1150_v11 = vld [vmem:[%s1632_s30 + $0xc0] sm:$0xf] }
  0x5f   : > { %745 = vmatpush.bf16.msra.mxu0 %v1167_v3  ;;  %v1299_v12 = vor.u32 %v1378_v9, %v1296_v10  ;;  %v1344_v13 = vld [vmem:[%s1632_s30 + $0xcc] sm:$0xf0]  ;;  %v1278_v14 = vld [vmem:[%s1632_s30 + $0x1c0] sm:$0xf]  ;;  %v1342_v18 = vld [vmem:[%s1632_s30 + $0xc4] sm:$0xf] }
  0x60   : > { %v1376_v15 = vld [vmem:[%s1632_s30 + $0x1cc] sm:$0xf0]  ;;  %764 = vmatpush.bf16.msra.mxu1 %v1295_v7  ;;  %783 = vmatpush.bf16.msra.mxu2 %v1171_v8  ;;  %v1151_v16 = vor.u32 %v1344_v13, %v1150_v11  ;;  %v1152_v19 = vld [vmem:[%s1632_s30 + $0xd0] sm:$0xf0]  ;;  %v1374_v20 = vld [vmem:[%s1632_s30 + $0x1c4] sm:$0xf] }
  0x61   : > { %v1279_v17 = vor.u32 %v1376_v15, %v1278_v14  ;;  %802 = vmatpush.bf16.msra.mxu3 %v1299_v12  ;;  %v1155_v21 = vor.u32 %v1342_v18, %v1152_v19  ;;  %v1280_v22 = vld [vmem:[%s1632_s30 + $0x1d0] sm:$0xf0]  ;;  %v1134_v23 = vld [vmem:[%s1632_s30 + $0xa0] sm:$0xf]  ;;  %v1340_v24 = vld [vmem:[%s1632_s30 + $0xac] sm:$0xf0] }
  0x62   : > { %v1283_v25 = vor.u32 %v1374_v20, %v1280_v22  ;;  %v1262_v26 = vld [vmem:[%s1632_s30 + $0x1a0] sm:$0xf]  ;;  %v1372_v27 = vld [vmem:[%s1632_s30 + $0x1ac] sm:$0xf0]  ;;  %v1338_v28 = vld [vmem:[%s1632_s30 + $0xa4] sm:$0xf]  ;;  %v1135_v29 = vor.u32 %v1340_v24, %v1134_v23 }
  0x63   : > { %746 = vmatpush.bf16.msra.mxu0 %v1151_v16  ;;  %v1136_v30 = vld [vmem:[%s1632_s30 + $0xb0] sm:$0xf0]  ;;  %v1370_v31 = vld [vmem:[%s1632_s30 + $0x1a4] sm:$0xf]  ;;  %v1263_v33 = vor.u32 %v1372_v27, %v1262_v26  ;;  %v1118_v35 = vld [vmem:[%s1632_s30 + $0x80] sm:$0xf] }
  0x64   : > { %v1264_v32 = vld [vmem:[%s1632_s30 + $0x1b0] sm:$0xf0]  ;;  %765 = vmatpush.bf16.msra.mxu1 %v1279_v17  ;;  %784 = vmatpush.bf16.msra.mxu2 %v1155_v21  ;;  %v1139_v34 = vor.u32 %v1338_v28, %v1136_v30  ;;  %v1336_v36 = vld [vmem:[%s1632_s30 + $0x8c] sm:$0xf0]  ;;  %v1246_v37 = vld [vmem:[%s1632_s30 + $0x180] sm:$0xf] }
  0x65   : > { %803 = vmatpush.bf16.msra.mxu3 %v1283_v25  ;;  %v1267_v38 = vor.u32 %v1370_v31, %v1264_v32  ;;  %v1368_v39 = vld [vmem:[%s1632_s30 + $0x18c] sm:$0xf0]  ;;  %v1334_v40 = vld [vmem:[%s1632_s30 + $0x84] sm:$0xf]  ;;  %v1120_v41 = vld [vmem:[%s1632_s30 + $0x90] sm:$0xf0]  ;;  %v1119_v44 = vor.u32 %v1336_v36, %v1118_v35 }
  0x66   : > { %v1366_v42 = vld [vmem:[%s1632_s30 + $0x184] sm:$0xf]  ;;  %v1248_v43 = vld [vmem:[%s1632_s30 + $0x190] sm:$0xf0]  ;;  %v1247_v45 = vor.u32 %v1368_v39, %v1246_v37  ;;  %v1123_v46 = vor.u32 %v1334_v40, %v1120_v41  ;;  %v1102_v47 = vld [vmem:[%s1632_s30 + $0x60] sm:$0xf] }
  0x67   : > { %747 = vmatpush.bf16.msra.mxu0 %v1135_v29  ;;  %v1332_v48 = vld [vmem:[%s1632_s30 + $0x6c] sm:$0xf0]  ;;  %v1230_v49 = vld [vmem:[%s1632_s30 + $0x160] sm:$0xf]  ;;  %v1251_v50 = vor.u32 %v1366_v42, %v1248_v43  ;;  %v1330_v52 = vld [vmem:[%s1632_s30 + $0x64] sm:$0xf] }
  0x68   : > { %766 = vmatpush.bf16.msra.mxu1 %v1263_v33  ;;  %785 = vmatpush.bf16.msra.mxu2 %v1139_v34  ;;  %v1364_v51 = vld [vmem:[%s1632_s30 + $0x16c] sm:$0xf0]  ;;  %v1104_v53 = vld [vmem:[%s1632_s30 + $0x70] sm:$0xf0]  ;;  %v1362_v54 = vld [vmem:[%s1632_s30 + $0x164] sm:$0xf]  ;;  %v1103_v56 = vor.u32 %v1332_v48, %v1102_v47 }
  0x69   : > { %804 = vmatpush.bf16.msra.mxu3 %v1267_v38  ;;  %v1232_v55 = vld [vmem:[%s1632_s30 + $0x170] sm:$0xf0]  ;;  %v1231_v57 = vor.u32 %v1364_v51, %v1230_v49  ;;  %v1107_v58 = vor.u32 %v1330_v52, %v1104_v53  ;;  %v1086_v59 = vld [vmem:[%s1632_s30 + $0x40] sm:$0xf]  ;;  %v1328_v60 = vld [vmem:[%s1632_s30 + $0x4c] sm:$0xf0] }
  0x6a   : > { %v1214_v61 = vld [vmem:[%s1632_s30 + $0x140] sm:$0xf]  ;;  %v1235_v62 = vor.u32 %v1362_v54, %v1232_v55  ;;  %v1360_v63 = vld [vmem:[%s1632_s30 + $0x14c] sm:$0xf0]  ;;  %v1326_v0 = vld [vmem:[%s1632_s30 + $0x44] sm:$0xf]  ;;  %v1087_v4 = vor.u32 %v1328_v60, %v1086_v59 }
  0x6b   : > { %748 = vmatpush.bf16.msra.mxu0 %v1119_v44  ;;  %v1088_v1 = vld [vmem:[%s1632_s30 + $0x50] sm:$0xf0]  ;;  %v1358_v2 = vld [vmem:[%s1632_s30 + $0x144] sm:$0xf]  ;;  %v1215_v5 = vor.u32 %v1360_v63, %v1214_v61  ;;  %v1070_v7 = vld [vmem:[%s1632_s30 + $0x20] sm:$0xf] }
  0x6c   : > { %767 = vmatpush.bf16.msra.mxu1 %v1247_v45  ;;  %786 = vmatpush.bf16.msra.mxu2 %v1123_v46  ;;  %v1216_v3 = vld [vmem:[%s1632_s30 + $0x150] sm:$0xf0]  ;;  %v1091_v6 = vor.u32 %v1326_v0, %v1088_v1  ;;  %v1324_v8 = vld [vmem:[%s1632_s30 + $0x2c] sm:$0xf0]  ;;  %v1198_v9 = vld [vmem:[%s1632_s30 + $0x120] sm:$0xf] }
  0x6d   : > { %805 = vmatpush.bf16.msra.mxu3 %v1251_v50  ;;  %v1219_v10 = vor.u32 %v1358_v2, %v1216_v3  ;;  %v1356_v11 = vld [vmem:[%s1632_s30 + $0x12c] sm:$0xf0]  ;;  %v1322_v12 = vld [vmem:[%s1632_s30 + $0x24] sm:$0xf]  ;;  %v1072_v13 = vld [vmem:[%s1632_s30 + $0x30] sm:$0xf0]  ;;  %v1071_v16 = vor.u32 %v1324_v8, %v1070_v7 }
  0x6e   : > { %v1354_v14 = vld [vmem:[%s1632_s30 + $0x124] sm:$0xf]  ;;  %v1200_v15 = vld [vmem:[%s1632_s30 + $0x130] sm:$0xf0]  ;;  %v1054_v17 = vld [vmem:[%s1632_s30] sm:$0xf]  ;;  %v1199_v19 = vor.u32 %v1356_v11, %v1198_v9  ;;  %v1075_v20 = vor.u32 %v1322_v12, %v1072_v13 }
  0x6f   : > { %749 = vmatpush.bf16.msra.mxu0 %v1103_v56  ;;  %v1320_v18 = vld [vmem:[%s1632_s30 + $0xc] sm:$0xf0]  ;;  %v1182_v21 = vld [vmem:[%s1632_s30 + $0x100] sm:$0xf]  ;;  %v1318_v23 = vld [vmem:[%s1632_s30 + $0x4] sm:$0xf]  ;;  %v1203_v24 = vor.u32 %v1354_v14, %v1200_v15 }
  0x70   : > { %768 = vmatpush.bf16.msra.mxu1 %v1231_v57  ;;  %787 = vmatpush.bf16.msra.mxu2 %v1107_v58  ;;  %v1352_v22 = vld [vmem:[%s1632_s30 + $0x10c] sm:$0xf0]  ;;  %v1056_v25 = vld [vmem:[%s1632_s30 + $0x10] sm:$0xf0]  ;;  %v1350_v26 = vld [vmem:[%s1632_s30 + $0x104] sm:$0xf]  ;;  %v1055_v31 = vor.u32 %v1320_v18, %v1054_v17 }
  0x71   : > { %806 = vmatpush.bf16.msra.mxu3 %v1235_v62  ;;  %v1184_v27 = vld [vmem:[%s1632_s30 + $0x110] sm:$0xf0]  ;;  %v1038_v28 = vld [vmem:[%s1871_s0] sm:$0xf]  ;;  %v1347_v29 = vld [vmem:[%s1632_s30 + $0xec] sm:$0xf]  ;;  %v1183_v35 = vor.u32 %v1352_v22, %v1182_v21  ;;  %v1059_v36 = vor.u32 %v1318_v23, %v1056_v25 }
  0x72   : > { %v1176_v30 = vld [vmem:[%s1632_s30 + $0xf8] sm:$0xf0]  ;;  %v1315_v32 = vld [vmem:[%s1871_s0 + $0x4] sm:$0xf0]  ;;  %v1381_v34 = vld [vmem:[%s1632_s30 + $0x1f4] sm:$0xf0]  ;;  %v1187_v40 = vor.u32 %v1350_v26, %v1184_v27 }
  0x73   : > { %750 = vmatpush.bf16.msra.mxu0 %v1087_v4  ;;  %v1302_v33 = vld [vmem:[%s1632_s30 + $0x1e8] sm:$0xf]  ;;  %v1314_v37 = vld [vmem:[%s1871_s0 + $0x4] sm:$0xf]  ;;  %v1040_v38 = vld [vmem:[%s1871_s0 + $0x8] sm:$0xf0]  ;;  %v1179_v41 = vor.u32 %v1347_v29, %v1176_v30  ;;  %v1718_v45 = vor.u32 %v1315_v32, %v1038_v28 }
  0x74   : > { %769 = vmatpush.bf16.msra.mxu1 %v1215_v5  ;;  %788 = vmatpush.bf16.msra.mxu2 %v1091_v6  ;;  %v1174_v39 = vld [vmem:[%s1632_s30 + $0xe8] sm:$0xf]  ;;  %v1349_v42 = vld [vmem:[%s1632_s30 + $0xf4] sm:$0xf0]  ;;  %v1379_v43 = vld [vmem:[%s1632_s30 + $0x1ec] sm:$0xf]  ;;  %v1303_v46 = vor.u32 %v1381_v34, %v1302_v33  ;;  %v1722_v49 = vor.u32 %v1314_v37, %v1040_v38 }
  0x75   : > { %807 = vmatpush.bf16.msra.mxu3 %v1219_v10  ;;  %v1304_v44 = vld [vmem:[%s1632_s30 + $0x1f8] sm:$0xf0]  ;;  %v1343_v47 = vld [vmem:[%s1632_s30 + $0xcc] sm:$0xf]  ;;  %v1286_v50 = vld [vmem:[%s1632_s30 + $0x1c8] sm:$0xf]  ;;  %v1175_v53 = vor.u32 %v1349_v42, %v1174_v39 }
  0x76   : > { %v1160_v48 = vld [vmem:[%s1632_s30 + $0xd8] sm:$0xf0]  ;;  %v1377_v51 = vld [vmem:[%s1632_s30 + $0x1d4] sm:$0xf0]  ;;  %v1434_v52 = vmov 0   ;;  %v1307_v54 = vor.u32 %v1379_v43, %v1304_v44  ;;  %v381_v1 = vld [vmem:[%s1873_s2] sm:$0xff] }
  0x77   : > { %751 = vmatpush.bf16.msra.mxu0 %v1071_v16  ;;  %1408 = vset.pattern.permute.xlu0 %v1434_v52  ;;  %v1163_v55 = vor.u32 %v1343_v47, %v1160_v48  ;;  %v1158_v56 = vld [vmem:[%s1632_s30 + $0xc8] sm:$0xf]  ;;  %v1345_v57 = vld [vmem:[%s1632_s30 + $0xd4] sm:$0xf0]  ;;  %v1375_v58 = vld [vmem:[%s1632_s30 + $0x1cc] sm:$0xf]  ;;  %v1287_v59 = vor.u32 %v1377_v51, %v1286_v50 }
  0x78   : > { %770 = vmatpush.bf16.msra.mxu1 %v1199_v19  ;;  %789 = vmatpush.bf16.msra.mxu2 %v1075_v20  ;;  %v1288_v60 = vld [vmem:[%s1632_s30 + $0x1d8] sm:$0xf0]  ;;  %v1339_v61 = vld [vmem:[%s1632_s30 + $0xac] sm:$0xf]  ;;  %v1270_v63 = vld [vmem:[%s1632_s30 + $0x1a8] sm:$0xf]  ;;  %v1159_v2 = vor.u32 %v1345_v57, %v1158_v56 }
  0x79   : > { %808 = vmatpush.bf16.msra.mxu3 %v1203_v24  ;;  %v1144_v62 = vld [vmem:[%s1632_s30 + $0xb8] sm:$0xf0]  ;;  %v1373_v0 = vld [vmem:[%s1632_s30 + $0x1b4] sm:$0xf0]  ;;  %v1291_v3 = vor.u32 %v1375_v58, %v1288_v60  ;;  %v1142_v5 = vld [vmem:[%s1632_s30 + $0xa8] sm:$0xf]  ;;  %387 = vperm.xlu0 %1408, %v381_v1  }
  0x7a   : > { %v1147_v4 = vor.u32 %v1339_v61, %v1144_v62  ;;  %v1341_v6 = vld [vmem:[%s1632_s30 + $0xb4] sm:$0xf0]  ;;  %v1371_v7 = vld [vmem:[%s1632_s30 + $0x1ac] sm:$0xf]  ;;  %v1271_v8 = vor.u32 %v1373_v0, %v1270_v63  ;;  %v1272_v9 = vld [vmem:[%s1632_s30 + $0x1b8] sm:$0xf0]  ;;  %1409 = vset.pattern.permute.xlu1 %v1434_v52 }
  0x7b   : > { %752 = vmatpush.bf16.msra.mxu0 %v1055_v31  ;;  %v1335_v10 = vld [vmem:[%s1632_s30 + $0x8c] sm:$0xf]  ;;  %v1128_v11 = vld [vmem:[%s1632_s30 + $0x98] sm:$0xf0]  ;;  %v1254_v12 = vld [vmem:[%s1632_s30 + $0x188] sm:$0xf]  ;;  %v1143_v14 = vor.u32 %v1341_v6, %v1142_v5  ;;  %v1275_v18 = vor.u32 %v1371_v7, %v1272_v9 }
  0x7c   : > { %771 = vmatpush.bf16.msra.mxu1 %v1183_v35  ;;  %790 = vmatpush.bf16.msra.mxu2 %v1059_v36  ;;  %v1369_v13 = vld [vmem:[%s1632_s30 + $0x194] sm:$0xf0]  ;;  %v1126_v15 = vld [vmem:[%s1632_s30 + $0x88] sm:$0xf]  ;;  %v1367_v17 = vld [vmem:[%s1632_s30 + $0x18c] sm:$0xf]  ;;  %v1131_v19 = vor.u32 %v1335_v10, %v1128_v11 }
  0x7d   : > { %809 = vmatpush.bf16.msra.mxu3 %v1187_v40  ;;  %v1337_v16 = vld [vmem:[%s1632_s30 + $0x94] sm:$0xf0]  ;;  %v1256_v20 = vld [vmem:[%s1632_s30 + $0x198] sm:$0xf0]  ;;  %v1046_v21 = vld [vmem:[%s1871_s0 + $0x10] sm:$0xf]  ;;  %v1255_v23 = vor.u32 %v1369_v13, %v1254_v12 }
  0x7e   : > { %753 = vmatmul.bf16.vlgmr.msra.gmra.mxu0 %v1718_v45  ;;  %v1317_v22 = vld [vmem:[%s1871_s0 + $0x14] sm:$0xf0]  ;;  %v1331_v24 = vld [vmem:[%s1632_s30 + $0x6c] sm:$0xf]  ;;  %v1112_v25 = vld [vmem:[%s1632_s30 + $0x78] sm:$0xf0]  ;;  %v1127_v30 = vor.u32 %v1337_v16, %v1126_v15  ;;  %v1259_v33 = vor.u32 %v1367_v17, %v1256_v20 }
  0x7f   : > { %772 = vmatmul.bf16.vlgmr.msra.gmra.mxu1 %v1722_v49  ;;  %791 = vmatmul.bf16.vlgmr.msra.gmra.mxu2 %v1718_v45  ;;  %v1238_v26 = vld [vmem:[%s1632_s30 + $0x168] sm:$0xf]  ;;  %v1365_v27 = vld [vmem:[%s1632_s30 + $0x174] sm:$0xf0]  ;;  %v383_v29 = vld [vmem:[%s1873_s2 + $0x10] sm:$0xff]  ;;  %v1115_v34 = vor.u32 %v1331_v24, %v1112_v25  ;;  %v1778_v38 = vor.u32 %v1317_v22, %v1046_v21  ;;  %s1382_s12 = sshll.u32 (%p1485_p5), %s1026_s15, 4 }
  0x80   : > { %859 = vmatpush.bf16.msrb.mxu2 %v1179_v41  ;;  %840 = vmatpush.bf16.msrb.mxu1 %v1303_v46  ;;  %v382_v28 = vld [vmem:[%s1873_s2 + $0x8] sm:$0xff]  ;;  %v1316_v31 = vld [vmem:[%s1871_s0 + $0x14] sm:$0xf]  ;;  %v1048_v32 = vld [vmem:[%s1871_s0 + $0x18] sm:$0xf0]  ;;  %v1239_v39 = vor.u32 %v1365_v27, %v1238_v26  ;;  %s938_s17 = scalar_lea.vmem (%p1485_p5), %s1874_s3, %s1382_s12 }
  0x81   : > { %810 = vmatmul.bf16.vlgmr.msra.gmra.mxu3 %v1722_v49  ;;  %821 = vmatpush.bf16.msrb.mxu0 %v1175_v53  ;;  %v1110_v35 = vld [vmem:[%s1632_s30 + $0x68] sm:$0xf]  ;;  %v1333_v36 = vld [vmem:[%s1632_s30 + $0x74] sm:$0xf0]  ;;  %v1363_v37 = vld [vmem:[%s1632_s30 + $0x16c] sm:$0xf]  ;;  %v1783_v43 = vor.u32 %v1316_v31, %v1048_v32 }
  0x82   : > { %878 = vmatpush.bf16.msrb.mxu3 %v1307_v54  ;;  %397 = vperm.xlu1 %1409, %v383_v29   ;;  %v1240_v40 = vld [vmem:[%s1632_s30 + $0x178] sm:$0xf0]  ;;  %v1327_v41 = vld [vmem:[%s1632_s30 + $0x4c] sm:$0xf]  ;;  %v1222_v44 = vld [vmem:[%s1632_s30 + $0x148] sm:$0xf]  ;;  %v1111_v47 = vor.u32 %v1333_v36, %v1110_v35 }
  0x83   : > { %392 = vperm.xlu0 %1408, %v382_v28   ;;  %v1096_v42 = vld [vmem:[%s1632_s30 + $0x58] sm:$0xf0]  ;;  %v1361_v46 = vld [vmem:[%s1632_s30 + $0x154] sm:$0xf0]  ;;  %v1243_v48 = vor.u32 %v1363_v37, %v1240_v40  ;;  %v1094_v51 = vld [vmem:[%s1632_s30 + $0x48] sm:$0xf] }
  0x84   : > { %860 = vmatpush.bf16.msrb.mxu2 %v1163_v55  ;;  %841 = vmatpush.bf16.msrb.mxu1 %v1287_v59  ;;  %v1099_v50 = vor.u32 %v1327_v41, %v1096_v42  ;;  %v1329_v52 = vld [vmem:[%s1632_s30 + $0x54] sm:$0xf0]  ;;  %v1359_v53 = vld [vmem:[%s1632_s30 + $0x14c] sm:$0xf]  ;;  %v1223_v54 = vor.u32 %v1361_v46, %v1222_v44  ;;  %v1224_v55 = vld [vmem:[%s1632_s30 + $0x158] sm:$0xf0] }
  0x85   : > { %822 = vmatpush.bf16.msrb.mxu0 %v1159_v2  ;;  %v1323_v56 = vld [vmem:[%s1632_s30 + $0x2c] sm:$0xf]  ;;  %v1080_v57 = vld [vmem:[%s1632_s30 + $0x38] sm:$0xf0]  ;;  %v1206_v58 = vld [vmem:[%s1632_s30 + $0x128] sm:$0xf]  ;;  %v1095_v61 = vor.u32 %v1329_v52, %v1094_v51  ;;  %v1227_v62 = vor.u32 %v1359_v53, %v1224_v55 }
  0x86   : > { %879 = vmatpush.bf16.msrb.mxu3 %v1291_v3  ;;  %v1357_v59 = vld [vmem:[%s1632_s30 + $0x134] sm:$0xf0]  ;;  %v1083_v63 = vor.u32 %v1323_v56, %v1080_v57  ;;  %v1078_v0 = vld [vmem:[%s1632_s30 + $0x28] sm:$0xf]  ;;  %v1355_v2 = vld [vmem:[%s1632_s30 + $0x12c] sm:$0xf] }
  0x87   : > { %v384_v60 = vld [vmem:[%s1873_s2 + $0x18] sm:$0xff]  ;;  %v1207_v3 = vor.u32 %v1357_v59, %v1206_v58  ;;  %v1319_v5 = vld [vmem:[%s1632_s30 + $0xc] sm:$0xf]  ;;  %v1190_v7 = vld [vmem:[%s1632_s30 + $0x108] sm:$0xf] }
  0x88   : > { %861 = vmatpush.bf16.msrb.mxu2 %v1147_v4  ;;  %842 = vmatpush.bf16.msrb.mxu1 %v1271_v8  ;;  %v1325_v1 = vld [vmem:[%s1632_s30 + $0x34] sm:$0xf0]  ;;  %v1208_v4 = vld [vmem:[%s1632_s30 + $0x138] sm:$0xf0]  ;;  %v1062_v12 = vld [vmem:[%s1632_s30 + $0x8] sm:$0xf] }
  0x89   : > { %823 = vmatpush.bf16.msrb.mxu0 %v1143_v14  ;;  %v1064_v6 = vld [vmem:[%s1632_s30 + $0x18] sm:$0xf0]  ;;  %v1353_v8 = vld [vmem:[%s1632_s30 + $0x114] sm:$0xf0]  ;;  %v1079_v9 = vor.u32 %v1325_v1, %v1078_v0  ;;  %v1211_v10 = vor.u32 %v1355_v2, %v1208_v4  ;;  %v1351_v15 = vld [vmem:[%s1632_s30 + $0x10c] sm:$0xf] }
  0x8a   : > { %880 = vmatpush.bf16.msrb.mxu3 %v1275_v18  ;;  %402 = vperm.xlu1 %1409, %v384_v60   ;;  %v1067_v11 = vor.u32 %v1319_v5, %v1064_v6  ;;  %v1321_v13 = vld [vmem:[%s1632_s30 + $0x14] sm:$0xf0]  ;;  %v1191_v14 = vor.u32 %v1353_v8, %v1190_v7  ;;  %v1192_v16 = vld [vmem:[%s1632_s30 + $0x118] sm:$0xf0]  ;;  %s1035_s30 = sshll.u32 %s289_s28, 6 }
  0x8b   : > { %v1063_v17 = vor.u32 %v1321_v13, %v1062_v12  ;;  %v1195_v18 = vor.u32 %v1351_v15, %v1192_v16  ;;  %s1829_s10 = scalar_lea.vmem [#allocation3], %s1035_s30 }
  0x8c   : > { %862 = vmatpush.bf16.msrb.mxu2 %v1131_v19  ;;  %843 = vmatpush.bf16.msrb.mxu1 %v1255_v23 }
  0x8d   : > { %824 = vmatpush.bf16.msrb.mxu0 %v1127_v30 }
  0x8e   : > { %881 = vmatpush.bf16.msrb.mxu3 %v1259_v33  ;;  %758 = vmatmul.bf16.gmra.mxu0 %v1778_v38 }
  0x8f   : > { %777 = vmatmul.bf16.gmra.mxu1 %v1783_v43  ;;  %796 = vmatmul.bf16.gmra.mxu2 %v1778_v38 }
  0x90   : > { %863 = vmatpush.bf16.msrb.mxu2 %v1115_v34  ;;  %844 = vmatpush.bf16.msrb.mxu1 %v1239_v39 }
  0x91   : > { %815 = vmatmul.bf16.gmra.mxu3 %v1783_v43  ;;  %825 = vmatpush.bf16.msrb.mxu0 %v1111_v47 }
  0x92   : > { %882 = vmatpush.bf16.msrb.mxu3 %v1243_v48 }
  0x94   : > { %864 = vmatpush.bf16.msrb.mxu2 %v1099_v50  ;;  %845 = vmatpush.bf16.msrb.mxu1 %v1223_v54 }
  0x95   : > { %826 = vmatpush.bf16.msrb.mxu0 %v1095_v61 }
  0x96   : > { %883 = vmatpush.bf16.msrb.mxu3 %v1227_v62 }
  0x98   : > { %865 = vmatpush.bf16.msrb.mxu2 %v1083_v63  ;;  %846 = vmatpush.bf16.msrb.mxu1 %v1207_v3 }
  0x99   : > { %827 = vmatpush.bf16.msrb.mxu0 %v1079_v9 }
  0x9a   : > { %884 = vmatpush.bf16.msrb.mxu3 %v1211_v10 }
  0x9c   : > { %866 = vmatpush.bf16.msrb.mxu2 %v1067_v11  ;;  %847 = vmatpush.bf16.msrb.mxu1 %v1191_v14 }
  0x9d   : > { %828 = vmatpush.bf16.msrb.mxu0 %v1063_v17 }
  0x9e   : > { %885 = vmatpush.bf16.msrb.mxu3 %v1195_v18 }
  0x9f   : > { %848 = vmatmul.bf16.vlgmr.msrb.gmra.mxu1 %v1722_v49  ;;  %867 = vmatmul.bf16.vlgmr.msrb.gmra.mxu2 %v1718_v45 }
  0xa0   : > { %829 = vmatmul.bf16.vlgmr.msrb.gmra.mxu0 %v1718_v45 }
  0xa1   : > { %886 = vmatmul.bf16.vlgmr.msrb.gmra.mxu3 %v1722_v49 }
  0xaf   : > { %853 = vmatmul.bf16.gmra.mxu1 %v1783_v43  ;;  %872 = vmatmul.bf16.gmra.mxu2 %v1778_v38 }
  0xb0   : > { %834 = vmatmul.bf16.gmra.mxu0 %v1778_v38 }
  0xb1   : > { %891 = vmatmul.bf16.gmra.mxu3 %v1783_v43 }
  0xeb   : > { %v388_v19 = vpop.permute.xlu0 %387 }
  0xf4   : > { %v1827_v34 = vpop.permute.xlu1 %397 }
  0xf5   : > { %v1822_v27 = vpop.permute.xlu0 %392 }
  0xfb   : > { %v754_v20 = vpop.f32.mrf.mxu0 }
  0xfc   : > { %v773_v21 = vpop.f32.mrf.mxu1  ;;  %v755_v22 = vadd.f32 %v754_v20, %v388_v19  ;;  %v403_v52 = vpop.permute.xlu1 %402 }
  0xfe   : > { %v774_v23 = vadd.f32 %v773_v21, %v755_v22 }
 0x100   : > { %v897_v28 = vmax.f32 %v774_v23, 0.0 }
 0x102   : > { %v792_v24 = vpop.f32.mrf.mxu2 }
 0x103   : > { %v793_v25 = vadd.f32 %v792_v24, %v388_v19  ;;  %v756_v45 = vpop.f32.mrf.mxu0 }
 0x104   : > { %v811_v26 = vpop.f32.mrf.mxu3  ;;  %v775_v49 = vpop.f32.mrf.mxu1  ;;  %v757_v31 = vadd.f32 %v756_v45, %v1822_v27 }
 0x105   : > { %v812_v29 = vadd.f32 %v811_v26, %v793_v25 }
 0x106   : > { %v776_v35 = vadd.f32 %v775_v49, %v757_v31 }
 0x107   : > { %v898_v30 = vmax.f32 %v812_v29, 0.0 }
 0x108   : > { %v901_v42 = vmax.f32 %v776_v35, 0.0 }
 0x109   : > { %v913_v32 = vpack.c.bf16 %v898_v30, %v897_v28 }
 0x10a   : > { %v794_v33 = vpop.f32.mrf.mxu2 }
 0x10b   : > { %921 = vst [vmem:[%s1829_s10] sm:$0xff] %v913_v32  ;;  %v795_v36 = vadd.f32 %v794_v33, %v1822_v27  ;;  %v759_v38 = vpop.f32.mrf.mxu0 }
 0x10c   : > { %v813_v37 = vpop.f32.mrf.mxu3  ;;  %v778_v39 = vpop.f32.mrf.mxu1  ;;  %v760_v41 = vadd.f32 %v759_v38, %v1827_v34 }
 0x10d   : > { %v814_v40 = vadd.f32 %v813_v37, %v795_v36 }
 0x10e   : > { %v779_v46 = vadd.f32 %v778_v39, %v760_v41 }
 0x10f   : > { %v902_v43 = vmax.f32 %v814_v40, 0.0 }
 0x110   : > { %v905_v54 = vmax.f32 %v779_v46, 0.0 }
 0x111   : > { %v915_v44 = vpack.c.bf16 %v902_v43, %v901_v42 }
 0x112   : > { %v797_v47 = vpop.f32.mrf.mxu2 }
 0x113   : > { %923 = vst [vmem:[%s1829_s10 + $0x10] sm:$0xff] %v915_v44  ;;  %v798_v48 = vadd.f32 %v797_v47, %v1827_v34  ;;  %v761_v51 = vpop.f32.mrf.mxu0 }
 0x114   : > { %v816_v50 = vpop.f32.mrf.mxu3  ;;  %v780_v53 = vpop.f32.mrf.mxu1  ;;  %v762_v57 = vadd.f32 %v761_v51, %v403_v52 }
 0x115   : > { %v817_v55 = vadd.f32 %v816_v50, %v798_v48 }
 0x116   : > { %v781_v60 = vadd.f32 %v780_v53, %v762_v57 }
 0x117   : > { %v906_v56 = vmax.f32 %v817_v55, 0.0 }
 0x118   : > { %v909_v3 = vmax.f32 %v781_v60, 0.0 }
 0x119   : > { %v917_v58 = vpack.c.bf16 %v906_v56, %v905_v54 }
 0x11a   : > { %v799_v59 = vpop.f32.mrf.mxu2  ;;  %v955_v48 = vld [vmem:[%s1829_s10 + $0x10] sm:$0xff] (%p1485_p5) }
 0x11b   : > { %925 = vst [vmem:[%s1829_s10 + $0x20] sm:$0xff] %v917_v58  ;;  %v800_v61 = vadd.f32 %v799_v59, %v403_v52 }
 0x11c   : > { %v818_v62 = vpop.f32.mrf.mxu3  ;;  %v849_v1 = vpop.f32.mrf.mxu1  ;;  %956 = vst [vmem:[%s938_s17 + $0x20] sm:$0xff] (%p1485_p5), %v955_v48 }
 0x11d   : > { %v830_v63 = vpop.f32.mrf.mxu0  ;;  %v819_v0 = vadd.f32 %v818_v62, %v800_v61 }
 0x11e   : > { %v831_v2 = vadd.f32 %v830_v63, %v388_v19 }
 0x11f   : > { %v910_v4 = vmax.f32 %v819_v0, 0.0 }
 0x120   : > { %v850_v6 = vadd.f32 %v849_v1, %v831_v2 }
 0x121   : > { %v919_v5 = vpack.c.bf16 %v910_v4, %v909_v3 }
 0x122   : > { %v868_v7 = vpop.f32.mrf.mxu2  ;;  %v899_v11 = vmax.f32 %v850_v6, 0.0  ;;  %v959_v51 = vld [vmem:[%s1829_s10 + $0x20] sm:$0xff] (%p1485_p5) }
 0x123   : > { %927 = vst [vmem:[%s1829_s10 + $0x30] sm:$0xff] %v919_v5  ;;  %v869_v9 = vadd.f32 %v868_v7, %v388_v19 }
 0x124   : > { %v887_v8 = vpop.f32.mrf.mxu3  ;;  %v851_v13 = vpop.f32.mrf.mxu1  ;;  %960 = vst [vmem:[%s938_s17 + $0x40] sm:$0xff] (%p1485_p5), %v959_v51 }
 0x125   : > { %v832_v10 = vpop.f32.mrf.mxu0  ;;  %v888_v12 = vadd.f32 %v887_v8, %v869_v9 }
 0x126   : > { %v833_v15 = vadd.f32 %v832_v10, %v1822_v27 }
 0x127   : > { %v900_v14 = vmax.f32 %v888_v12, 0.0 }
 0x128   : > { %v852_v20 = vadd.f32 %v851_v13, %v833_v15 }
 0x129   : > { %v914_v16 = vpack.c.bf16 %v900_v14, %v899_v11 }
 0x12a   : > { %v870_v17 = vpop.f32.mrf.mxu2  ;;  %v903_v19 = vmax.f32 %v852_v20, 0.0  ;;  %v963_v53 = vld [vmem:[%s1829_s10 + $0x30] sm:$0xff] (%p1485_p5) }
 0x12b   : > { %922 = vst [vmem:[%s1829_s10 + $0x8] sm:$0xff] %v914_v16  ;;  %v871_v21 = vadd.f32 %v870_v17, %v1822_v27 }
 0x12c   : > { %v889_v18 = vpop.f32.mrf.mxu3  ;;  %v854_v26 = vpop.f32.mrf.mxu1  ;;  %964 = vst [vmem:[%s938_s17 + $0x60] sm:$0xff] (%p1485_p5), %v963_v53 }
 0x12d   : > { %v835_v22 = vpop.f32.mrf.mxu0  ;;  %v890_v23 = vadd.f32 %v889_v18, %v871_v21 }
 0x12e   : > { %v836_v24 = vadd.f32 %v835_v22, %v1827_v34 }
 0x12f   : > { %v904_v25 = vmax.f32 %v890_v23, 0.0 }
 0x130   : > { %v855_v49 = vadd.f32 %v854_v26, %v836_v24 }
 0x131   : > { %v916_v45 = vpack.c.bf16 %v904_v25, %v903_v19 }
 0x132   : > { %v873_v28 = vpop.f32.mrf.mxu2  ;;  %v907_v32 = vmax.f32 %v855_v49, 0.0  ;;  %v953_v47 = vld [vmem:[%s1829_s10 + $0x8] sm:$0xff] (%p1485_p5) }
 0x133   : > { %924 = vst [vmem:[%s1829_s10 + $0x18] sm:$0xff] %v916_v45  ;;  %v874_v30 = vadd.f32 %v873_v28, %v1827_v34  ;;  %v951_v34 = vld [vmem:[%s1829_s10] sm:$0xff] (%p1485_p5) }
 0x134   : > { %v892_v29 = vpop.f32.mrf.mxu3  ;;  %v856_v37 = vpop.f32.mrf.mxu1  ;;  %952 = vst [vmem:[%s938_s17] sm:$0xff] (%p1485_p5), %v951_v34 }
 0x135   : > { %v837_v31 = vpop.f32.mrf.mxu0  ;;  %v893_v33 = vadd.f32 %v892_v29, %v874_v30  ;;  %954 = vst [vmem:[%s938_s17 + $0x8] sm:$0xff] (%p1485_p5), %v953_v47 }
 0x136   : > { %v838_v35 = vadd.f32 %v837_v31, %v403_v52 }
 0x137   : > { %v908_v27 = vmax.f32 %v893_v33, 0.0 }
 0x138   : > { %v857_v39 = vadd.f32 %v856_v37, %v838_v35 }
 0x139   : > { %v918_v36 = vpack.c.bf16 %v908_v27, %v907_v32 }
 0x13a   : > { %v875_v38 = vpop.f32.mrf.mxu2  ;;  %v911_v43 = vmax.f32 %v857_v39, 0.0  ;;  %v957_v50 = vld [vmem:[%s1829_s10 + $0x18] sm:$0xff] (%p1485_p5) }
 0x13b   : > { %926 = vst [vmem:[%s1829_s10 + $0x28] sm:$0xff] %v918_v36  ;;  %v876_v40 = vadd.f32 %v875_v38, %v403_v52 }
 0x13c   : > { %v894_v41 = vpop.f32.mrf.mxu3  ;;  %958 = vst [vmem:[%s938_s17 + $0x28] sm:$0xff] (%p1485_p5), %v957_v50 }
 0x13d   : > { %v895_v42 = vadd.f32 %v894_v41, %v876_v40 }
 0x13f   : > { %v912_v44 = vmax.f32 %v895_v42, 0.0  ;;  %935 = sbr.rel (!%p1485_p5) target bundleno = 332 (0x14c), region = 59 }
 0x141   : > { %v920_v46 = vpack.c.bf16 %v912_v44, %v911_v43 }
 0x142   : > { %v961_v52 = vld [vmem:[%s1829_s10 + $0x28] sm:$0xff] (%p1485_p5) }
 0x143   : > { %928 = vst [vmem:[%s1829_s10 + $0x38] sm:$0xff] %v920_v46 }
 0x144   : > { %962 = vst [vmem:[%s938_s17 + $0x48] sm:$0xff] %v961_v52 }
 0x14a   : > { %v965_v54 = vld [vmem:[%s1829_s10 + $0x38] sm:$0xff] }
 0x14b   : > { %966 = vst [vmem:[%s938_s17 + $0x68] sm:$0xff] %v965_v54 }
 0x14c PF: > { %p10_p10 = scmp.ge.s32.totalorder %s1472_s16, 4   ;;  %s1876_s12 = smov %s1428_s13 }
 0x14d   : > { %s1877_s13 = smov %s1483_s19  ;;  %s1878_s14 = smov %s1472_s16 }
 0x14e   :  { %12 = sbr.rel (!%p10_p10) target bundleno = 2 (0x2), region = 113 }

// kernel: _cnn_forward.6
= control target key start
LH: loop header
LB: loop body
LE: loop exit
PB: predicated region body
PF: predicated region fallthrough
CT: control target
= control target key end

     0   :  { %s1851_s1 = inlined_call_operand.vmem [shape: bf16[512,256], index: 1, kind: input, shape index: {}]   ;;  %s1852_s0 = inlined_call_operand.vmem [shape: bf16[64,512], index: 0, kind: input, shape index: {}]   ;;  %s1853_s2 = inlined_call_operand.vmem [shape: f32[64,1], index: 2, kind: input, shape index: {}]   ;;  %s1854_s3 = inlined_call_operand.vmem [shape: bf16[64,256], index: 3, kind: output, shape index: {}]  }
   0x1   :  { %v932_v0 = vld [vmem:[%s1851_s1 + $0x70] sm:$0xf]  ;;  %v1161_v1 = vld [vmem:[%s1851_s1 + $0x74] sm:$0xf0]  ;;  %v924_v11 = vld [vmem:[%s1851_s1 + $0x60] sm:$0xf] }
   0x2   :  { %v996_v2 = vld [vmem:[%s1851_s1 + $0xf0] sm:$0xf]  ;;  %v933_v3 = vor.u32 %v1161_v1, %v932_v0  ;;  %v1177_v4 = vld [vmem:[%s1851_s1 + $0xf4] sm:$0xf0]  ;;  %v1159_v13 = vld [vmem:[%s1851_s1 + $0x64] sm:$0xf0] }
   0x3   :  { %v1060_v5 = vld [vmem:[%s1851_s1 + $0x170] sm:$0xf]  ;;  %v1193_v6 = vld [vmem:[%s1851_s1 + $0x174] sm:$0xf0]  ;;  %v997_v7 = vor.u32 %v1177_v4, %v996_v2  ;;  %v988_v14 = vld [vmem:[%s1851_s1 + $0xe0] sm:$0xf]  ;;  %v925_v16 = vor.u32 %v1159_v13, %v924_v11 }
   0x4   :  { %v1061_v8 = vor.u32 %v1193_v6, %v1060_v5  ;;  %v1124_v9 = vld [vmem:[%s1851_s1 + $0x1f0] sm:$0xf]  ;;  %v1209_v10 = vld [vmem:[%s1851_s1 + $0x1f4] sm:$0xf0]  ;;  %542 = vmatpush.bf16.msra.mxu0 %v933_v3  ;;  %v1175_v15 = vld [vmem:[%s1851_s1 + $0xe4] sm:$0xf0] }
   0x5   :  { %v1125_v12 = vor.u32 %v1209_v10, %v1124_v9  ;;  %571 = vmatpush.bf16.msra.mxu1 %v997_v7  ;;  %v989_v17 = vor.u32 %v1175_v15, %v988_v14  ;;  %v1052_v18 = vld [vmem:[%s1851_s1 + $0x160] sm:$0xf]  ;;  %v1191_v19 = vld [vmem:[%s1851_s1 + $0x164] sm:$0xf0]  ;;  %v916_v23 = vld [vmem:[%s1851_s1 + $0x50] sm:$0xf] }
   0x6   :  { %600 = vmatpush.bf16.msra.mxu2 %v1061_v8  ;;  %v1116_v20 = vld [vmem:[%s1851_s1 + $0x1e0] sm:$0xf]  ;;  %v1053_v21 = vor.u32 %v1191_v19, %v1052_v18  ;;  %v1207_v22 = vld [vmem:[%s1851_s1 + $0x1e4] sm:$0xf0]  ;;  %v1157_v24 = vld [vmem:[%s1851_s1 + $0x54] sm:$0xf0] }
   0x7   :  { %629 = vmatpush.bf16.msra.mxu3 %v1125_v12  ;;  %v1117_v25 = vor.u32 %v1207_v22, %v1116_v20  ;;  %v980_v26 = vld [vmem:[%s1851_s1 + $0xd0] sm:$0xf]  ;;  %v1173_v27 = vld [vmem:[%s1851_s1 + $0xd4] sm:$0xf0]  ;;  %v917_v29 = vor.u32 %v1157_v24, %v916_v23  ;;  %v908_v35 = vld [vmem:[%s1851_s1 + $0x40] sm:$0xf] }
   0x8   :  { %v1044_v28 = vld [vmem:[%s1851_s1 + $0x150] sm:$0xf]  ;;  %543 = vmatpush.bf16.msra.mxu0 %v925_v16  ;;  %v1189_v30 = vld [vmem:[%s1851_s1 + $0x154] sm:$0xf0]  ;;  %v981_v33 = vor.u32 %v1173_v27, %v980_v26  ;;  %v1155_v36 = vld [vmem:[%s1851_s1 + $0x44] sm:$0xf0] }
   0x9   :  { %v1108_v31 = vld [vmem:[%s1851_s1 + $0x1d0] sm:$0xf]  ;;  %v1205_v32 = vld [vmem:[%s1851_s1 + $0x1d4] sm:$0xf0]  ;;  %572 = vmatpush.bf16.msra.mxu1 %v989_v17  ;;  %v1045_v34 = vor.u32 %v1189_v30, %v1044_v28  ;;  %v972_v37 = vld [vmem:[%s1851_s1 + $0xc0] sm:$0xf]  ;;  %v909_v44 = vor.u32 %v1155_v36, %v908_v35 }
   0xa   :  { %601 = vmatpush.bf16.msra.mxu2 %v1053_v21  ;;  %v1109_v38 = vor.u32 %v1205_v32, %v1108_v31  ;;  %v1171_v39 = vld [vmem:[%s1851_s1 + $0xc4] sm:$0xf0]  ;;  %v1036_v40 = vld [vmem:[%s1851_s1 + $0x140] sm:$0xf]  ;;  %v900_v47 = vld [vmem:[%s1851_s1 + $0x30] sm:$0xf] }
   0xb   :  { %630 = vmatpush.bf16.msra.mxu3 %v1117_v25  ;;  %v1187_v41 = vld [vmem:[%s1851_s1 + $0x144] sm:$0xf0]  ;;  %v1100_v42 = vld [vmem:[%s1851_s1 + $0x1c0] sm:$0xf]  ;;  %v973_v45 = vor.u32 %v1171_v39, %v972_v37  ;;  %v1153_v48 = vld [vmem:[%s1851_s1 + $0x34] sm:$0xf0] }
   0xc   :  { %v1203_v43 = vld [vmem:[%s1851_s1 + $0x1c4] sm:$0xf0]  ;;  %544 = vmatpush.bf16.msra.mxu0 %v917_v29  ;;  %v1037_v46 = vor.u32 %v1187_v41, %v1036_v40  ;;  %v964_v49 = vld [vmem:[%s1851_s1 + $0xb0] sm:$0xf]  ;;  %v1169_v51 = vld [vmem:[%s1851_s1 + $0xb4] sm:$0xf0]  ;;  %v901_v56 = vor.u32 %v1153_v48, %v900_v47 }
   0xd   :  { %573 = vmatpush.bf16.msra.mxu1 %v981_v33  ;;  %v1101_v50 = vor.u32 %v1203_v43, %v1100_v42  ;;  %v1028_v52 = vld [vmem:[%s1851_s1 + $0x130] sm:$0xf]  ;;  %v1185_v53 = vld [vmem:[%s1851_s1 + $0x134] sm:$0xf0]  ;;  %v965_v57 = vor.u32 %v1169_v51, %v964_v49  ;;  %v892_v59 = vld [vmem:[%s1851_s1 + $0x20] sm:$0xf] }
   0xe   :  { %602 = vmatpush.bf16.msra.mxu2 %v1045_v34  ;;  %v1092_v54 = vld [vmem:[%s1851_s1 + $0x1b0] sm:$0xf]  ;;  %v1201_v55 = vld [vmem:[%s1851_s1 + $0x1b4] sm:$0xf0]  ;;  %v1029_v58 = vor.u32 %v1185_v53, %v1028_v52  ;;  %v1151_v60 = vld [vmem:[%s1851_s1 + $0x24] sm:$0xf0] }
   0xf   :  { %631 = vmatpush.bf16.msra.mxu3 %v1109_v38  ;;  %v956_v61 = vld [vmem:[%s1851_s1 + $0xa0] sm:$0xf]  ;;  %v1093_v62 = vor.u32 %v1201_v55, %v1092_v54  ;;  %v1167_v63 = vld [vmem:[%s1851_s1 + $0xa4] sm:$0xf0]  ;;  %v893_v4 = vor.u32 %v1151_v60, %v892_v59  ;;  %v884_v7 = vld [vmem:[%s1851_s1 + $0x10] sm:$0xf] }
  0x10   :  { %545 = vmatpush.bf16.msra.mxu0 %v909_v44  ;;  %v1020_v0 = vld [vmem:[%s1851_s1 + $0x120] sm:$0xf]  ;;  %v1183_v1 = vld [vmem:[%s1851_s1 + $0x124] sm:$0xf0]  ;;  %v957_v5 = vor.u32 %v1167_v63, %v956_v61  ;;  %v1149_v8 = vld [vmem:[%s1851_s1 + $0x14] sm:$0xf0] }
  0x11   :  { %574 = vmatpush.bf16.msra.mxu1 %v973_v45  ;;  %v1084_v2 = vld [vmem:[%s1851_s1 + $0x1a0] sm:$0xf]  ;;  %v1199_v3 = vld [vmem:[%s1851_s1 + $0x1a4] sm:$0xf0]  ;;  %v1021_v6 = vor.u32 %v1183_v1, %v1020_v0  ;;  %v948_v9 = vld [vmem:[%s1851_s1 + $0x90] sm:$0xf]  ;;  %v885_v17 = vor.u32 %v1149_v8, %v884_v7 }
  0x12   :  { %603 = vmatpush.bf16.msra.mxu2 %v1037_v46  ;;  %v1085_v10 = vor.u32 %v1199_v3, %v1084_v2  ;;  %v1165_v11 = vld [vmem:[%s1851_s1 + $0x94] sm:$0xf0]  ;;  %v1012_v12 = vld [vmem:[%s1851_s1 + $0x110] sm:$0xf]  ;;  %v876_v16 = vld [vmem:[%s1851_s1] sm:$0xf] }
  0x13   :  { %632 = vmatpush.bf16.msra.mxu3 %v1101_v50  ;;  %v1181_v13 = vld [vmem:[%s1851_s1 + $0x114] sm:$0xf0]  ;;  %v1076_v14 = vld [vmem:[%s1851_s1 + $0x190] sm:$0xf]  ;;  %v1147_v18 = vld [vmem:[%s1851_s1 + $0x4] sm:$0xf0]  ;;  %v949_v21 = vor.u32 %v1165_v11, %v948_v9 }
  0x14   :  { %546 = vmatpush.bf16.msra.mxu0 %v901_v56  ;;  %v1197_v15 = vld [vmem:[%s1851_s1 + $0x194] sm:$0xf0]  ;;  %v940_v19 = vld [vmem:[%s1851_s1 + $0x80] sm:$0xf]  ;;  %v1163_v20 = vld [vmem:[%s1851_s1 + $0x84] sm:$0xf0]  ;;  %v1013_v22 = vor.u32 %v1181_v13, %v1012_v12  ;;  %v877_v35 = vor.u32 %v1147_v18, %v876_v16 }
  0x15   :  { %575 = vmatpush.bf16.msra.mxu1 %v965_v57  ;;  %v1004_v23 = vld [vmem:[%s1851_s1 + $0x100] sm:$0xf]  ;;  %v1179_v24 = vld [vmem:[%s1851_s1 + $0x104] sm:$0xf0]  ;;  %v1077_v26 = vor.u32 %v1197_v15, %v1076_v14  ;;  %v1132_v29 = vld [vmem:[%s1852_s0 + $0xc] sm:$0xf0]  ;;  %v941_v39 = vor.u32 %v1163_v20, %v940_v19 }
  0x16   :  { %604 = vmatpush.bf16.msra.mxu2 %v1029_v58  ;;  %v1068_v25 = vld [vmem:[%s1851_s1 + $0x180] sm:$0xf]  ;;  %v1195_v27 = vld [vmem:[%s1851_s1 + $0x184] sm:$0xf0]  ;;  %v1130_v30 = vld [vmem:[%s1852_s0 + $0x4] sm:$0xf]  ;;  %v1005_v40 = vor.u32 %v1179_v24, %v1004_v23 }
  0x17   :  { %633 = vmatpush.bf16.msra.mxu3 %v1093_v62  ;;  %v812_v28 = vld [vmem:[%s1852_s0] sm:$0xf]  ;;  %v814_v31 = vld [vmem:[%s1852_s0 + $0x10] sm:$0xf0]  ;;  %v820_v32 = vld [vmem:[%s1852_s0 + $0x8] sm:$0xf]  ;;  %v1069_v44 = vor.u32 %v1195_v27, %v1068_v25 }
  0x18   :  { %547 = vmatpush.bf16.msra.mxu0 %v893_v4  ;;  %v1192_v33 = vld [vmem:[%s1851_s1 + $0x174] sm:$0xf]  ;;  %v1062_v34 = vld [vmem:[%s1851_s1 + $0x178] sm:$0xf0]  ;;  %v94_v38 = vld [vmem:[%s1853_s2] sm:$0xff]  ;;  %v1214_v49 = vmov 0   ;;  %v1475_v50 = vor.u32 %v1132_v29, %v812_v28  ;;  %v1486_v55 = vor.u32 %v1130_v30, %v814_v31 }
  0x19   :  { %576 = vmatpush.bf16.msra.mxu1 %v957_v5  ;;  %v1208_v36 = vld [vmem:[%s1851_s1 + $0x1f4] sm:$0xf]  ;;  %v1126_v37 = vld [vmem:[%s1851_s1 + $0x1f8] sm:$0xf0]  ;;  %v1133_v41 = vld [vmem:[%s1852_s0 + $0x14] sm:$0xf0]  ;;  %v1065_v45 = vor.u32 %v1192_v33, %v1062_v34  ;;  %1211 = vset.pattern.permute.xlu0 %v1214_v49 }
  0x1a   :  { %605 = vmatpush.bf16.msra.mxu2 %v1021_v6  ;;  %v1131_v42 = vld [vmem:[%s1852_s0 + $0xc] sm:$0xf]  ;;  %v822_v43 = vld [vmem:[%s1852_s0 + $0x18] sm:$0xf0]  ;;  %v1160_v46 = vld [vmem:[%s1851_s1 + $0x74] sm:$0xf]  ;;  %v1129_v51 = vor.u32 %v1208_v36, %v1126_v37  ;;  %104 = vperm.xlu0 %1211, %v94_v38   ;;  %v1488_v56 = vor.u32 %v1133_v41, %v820_v32 }
  0x1b   :  { %634 = vmatpush.bf16.msra.mxu3 %v1085_v10  ;;  %v934_v47 = vld [vmem:[%s1851_s1 + $0x78] sm:$0xf0]  ;;  %v1176_v48 = vld [vmem:[%s1851_s1 + $0xf4] sm:$0xf]  ;;  %v1190_v53 = vld [vmem:[%s1851_s1 + $0x164] sm:$0xf]  ;;  %1212 = vset.pattern.permute.xlu1 %v1214_v49  ;;  %v1496_v59 = vor.u32 %v1131_v42, %v822_v43 }
  0x1c   :  { %548 = vmatpush.bf16.msra.mxu0 %v885_v17  ;;  %v998_v52 = vld [vmem:[%s1851_s1 + $0xf8] sm:$0xf0]  ;;  %v1054_v54 = vld [vmem:[%s1851_s1 + $0x168] sm:$0xf0]  ;;  %v1206_v57 = vld [vmem:[%s1851_s1 + $0x1e4] sm:$0xf]  ;;  %1213 = vset.pattern.permute.xlu2 %v1214_v49  ;;  %v937_v60 = vor.u32 %v1160_v46, %v934_v47 }
  0x1d   :  { %577 = vmatpush.bf16.msra.mxu1 %v949_v21  ;;  %v1118_v58 = vld [vmem:[%s1851_s1 + $0x1e8] sm:$0xf0]  ;;  %v1001_v61 = vor.u32 %v1176_v48, %v998_v52  ;;  %v1057_v62 = vor.u32 %v1190_v53, %v1054_v54  ;;  %v1158_v63 = vld [vmem:[%s1851_s1 + $0x64] sm:$0xf]  ;;  %v1188_v4 = vld [vmem:[%s1851_s1 + $0x154] sm:$0xf] }
  0x1e   :  { %606 = vmatpush.bf16.msra.mxu2 %v1013_v22  ;;  %v926_v0 = vld [vmem:[%s1851_s1 + $0x68] sm:$0xf0]  ;;  %v1174_v1 = vld [vmem:[%s1851_s1 + $0xe4] sm:$0xf]  ;;  %v1121_v2 = vor.u32 %v1206_v57, %v1118_v58  ;;  %v1046_v5 = vld [vmem:[%s1851_s1 + $0x158] sm:$0xf0] }
  0x1f   :  { %635 = vmatpush.bf16.msra.mxu3 %v1077_v26  ;;  %v990_v3 = vld [vmem:[%s1851_s1 + $0xe8] sm:$0xf0]  ;;  %v1204_v6 = vld [vmem:[%s1851_s1 + $0x1d4] sm:$0xf]  ;;  %v1110_v7 = vld [vmem:[%s1851_s1 + $0x1d8] sm:$0xf0]  ;;  %v929_v9 = vor.u32 %v1158_v63, %v926_v0  ;;  %v1049_v12 = vor.u32 %v1188_v4, %v1046_v5 }
  0x20   :  { %549 = vmatpush.bf16.msra.mxu0 %v877_v35  ;;  %v95_v8 = vld [vmem:[%s1853_s2 + $0x8] sm:$0xff]  ;;  %v1156_v10 = vld [vmem:[%s1851_s1 + $0x54] sm:$0xf]  ;;  %v993_v11 = vor.u32 %v1174_v1, %v990_v3  ;;  %v918_v13 = vld [vmem:[%s1851_s1 + $0x58] sm:$0xf0]  ;;  %v1113_v16 = vor.u32 %v1204_v6, %v1110_v7 }
  0x21   :  { %578 = vmatpush.bf16.msra.mxu1 %v941_v39  ;;  %v1172_v14 = vld [vmem:[%s1851_s1 + $0xd4] sm:$0xf]  ;;  %v982_v17 = vld [vmem:[%s1851_s1 + $0xd8] sm:$0xf0]  ;;  %v1186_v18 = vld [vmem:[%s1851_s1 + $0x144] sm:$0xf]  ;;  %v921_v22 = vor.u32 %v1156_v10, %v918_v13 }
  0x22   :  { %607 = vmatpush.bf16.msra.mxu2 %v1005_v40  ;;  %v96_v15 = vld [vmem:[%s1853_s2 + $0x10] sm:$0xff]  ;;  %109 = vperm.xlu0 %1211, %v95_v8   ;;  %v1038_v19 = vld [vmem:[%s1851_s1 + $0x148] sm:$0xf0]  ;;  %v1202_v20 = vld [vmem:[%s1851_s1 + $0x1c4] sm:$0xf]  ;;  %v985_v25 = vor.u32 %v1172_v14, %v982_v17 }
  0x23   :  { %636 = vmatpush.bf16.msra.mxu3 %v1069_v44  ;;  %550 = vmatmul.bf16.vlgmr.msra.gmra.mxu0 %v1475_v50  ;;  %v1102_v21 = vld [vmem:[%s1851_s1 + $0x1c8] sm:$0xf0]  ;;  %v828_v23 = vld [vmem:[%s1852_s0 + $0x20] sm:$0xf]  ;;  %v1136_v24 = vld [vmem:[%s1852_s0 + $0x2c] sm:$0xf0]  ;;  %v1041_v26 = vor.u32 %v1186_v18, %v1038_v19 }
  0x24   :  { %579 = vmatmul.bf16.vlgmr.msra.gmra.mxu1 %v1486_v55  ;;  %658 = vmatpush.bf16.msrb.mxu0 %v937_v60  ;;  %v1154_v27 = vld [vmem:[%s1851_s1 + $0x44] sm:$0xf]  ;;  %v910_v28 = vld [vmem:[%s1851_s1 + $0x48] sm:$0xf0]  ;;  %v830_v31 = vld [vmem:[%s1852_s0 + $0x30] sm:$0xf0]  ;;  %v1105_v33 = vor.u32 %v1202_v20, %v1102_v21  ;;  %v1616_v49 = vor.u32 %v1136_v24, %v828_v23 }
  0x25   :  { %608 = vmatmul.bf16.vlgmr.msra.gmra.mxu2 %v1488_v56  ;;  %687 = vmatpush.bf16.msrb.mxu1 %v1001_v61  ;;  %v1170_v29 = vld [vmem:[%s1851_s1 + $0xc4] sm:$0xf]  ;;  %v836_v32 = vld [vmem:[%s1852_s0 + $0x28] sm:$0xf]  ;;  %v974_v34 = vld [vmem:[%s1851_s1 + $0xc8] sm:$0xf0]  ;;  %v913_v42 = vor.u32 %v1154_v27, %v910_v28 }
  0x26   :  { %716 = vmatpush.bf16.msrb.mxu2 %v1065_v45  ;;  %637 = vmatmul.bf16.vlgmr.msra.gmra.mxu3 %v1496_v59  ;;  %v1134_v30 = vld [vmem:[%s1852_s0 + $0x24] sm:$0xf]  ;;  %v1184_v35 = vld [vmem:[%s1851_s1 + $0x134] sm:$0xf]  ;;  %v1030_v36 = vld [vmem:[%s1851_s1 + $0x138] sm:$0xf0]  ;;  %v977_v44 = vor.u32 %v1170_v29, %v974_v34 }
  0x27   :  { %745 = vmatpush.bf16.msrb.mxu3 %v1129_v51  ;;  %114 = vperm.xlu1 %1212, %v96_v15   ;;  %v1137_v37 = vld [vmem:[%s1852_s0 + $0x34] sm:$0xf0]  ;;  %v1200_v38 = vld [vmem:[%s1851_s1 + $0x1b4] sm:$0xf]  ;;  %v1094_v39 = vld [vmem:[%s1851_s1 + $0x1b8] sm:$0xf0]  ;;  %v1033_v45 = vor.u32 %v1184_v35, %v1030_v36  ;;  %v1627_v57 = vor.u32 %v1134_v30, %v830_v31 }
  0x28   :  { %659 = vmatpush.bf16.msrb.mxu0 %v929_v9  ;;  %v1135_v40 = vld [vmem:[%s1852_s0 + $0x2c] sm:$0xf]  ;;  %v838_v41 = vld [vmem:[%s1852_s0 + $0x38] sm:$0xf0]  ;;  %v1152_v46 = vld [vmem:[%s1851_s1 + $0x34] sm:$0xf]  ;;  %v1097_v51 = vor.u32 %v1200_v38, %v1094_v39  ;;  %v1629_v58 = vor.u32 %v1137_v37, %v836_v32 }
  0x29   :  { %688 = vmatpush.bf16.msrb.mxu1 %v993_v11  ;;  %v97_v43 = vld [vmem:[%s1853_s2 + $0x18] sm:$0xff]  ;;  %v1168_v48 = vld [vmem:[%s1851_s1 + $0xb4] sm:$0xf]  ;;  %v1182_v53 = vld [vmem:[%s1851_s1 + $0x124] sm:$0xf] }
  0x2a   :  { %717 = vmatpush.bf16.msrb.mxu2 %v1057_v62  ;;  %v902_v47 = vld [vmem:[%s1851_s1 + $0x38] sm:$0xf0]  ;;  %v1022_v54 = vld [vmem:[%s1851_s1 + $0x128] sm:$0xf0]  ;;  %v1198_v60 = vld [vmem:[%s1851_s1 + $0x1a4] sm:$0xf]  ;;  %v1637_v62 = vor.u32 %v1135_v40, %v838_v41 }
  0x2b   :  { %746 = vmatpush.bf16.msrb.mxu3 %v1121_v2  ;;  %v966_v52 = vld [vmem:[%s1851_s1 + $0xb8] sm:$0xf0]  ;;  %v1086_v61 = vld [vmem:[%s1851_s1 + $0x1a8] sm:$0xf0]  ;;  %v905_v63 = vor.u32 %v1152_v46, %v902_v47  ;;  %v1025_v1 = vor.u32 %v1182_v53, %v1022_v54  ;;  %v1150_v2 = vld [vmem:[%s1851_s1 + $0x24] sm:$0xf] }
  0x2c   :  { %660 = vmatpush.bf16.msrb.mxu0 %v921_v22  ;;  %v969_v0 = vor.u32 %v1168_v48, %v966_v52  ;;  %v894_v3 = vld [vmem:[%s1851_s1 + $0x28] sm:$0xf0]  ;;  %v1089_v4 = vor.u32 %v1198_v60, %v1086_v61  ;;  %v1166_v5 = vld [vmem:[%s1851_s1 + $0xa4] sm:$0xf]  ;;  %v1180_v8 = vld [vmem:[%s1851_s1 + $0x114] sm:$0xf] }
  0x2d   :  { %689 = vmatpush.bf16.msrb.mxu1 %v985_v25  ;;  %v958_v6 = vld [vmem:[%s1851_s1 + $0xa8] sm:$0xf0]  ;;  %v897_v7 = vor.u32 %v1150_v2, %v894_v3  ;;  %v1014_v9 = vld [vmem:[%s1851_s1 + $0x118] sm:$0xf0]  ;;  %v1148_v10 = vld [vmem:[%s1851_s1 + $0x14] sm:$0xf] }
  0x2e   :  { %718 = vmatpush.bf16.msrb.mxu2 %v1049_v12  ;;  %v961_v11 = vor.u32 %v1166_v5, %v958_v6  ;;  %v1017_v12 = vor.u32 %v1180_v8, %v1014_v9  ;;  %v886_v13 = vld [vmem:[%s1851_s1 + $0x18] sm:$0xf0]  ;;  %v1196_v14 = vld [vmem:[%s1851_s1 + $0x194] sm:$0xf]  ;;  %v1178_v19 = vld [vmem:[%s1851_s1 + $0x104] sm:$0xf] }
  0x2f   :  { %747 = vmatpush.bf16.msrb.mxu3 %v1113_v16  ;;  %119 = vperm.xlu1 %1212, %v97_v43   ;;  %v1078_v15 = vld [vmem:[%s1851_s1 + $0x198] sm:$0xf0]  ;;  %v1164_v17 = vld [vmem:[%s1851_s1 + $0x94] sm:$0xf]  ;;  %v1006_v20 = vld [vmem:[%s1851_s1 + $0x108] sm:$0xf0]  ;;  %v889_v21 = vor.u32 %v1148_v10, %v886_v13 }
  0x30   :  { %661 = vmatpush.bf16.msrb.mxu0 %v913_v42  ;;  %v1081_v16 = vor.u32 %v1196_v14, %v1078_v15  ;;  %v950_v18 = vld [vmem:[%s1851_s1 + $0x98] sm:$0xf0]  ;;  %v1194_v22 = vld [vmem:[%s1851_s1 + $0x184] sm:$0xf]  ;;  %v1070_v23 = vld [vmem:[%s1851_s1 + $0x188] sm:$0xf0]  ;;  %v1009_v25 = vor.u32 %v1178_v19, %v1006_v20 }
  0x31   :  { %690 = vmatpush.bf16.msrb.mxu1 %v977_v44  ;;  %v953_v24 = vor.u32 %v1164_v17, %v950_v18  ;;  %v878_v27 = vld [vmem:[%s1851_s1 + $0x8] sm:$0xf0]  ;;  %v100_v28 = vld [vmem:[%s1853_s2 + $0x30] sm:$0xff]  ;;  %v1073_v29 = vor.u32 %v1194_v22, %v1070_v23  ;;  %v1162_v30 = vld [vmem:[%s1851_s1 + $0x84] sm:$0xf] }
  0x32   :  { %719 = vmatpush.bf16.msrb.mxu2 %v1041_v26  ;;  %v1146_v26 = vld [vmem:[%s1851_s1 + $0x4] sm:$0xf]  ;;  %v942_v31 = vld [vmem:[%s1851_s1 + $0x88] sm:$0xf0]  ;;  %134 = vperm.xlu0 %1211, %v100_v28   ;;  %v844_v32 = vld [vmem:[%s1852_s0 + $0x40] sm:$0xf] }
  0x33   :  { %748 = vmatpush.bf16.msrb.mxu3 %v1105_v33  ;;  %555 = vmatmul.bf16.gmra.mxu0 %v1616_v49  ;;  %v1140_v33 = vld [vmem:[%s1852_s0 + $0x4c] sm:$0xf0]  ;;  %v1138_v34 = vld [vmem:[%s1852_s0 + $0x44] sm:$0xf]  ;;  %v846_v35 = vld [vmem:[%s1852_s0 + $0x50] sm:$0xf0]  ;;  %v881_v38 = vor.u32 %v1146_v26, %v878_v27  ;;  %v945_v41 = vor.u32 %v1162_v30, %v942_v31 }
  0x34   :  { %584 = vmatmul.bf16.gmra.mxu1 %v1627_v57  ;;  %662 = vmatpush.bf16.msrb.mxu0 %v905_v63  ;;  %v852_v36 = vld [vmem:[%s1852_s0 + $0x48] sm:$0xf]  ;;  %v1141_v37 = vld [vmem:[%s1852_s0 + $0x54] sm:$0xf0]  ;;  %v1139_v39 = vld [vmem:[%s1852_s0 + $0x4c] sm:$0xf]  ;;  %v845_v42 = vor.u32 %v1140_v33, %v844_v32  ;;  %v849_v43 = vor.u32 %v1138_v34, %v846_v35 }
  0x35   :  { %613 = vmatmul.bf16.gmra.mxu2 %v1629_v58  ;;  %691 = vmatpush.bf16.msrb.mxu1 %v969_v0  ;;  %v854_v40 = vld [vmem:[%s1852_s0 + $0x58] sm:$0xf0]  ;;  %v853_v44 = vor.u32 %v1141_v37, %v852_v36  ;;  %v98_v46 = vld [vmem:[%s1853_s2 + $0x20] sm:$0xff]  ;;  %v99_v48 = vld [vmem:[%s1853_s2 + $0x28] sm:$0xff] }
  0x36   :  { %720 = vmatpush.bf16.msrb.mxu2 %v1033_v45  ;;  %642 = vmatmul.bf16.gmra.mxu3 %v1637_v62  ;;  %v857_v45 = vor.u32 %v1139_v39, %v854_v40  ;;  %v101_v47 = vld [vmem:[%s1853_s2 + $0x38] sm:$0xff]  ;;  %v1144_v52 = vld [vmem:[%s1852_s0 + $0x6c] sm:$0xf0]  ;;  %v1142_v53 = vld [vmem:[%s1852_s0 + $0x64] sm:$0xf] }
  0x37   :  { %749 = vmatpush.bf16.msrb.mxu3 %v1097_v51  ;;  %124 = vperm.xlu2 %1213, %v98_v46   ;;  %v860_v51 = vld [vmem:[%s1852_s0 + $0x60] sm:$0xf]  ;;  %v862_v54 = vld [vmem:[%s1852_s0 + $0x70] sm:$0xf0]  ;;  %v868_v60 = vld [vmem:[%s1852_s0 + $0x68] sm:$0xf] }
  0x38   :  { %663 = vmatpush.bf16.msrb.mxu0 %v897_v7  ;;  %139 = vperm.xlu1 %1212, %v101_v47   ;;  %v1145_v61 = vld [vmem:[%s1852_s0 + $0x74] sm:$0xf0]  ;;  %v1143_v63 = vld [vmem:[%s1852_s0 + $0x6c] sm:$0xf]  ;;  %v870_v0 = vld [vmem:[%s1852_s0 + $0x78] sm:$0xf0]  ;;  %v865_v2 = vor.u32 %v1142_v53, %v862_v54 }
  0x39   :  { %692 = vmatpush.bf16.msrb.mxu1 %v961_v11  ;;  %v869_v3 = vor.u32 %v1145_v61, %v868_v60 }
  0x3a   :  { %721 = vmatpush.bf16.msrb.mxu2 %v1025_v1  ;;  %v861_v1 = vor.u32 %v1144_v52, %v860_v51 }
  0x3b   :  { %750 = vmatpush.bf16.msrb.mxu3 %v1089_v4  ;;  %v873_v4 = vor.u32 %v1143_v63, %v870_v0 }
  0x3c   :  { %664 = vmatpush.bf16.msrb.mxu0 %v889_v21 }
  0x3d   :  { %693 = vmatpush.bf16.msrb.mxu1 %v953_v24 }
  0x3e   :  { %722 = vmatpush.bf16.msrb.mxu2 %v1017_v12 }
  0x3f   :  { %751 = vmatpush.bf16.msrb.mxu3 %v1081_v16  ;;  %129 = vperm.xlu2 %1213, %v99_v48  }
  0x40   :  { %665 = vmatpush.bf16.msrb.mxu0 %v881_v38 }
  0x41   :  { %694 = vmatpush.bf16.msrb.mxu1 %v945_v41 }
  0x42   :  { %723 = vmatpush.bf16.msrb.mxu2 %v1009_v25 }
  0x43   :  { %752 = vmatpush.bf16.msrb.mxu3 %v1073_v29  ;;  %560 = vmatmul.bf16.gmra.mxu0 %v845_v42 }
  0x44   :  { %589 = vmatmul.bf16.gmra.mxu1 %v849_v43 }
  0x45   :  { %618 = vmatmul.bf16.gmra.mxu2 %v853_v44 }
  0x46   :  { %647 = vmatmul.bf16.gmra.mxu3 %v857_v45 }
  0x53   :  { %565 = vmatmul.bf16.gmra.mxu0 %v861_v1 }
  0x54   :  { %594 = vmatmul.bf16.gmra.mxu1 %v865_v2 }
  0x55   :  { %623 = vmatmul.bf16.gmra.mxu2 %v869_v3 }
  0x56   :  { %652 = vmatmul.bf16.gmra.mxu3 %v873_v4 }
  0x63   :  { %666 = vmatmul.bf16.vlgmr.msrb.gmra.mxu0 %v1475_v50 }
  0x64   :  { %695 = vmatmul.bf16.vlgmr.msrb.gmra.mxu1 %v1486_v55 }
  0x65   :  { %724 = vmatmul.bf16.vlgmr.msrb.gmra.mxu2 %v1488_v56 }
  0x66   :  { %753 = vmatmul.bf16.vlgmr.msrb.gmra.mxu3 %v1496_v59 }
  0x73   :  { %671 = vmatmul.bf16.gmra.mxu0 %v1616_v49 }
  0x74   :  { %700 = vmatmul.bf16.gmra.mxu1 %v1627_v57 }
  0x75   :  { %729 = vmatmul.bf16.gmra.mxu2 %v1629_v58 }
  0x76   :  { %758 = vmatmul.bf16.gmra.mxu3 %v1637_v62 }
  0x83   :  { %676 = vmatmul.bf16.gmra.mxu0 %v845_v42 }
  0x84   :  { %705 = vmatmul.bf16.gmra.mxu1 %v849_v43 }
  0x85   :  { %734 = vmatmul.bf16.gmra.mxu2 %v853_v44 }
  0x86   :  { %763 = vmatmul.bf16.gmra.mxu3 %v857_v45 }
  0x8c   :  { %v1771_v50 = vpop.permute.xlu0 %104 }
  0x91   :  { %v1789_v29 = vpop.permute.xlu2 %124 }
  0x93   :  { %681 = vmatmul.bf16.gmra.mxu0 %v861_v1 }
  0x94   :  { %710 = vmatmul.bf16.gmra.mxu1 %v865_v2  ;;  %v1774_v57 = vpop.permute.xlu0 %109 }
  0x95   :  { %739 = vmatmul.bf16.gmra.mxu2 %v869_v3 }
  0x96   :  { %768 = vmatmul.bf16.gmra.mxu3 %v873_v4 }
  0x99   :  { %v1779_v11 = vpop.permute.xlu1 %114  ;;  %v1794_v38 = vpop.permute.xlu2 %129 }
  0xa0   :  { %v551_v55 = vpop.f32.mrf.mxu0 }
  0xa1   :  { %v552_v56 = vadd.f32 %v551_v55, %v1771_v50  ;;  %v580_v59 = vpop.f32.mrf.mxu1  ;;  %v1784_v20 = vpop.permute.xlu1 %119 }
  0xa3   :  { %v581_v49 = vadd.f32 %v580_v59, %v552_v56 }
  0xa4   :  { %v1799_v47 = vpop.permute.xlu0 %134 }
  0xa8   :  { %v609_v58 = vpop.f32.mrf.mxu2  ;;  %v553_v6 = vpop.f32.mrf.mxu0 }
  0xa9   :  { %v610_v5 = vadd.f32 %v609_v58, %v581_v49  ;;  %v638_v62 = vpop.f32.mrf.mxu3  ;;  %v554_v7 = vadd.f32 %v553_v6, %v1774_v57  ;;  %v582_v8 = vpop.f32.mrf.mxu1 }
  0xaa   :  { %v1804_v0 = vpop.permute.xlu1 %139 }
  0xab   :  { %v1777_v9 = vadd.f32 %v638_v62, %v610_v5  ;;  %v583_v10 = vadd.f32 %v582_v8, %v554_v7 }
  0xb0   :  { %v611_v12 = vpop.f32.mrf.mxu2  ;;  %v556_v15 = vpop.f32.mrf.mxu0 }
  0xb1   :  { %v612_v13 = vadd.f32 %v611_v12, %v583_v10  ;;  %v640_v14 = vpop.f32.mrf.mxu3  ;;  %v557_v16 = vadd.f32 %v556_v15, %v1779_v11  ;;  %v585_v17 = vpop.f32.mrf.mxu1 }
  0xb3   :  { %v1782_v18 = vadd.f32 %v640_v14, %v612_v13  ;;  %v586_v19 = vadd.f32 %v585_v17, %v557_v16 }
  0xb8   :  { %v614_v21 = vpop.f32.mrf.mxu2  ;;  %v558_v24 = vpop.f32.mrf.mxu0 }
  0xb9   :  { %v615_v22 = vadd.f32 %v614_v21, %v586_v19  ;;  %v643_v23 = vpop.f32.mrf.mxu3  ;;  %v559_v25 = vadd.f32 %v558_v24, %v1784_v20  ;;  %v587_v26 = vpop.f32.mrf.mxu1 }
  0xbb   :  { %v1787_v27 = vadd.f32 %v643_v23, %v615_v22  ;;  %v588_v28 = vadd.f32 %v587_v26, %v559_v25  ;;  %v774_v22 = vmax.f32 %v1777_v9, 0.0 }
  0xc0   :  { %v616_v30 = vpop.f32.mrf.mxu2  ;;  %v561_v33 = vpop.f32.mrf.mxu0 }
  0xc1   :  { %v617_v31 = vadd.f32 %v616_v30, %v588_v28  ;;  %v645_v32 = vpop.f32.mrf.mxu3  ;;  %v562_v34 = vadd.f32 %v561_v33, %v1789_v29  ;;  %v590_v35 = vpop.f32.mrf.mxu1 }
  0xc3   :  { %v1792_v36 = vadd.f32 %v645_v32, %v617_v31  ;;  %v591_v37 = vadd.f32 %v590_v35, %v562_v34  ;;  %v776_v34 = vmax.f32 %v1782_v18, 0.0 }
  0xc8   :  { %v619_v39 = vpop.f32.mrf.mxu2  ;;  %v563_v42 = vpop.f32.mrf.mxu0 }
  0xc9   :  { %v620_v40 = vadd.f32 %v619_v39, %v591_v37  ;;  %v648_v41 = vpop.f32.mrf.mxu3  ;;  %v564_v43 = vadd.f32 %v563_v42, %v1794_v38  ;;  %v592_v44 = vpop.f32.mrf.mxu1 }
  0xcb   :  { %v1797_v45 = vadd.f32 %v648_v41, %v620_v40  ;;  %v593_v46 = vadd.f32 %v592_v44, %v564_v43 }
  0xd0   :  { %v621_v48 = vpop.f32.mrf.mxu2  ;;  %v566_v53 = vpop.f32.mrf.mxu0 }
  0xd1   :  { %v622_v51 = vadd.f32 %v621_v48, %v593_v46  ;;  %v650_v52 = vpop.f32.mrf.mxu3  ;;  %v595_v54 = vpop.f32.mrf.mxu1  ;;  %v567_v60 = vadd.f32 %v566_v53, %v1799_v47 }
  0xd3   :  { %v1802_v61 = vadd.f32 %v650_v52, %v622_v51  ;;  %v596_v63 = vadd.f32 %v595_v54, %v567_v60 }
  0xd8   :  { %v624_v1 = vpop.f32.mrf.mxu2  ;;  %v568_v4 = vpop.f32.mrf.mxu0 }
  0xd9   :  { %v625_v2 = vadd.f32 %v624_v1, %v596_v63  ;;  %v653_v3 = vpop.f32.mrf.mxu3  ;;  %v569_v55 = vadd.f32 %v568_v4, %v1804_v0  ;;  %v597_v56 = vpop.f32.mrf.mxu1 }
  0xdb   :  { %v1807_v59 = vadd.f32 %v653_v3, %v625_v2  ;;  %v598_v49 = vadd.f32 %v597_v56, %v569_v55  ;;  %v780_v2 = vmax.f32 %v1792_v36, 0.0 }
  0xe0   :  { %v626_v58 = vpop.f32.mrf.mxu2  ;;  %v667_v6 = vpop.f32.mrf.mxu0 }
  0xe1   :  { %v627_v5 = vadd.f32 %v626_v58, %v598_v49  ;;  %v655_v62 = vpop.f32.mrf.mxu3  ;;  %v668_v7 = vadd.f32 %v667_v6, %v1771_v50  ;;  %v696_v8 = vpop.f32.mrf.mxu1 }
  0xe3   :  { %v1810_v10 = vadd.f32 %v655_v62, %v627_v5  ;;  %v697_v12 = vadd.f32 %v696_v8, %v668_v7 }
  0xe8   :  { %v725_v13 = vpop.f32.mrf.mxu2  ;;  %v669_v16 = vpop.f32.mrf.mxu0 }
  0xe9   :  { %v726_v14 = vadd.f32 %v725_v13, %v697_v12  ;;  %v754_v15 = vpop.f32.mrf.mxu3  ;;  %v698_v17 = vpop.f32.mrf.mxu1  ;;  %v670_v21 = vadd.f32 %v669_v16, %v1774_v57 }
  0xeb   :  { %v755_v19 = vadd.f32 %v754_v15, %v726_v14  ;;  %v699_v25 = vadd.f32 %v698_v17, %v670_v21 }
  0xed   :  { %v775_v23 = vmax.f32 %v755_v19, 0.0  ;;  %v784_v19 = vmax.f32 %v1802_v61, 0.0 }
  0xef   :  { %v790_v24 = vpack.c.bf16 %v775_v23, %v774_v22 }
  0xf0   :  { %v727_v26 = vpop.f32.mrf.mxu2  ;;  %v672_v30 = vpop.f32.mrf.mxu0 }
  0xf1   :  { %798 = vst [vmem:[%s1854_s3] sm:$0xff] %v790_v24  ;;  %v728_v50 = vadd.f32 %v727_v26, %v699_v25  ;;  %v756_v28 = vpop.f32.mrf.mxu3  ;;  %v673_v31 = vadd.f32 %v672_v30, %v1779_v11  ;;  %v701_v32 = vpop.f32.mrf.mxu1  ;;  %v778_v11 = vmax.f32 %v1787_v27, 0.0 }
  0xf3   :  { %v757_v33 = vadd.f32 %v756_v28, %v728_v50  ;;  %v702_v35 = vadd.f32 %v701_v32, %v673_v31  ;;  %v786_v28 = vmax.f32 %v1807_v59, 0.0 }
  0xf5   :  { %v777_v57 = vmax.f32 %v757_v33, 0.0 }
  0xf7   :  { %v791_v9 = vpack.c.bf16 %v777_v57, %v776_v34 }
  0xf8   :  { %v730_v37 = vpop.f32.mrf.mxu2  ;;  %v674_v41 = vpop.f32.mrf.mxu0 }
  0xf9   :  { %799 = vst [vmem:[%s1854_s3 + $0x8] sm:$0xff] %v791_v9  ;;  %v731_v39 = vadd.f32 %v730_v37, %v702_v35  ;;  %v759_v40 = vpop.f32.mrf.mxu3  ;;  %v703_v42 = vpop.f32.mrf.mxu1  ;;  %v675_v44 = vadd.f32 %v674_v41, %v1784_v20  ;;  %v788_v35 = vmax.f32 %v1810_v10, 0.0 }
  0xfb   :  { %v760_v43 = vadd.f32 %v759_v40, %v731_v39  ;;  %v704_v18 = vadd.f32 %v703_v42, %v675_v44 }
  0xfd   :  { %v779_v46 = vmax.f32 %v760_v43, 0.0 }
  0xff   :  { %v792_v48 = vpack.c.bf16 %v779_v46, %v778_v11 }
 0x100   :  { %v732_v51 = vpop.f32.mrf.mxu2  ;;  %v677_v54 = vpop.f32.mrf.mxu0 }
 0x101   :  { %800 = vst [vmem:[%s1854_s3 + $0x10] sm:$0xff] %v792_v48  ;;  %v733_v52 = vadd.f32 %v732_v51, %v704_v18  ;;  %v761_v53 = vpop.f32.mrf.mxu3  ;;  %v678_v60 = vadd.f32 %v677_v54, %v1789_v29  ;;  %v706_v63 = vpop.f32.mrf.mxu1  ;;  %v782_v29 = vmax.f32 %v1797_v45, 0.0 }
 0x103   :  { %v762_v1 = vadd.f32 %v761_v53, %v733_v52  ;;  %v707_v3 = vadd.f32 %v706_v63, %v678_v60 }
 0x105   :  { %v781_v20 = vmax.f32 %v762_v1, 0.0 }
 0x107   :  { %v793_v27 = vpack.c.bf16 %v781_v20, %v780_v2 }
 0x108   :  { %v735_v4 = vpop.f32.mrf.mxu2  ;;  %v679_v49 = vpop.f32.mrf.mxu0 }
 0x109   :  { %801 = vst [vmem:[%s1854_s3 + $0x18] sm:$0xff] %v793_v27  ;;  %v736_v55 = vadd.f32 %v735_v4, %v707_v3  ;;  %v764_v56 = vpop.f32.mrf.mxu3  ;;  %v708_v58 = vpop.f32.mrf.mxu1  ;;  %v680_v62 = vadd.f32 %v679_v49, %v1794_v38 }
 0x10b   :  { %v765_v5 = vadd.f32 %v764_v56, %v736_v55  ;;  %v709_v36 = vadd.f32 %v708_v58, %v680_v62 }
 0x10d   :  { %v783_v6 = vmax.f32 %v765_v5, 0.0 }
 0x10f   :  { %v794_v7 = vpack.c.bf16 %v783_v6, %v782_v29 }
 0x110   :  { %v737_v8 = vpop.f32.mrf.mxu2  ;;  %v682_v14 = vpop.f32.mrf.mxu0 }
 0x111   :  { %802 = vst [vmem:[%s1854_s3 + $0x20] sm:$0xff] %v794_v7  ;;  %v738_v12 = vadd.f32 %v737_v8, %v709_v36  ;;  %v766_v13 = vpop.f32.mrf.mxu3  ;;  %v683_v16 = vadd.f32 %v682_v14, %v1799_v47  ;;  %v711_v17 = vpop.f32.mrf.mxu1 }
 0x113   :  { %v767_v15 = vadd.f32 %v766_v13, %v738_v12  ;;  %v712_v45 = vadd.f32 %v711_v17, %v683_v16 }
 0x115   :  { %v785_v38 = vmax.f32 %v767_v15, 0.0 }
 0x117   :  { %v795_v21 = vpack.c.bf16 %v785_v38, %v784_v19 }
 0x118   :  { %v740_v22 = vpop.f32.mrf.mxu2  ;;  %v684_v25 = vpop.f32.mrf.mxu0 }
 0x119   :  { %803 = vst [vmem:[%s1854_s3 + $0x28] sm:$0xff] %v795_v21  ;;  %v741_v23 = vadd.f32 %v740_v22, %v712_v45  ;;  %v769_v24 = vpop.f32.mrf.mxu3  ;;  %v685_v50 = vadd.f32 %v684_v25, %v1804_v0  ;;  %v713_v30 = vpop.f32.mrf.mxu1 }
 0x11b   :  { %v770_v26 = vadd.f32 %v769_v24, %v741_v23  ;;  %v714_v61 = vadd.f32 %v713_v30, %v685_v50 }
 0x11d   :  { %v787_v47 = vmax.f32 %v770_v26, 0.0 }
 0x11f   :  { %v796_v31 = vpack.c.bf16 %v787_v47, %v786_v28 }
 0x120   :  { %v742_v32 = vpop.f32.mrf.mxu2 }
 0x121   :  { %804 = vst [vmem:[%s1854_s3 + $0x30] sm:$0xff] %v796_v31  ;;  %v743_v33 = vadd.f32 %v742_v32, %v714_v61  ;;  %v771_v34 = vpop.f32.mrf.mxu3 }
 0x123   :  { %v772_v57 = vadd.f32 %v771_v34, %v743_v33 }
 0x125   :  { %v789_v9 = vmax.f32 %v772_v57, 0.0 }
 0x127   :  { %v797_v37 = vpack.c.bf16 %v789_v9, %v788_v35 }
 0x129   :  { %805 = vst [vmem:[%s1854_s3 + $0x38] sm:$0xff] %v797_v37 }

// kernel: _cnn_forward.7
= control target key start
LH: loop header
LB: loop body
LE: loop exit
PB: predicated region body
PF: predicated region fallthrough
CT: control target
= control target key end

     0   :  { %v988_v6 = vmov 0   ;;  %vm475_vm0 = vcmask 523264   ;;  %s1283_s1 = inlined_call_operand.vmem [shape: bf16[576,128], index: 1, kind: input, shape index: {}]   ;;  %s1284_s2 = inlined_call_operand.vmem [shape: f32[64,1], index: 2, kind: input, shape index: {}]   ;;  %s1285_s0 = inlined_call_operand.vmem [shape: bf16[64,576], index: 0, kind: input, shape index: {}]   ;;  %s1286_s3 = inlined_call_operand.vmem [shape: bf16[64,128], index: 3, kind: output, shape index: {}]  }
   0x1   :  { %v916_v0 = vld [vmem:[%s1283_s1 + $0x38] sm:$0xff]  ;;  %v915_v1 = vld [vmem:[%s1283_s1 + $0x30] sm:$0xff]  ;;  %v914_v4 = vld [vmem:[%s1283_s1 + $0x28] sm:$0xff]  ;;  %986 = vset.pattern.permute.xlu1 %v988_v6  ;;  %985 = vset.pattern.permute.xlu0 %v988_v6 }
   0x2   :  { %968 = vmatpush.bf16.msra.mxu1 %v916_v0  ;;  %969 = vmatpush.bf16.msra.mxu2 %v916_v0  ;;  %v940_v2 = vld [vmem:[%s1283_s1 + $0xf8] sm:$0xff]  ;;  %v939_v3 = vld [vmem:[%s1283_s1 + $0xf0] sm:$0xff]  ;;  %v938_v5 = vld [vmem:[%s1283_s1 + $0xe8] sm:$0xff] }
   0x3   :  { %488 = vmatpush.bf16.msra.mxu0 %v916_v0  ;;  %575 = vmatpush.bf16.msra.mxu3 %v940_v2  ;;  %v913_v7 = vld [vmem:[%s1283_s1 + $0x20] sm:$0xff]  ;;  %v113_v8 = vld [vmem:[%s1284_s2 + $0x10] sm:$0xff]  ;;  %v912_v11 = vld [vmem:[%s1283_s1 + $0x18] sm:$0xff] }
   0x4   :  { %987 = vset.pattern.permute.xlu2 %v988_v6  ;;  %v937_v9 = vld [vmem:[%s1283_s1 + $0xe0] sm:$0xff]  ;;  %131 = vperm.xlu1 %986, %v113_v8   ;;  %v936_v12 = vld [vmem:[%s1283_s1 + $0xd8] sm:$0xff]  ;;  %v911_v13 = vld [vmem:[%s1283_s1 + $0x10] sm:$0xff] }
   0x5   :  { %v111_v10 = vld [vmem:[%s1284_s2] sm:$0xff]  ;;  %v114_v14 = vld [vmem:[%s1284_s2 + $0x18] sm:$0xff]  ;;  %v935_v15 = vld [vmem:[%s1283_s1 + $0xd0] sm:$0xff] }
   0x6   :  { %970 = vmatpush.bf16.msra.mxu1 %v915_v1  ;;  %971 = vmatpush.bf16.msra.mxu2 %v915_v1  ;;  %v112_v16 = vld [vmem:[%s1284_s2 + $0x8] sm:$0xff]  ;;  %v909_v19 = vld [vmem:[%s1283_s1] sm:$0xff]  ;;  %v896_v21 = vld [vmem:[%s1285_s0 + $0x38] sm:$0xf0] }
   0x7   :  { %489 = vmatpush.bf16.msra.mxu0 %v915_v1  ;;  %576 = vmatpush.bf16.msra.mxu3 %v939_v3  ;;  %v910_v17 = vld [vmem:[%s1283_s1 + $0x8] sm:$0xff]  ;;  %v723_v22 = vld [vmem:[%s1285_s0 + $0x78] sm:$0xf]  ;;  %v663_v26 = vld [vmem:[%s1285_s0] sm:$0xf] }
   0x8   :  { %121 = vperm.xlu0 %985, %v111_v10   ;;  %v934_v18 = vld [vmem:[%s1283_s1 + $0xc8] sm:$0xff]  ;;  %v932_v24 = vld [vmem:[%s1283_s1 + $0xb8] sm:$0xff]  ;;  %v933_v27 = vld [vmem:[%s1283_s1 + $0xc0] sm:$0xff] }
   0x9   :  { %v683_v20 = vld [vmem:[%s1285_s0 + $0x28] sm:$0xf]  ;;  %v906_v23 = vld [vmem:[%s1285_s0 + $0x88] sm:$0xf0]  ;;  %v924_v25 = vld [vmem:[%s1283_s1 + $0x78] sm:$0xff] }
   0xa   :  { %972 = vmatpush.bf16.msra.mxu1 %v914_v4  ;;  %973 = vmatpush.bf16.msra.mxu2 %v914_v4  ;;  %v684_v28 = vor.u32 %v896_v21, %v683_v20  ;;  %v724_v29 = vor.u32 %v906_v23, %v723_v22  ;;  %v891_v30 = vld [vmem:[%s1285_s0 + $0x10] sm:$0xf0]  ;;  %v890_v31 = vld [vmem:[%s1285_s0 + $0xc] sm:$0xf]  ;;  %v673_v32 = vld [vmem:[%s1285_s0 + $0x1c] sm:$0xf0] }
   0xb   :  { %490 = vmatpush.bf16.msra.mxu0 %v914_v4  ;;  %577 = vmatpush.bf16.msra.mxu3 %v938_v5  ;;  %v944_v33 = vld [vmem:[%s1283_s1 + $0x118] sm:$0xff]  ;;  %v931_v34 = vld [vmem:[%s1283_s1 + $0xb0] sm:$0xff]  ;;  %v664_v37 = vor.u32 %v891_v30, %v663_v26  ;;  %v676_v38 = vor.u32 %v890_v31, %v673_v32  ;;  %v930_v41 = vld [vmem:[%s1283_s1 + $0xa8] sm:$0xff] }
   0xc   :  { %136 = vperm.xlu1 %986, %v114_v14   ;;  %v923_v35 = vld [vmem:[%s1283_s1 + $0x70] sm:$0xff]  ;;  %v118_v36 = vld [vmem:[%s1284_s2 + $0x38] sm:$0xff]  ;;  %v922_v42 = vld [vmem:[%s1283_s1 + $0x68] sm:$0xff] }
   0xd   :  { %v943_v39 = vld [vmem:[%s1283_s1 + $0x110] sm:$0xff]  ;;  %v942_v43 = vld [vmem:[%s1283_s1 + $0x108] sm:$0xff]  ;;  %v929_v44 = vld [vmem:[%s1283_s1 + $0xa0] sm:$0xff] }
   0xe   :  { %974 = vmatpush.bf16.msra.mxu1 %v913_v7  ;;  %975 = vmatpush.bf16.msra.mxu2 %v913_v7  ;;  %v117_v40 = vld [vmem:[%s1284_s2 + $0x30] sm:$0xff]  ;;  %v921_v45 = vld [vmem:[%s1283_s1 + $0x60] sm:$0xff]  ;;  %v928_v49 = vld [vmem:[%s1283_s1 + $0x98] sm:$0xff] }
   0xf   :  { %491 = vmatpush.bf16.msra.mxu0 %v913_v7  ;;  %578 = vmatpush.bf16.msra.mxu3 %v937_v9  ;;  %v703_v46 = vld [vmem:[%s1285_s0 + $0x50] sm:$0xf]  ;;  %v901_v47 = vld [vmem:[%s1285_s0 + $0x60] sm:$0xf0]  ;;  %v920_v50 = vld [vmem:[%s1283_s1 + $0x58] sm:$0xff] }
  0x10   :  { %126 = vperm.xlu0 %985, %v112_v16   ;;  %v941_v48 = vld [vmem:[%s1283_s1 + $0x100] sm:$0xff]  ;;  %v679_v51 = vld [vmem:[%s1285_s0 + $0x10] sm:$0xf]  ;;  %v704_v52 = vor.u32 %v901_v47, %v703_v46  ;;  %v895_v54 = vld [vmem:[%s1285_s0 + $0x34] sm:$0xf] }
  0x11   :  { %v893_v53 = vld [vmem:[%s1285_s0 + $0x20] sm:$0xf0]  ;;  %v693_v55 = vld [vmem:[%s1285_s0 + $0x44] sm:$0xf0]  ;;  %v927_v56 = vld [vmem:[%s1283_s1 + $0x90] sm:$0xff] }
  0x12   :  { %976 = vmatpush.bf16.msra.mxu1 %v912_v11  ;;  %977 = vmatpush.bf16.msra.mxu2 %v912_v11  ;;  %v919_v57 = vld [vmem:[%s1283_s1 + $0x50] sm:$0xff]  ;;  %v680_v58 = vor.u32 %v893_v53, %v679_v51  ;;  %v696_v59 = vor.u32 %v895_v54, %v693_v55  ;;  %v115_v60 = vld [vmem:[%s1284_s2 + $0x20] sm:$0xff]  ;;  %v926_v61 = vld [vmem:[%s1283_s1 + $0x88] sm:$0xff] }
  0x13   :  { %492 = vmatpush.bf16.msra.mxu0 %v912_v11  ;;  %579 = vmatpush.bf16.msra.mxu3 %v936_v12  ;;  %v918_v62 = vld [vmem:[%s1283_s1 + $0x48] sm:$0xff]  ;;  %v925_v63 = vld [vmem:[%s1283_s1 + $0x80] sm:$0xff]  ;;  %v892_v2 = vld [vmem:[%s1285_s0 + $0x18] sm:$0xf0] }
  0x14   :  { %156 = vperm.xlu1 %986, %v118_v36   ;;  %141 = vperm.xlu2 %987, %v115_v60   ;;  %v917_v0 = vld [vmem:[%s1283_s1 + $0x40] sm:$0xff]  ;;  %v671_v1 = vld [vmem:[%s1285_s0 + $0x8] sm:$0xf]  ;;  %v665_v6 = vld [vmem:[%s1285_s0 + $0x14] sm:$0xf0] }
  0x15   :  { %v116_v3 = vld [vmem:[%s1284_s2 + $0x28] sm:$0xff]  ;;  %v672_v4 = vor.u32 %v892_v2, %v671_v1  ;;  %v889_v5 = vld [vmem:[%s1285_s0 + $0x4] sm:$0xf]  ;;  %v699_v7 = vld [vmem:[%s1285_s0 + $0x38] sm:$0xf] }
  0x16   :  { %978 = vmatpush.bf16.msra.mxu1 %v911_v13  ;;  %979 = vmatpush.bf16.msra.mxu2 %v911_v13  ;;  %v668_v8 = vor.u32 %v889_v5, %v665_v6  ;;  %v898_v9 = vld [vmem:[%s1285_s0 + $0x48] sm:$0xf0]  ;;  %v900_v10 = vld [vmem:[%s1285_s0 + $0x5c] sm:$0xf]  ;;  %v713_v11 = vld [vmem:[%s1285_s0 + $0x6c] sm:$0xf0] }
  0x17   :  { %493 = vmatpush.bf16.msra.mxu0 %v911_v13  ;;  %580 = vmatpush.bf16.msra.mxu3 %v935_v15  ;;  %v700_v12 = vor.u32 %v898_v9, %v699_v7  ;;  %v716_v13 = vor.u32 %v900_v10, %v713_v11  ;;  %v691_v14 = vld [vmem:[%s1285_s0 + $0x30] sm:$0xf]  ;;  %v897_v15 = vld [vmem:[%s1285_s0 + $0x40] sm:$0xf0]  ;;  %v903_v21 = vld [vmem:[%s1285_s0 + $0x70] sm:$0xf0] }
  0x18   :  { %151 = vperm.xlu0 %985, %v117_v40   ;;  %v692_v16 = vor.u32 %v897_v15, %v691_v14  ;;  %v905_v22 = vld [vmem:[%s1285_s0 + $0x84] sm:$0xf]  ;;  %v733_v23 = vld [vmem:[%s1285_s0 + $0x94] sm:$0xf0]  ;;  %v705_v30 = vld [vmem:[%s1285_s0 + $0x64] sm:$0xf0] }
  0x19   :  { %v711_v26 = vld [vmem:[%s1285_s0 + $0x58] sm:$0xf]  ;;  %v739_v32 = vld [vmem:[%s1285_s0 + $0x88] sm:$0xf]  ;;  %v907_v36 = vld [vmem:[%s1285_s0 + $0x90] sm:$0xf0] }
  0x1a   :  { %980 = vmatpush.bf16.msra.mxu1 %v910_v17  ;;  %981 = vmatpush.bf16.msra.mxu2 %v910_v17 }
  0x1b   :  { %494 = vmatpush.bf16.msra.mxu0 %v910_v17  ;;  %581 = vmatpush.bf16.msra.mxu3 %v934_v18  ;;  %v894_v17 = vld [vmem:[%s1285_s0 + $0x2c] sm:$0xf]  ;;  %v685_v18 = vld [vmem:[%s1285_s0 + $0x3c] sm:$0xf0] }
  0x1c   :  { %146 = vperm.xlu2 %987, %v116_v3   ;;  %v688_v20 = vor.u32 %v894_v17, %v685_v18 }
  0x1e   :  { %982 = vmatpush.bf16.msra.mxu1 %v909_v19  ;;  %983 = vmatpush.bf16.msra.mxu2 %v909_v19 }
  0x1f   :  { %495 = vmatpush.bf16.msra.mxu0 %v909_v19  ;;  %582 = vmatpush.bf16.msra.mxu3 %v933_v27  ;;  %v719_v19 = vld [vmem:[%s1285_s0 + $0x60] sm:$0xf]  ;;  %v902_v27 = vld [vmem:[%s1285_s0 + $0x68] sm:$0xf0] }
  0x21   :  { %501 = vmatmul.bf16.vlgmr.msra.gmra.mxu1 %v684_v28  ;;  %511 = vmatmul.bf16.vlgmr.msra.gmra.mxu2 %v724_v29  ;;  %v712_v28 = vor.u32 %v902_v27, %v711_v26  ;;  %v899_v29 = vld [vmem:[%s1285_s0 + $0x54] sm:$0xf] }
  0x22   :  { %546 = vmatpush.bf16.msrb.mxu2 %v932_v24  ;;  %517 = vmatpush.bf16.msrb.mxu1 %v924_v25  ;;  %v720_v24 = vor.u32 %v903_v21, %v719_v19  ;;  %v736_v25 = vor.u32 %v905_v22, %v733_v23  ;;  %v708_v31 = vor.u32 %v899_v29, %v705_v30 }
  0x23   :  { %608 = vmatpush.bf16.msrb.mxu0 %v944_v33  ;;  %583 = vmatmul.bf16.vlgmr.msra.gmra.mxu3 %v676_v38  ;;  %v908_v33 = vld [vmem:[%s1285_s0 + $0x98] sm:$0xf0] }
  0x24   :  { %496 = vmatmul.bf16.vlgmr.msra.gmra.mxu0 %v664_v37  ;;  %v904_v38 = vld [vmem:[%s1285_s0 + $0x7c] sm:$0xf] }
  0x26   :  { %547 = vmatpush.bf16.msrb.mxu2 %v931_v34  ;;  %518 = vmatpush.bf16.msrb.mxu1 %v923_v35  ;;  %v740_v34 = vor.u32 %v908_v33, %v739_v32  ;;  %v731_v35 = vld [vmem:[%s1285_s0 + $0x80] sm:$0xf] }
  0x27   :  { %609 = vmatpush.bf16.msrb.mxu0 %v943_v39  ;;  %v732_v37 = vor.u32 %v907_v36, %v731_v35  ;;  %v725_v39 = vld [vmem:[%s1285_s0 + $0x8c] sm:$0xf0] }
  0x28   :  { %v728_v40 = vor.u32 %v904_v38, %v725_v39 }
  0x2a   :  { %548 = vmatpush.bf16.msrb.mxu2 %v930_v41  ;;  %519 = vmatpush.bf16.msrb.mxu1 %v922_v42 }
  0x2b   :  { %610 = vmatpush.bf16.msrb.mxu0 %v942_v43 }
  0x2e   :  { %549 = vmatpush.bf16.msrb.mxu2 %v929_v44  ;;  %520 = vmatpush.bf16.msrb.mxu1 %v921_v45 }
  0x2f   :  { %611 = vmatpush.bf16.msrb.mxu0 %v941_v48 }
  0x31   :  { %506 = vmatmul.bf16.gmra.mxu1 %v704_v52 }
  0x32   :  { %550 = vmatpush.bf16.msrb.mxu2 %v928_v49  ;;  %521 = vmatpush.bf16.msrb.mxu1 %v920_v50 }
  0x33   :  { %588 = vmatmul.bf16.gmra.mxu3 %v696_v59 }
  0x34   :  { %885 = vmatmul.msk.bf16.vlgmr.msrb.gmra.mxu0 %vm475_vm0, %v680_v58 }
  0x36   :  { %551 = vmatpush.bf16.msrb.mxu2 %v927_v56  ;;  %522 = vmatpush.bf16.msrb.mxu1 %v919_v57 }
  0x3a   :  { %552 = vmatpush.bf16.msrb.mxu2 %v926_v61  ;;  %523 = vmatpush.bf16.msrb.mxu1 %v918_v62 }
  0x3e   :  { %553 = vmatpush.bf16.msrb.mxu2 %v925_v63  ;;  %524 = vmatpush.bf16.msrb.mxu1 %v917_v0 }
  0x41   :  { %554 = vmatmul.bf16.vlgmr.msrb.gmra.mxu2 %v672_v4  ;;  %525 = vmatmul.bf16.vlgmr.msrb.gmra.mxu1 %v668_v8 }
  0x43   :  { %593 = vmatmul.bf16.gmra.mxu3 %v716_v13 }
  0x44   :  { %886 = vmatmul.msk.bf16.gmra.mxu0 %vm475_vm0, %v700_v12 }
  0x51   :  { %559 = vmatmul.bf16.gmra.mxu2 %v692_v16  ;;  %530 = vmatmul.bf16.gmra.mxu1 %v688_v20 }
  0x53   :  { %598 = vmatmul.bf16.gmra.mxu3 %v736_v25 }
  0x54   :  { %887 = vmatmul.msk.bf16.gmra.mxu0 %vm475_vm0, %v720_v24 }
  0x61   :  { %564 = vmatmul.bf16.gmra.mxu2 %v712_v28  ;;  %535 = vmatmul.bf16.gmra.mxu1 %v708_v31 }
  0x64   :  { %888 = vmatmul.msk.bf16.gmra.mxu0 %vm475_vm0, %v740_v34 }
  0x6e   :  { %v142_v22 = vpop.permute.xlu2 %141 }
  0x71   :  { %569 = vmatmul.bf16.gmra.mxu2 %v732_v37  ;;  %540 = vmatmul.bf16.gmra.mxu1 %v728_v40 }
  0x76   :  { %v132_v63 = vpop.permute.xlu1 %131  ;;  %v147_v37 = vpop.permute.xlu2 %146 }
  0x7a   :  { %v122_v51 = vpop.permute.xlu0 %121 }
  0x7e   :  { %v137_v14 = vpop.permute.xlu1 %136 }
  0x82   :  { %v127_v58 = vpop.permute.xlu0 %126 }
  0x9e   :  { %v502_v41 = vpop.f32.mrf.mxu1 }
  0x9f   :  { %v503_v7 = vadd.f32 %v502_v41, %v132_v63 }
  0xa1   :  { %v497_v42 = vpop.f32.mrf.mxu0 }
  0xa2   :  { %v498_v52 = vadd.f32 %v497_v42, %v122_v51  ;;  %v152_v51 = vpop.permute.xlu0 %151 }
  0xa4   :  { %v1265_v46 = vpop.f32.mrf.mxu2 }
  0xa6   :  { %v504_v43 = vpop.f32.mrf.mxu1  ;;  %v584_v47 = vpop.f32.mrf.mxu3 }
  0xa7   :  { %v505_v18 = vadd.f32 %v504_v43, %v137_v14 }
  0xa9   :  { %v499_v44 = vpop.f32.mrf.mxu0 }
  0xaa   :  { %v500_v60 = vadd.f32 %v499_v44, %v127_v58 }
  0xac   :  { %v1267_v50 = vpop.f32.mrf.mxu2 }
  0xae   :  { %v507_v45 = vpop.f32.mrf.mxu1  ;;  %v586_v54 = vpop.f32.mrf.mxu3 }
  0xaf   :  { %v508_v29 = vadd.f32 %v507_v45, %v142_v22 }
  0xb1   :  { %v613_v49 = vpop.f32.mrf.mxu0 }
  0xb6   :  { %v509_v48 = vpop.f32.mrf.mxu1  ;;  %v589_v2 = vpop.f32.mrf.mxu3 }
  0xb7   :  { %v510_v40 = vadd.f32 %v509_v48, %v147_v37  ;;  %v157_v48 = vpop.permute.xlu1 %156 }
  0xb9   :  { %v615_v57 = vpop.f32.mrf.mxu0 }
  0xbe   :  { %v526_v53 = vpop.f32.mrf.mxu1  ;;  %v591_v16 = vpop.f32.mrf.mxu3 }
  0xbf   :  { %v527_v55 = vadd.f32 %v526_v53, %v498_v52 }
  0xc1   :  { %v618_v4 = vpop.f32.mrf.mxu0 }
  0xc4   :  { %v555_v56 = vpop.f32.mrf.mxu2 }
  0xc5   :  { %v556_v59 = vadd.f32 %v555_v56, %v527_v55 }
  0xc6   :  { %v528_v61 = vpop.f32.mrf.mxu1  ;;  %v594_v28 = vpop.f32.mrf.mxu3 }
  0xc7   :  { %v529_v62 = vadd.f32 %v528_v61, %v500_v60  ;;  %v585_v0 = vadd.f32 %v584_v47, %v556_v59 }
  0xc9   :  { %v614_v5 = vadd.f32 %v613_v49, %v585_v0  ;;  %v620_v19 = vpop.f32.mrf.mxu0 }
  0xcb   :  { %v633_v10 = vmax.f32 %v614_v5, 0.0 }
  0xcc   :  { %v557_v1 = vpop.f32.mrf.mxu2 }
  0xcd   :  { %v558_v3 = vadd.f32 %v557_v1, %v529_v62  ;;  %v515_v1 = vadd.f32 %v1267_v50, %v157_v48 }
  0xce   :  { %v531_v9 = vpop.f32.mrf.mxu1  ;;  %v596_v42 = vpop.f32.mrf.mxu3 }
  0xcf   :  { %v587_v6 = vadd.f32 %v586_v54, %v558_v3  ;;  %v532_v12 = vadd.f32 %v531_v9, %v503_v7  ;;  %v513_v54 = vadd.f32 %v1265_v46, %v152_v51 }
  0xd1   :  { %v616_v8 = vadd.f32 %v615_v57, %v587_v6  ;;  %v623_v32 = vpop.f32.mrf.mxu0 }
  0xd3   :  { %v634_v11 = vmax.f32 %v616_v8, 0.0 }
  0xd4   :  { %v560_v13 = vpop.f32.mrf.mxu2 }
  0xd5   :  { %v948_v15 = vpack.c.bf16 %v634_v11, %v633_v10  ;;  %v561_v17 = vadd.f32 %v560_v13, %v532_v12 }
  0xd6   :  { %v533_v20 = vpop.f32.mrf.mxu1  ;;  %v599_v60 = vpop.f32.mrf.mxu3 }
  0xd7   :  { %949 = vst [vmem:[%s1286_s3] sm:$0xff] %v948_v15   ;;  %v534_v21 = vadd.f32 %v533_v20, %v505_v18  ;;  %v590_v23 = vadd.f32 %v589_v2, %v561_v17 }
  0xd9   :  { %v619_v26 = vadd.f32 %v618_v4, %v590_v23  ;;  %v625_v45 = vpop.f32.mrf.mxu0 }
  0xdb   :  { %v635_v33 = vmax.f32 %v619_v26, 0.0 }
  0xdc   :  { %v562_v24 = vpop.f32.mrf.mxu2 }
  0xdd   :  { %v563_v25 = vadd.f32 %v562_v24, %v534_v21 }
  0xde   :  { %v536_v31 = vpop.f32.mrf.mxu1  ;;  %v601_v6 = vpop.f32.mrf.mxu3 }
  0xdf   :  { %v592_v27 = vadd.f32 %v591_v16, %v563_v25  ;;  %v537_v35 = vadd.f32 %v536_v31, %v508_v29 }
  0xe1   :  { %v621_v30 = vadd.f32 %v620_v19, %v592_v27  ;;  %v628_v63 = vpop.f32.mrf.mxu0 }
  0xe3   :  { %v636_v34 = vmax.f32 %v621_v30, 0.0 }
  0xe4   :  { %v565_v36 = vpop.f32.mrf.mxu2 }
  0xe5   :  { %v953_v38 = vpack.c.bf16 %v636_v34, %v635_v33  ;;  %v566_v39 = vadd.f32 %v565_v36, %v537_v35 }
  0xe6   :  { %v538_v41 = vpop.f32.mrf.mxu1 }
  0xe7   :  { %965 = vst [vmem:[%s1286_s3 + $0x8] sm:$0xff] %v953_v38   ;;  %v539_v43 = vadd.f32 %v538_v41, %v510_v40  ;;  %v595_v44 = vadd.f32 %v594_v28, %v566_v39 }
  0xe9   :  { %v624_v52 = vadd.f32 %v623_v32, %v595_v44  ;;  %v630_v9 = vpop.f32.mrf.mxu0 }
  0xeb   :  { %v637_v57 = vmax.f32 %v624_v52, 0.0 }
  0xec   :  { %v567_v47 = vpop.f32.mrf.mxu2 }
  0xed   :  { %v568_v49 = vadd.f32 %v567_v47, %v539_v43 }
  0xee   :  { %v541_v56 = vpop.f32.mrf.mxu1 }
  0xef   :  { %v597_v53 = vadd.f32 %v596_v42, %v568_v49  ;;  %v542_v59 = vadd.f32 %v541_v56, %v513_v54 }
  0xf1   :  { %v626_v55 = vadd.f32 %v625_v45, %v597_v53 }
  0xf3   :  { %v638_v58 = vmax.f32 %v626_v55, 0.0 }
  0xf4   :  { %v570_v61 = vpop.f32.mrf.mxu2 }
  0xf5   :  { %v958_v62 = vpack.c.bf16 %v638_v58, %v637_v57  ;;  %v571_v0 = vadd.f32 %v570_v61, %v542_v59 }
  0xf6   :  { %v543_v2 = vpop.f32.mrf.mxu1 }
  0xf7   :  { %966 = vst [vmem:[%s1286_s3 + $0x10] sm:$0xff] %v958_v62   ;;  %v544_v3 = vadd.f32 %v543_v2, %v515_v1  ;;  %v600_v46 = vadd.f32 %v599_v60, %v571_v0 }
  0xf9   :  { %v629_v7 = vadd.f32 %v628_v63, %v600_v46 }
  0xfb   :  { %v639_v11 = vmax.f32 %v629_v7, 0.0 }
  0xfc   :  { %v572_v4 = vpop.f32.mrf.mxu2 }
  0xfd   :  { %v573_v5 = vadd.f32 %v572_v4, %v544_v3 }
  0xff   :  { %v602_v8 = vadd.f32 %v601_v6, %v573_v5 }
 0x101   :  { %v631_v10 = vadd.f32 %v630_v9, %v602_v8 }
 0x103   :  { %v640_v12 = vmax.f32 %v631_v10, 0.0 }
 0x105   :  { %v963_v13 = vpack.c.bf16 %v640_v12, %v639_v11 }
 0x107   :  { %967 = vst [vmem:[%s1286_s3 + $0x18] sm:$0xff] %v963_v13  }

// kernel: _cnn_forward.9
= control target key start
LH: loop header
LB: loop body
LE: loop exit
PB: predicated region body
PF: predicated region fallthrough
CT: control target
= control target key end

     0   :  { %vm342_vm0 = vcmask 39936   ;;  %s637_s1 = inlined_call_operand.vmem [shape: bf16[512,5], index: 1, kind: input, shape index: {}]   ;;  %s638_s2 = inlined_call_operand.vmem [shape: f32[1,5], index: 2, kind: input, shape index: {}]   ;;  %s639_s0 = inlined_call_operand.vmem [shape: bf16[8,512], index: 0, kind: input, shape index: {}]   ;;  %s640_s3 = inlined_call_operand.vmem [shape: f32[8,5], index: 3, kind: output, shape index: {}]  }
   0x1   :  { %v483_v0 = vld [vmem:[%s637_s1 + $0x38] sm:$0xff]  ;;  %v482_v4 = vld [vmem:[%s637_s1 + $0x30] sm:$0xff]  ;;  %v481_v8 = vld [vmem:[%s637_s1 + $0x28] sm:$0xff] }
   0x2   :  { %v491_v1 = vld [vmem:[%s637_s1 + $0x78] sm:$0xff]  ;;  %290 = vmatpush.bf16.msra.mxu0 %v483_v0  ;;  %v490_v5 = vld [vmem:[%s637_s1 + $0x70] sm:$0xff]  ;;  %v489_v9 = vld [vmem:[%s637_s1 + $0x68] sm:$0xff] }
   0x3   :  { %v499_v2 = vld [vmem:[%s637_s1 + $0xb8] sm:$0xff]  ;;  %303 = vmatpush.bf16.msra.mxu1 %v491_v1  ;;  %v498_v6 = vld [vmem:[%s637_s1 + $0xb0] sm:$0xff]  ;;  %v497_v10 = vld [vmem:[%s637_s1 + $0xa8] sm:$0xff] }
   0x4   :  { %v507_v3 = vld [vmem:[%s637_s1 + $0xf8] sm:$0xff]  ;;  %316 = vmatpush.bf16.msra.mxu2 %v499_v2  ;;  %v506_v7 = vld [vmem:[%s637_s1 + $0xf0] sm:$0xff]  ;;  %v505_v11 = vld [vmem:[%s637_s1 + $0xe8] sm:$0xff] }
   0x5   :  { %329 = vmatpush.bf16.msra.mxu3 %v507_v3  ;;  %v480_v12 = vld [vmem:[%s637_s1 + $0x20] sm:$0xff]  ;;  %v479_v16 = vld [vmem:[%s637_s1 + $0x18] sm:$0xff]  ;;  %v478_v20 = vld [vmem:[%s637_s1 + $0x10] sm:$0xff] }
   0x6   :  { %291 = vmatpush.bf16.msra.mxu0 %v482_v4  ;;  %v488_v13 = vld [vmem:[%s637_s1 + $0x60] sm:$0xff]  ;;  %v487_v17 = vld [vmem:[%s637_s1 + $0x58] sm:$0xff]  ;;  %v486_v21 = vld [vmem:[%s637_s1 + $0x50] sm:$0xff] }
   0x7   :  { %304 = vmatpush.bf16.msra.mxu1 %v490_v5  ;;  %v496_v14 = vld [vmem:[%s637_s1 + $0xa0] sm:$0xff]  ;;  %v495_v18 = vld [vmem:[%s637_s1 + $0x98] sm:$0xff]  ;;  %v494_v22 = vld [vmem:[%s637_s1 + $0x90] sm:$0xff] }
   0x8   :  { %317 = vmatpush.bf16.msra.mxu2 %v498_v6  ;;  %v504_v15 = vld [vmem:[%s637_s1 + $0xe0] sm:$0xff]  ;;  %v503_v19 = vld [vmem:[%s637_s1 + $0xd8] sm:$0xff]  ;;  %v502_v23 = vld [vmem:[%s637_s1 + $0xd0] sm:$0xff] }
   0x9   :  { %330 = vmatpush.bf16.msra.mxu3 %v506_v7  ;;  %v477_v24 = vld [vmem:[%s637_s1 + $0x8] sm:$0xff]  ;;  %v14_v26 = vld [vmem:[%s639_s0] sm:$0xff] }
   0xa   :  { %292 = vmatpush.bf16.msra.mxu0 %v481_v8  ;;  %v485_v25 = vld [vmem:[%s637_s1 + $0x48] sm:$0xff]  ;;  %v86_v30 = vunpack.c.l.b16 %v14_v26  ;;  %v87_v31 = vunpack.c.h.b16 %v14_v26  ;;  %v476_v32 = vld [vmem:[%s637_s1] sm:$0xff] }
   0xb   :  { %305 = vmatpush.bf16.msra.mxu1 %v489_v9  ;;  %v493_v27 = vld [vmem:[%s637_s1 + $0x88] sm:$0xff]  ;;  %v484_v33 = vld [vmem:[%s637_s1 + $0x40] sm:$0xff] }
   0xc   :  { %318 = vmatpush.bf16.msra.mxu2 %v497_v10  ;;  %v501_v28 = vld [vmem:[%s637_s1 + $0xc8] sm:$0xff]  ;;  %v492_v36 = vld [vmem:[%s637_s1 + $0x80] sm:$0xff]  ;;  %v90_v38 = vpack.c.b16 %v86_v30, %v86_v30  ;;  %v91_v39 = vpack.c.b16 %v87_v31, %v87_v31 }
   0xd   :  { %331 = vmatpush.bf16.msra.mxu3 %v505_v11  ;;  %v15_v29 = vld [vmem:[%s639_s0 + $0x8] sm:$0xff]  ;;  %v500_v37 = vld [vmem:[%s637_s1 + $0xc0] sm:$0xff] }
   0xe   :  { %293 = vmatpush.bf16.msra.mxu0 %v480_v12  ;;  %v88_v34 = vunpack.c.l.b16 %v15_v29  ;;  %v89_v35 = vunpack.c.h.b16 %v15_v29  ;;  %v508_v42 = vld [vmem:[%s638_s2] ss:$0 sm:$0xff] }
   0xf   :  { %306 = vmatpush.bf16.msra.mxu1 %v488_v13 }
  0x10   :  { %319 = vmatpush.bf16.msra.mxu2 %v496_v14  ;;  %v92_v40 = vpack.c.b16 %v88_v34, %v88_v34  ;;  %v93_v41 = vpack.c.b16 %v89_v35, %v89_v35 }
  0x11   :  { %332 = vmatpush.bf16.msra.mxu3 %v504_v15 }
  0x12   :  { %294 = vmatpush.bf16.msra.mxu0 %v479_v16 }
  0x13   :  { %307 = vmatpush.bf16.msra.mxu1 %v487_v17 }
  0x14   :  { %320 = vmatpush.bf16.msra.mxu2 %v495_v18 }
  0x15   :  { %333 = vmatpush.bf16.msra.mxu3 %v503_v19 }
  0x16   :  { %295 = vmatpush.bf16.msra.mxu0 %v478_v20 }
  0x17   :  { %308 = vmatpush.bf16.msra.mxu1 %v486_v21 }
  0x18   :  { %321 = vmatpush.bf16.msra.mxu2 %v494_v22 }
  0x19   :  { %334 = vmatpush.bf16.msra.mxu3 %v502_v23 }
  0x1a   :  { %296 = vmatpush.bf16.msra.mxu0 %v477_v24 }
  0x1b   :  { %309 = vmatpush.bf16.msra.mxu1 %v485_v25 }
  0x1c   :  { %322 = vmatpush.bf16.msra.mxu2 %v493_v27 }
  0x1d   :  { %335 = vmatpush.bf16.msra.mxu3 %v501_v28 }
  0x1e   :  { %297 = vmatpush.bf16.msra.mxu0 %v476_v32 }
  0x1f   :  { %310 = vmatpush.bf16.msra.mxu1 %v484_v33 }
  0x20   :  { %323 = vmatpush.bf16.msra.mxu2 %v492_v36 }
  0x21   :  { %336 = vmatpush.bf16.msra.mxu3 %v500_v37  ;;  %298 = vmatmul.bf16.vlgmr.msra.gmra.mxu0 %v90_v38 }
  0x22   :  { %311 = vmatmul.bf16.vlgmr.msra.gmra.mxu1 %v91_v39 }
  0x23   :  { %324 = vmatmul.bf16.vlgmr.msra.gmra.mxu2 %v92_v40 }
  0x24   :  { %337 = vmatmul.bf16.vlgmr.msra.gmra.mxu3 %v93_v41 }
  0x9e   :  { %v299_v43 = vpop.f32.mrf.mxu0 }
  0x9f   :  { %v312_v44 = vpop.f32.mrf.mxu1  ;;  %v300_v45 = vadd.f32 %v508_v42, %v299_v43 }
  0xa1   :  { %v313_v46 = vadd.f32 %v312_v44, %v300_v45 }
  0xa6   :  { %v325_v47 = vpop.f32.mrf.mxu2  ;;  %v301_v50 = vpop.f32.mrf.mxu0 }
  0xa7   :  { %v338_v48 = vpop.f32.mrf.mxu3  ;;  %v326_v49 = vadd.f32 %v325_v47, %v313_v46  ;;  %v314_v51 = vpop.f32.mrf.mxu1 }
  0xa9   :  { %v339_v52 = vadd.f32 %v338_v48, %v326_v49 }
  0xab   :  { %343 = vst.msk [vmem:[%s640_s3] sm:$0xff] %vm342_vm0, %v339_v52 }
  0xae   :  { %v327_v53 = vpop.f32.mrf.mxu2 }
  0xaf   :  { %v340_v54 = vpop.f32.mrf.mxu3 }

// kernel: _cnn_forward.8
= control target key start
LH: loop header
LB: loop body
LE: loop exit
PB: predicated region body
PF: predicated region fallthrough
CT: control target
= control target key end

     0   :  { %vm4829_vm0 = vcmask 523264   ;;  %s15076_s1 = inlined_call_operand.vmem [shape: bf16[3136,512], index: 1, kind: input, shape index: {}]   ;;  %s15077_s0 = inlined_call_operand.vmem [shape: bf16[8,3136], index: 0, kind: input, shape index: {}]   ;;  %s15078_s2 = inlined_call_operand.vmem [shape: f32[1,512], index: 2, kind: input, shape index: {}]   ;;  %s15079_s3 = inlined_call_operand.vmem [shape: bf16[8,512], index: 3, kind: output, shape index: {}]  }
   0x1   :  { %v6259_v0 = vld [vmem:[%s15076_s1 + $0xe0] sm:$0xf]  ;;  %v9315_v1 = vld [vmem:[%s15076_s1 + $0xec] sm:$0xf0] }
   0x2   :  { %v6387_v2 = vld [vmem:[%s15076_s1 + $0x1e0] sm:$0xf]  ;;  %v6260_v3 = vor.u32 %v9315_v1, %v6259_v0  ;;  %v9347_v4 = vld [vmem:[%s15076_s1 + $0x1ec] sm:$0xf0] }
   0x3   :  { %v6515_v5 = vld [vmem:[%s15076_s1 + $0x2e0] sm:$0xf]  ;;  %v9379_v6 = vld [vmem:[%s15076_s1 + $0x2ec] sm:$0xf0]  ;;  %v6388_v7 = vor.u32 %v9347_v4, %v6387_v2 }
   0x4   :  { %v6516_v8 = vor.u32 %v9379_v6, %v6515_v5  ;;  %v6643_v9 = vld [vmem:[%s15076_s1 + $0x3e0] sm:$0xf]  ;;  %v9411_v10 = vld [vmem:[%s15076_s1 + $0x3ec] sm:$0xf0]  ;;  %4833 = vmatpush.bf16.msra.mxu0 %v6260_v3 }
   0x5   :  { %v6243_v11 = vld [vmem:[%s15076_s1 + $0xc0] sm:$0xf]  ;;  %v6644_v12 = vor.u32 %v9411_v10, %v6643_v9  ;;  %v9311_v13 = vld [vmem:[%s15076_s1 + $0xcc] sm:$0xf0]  ;;  %4846 = vmatpush.bf16.msra.mxu1 %v6388_v7 }
   0x6   :  { %v6371_v14 = vld [vmem:[%s15076_s1 + $0x1c0] sm:$0xf]  ;;  %v9343_v15 = vld [vmem:[%s15076_s1 + $0x1cc] sm:$0xf0]  ;;  %4859 = vmatpush.bf16.msra.mxu2 %v6516_v8  ;;  %v6244_v16 = vor.u32 %v9311_v13, %v6243_v11 }
   0x7   :  { %v6372_v17 = vor.u32 %v9343_v15, %v6371_v14  ;;  %v6499_v18 = vld [vmem:[%s15076_s1 + $0x2c0] sm:$0xf]  ;;  %v9375_v19 = vld [vmem:[%s15076_s1 + $0x2cc] sm:$0xf0]  ;;  %4872 = vmatpush.bf16.msra.mxu3 %v6644_v12 }
   0x8   :  { %v6627_v20 = vld [vmem:[%s15076_s1 + $0x3c0] sm:$0xf]  ;;  %v6500_v21 = vor.u32 %v9375_v19, %v6499_v18  ;;  %v9407_v22 = vld [vmem:[%s15076_s1 + $0x3cc] sm:$0xf0]  ;;  %4834 = vmatpush.bf16.msra.mxu0 %v6244_v16 }
   0x9   :  { %v6227_v23 = vld [vmem:[%s15076_s1 + $0xa0] sm:$0xf]  ;;  %v9307_v24 = vld [vmem:[%s15076_s1 + $0xac] sm:$0xf0]  ;;  %v6628_v25 = vor.u32 %v9407_v22, %v6627_v20  ;;  %4847 = vmatpush.bf16.msra.mxu1 %v6372_v17 }
   0xa   :  { %v6355_v26 = vld [vmem:[%s15076_s1 + $0x1a0] sm:$0xf]  ;;  %v9339_v27 = vld [vmem:[%s15076_s1 + $0x1ac] sm:$0xf0]  ;;  %v6228_v29 = vor.u32 %v9307_v24, %v6227_v23  ;;  %4860 = vmatpush.bf16.msra.mxu2 %v6500_v21 }
   0xb   :  { %v6483_v28 = vld [vmem:[%s15076_s1 + $0x2a0] sm:$0xf]  ;;  %v9371_v30 = vld [vmem:[%s15076_s1 + $0x2ac] sm:$0xf0]  ;;  %v6356_v33 = vor.u32 %v9339_v27, %v6355_v26  ;;  %4873 = vmatpush.bf16.msra.mxu3 %v6628_v25 }
   0xc   :  { %v6611_v31 = vld [vmem:[%s15076_s1 + $0x3a0] sm:$0xf]  ;;  %v9403_v32 = vld [vmem:[%s15076_s1 + $0x3ac] sm:$0xf0]  ;;  %v6484_v34 = vor.u32 %v9371_v30, %v6483_v28  ;;  %4835 = vmatpush.bf16.msra.mxu0 %v6228_v29 }
   0xd   :  { %v6211_v35 = vld [vmem:[%s15076_s1 + $0x80] sm:$0xf]  ;;  %v9303_v36 = vld [vmem:[%s15076_s1 + $0x8c] sm:$0xf0]  ;;  %v6612_v38 = vor.u32 %v9403_v32, %v6611_v31  ;;  %4848 = vmatpush.bf16.msra.mxu1 %v6356_v33 }
   0xe   :  { %v6339_v37 = vld [vmem:[%s15076_s1 + $0x180] sm:$0xf]  ;;  %v9335_v39 = vld [vmem:[%s15076_s1 + $0x18c] sm:$0xf0]  ;;  %v6212_v44 = vor.u32 %v9303_v36, %v6211_v35  ;;  %4861 = vmatpush.bf16.msra.mxu2 %v6484_v34 }
   0xf   :  { %v6467_v40 = vld [vmem:[%s15076_s1 + $0x280] sm:$0xf]  ;;  %v9367_v41 = vld [vmem:[%s15076_s1 + $0x28c] sm:$0xf0]  ;;  %v6340_v45 = vor.u32 %v9335_v39, %v6339_v37  ;;  %4874 = vmatpush.bf16.msra.mxu3 %v6612_v38 }
  0x10   :  { %v6595_v42 = vld [vmem:[%s15076_s1 + $0x380] sm:$0xf]  ;;  %v9399_v43 = vld [vmem:[%s15076_s1 + $0x38c] sm:$0xf0]  ;;  %v6468_v46 = vor.u32 %v9367_v41, %v6467_v40  ;;  %4836 = vmatpush.bf16.msra.mxu0 %v6212_v44 }
  0x11   :  { %v6195_v47 = vld [vmem:[%s15076_s1 + $0x60] sm:$0xf]  ;;  %v9299_v48 = vld [vmem:[%s15076_s1 + $0x6c] sm:$0xf0]  ;;  %v6596_v50 = vor.u32 %v9399_v43, %v6595_v42  ;;  %4849 = vmatpush.bf16.msra.mxu1 %v6340_v45 }
  0x12   :  { %v6323_v49 = vld [vmem:[%s15076_s1 + $0x160] sm:$0xf]  ;;  %v9331_v51 = vld [vmem:[%s15076_s1 + $0x16c] sm:$0xf0]  ;;  %v6196_v56 = vor.u32 %v9299_v48, %v6195_v47  ;;  %4862 = vmatpush.bf16.msra.mxu2 %v6468_v46 }
  0x13   :  { %v6451_v52 = vld [vmem:[%s15076_s1 + $0x260] sm:$0xf]  ;;  %v9363_v53 = vld [vmem:[%s15076_s1 + $0x26c] sm:$0xf0]  ;;  %v6324_v57 = vor.u32 %v9331_v51, %v6323_v49  ;;  %4875 = vmatpush.bf16.msra.mxu3 %v6596_v50 }
  0x14   :  { %v6579_v54 = vld [vmem:[%s15076_s1 + $0x360] sm:$0xf]  ;;  %v9395_v55 = vld [vmem:[%s15076_s1 + $0x36c] sm:$0xf0]  ;;  %v6452_v58 = vor.u32 %v9363_v53, %v6451_v52  ;;  %4837 = vmatpush.bf16.msra.mxu0 %v6196_v56 }
  0x15   :  { %v6179_v59 = vld [vmem:[%s15076_s1 + $0x40] sm:$0xf]  ;;  %v9295_v60 = vld [vmem:[%s15076_s1 + $0x4c] sm:$0xf0]  ;;  %v6580_v62 = vor.u32 %v9395_v55, %v6579_v54  ;;  %4850 = vmatpush.bf16.msra.mxu1 %v6324_v57 }
  0x16   :  { %v6307_v61 = vld [vmem:[%s15076_s1 + $0x140] sm:$0xf]  ;;  %v9327_v63 = vld [vmem:[%s15076_s1 + $0x14c] sm:$0xf0]  ;;  %v6180_v4 = vor.u32 %v9295_v60, %v6179_v59  ;;  %4863 = vmatpush.bf16.msra.mxu2 %v6452_v58  ;;  %v16_v58 = vld [vmem:[%s15077_s0 + $0x8] sm:$0xff] }
  0x17   :  { %v6435_v0 = vld [vmem:[%s15076_s1 + $0x240] sm:$0xf]  ;;  %v9359_v1 = vld [vmem:[%s15076_s1 + $0x24c] sm:$0xf0]  ;;  %v6308_v5 = vor.u32 %v9327_v63, %v6307_v61  ;;  %4876 = vmatpush.bf16.msra.mxu3 %v6580_v62  ;;  %v837_v63 = vunpack.c.l.b16 %v16_v58 }
  0x18   :  { %v6563_v2 = vld [vmem:[%s15076_s1 + $0x340] sm:$0xf]  ;;  %v9391_v3 = vld [vmem:[%s15076_s1 + $0x34c] sm:$0xf0]  ;;  %v6436_v6 = vor.u32 %v9359_v1, %v6435_v0  ;;  %4838 = vmatpush.bf16.msra.mxu0 %v6180_v4  ;;  %v838_v0 = vunpack.c.h.b16 %v16_v58 }
  0x19   :  { %v6163_v7 = vld [vmem:[%s15076_s1 + $0x20] sm:$0xf]  ;;  %v9291_v8 = vld [vmem:[%s15076_s1 + $0x2c] sm:$0xf0]  ;;  %v6564_v10 = vor.u32 %v9391_v3, %v6563_v2  ;;  %4851 = vmatpush.bf16.msra.mxu1 %v6308_v5  ;;  %v10359_v4 = vpack.c.b16 %v837_v63, %v837_v63 }
  0x1a   :  { %v6291_v9 = vld [vmem:[%s15076_s1 + $0x120] sm:$0xf]  ;;  %v9323_v11 = vld [vmem:[%s15076_s1 + $0x12c] sm:$0xf0]  ;;  %v6164_v16 = vor.u32 %v9291_v8, %v6163_v7  ;;  %4864 = vmatpush.bf16.msra.mxu2 %v6436_v6  ;;  %v10364_v6 = vpack.c.b16 %v838_v0, %v838_v0 }
  0x1b   :  { %v6419_v12 = vld [vmem:[%s15076_s1 + $0x220] sm:$0xf]  ;;  %v9355_v13 = vld [vmem:[%s15076_s1 + $0x22c] sm:$0xf0]  ;;  %v6292_v19 = vor.u32 %v9323_v11, %v6291_v9  ;;  %4877 = vmatpush.bf16.msra.mxu3 %v6564_v10 }
  0x1c   :  { %v6547_v14 = vld [vmem:[%s15076_s1 + $0x320] sm:$0xf]  ;;  %v9387_v15 = vld [vmem:[%s15076_s1 + $0x32c] sm:$0xf0]  ;;  %v6420_v20 = vor.u32 %v9355_v13, %v6419_v12  ;;  %4839 = vmatpush.bf16.msra.mxu0 %v6164_v16 }
  0x1d   :  { %v6147_v17 = vld [vmem:[%s15076_s1] sm:$0xf]  ;;  %v9287_v18 = vld [vmem:[%s15076_s1 + $0xc] sm:$0xf0]  ;;  %v6548_v24 = vor.u32 %v9387_v15, %v6547_v14  ;;  %4852 = vmatpush.bf16.msra.mxu1 %v6292_v19 }
  0x1e   :  { %v6275_v21 = vld [vmem:[%s15076_s1 + $0x100] sm:$0xf]  ;;  %v9319_v22 = vld [vmem:[%s15076_s1 + $0x10c] sm:$0xf0]  ;;  %v6148_v31 = vor.u32 %v9287_v18, %v6147_v17  ;;  %4865 = vmatpush.bf16.msra.mxu2 %v6420_v20 }
  0x1f   :  { %v6403_v23 = vld [vmem:[%s15076_s1 + $0x200] sm:$0xf]  ;;  %v9351_v25 = vld [vmem:[%s15076_s1 + $0x20c] sm:$0xf0]  ;;  %v6276_v35 = vor.u32 %v9319_v22, %v6275_v21  ;;  %4878 = vmatpush.bf16.msra.mxu3 %v6548_v24 }
  0x20   :  { %v6531_v26 = vld [vmem:[%s15076_s1 + $0x300] sm:$0xf]  ;;  %v9383_v27 = vld [vmem:[%s15076_s1 + $0x30c] sm:$0xf0]  ;;  %v6404_v36 = vor.u32 %v9351_v25, %v6403_v23  ;;  %4840 = vmatpush.bf16.msra.mxu0 %v6148_v31 }
  0x21   :  { %v6771_v28 = vld [vmem:[%s15076_s1 + $0x4e0] sm:$0xf]  ;;  %v9443_v29 = vld [vmem:[%s15076_s1 + $0x4ec] sm:$0xf0]  ;;  %v6532_v39 = vor.u32 %v9383_v27, %v6531_v26  ;;  %4853 = vmatpush.bf16.msra.mxu1 %v6276_v35 }
  0x22   :  { %v6899_v30 = vld [vmem:[%s15076_s1 + $0x5e0] sm:$0xf]  ;;  %v9475_v32 = vld [vmem:[%s15076_s1 + $0x5ec] sm:$0xf0]  ;;  %v6772_v40 = vor.u32 %v9443_v29, %v6771_v28  ;;  %4866 = vmatpush.bf16.msra.mxu2 %v6404_v36 }
  0x23   :  { %v7027_v33 = vld [vmem:[%s15076_s1 + $0x6e0] sm:$0xf]  ;;  %v9507_v34 = vld [vmem:[%s15076_s1 + $0x6ec] sm:$0xf0]  ;;  %v6900_v41 = vor.u32 %v9475_v32, %v6899_v30  ;;  %4879 = vmatpush.bf16.msra.mxu3 %v6532_v39 }
  0x24   :  { %v7155_v37 = vld [vmem:[%s15076_s1 + $0x7e0] sm:$0xf]  ;;  %v9539_v38 = vld [vmem:[%s15076_s1 + $0x7ec] sm:$0xf0]  ;;  %v7028_v42 = vor.u32 %v9507_v34, %v7027_v33  ;;  %4885 = vmatpush.bf16.msrb.mxu0 %v6772_v40 }
  0x25   :  { %v6755_v43 = vld [vmem:[%s15076_s1 + $0x4c0] sm:$0xf]  ;;  %v9439_v44 = vld [vmem:[%s15076_s1 + $0x4cc] sm:$0xf0]  ;;  %v7156_v46 = vor.u32 %v9539_v38, %v7155_v37  ;;  %4898 = vmatpush.bf16.msrb.mxu1 %v6900_v41  ;;  %4867 = vmatmul.bf16.vlgmr.msra.gmra.mxu2 %v10359_v4 }
  0x26   :  { %v6883_v45 = vld [vmem:[%s15076_s1 + $0x5c0] sm:$0xf]  ;;  %v9471_v47 = vld [vmem:[%s15076_s1 + $0x5cc] sm:$0xf0]  ;;  %v6756_v52 = vor.u32 %v9439_v44, %v6755_v43  ;;  %4911 = vmatpush.bf16.msrb.mxu2 %v7028_v42  ;;  %4880 = vmatmul.bf16.vlgmr.msra.gmra.mxu3 %v10364_v6 }
  0x27   :  { %v7011_v48 = vld [vmem:[%s15076_s1 + $0x6c0] sm:$0xf]  ;;  %v9503_v49 = vld [vmem:[%s15076_s1 + $0x6cc] sm:$0xf0]  ;;  %v6884_v54 = vor.u32 %v9471_v47, %v6883_v45  ;;  %4924 = vmatpush.bf16.msrb.mxu3 %v7156_v46 }
  0x28   :  { %v7139_v50 = vld [vmem:[%s15076_s1 + $0x7c0] sm:$0xf]  ;;  %v9535_v51 = vld [vmem:[%s15076_s1 + $0x7cc] sm:$0xf0]  ;;  %v7012_v55 = vor.u32 %v9503_v49, %v7011_v48  ;;  %4886 = vmatpush.bf16.msrb.mxu0 %v6756_v52 }
  0x29   :  { %v6739_v53 = vld [vmem:[%s15076_s1 + $0x4a0] sm:$0xf]  ;;  %v9435_v56 = vld [vmem:[%s15076_s1 + $0x4ac] sm:$0xf0]  ;;  %v7140_v59 = vor.u32 %v9535_v51, %v7139_v50  ;;  %4899 = vmatpush.bf16.msrb.mxu1 %v6884_v54 }
  0x2a   :  { %v6867_v57 = vld [vmem:[%s15076_s1 + $0x5a0] sm:$0xf]  ;;  %v9467_v60 = vld [vmem:[%s15076_s1 + $0x5ac] sm:$0xf0]  ;;  %v6740_v3 = vor.u32 %v9435_v56, %v6739_v53  ;;  %4912 = vmatpush.bf16.msrb.mxu2 %v7012_v55 }
  0x2b   :  { %v6995_v61 = vld [vmem:[%s15076_s1 + $0x6a0] sm:$0xf]  ;;  %v9499_v62 = vld [vmem:[%s15076_s1 + $0x6ac] sm:$0xf0]  ;;  %v6868_v7 = vor.u32 %v9467_v60, %v6867_v57  ;;  %4925 = vmatpush.bf16.msrb.mxu3 %v7140_v59 }
  0x2c   :  { %v7123_v1 = vld [vmem:[%s15076_s1 + $0x7a0] sm:$0xf]  ;;  %v9531_v2 = vld [vmem:[%s15076_s1 + $0x7ac] sm:$0xf0]  ;;  %v6996_v8 = vor.u32 %v9499_v62, %v6995_v61  ;;  %4887 = vmatpush.bf16.msrb.mxu0 %v6740_v3  ;;  %v18_v3 = vld [vmem:[%s15077_s0 + $0x18] sm:$0xff] }
  0x2d   :  { %v15_v5 = vld [vmem:[%s15077_s0] sm:$0xff]  ;;  %v9431_v10 = vld [vmem:[%s15076_s1 + $0x48c] sm:$0xf0]  ;;  %v7124_v14 = vor.u32 %v9531_v2, %v7123_v1  ;;  %4900 = vmatpush.bf16.msrb.mxu1 %v6868_v7 }
  0x2e   :  { %v6723_v9 = vld [vmem:[%s15076_s1 + $0x480] sm:$0xf]  ;;  %v835_v12 = vunpack.c.l.b16 %v15_v5  ;;  %v836_v13 = vunpack.c.h.b16 %v15_v5  ;;  %v9463_v15 = vld [vmem:[%s15076_s1 + $0x58c] sm:$0xf0]  ;;  %4913 = vmatpush.bf16.msrb.mxu2 %v6996_v8 }
  0x2f   :  { %v6851_v11 = vld [vmem:[%s15076_s1 + $0x580] sm:$0xf]  ;;  %v9495_v17 = vld [vmem:[%s15076_s1 + $0x68c] sm:$0xf0]  ;;  %v6724_v22 = vor.u32 %v9431_v10, %v6723_v9  ;;  %4926 = vmatpush.bf16.msrb.mxu3 %v7124_v14 }
  0x30   :  { %v6979_v16 = vld [vmem:[%s15076_s1 + $0x680] sm:$0xf]  ;;  %v9527_v19 = vld [vmem:[%s15076_s1 + $0x78c] sm:$0xf0]  ;;  %v10391_v20 = vpack.c.b16 %v835_v12, %v835_v12  ;;  %v10394_v21 = vpack.c.b16 %v836_v13, %v836_v13  ;;  %v6852_v23 = vor.u32 %v9463_v15, %v6851_v11 }
  0x31   :  { %v7107_v18 = vld [vmem:[%s15076_s1 + $0x780] sm:$0xf]  ;;  %v6980_v24 = vor.u32 %v9495_v17, %v6979_v16  ;;  %v9427_v26 = vld [vmem:[%s15076_s1 + $0x46c] sm:$0xf0]  ;;  %4888 = vmatpush.bf16.msrb.mxu0 %v6724_v22  ;;  %v841_v17 = vunpack.c.l.b16 %v18_v3 }
  0x32   :  { %v6707_v25 = vld [vmem:[%s15076_s1 + $0x460] sm:$0xf]  ;;  %v7108_v28 = vor.u32 %v9527_v19, %v7107_v18  ;;  %v9459_v29 = vld [vmem:[%s15076_s1 + $0x56c] sm:$0xf0]  ;;  %4841 = vmatmul.bf16.vlgmr.msra.gmra.mxu0 %v10391_v20  ;;  %4854 = vmatmul.bf16.vlgmr.msra.gmra.mxu1 %v10394_v21 }
  0x33   :  { %v6835_v27 = vld [vmem:[%s15076_s1 + $0x560] sm:$0xf]  ;;  %v9491_v31 = vld [vmem:[%s15076_s1 + $0x66c] sm:$0xf0]  ;;  %v6708_v34 = vor.u32 %v9427_v26, %v6707_v25  ;;  %4901 = vmatpush.bf16.msrb.mxu1 %v6852_v23  ;;  %4914 = vmatpush.bf16.msrb.mxu2 %v6980_v24  ;;  %v842_v25 = vunpack.c.h.b16 %v18_v3 }
  0x34   :  { %v6963_v30 = vld [vmem:[%s15076_s1 + $0x660] sm:$0xf]  ;;  %v9523_v33 = vld [vmem:[%s15076_s1 + $0x76c] sm:$0xf0]  ;;  %v6836_v35 = vor.u32 %v9459_v29, %v6835_v27  ;;  %4927 = vmatpush.bf16.msrb.mxu3 %v7108_v28 }
  0x35   :  { %v7091_v32 = vld [vmem:[%s15076_s1 + $0x760] sm:$0xf]  ;;  %v6964_v36 = vor.u32 %v9491_v31, %v6963_v30  ;;  %v9423_v38 = vld [vmem:[%s15076_s1 + $0x44c] sm:$0xf0]  ;;  %4889 = vmatpush.bf16.msrb.mxu0 %v6708_v34 }
  0x36   :  { %v6691_v37 = vld [vmem:[%s15076_s1 + $0x440] sm:$0xf]  ;;  %v7092_v40 = vor.u32 %v9523_v33, %v7091_v32  ;;  %v9455_v41 = vld [vmem:[%s15076_s1 + $0x54c] sm:$0xf0] }
  0x37   :  { %v6819_v39 = vld [vmem:[%s15076_s1 + $0x540] sm:$0xf]  ;;  %v9487_v43 = vld [vmem:[%s15076_s1 + $0x64c] sm:$0xf0]  ;;  %v6692_v46 = vor.u32 %v9423_v38, %v6691_v37  ;;  %4902 = vmatpush.bf16.msrb.mxu1 %v6836_v35  ;;  %4915 = vmatpush.bf16.msrb.mxu2 %v6964_v36  ;;  %v10542_v38 = vpack.c.b16 %v841_v17, %v841_v17 }
  0x38   :  { %v6947_v42 = vld [vmem:[%s15076_s1 + $0x640] sm:$0xf]  ;;  %v9519_v45 = vld [vmem:[%s15076_s1 + $0x74c] sm:$0xf0]  ;;  %v6820_v47 = vor.u32 %v9455_v41, %v6819_v39  ;;  %4928 = vmatpush.bf16.msrb.mxu3 %v7092_v40 }
  0x39   :  { %v7075_v44 = vld [vmem:[%s15076_s1 + $0x740] sm:$0xf]  ;;  %v6948_v48 = vor.u32 %v9487_v43, %v6947_v42  ;;  %v9419_v50 = vld [vmem:[%s15076_s1 + $0x42c] sm:$0xf0]  ;;  %4890 = vmatpush.bf16.msrb.mxu0 %v6692_v46  ;;  %v10552_v42 = vpack.c.b16 %v842_v25, %v842_v25 }
  0x3a   :  { %v6675_v49 = vld [vmem:[%s15076_s1 + $0x420] sm:$0xf]  ;;  %v7076_v52 = vor.u32 %v9519_v45, %v7075_v44  ;;  %v9451_v53 = vld [vmem:[%s15076_s1 + $0x52c] sm:$0xf0] }
  0x3b   :  { %v6803_v51 = vld [vmem:[%s15076_s1 + $0x520] sm:$0xf]  ;;  %v9483_v55 = vld [vmem:[%s15076_s1 + $0x62c] sm:$0xf0]  ;;  %v6676_v59 = vor.u32 %v9419_v50, %v6675_v49  ;;  %4903 = vmatpush.bf16.msrb.mxu1 %v6820_v47  ;;  %4916 = vmatpush.bf16.msrb.mxu2 %v6948_v48 }
  0x3c   :  { %v6931_v54 = vld [vmem:[%s15076_s1 + $0x620] sm:$0xf]  ;;  %v9515_v57 = vld [vmem:[%s15076_s1 + $0x72c] sm:$0xf0]  ;;  %v6804_v63 = vor.u32 %v9451_v53, %v6803_v51  ;;  %4929 = vmatpush.bf16.msrb.mxu3 %v7076_v52 }
  0x3d   :  { %v7059_v56 = vld [vmem:[%s15076_s1 + $0x720] sm:$0xf]  ;;  %v9415_v60 = vld [vmem:[%s15076_s1 + $0x40c] sm:$0xf0]  ;;  %v6932_v0 = vor.u32 %v9483_v55, %v6931_v54  ;;  %4891 = vmatpush.bf16.msrb.mxu0 %v6676_v59 }
  0x3e   :  { %v6659_v58 = vld [vmem:[%s15076_s1 + $0x400] sm:$0xf]  ;;  %v9447_v62 = vld [vmem:[%s15076_s1 + $0x50c] sm:$0xf0]  ;;  %v7060_v5 = vor.u32 %v9515_v57, %v7059_v56 }
  0x3f   :  { %v6787_v61 = vld [vmem:[%s15076_s1 + $0x500] sm:$0xf]  ;;  %v9479_v2 = vld [vmem:[%s15076_s1 + $0x60c] sm:$0xf0]  ;;  %v6660_v13 = vor.u32 %v9415_v60, %v6659_v58  ;;  %4904 = vmatpush.bf16.msrb.mxu1 %v6804_v63  ;;  %4917 = vmatpush.bf16.msrb.mxu2 %v6932_v0 }
  0x40   :  { %v6915_v1 = vld [vmem:[%s15076_s1 + $0x600] sm:$0xf]  ;;  %v9511_v8 = vld [vmem:[%s15076_s1 + $0x70c] sm:$0xf0]  ;;  %v6788_v18 = vor.u32 %v9447_v62, %v6787_v61  ;;  %4930 = vmatpush.bf16.msrb.mxu3 %v7060_v5 }
  0x41   :  { %v7043_v7 = vld [vmem:[%s15076_s1 + $0x700] sm:$0xf]  ;;  %v17_v9 = vld [vmem:[%s15077_s0 + $0x10] sm:$0xff]  ;;  %v6916_v19 = vor.u32 %v9479_v2, %v6915_v1  ;;  %4892 = vmatpush.bf16.msrb.mxu0 %v6660_v13 }
  0x42   :  { %v7283_v10 = vld [vmem:[%s15076_s1 + $0x8e0] sm:$0xf]  ;;  %v9571_v11 = vld [vmem:[%s15076_s1 + $0x8ec] sm:$0xf0]  ;;  %v839_v24 = vunpack.c.l.b16 %v17_v9  ;;  %v7044_v26 = vor.u32 %v9511_v8, %v7043_v7  ;;  %v840_v28 = vunpack.c.h.b16 %v17_v9 }
  0x43   :  { %v7411_v12 = vld [vmem:[%s15076_s1 + $0x9e0] sm:$0xf]  ;;  %v9603_v14 = vld [vmem:[%s15076_s1 + $0x9ec] sm:$0xf0]  ;;  %v7284_v27 = vor.u32 %v9571_v11, %v7283_v10  ;;  %4905 = vmatpush.bf16.msrb.mxu1 %v6788_v18  ;;  %4918 = vmatpush.bf16.msrb.mxu2 %v6916_v19 }
  0x44   :  { %v7539_v15 = vld [vmem:[%s15076_s1 + $0xae0] sm:$0xf]  ;;  %v9635_v16 = vld [vmem:[%s15076_s1 + $0xaec] sm:$0xf0]  ;;  %v7412_v29 = vor.u32 %v9603_v14, %v7411_v12  ;;  %v10550_v41 = vpack.c.b16 %v839_v24, %v839_v24  ;;  %4931 = vmatpush.bf16.msrb.mxu3 %v7044_v26  ;;  %v10554_v44 = vpack.c.b16 %v840_v28, %v840_v28 }
  0x45   :  { %v7667_v22 = vld [vmem:[%s15076_s1 + $0xbe0] sm:$0xf]  ;;  %v9667_v23 = vld [vmem:[%s15076_s1 + $0xbec] sm:$0xf0]  ;;  %v7540_v30 = vor.u32 %v9635_v16, %v7539_v15  ;;  %4937 = vmatpush.bf16.msra.mxu0 %v7284_v27 }
  0x46   :  { %v7267_v31 = vld [vmem:[%s15076_s1 + $0x8c0] sm:$0xf]  ;;  %v9567_v32 = vld [vmem:[%s15076_s1 + $0x8cc] sm:$0xf0]  ;;  %v7668_v34 = vor.u32 %v9667_v23, %v7667_v22  ;;  %4919 = vmatmul.bf16.vlgmr.msrb.gmra.mxu2 %v10542_v38  ;;  %4893 = vmatmul.bf16.vlgmr.msrb.gmra.mxu0 %v10550_v41 }
  0x47   :  { %v7395_v33 = vld [vmem:[%s15076_s1 + $0x9c0] sm:$0xf]  ;;  %v9599_v35 = vld [vmem:[%s15076_s1 + $0x9cc] sm:$0xf0]  ;;  %v7268_v43 = vor.u32 %v9567_v32, %v7267_v31  ;;  %4950 = vmatpush.bf16.msra.mxu1 %v7412_v29  ;;  %4963 = vmatpush.bf16.msra.mxu2 %v7540_v30 }
  0x48   :  { %v7523_v36 = vld [vmem:[%s15076_s1 + $0xac0] sm:$0xf]  ;;  %v9631_v37 = vld [vmem:[%s15076_s1 + $0xacc] sm:$0xf0]  ;;  %v7396_v45 = vor.u32 %v9599_v35, %v7395_v33  ;;  %4976 = vmatpush.bf16.msra.mxu3 %v7668_v34  ;;  %4906 = vmatmul.bf16.vlgmr.msrb.gmra.mxu1 %v10554_v44 }
  0x49   :  { %v7651_v39 = vld [vmem:[%s15076_s1 + $0xbc0] sm:$0xf]  ;;  %v9663_v40 = vld [vmem:[%s15076_s1 + $0xbcc] sm:$0xf0]  ;;  %v7524_v46 = vor.u32 %v9631_v37, %v7523_v36  ;;  %4932 = vmatmul.bf16.vlgmr.msrb.gmra.mxu3 %v10552_v42  ;;  %4938 = vmatpush.bf16.msra.mxu0 %v7268_v43 }
  0x4a   :  { %v7251_v47 = vld [vmem:[%s15076_s1 + $0x8a0] sm:$0xf]  ;;  %v9563_v48 = vld [vmem:[%s15076_s1 + $0x8ac] sm:$0xf0]  ;;  %v7652_v50 = vor.u32 %v9663_v40, %v7651_v39 }
  0x4b   :  { %v7379_v49 = vld [vmem:[%s15076_s1 + $0x9a0] sm:$0xf]  ;;  %v9595_v51 = vld [vmem:[%s15076_s1 + $0x9ac] sm:$0xf0]  ;;  %v7252_v56 = vor.u32 %v9563_v48, %v7251_v47  ;;  %4951 = vmatpush.bf16.msra.mxu1 %v7396_v45  ;;  %4964 = vmatpush.bf16.msra.mxu2 %v7524_v46 }
  0x4c   :  { %v7507_v52 = vld [vmem:[%s15076_s1 + $0xaa0] sm:$0xf]  ;;  %v9627_v53 = vld [vmem:[%s15076_s1 + $0xaac] sm:$0xf0]  ;;  %v7380_v57 = vor.u32 %v9595_v51, %v7379_v49  ;;  %4977 = vmatpush.bf16.msra.mxu3 %v7652_v50 }
  0x4d   :  { %v7635_v54 = vld [vmem:[%s15076_s1 + $0xba0] sm:$0xf]  ;;  %v9659_v55 = vld [vmem:[%s15076_s1 + $0xbac] sm:$0xf0]  ;;  %v7508_v58 = vor.u32 %v9627_v53, %v7507_v52  ;;  %4939 = vmatpush.bf16.msra.mxu0 %v7252_v56 }
  0x4e   :  { %v7235_v59 = vld [vmem:[%s15076_s1 + $0x880] sm:$0xf]  ;;  %v9559_v60 = vld [vmem:[%s15076_s1 + $0x88c] sm:$0xf0]  ;;  %v7636_v62 = vor.u32 %v9659_v55, %v7635_v54 }
  0x4f   :  { %v7363_v61 = vld [vmem:[%s15076_s1 + $0x980] sm:$0xf]  ;;  %v9591_v63 = vld [vmem:[%s15076_s1 + $0x98c] sm:$0xf0]  ;;  %v7236_v5 = vor.u32 %v9559_v60, %v7235_v59  ;;  %4952 = vmatpush.bf16.msra.mxu1 %v7380_v57  ;;  %4965 = vmatpush.bf16.msra.mxu2 %v7508_v58 }
  0x50   :  { %v7491_v0 = vld [vmem:[%s15076_s1 + $0xa80] sm:$0xf]  ;;  %v9623_v1 = vld [vmem:[%s15076_s1 + $0xa8c] sm:$0xf0]  ;;  %v7364_v7 = vor.u32 %v9591_v63, %v7363_v61  ;;  %4978 = vmatpush.bf16.msra.mxu3 %v7636_v62  ;;  %v20_v61 = vld [vmem:[%s15077_s0 + $0x28] sm:$0xff] }
  0x51   :  { %v7619_v2 = vld [vmem:[%s15076_s1 + $0xb80] sm:$0xf]  ;;  %v9655_v3 = vld [vmem:[%s15076_s1 + $0xb8c] sm:$0xf0]  ;;  %v7492_v8 = vor.u32 %v9623_v1, %v7491_v0  ;;  %4940 = vmatpush.bf16.msra.mxu0 %v7236_v5 }
  0x52   :  { %v7219_v9 = vld [vmem:[%s15076_s1 + $0x860] sm:$0xf]  ;;  %v9555_v10 = vld [vmem:[%s15076_s1 + $0x86c] sm:$0xf0]  ;;  %v7620_v12 = vor.u32 %v9655_v3, %v7619_v2 }
  0x53   :  { %v7347_v11 = vld [vmem:[%s15076_s1 + $0x960] sm:$0xf]  ;;  %v9587_v13 = vld [vmem:[%s15076_s1 + $0x96c] sm:$0xf0]  ;;  %v7220_v18 = vor.u32 %v9555_v10, %v7219_v9  ;;  %4953 = vmatpush.bf16.msra.mxu1 %v7364_v7  ;;  %4966 = vmatpush.bf16.msra.mxu2 %v7492_v8 }
  0x54   :  { %v7475_v14 = vld [vmem:[%s15076_s1 + $0xa60] sm:$0xf]  ;;  %v9619_v15 = vld [vmem:[%s15076_s1 + $0xa6c] sm:$0xf0]  ;;  %v7348_v19 = vor.u32 %v9587_v13, %v7347_v11  ;;  %4979 = vmatpush.bf16.msra.mxu3 %v7620_v12  ;;  %v845_v12 = vunpack.c.l.b16 %v20_v61 }
  0x55   :  { %v7603_v16 = vld [vmem:[%s15076_s1 + $0xb60] sm:$0xf]  ;;  %v9651_v17 = vld [vmem:[%s15076_s1 + $0xb6c] sm:$0xf0]  ;;  %v7476_v22 = vor.u32 %v9619_v15, %v7475_v14  ;;  %4941 = vmatpush.bf16.msra.mxu0 %v7220_v18 }
  0x56   :  { %v7203_v23 = vld [vmem:[%s15076_s1 + $0x840] sm:$0xf]  ;;  %v9551_v24 = vld [vmem:[%s15076_s1 + $0x84c] sm:$0xf0]  ;;  %v7604_v26 = vor.u32 %v9651_v17, %v7603_v16  ;;  %v846_v16 = vunpack.c.h.b16 %v20_v61 }
  0x57   :  { %v7331_v25 = vld [vmem:[%s15076_s1 + $0x940] sm:$0xf]  ;;  %v9583_v27 = vld [vmem:[%s15076_s1 + $0x94c] sm:$0xf0]  ;;  %v7204_v32 = vor.u32 %v9551_v24, %v7203_v23  ;;  %4954 = vmatpush.bf16.msra.mxu1 %v7348_v19  ;;  %4967 = vmatpush.bf16.msra.mxu2 %v7476_v22 }
  0x58   :  { %v7459_v28 = vld [vmem:[%s15076_s1 + $0xa40] sm:$0xf]  ;;  %v9615_v29 = vld [vmem:[%s15076_s1 + $0xa4c] sm:$0xf0]  ;;  %v7332_v33 = vor.u32 %v9583_v27, %v7331_v25  ;;  %4980 = vmatpush.bf16.msra.mxu3 %v7604_v26 }
  0x59   :  { %v7587_v30 = vld [vmem:[%s15076_s1 + $0xb40] sm:$0xf]  ;;  %v9647_v31 = vld [vmem:[%s15076_s1 + $0xb4c] sm:$0xf0]  ;;  %v7460_v34 = vor.u32 %v9615_v29, %v7459_v28  ;;  %4942 = vmatpush.bf16.msra.mxu0 %v7204_v32  ;;  %v10754_v29 = vpack.c.b16 %v845_v12, %v845_v12 }
  0x5a   :  { %v7187_v35 = vld [vmem:[%s15076_s1 + $0x820] sm:$0xf]  ;;  %v9547_v36 = vld [vmem:[%s15076_s1 + $0x82c] sm:$0xf0]  ;;  %v7588_v39 = vor.u32 %v9647_v31, %v7587_v30 }
  0x5b   :  { %v7315_v37 = vld [vmem:[%s15076_s1 + $0x920] sm:$0xf]  ;;  %v9579_v40 = vld [vmem:[%s15076_s1 + $0x92c] sm:$0xf0]  ;;  %v7188_v49 = vor.u32 %v9547_v36, %v7187_v35  ;;  %4955 = vmatpush.bf16.msra.mxu1 %v7332_v33  ;;  %4968 = vmatpush.bf16.msra.mxu2 %v7460_v34  ;;  %v10764_v33 = vpack.c.b16 %v846_v16, %v846_v16 }
  0x5c   :  { %v7443_v43 = vld [vmem:[%s15076_s1 + $0xa20] sm:$0xf]  ;;  %v9611_v45 = vld [vmem:[%s15076_s1 + $0xa2c] sm:$0xf0]  ;;  %v7316_v53 = vor.u32 %v9579_v40, %v7315_v37  ;;  %4981 = vmatpush.bf16.msra.mxu3 %v7588_v39 }
  0x5d   :  { %v7571_v46 = vld [vmem:[%s15076_s1 + $0xb20] sm:$0xf]  ;;  %v9643_v47 = vld [vmem:[%s15076_s1 + $0xb2c] sm:$0xf0]  ;;  %v7444_v54 = vor.u32 %v9611_v45, %v7443_v43  ;;  %4943 = vmatpush.bf16.msra.mxu0 %v7188_v49 }
  0x5e   :  { %v7171_v48 = vld [vmem:[%s15076_s1 + $0x800] sm:$0xf]  ;;  %v9543_v50 = vld [vmem:[%s15076_s1 + $0x80c] sm:$0xf0]  ;;  %v7572_v58 = vor.u32 %v9643_v47, %v7571_v46 }
  0x5f   :  { %v7299_v51 = vld [vmem:[%s15076_s1 + $0x900] sm:$0xf]  ;;  %v9575_v52 = vld [vmem:[%s15076_s1 + $0x90c] sm:$0xf0]  ;;  %v7172_v1 = vor.u32 %v9543_v50, %v7171_v48  ;;  %4956 = vmatpush.bf16.msra.mxu1 %v7316_v53  ;;  %4969 = vmatpush.bf16.msra.mxu2 %v7444_v54 }
  0x60   :  { %v7427_v55 = vld [vmem:[%s15076_s1 + $0xa00] sm:$0xf]  ;;  %v9607_v56 = vld [vmem:[%s15076_s1 + $0xa0c] sm:$0xf0]  ;;  %v7300_v8 = vor.u32 %v9575_v52, %v7299_v51  ;;  %4982 = vmatpush.bf16.msra.mxu3 %v7572_v58 }
  0x61   :  { %v19_v57 = vld [vmem:[%s15077_s0 + $0x20] sm:$0xff]  ;;  %v9639_v60 = vld [vmem:[%s15076_s1 + $0xb0c] sm:$0xf0]  ;;  %v7428_v9 = vor.u32 %v9607_v56, %v7427_v55  ;;  %4944 = vmatpush.bf16.msra.mxu0 %v7172_v1 }
  0x62   :  { %v7555_v59 = vld [vmem:[%s15076_s1 + $0xb00] sm:$0xf]  ;;  %v9699_v63 = vld [vmem:[%s15076_s1 + $0xcec] sm:$0xf0]  ;;  %v843_v7 = vunpack.c.l.b16 %v19_v57  ;;  %v844_v13 = vunpack.c.h.b16 %v19_v57 }
  0x63   :  { %v7795_v62 = vld [vmem:[%s15076_s1 + $0xce0] sm:$0xf]  ;;  %v9731_v2 = vld [vmem:[%s15076_s1 + $0xdec] sm:$0xf0]  ;;  %v7556_v14 = vor.u32 %v9639_v60, %v7555_v59  ;;  %4957 = vmatpush.bf16.msra.mxu1 %v7300_v8  ;;  %4970 = vmatpush.bf16.msra.mxu2 %v7428_v9 }
  0x64   :  { %v7923_v0 = vld [vmem:[%s15076_s1 + $0xde0] sm:$0xf]  ;;  %v9763_v5 = vld [vmem:[%s15076_s1 + $0xeec] sm:$0xf0]  ;;  %v7796_v15 = vor.u32 %v9699_v63, %v7795_v62  ;;  %v10743_v25 = vpack.c.b16 %v843_v7, %v843_v7  ;;  %v10756_v30 = vpack.c.b16 %v844_v13, %v844_v13 }
  0x65   :  { %v8051_v3 = vld [vmem:[%s15076_s1 + $0xee0] sm:$0xf]  ;;  %v9795_v11 = vld [vmem:[%s15076_s1 + $0xfec] sm:$0xf0]  ;;  %v7924_v17 = vor.u32 %v9731_v2, %v7923_v0  ;;  %4983 = vmatpush.bf16.msra.mxu3 %v7556_v14 }
  0x66   :  { %v8179_v10 = vld [vmem:[%s15076_s1 + $0xfe0] sm:$0xf]  ;;  %v8052_v18 = vor.u32 %v9763_v5, %v8051_v3  ;;  %v9695_v22 = vld [vmem:[%s15076_s1 + $0xccc] sm:$0xf0]  ;;  %4989 = vmatpush.bf16.msrb.mxu0 %v7796_v15  ;;  %4971 = vmatmul.bf16.vlgmr.msra.gmra.mxu2 %v10754_v29 }
  0x67   :  { %v7779_v19 = vld [vmem:[%s15076_s1 + $0xcc0] sm:$0xf]  ;;  %v8180_v24 = vor.u32 %v9795_v11, %v8179_v10  ;;  %v9727_v26 = vld [vmem:[%s15076_s1 + $0xdcc] sm:$0xf0]  ;;  %5002 = vmatpush.bf16.msrb.mxu1 %v7924_v17  ;;  %4945 = vmatmul.bf16.vlgmr.msra.gmra.mxu0 %v10743_v25 }
  0x68   :  { %v7907_v23 = vld [vmem:[%s15076_s1 + $0xdc0] sm:$0xf]  ;;  %v9759_v28 = vld [vmem:[%s15076_s1 + $0xecc] sm:$0xf0]  ;;  %v7780_v34 = vor.u32 %v9695_v22, %v7779_v19  ;;  %5015 = vmatpush.bf16.msrb.mxu2 %v8052_v18  ;;  %4958 = vmatmul.bf16.vlgmr.msra.gmra.mxu1 %v10756_v30 }
  0x69   :  { %v8035_v27 = vld [vmem:[%s15076_s1 + $0xec0] sm:$0xf]  ;;  %v9791_v32 = vld [vmem:[%s15076_s1 + $0xfcc] sm:$0xf0]  ;;  %v7908_v35 = vor.u32 %v9727_v26, %v7907_v23  ;;  %5028 = vmatpush.bf16.msrb.mxu3 %v8180_v24 }
  0x6a   :  { %v8163_v31 = vld [vmem:[%s15076_s1 + $0xfc0] sm:$0xf]  ;;  %v8036_v36 = vor.u32 %v9759_v28, %v8035_v27  ;;  %v9691_v39 = vld [vmem:[%s15076_s1 + $0xcac] sm:$0xf0]  ;;  %4984 = vmatmul.bf16.vlgmr.msra.gmra.mxu3 %v10764_v33  ;;  %4990 = vmatpush.bf16.msrb.mxu0 %v7780_v34 }
  0x6b   :  { %v7763_v37 = vld [vmem:[%s15076_s1 + $0xca0] sm:$0xf]  ;;  %v8164_v43 = vor.u32 %v9791_v32, %v8163_v31  ;;  %v9723_v45 = vld [vmem:[%s15076_s1 + $0xdac] sm:$0xf0]  ;;  %5003 = vmatpush.bf16.msrb.mxu1 %v7908_v35 }
  0x6c   :  { %v7891_v40 = vld [vmem:[%s15076_s1 + $0xda0] sm:$0xf]  ;;  %v9755_v47 = vld [vmem:[%s15076_s1 + $0xeac] sm:$0xf0]  ;;  %v7764_v50 = vor.u32 %v9691_v39, %v7763_v37  ;;  %5016 = vmatpush.bf16.msrb.mxu2 %v8036_v36 }
  0x6d   :  { %v8019_v46 = vld [vmem:[%s15076_s1 + $0xea0] sm:$0xf]  ;;  %v9787_v49 = vld [vmem:[%s15076_s1 + $0xfac] sm:$0xf0]  ;;  %v7892_v51 = vor.u32 %v9723_v45, %v7891_v40  ;;  %5029 = vmatpush.bf16.msrb.mxu3 %v8164_v43 }
  0x6e   :  { %v8147_v48 = vld [vmem:[%s15076_s1 + $0xfa0] sm:$0xf]  ;;  %v8020_v52 = vor.u32 %v9755_v47, %v8019_v46  ;;  %v9687_v54 = vld [vmem:[%s15076_s1 + $0xc8c] sm:$0xf0]  ;;  %4991 = vmatpush.bf16.msrb.mxu0 %v7764_v50 }
  0x6f   :  { %v7747_v53 = vld [vmem:[%s15076_s1 + $0xc80] sm:$0xf]  ;;  %v8148_v56 = vor.u32 %v9787_v49, %v8147_v48  ;;  %v9719_v57 = vld [vmem:[%s15076_s1 + $0xd8c] sm:$0xf0]  ;;  %5004 = vmatpush.bf16.msrb.mxu1 %v7892_v51 }
  0x70   :  { %v7875_v55 = vld [vmem:[%s15076_s1 + $0xd80] sm:$0xf]  ;;  %v9751_v59 = vld [vmem:[%s15076_s1 + $0xe8c] sm:$0xf0]  ;;  %v7748_v62 = vor.u32 %v9687_v54, %v7747_v53  ;;  %5017 = vmatpush.bf16.msrb.mxu2 %v8020_v52 }
  0x71   :  { %v8003_v58 = vld [vmem:[%s15076_s1 + $0xe80] sm:$0xf]  ;;  %v9783_v61 = vld [vmem:[%s15076_s1 + $0xf8c] sm:$0xf0]  ;;  %v7876_v63 = vor.u32 %v9719_v57, %v7875_v55  ;;  %5030 = vmatpush.bf16.msrb.mxu3 %v8148_v56 }
  0x72   :  { %v8131_v60 = vld [vmem:[%s15076_s1 + $0xf80] sm:$0xf]  ;;  %v8004_v0 = vor.u32 %v9751_v59, %v8003_v58  ;;  %v9683_v2 = vld [vmem:[%s15076_s1 + $0xc6c] sm:$0xf0]  ;;  %4992 = vmatpush.bf16.msrb.mxu0 %v7748_v62  ;;  %v22_v59 = vld [vmem:[%s15077_s0 + $0x38] sm:$0xff] }
  0x73   :  { %v7731_v1 = vld [vmem:[%s15076_s1 + $0xc60] sm:$0xf]  ;;  %v8132_v5 = vor.u32 %v9783_v61, %v8131_v60  ;;  %v9715_v7 = vld [vmem:[%s15076_s1 + $0xd6c] sm:$0xf0]  ;;  %5005 = vmatpush.bf16.msrb.mxu1 %v7876_v63 }
  0x74   :  { %v7859_v3 = vld [vmem:[%s15076_s1 + $0xd60] sm:$0xf]  ;;  %v9747_v9 = vld [vmem:[%s15076_s1 + $0xe6c] sm:$0xf0]  ;;  %v7732_v12 = vor.u32 %v9683_v2, %v7731_v1  ;;  %5018 = vmatpush.bf16.msrb.mxu2 %v8004_v0 }
  0x75   :  { %v7987_v8 = vld [vmem:[%s15076_s1 + $0xe60] sm:$0xf]  ;;  %v9779_v11 = vld [vmem:[%s15076_s1 + $0xf6c] sm:$0xf0]  ;;  %v7860_v13 = vor.u32 %v9715_v7, %v7859_v3  ;;  %5031 = vmatpush.bf16.msrb.mxu3 %v8132_v5 }
  0x76   :  { %v8115_v10 = vld [vmem:[%s15076_s1 + $0xf60] sm:$0xf]  ;;  %v7988_v14 = vor.u32 %v9747_v9, %v7987_v8  ;;  %v9679_v16 = vld [vmem:[%s15076_s1 + $0xc4c] sm:$0xf0]  ;;  %4993 = vmatpush.bf16.msrb.mxu0 %v7732_v12 }
  0x77   :  { %v7715_v15 = vld [vmem:[%s15076_s1 + $0xc40] sm:$0xf]  ;;  %v8116_v18 = vor.u32 %v9779_v11, %v8115_v10  ;;  %v9711_v19 = vld [vmem:[%s15076_s1 + $0xd4c] sm:$0xf0]  ;;  %5006 = vmatpush.bf16.msrb.mxu1 %v7860_v13  ;;  %v849_v10 = vunpack.c.l.b16 %v22_v59 }
  0x78   :  { %v7843_v17 = vld [vmem:[%s15076_s1 + $0xd40] sm:$0xf]  ;;  %v9743_v23 = vld [vmem:[%s15076_s1 + $0xe4c] sm:$0xf0]  ;;  %v7716_v27 = vor.u32 %v9679_v16, %v7715_v15  ;;  %5019 = vmatpush.bf16.msrb.mxu2 %v7988_v14  ;;  %v850_v14 = vunpack.c.h.b16 %v22_v59 }
  0x79   :  { %v7971_v22 = vld [vmem:[%s15076_s1 + $0xe40] sm:$0xf]  ;;  %v9775_v26 = vld [vmem:[%s15076_s1 + $0xf4c] sm:$0xf0]  ;;  %v7844_v28 = vor.u32 %v9711_v19, %v7843_v17  ;;  %5032 = vmatpush.bf16.msrb.mxu3 %v8116_v18 }
  0x7a   :  { %v8099_v24 = vld [vmem:[%s15076_s1 + $0xf40] sm:$0xf]  ;;  %v7972_v31 = vor.u32 %v9743_v23, %v7971_v22  ;;  %v9675_v34 = vld [vmem:[%s15076_s1 + $0xc2c] sm:$0xf0]  ;;  %4994 = vmatpush.bf16.msrb.mxu0 %v7716_v27 }
  0x7b   :  { %v7699_v32 = vld [vmem:[%s15076_s1 + $0xc20] sm:$0xf]  ;;  %v8100_v36 = vor.u32 %v9775_v26, %v8099_v24  ;;  %v9707_v37 = vld [vmem:[%s15076_s1 + $0xd2c] sm:$0xf0]  ;;  %5007 = vmatpush.bf16.msrb.mxu1 %v7844_v28  ;;  %v10964_v28 = vpack.c.b16 %v849_v10, %v849_v10 }
  0x7c   :  { %v7827_v35 = vld [vmem:[%s15076_s1 + $0xd20] sm:$0xf]  ;;  %v9739_v40 = vld [vmem:[%s15076_s1 + $0xe2c] sm:$0xf0]  ;;  %v7700_v47 = vor.u32 %v9675_v34, %v7699_v32  ;;  %5020 = vmatpush.bf16.msrb.mxu2 %v7972_v31 }
  0x7d   :  { %v7955_v39 = vld [vmem:[%s15076_s1 + $0xe20] sm:$0xf]  ;;  %v9771_v45 = vld [vmem:[%s15076_s1 + $0xf2c] sm:$0xf0]  ;;  %v7828_v51 = vor.u32 %v9707_v37, %v7827_v35  ;;  %5033 = vmatpush.bf16.msrb.mxu3 %v8100_v36  ;;  %v10974_v35 = vpack.c.b16 %v850_v14, %v850_v14 }
  0x7e   :  { %v8083_v43 = vld [vmem:[%s15076_s1 + $0xf20] sm:$0xf]  ;;  %v9671_v48 = vld [vmem:[%s15076_s1 + $0xc0c] sm:$0xf0]  ;;  %v7956_v52 = vor.u32 %v9739_v40, %v7955_v39  ;;  %4995 = vmatpush.bf16.msrb.mxu0 %v7700_v47 }
  0x7f   :  { %v7683_v46 = vld [vmem:[%s15076_s1 + $0xc00] sm:$0xf]  ;;  %v9703_v50 = vld [vmem:[%s15076_s1 + $0xd0c] sm:$0xf0]  ;;  %v8084_v56 = vor.u32 %v9771_v45, %v8083_v43  ;;  %5008 = vmatpush.bf16.msrb.mxu1 %v7828_v51 }
  0x80   :  { %v7811_v49 = vld [vmem:[%s15076_s1 + $0xd00] sm:$0xf]  ;;  %v9735_v54 = vld [vmem:[%s15076_s1 + $0xe0c] sm:$0xf0]  ;;  %v7684_v63 = vor.u32 %v9671_v48, %v7683_v46  ;;  %5021 = vmatpush.bf16.msrb.mxu2 %v7956_v52 }
  0x81   :  { %v7939_v53 = vld [vmem:[%s15076_s1 + $0xe00] sm:$0xf]  ;;  %v21_v55 = vld [vmem:[%s15077_s0 + $0x30] sm:$0xff]  ;;  %v7812_v5 = vor.u32 %v9703_v50, %v7811_v49  ;;  %5034 = vmatpush.bf16.msrb.mxu3 %v8084_v56 }
  0x82   :  { %v8067_v57 = vld [vmem:[%s15076_s1 + $0xf00] sm:$0xf]  ;;  %v9767_v58 = vld [vmem:[%s15076_s1 + $0xf0c] sm:$0xf0]  ;;  %v847_v3 = vunpack.c.l.b16 %v21_v55  ;;  %v7940_v7 = vor.u32 %v9735_v54, %v7939_v53  ;;  %v848_v11 = vunpack.c.h.b16 %v21_v55  ;;  %4996 = vmatpush.bf16.msrb.mxu0 %v7684_v63 }
  0x83   :  { %v8307_v60 = vld [vmem:[%s15076_s1 + $0x10e0] sm:$0xf]  ;;  %v9827_v61 = vld [vmem:[%s15076_s1 + $0x10ec] sm:$0xf0]  ;;  %v8068_v12 = vor.u32 %v9767_v58, %v8067_v57  ;;  %5009 = vmatpush.bf16.msrb.mxu1 %v7812_v5 }
  0x84   :  { %v8435_v62 = vld [vmem:[%s15076_s1 + $0x11e0] sm:$0xf]  ;;  %v9859_v0 = vld [vmem:[%s15076_s1 + $0x11ec] sm:$0xf0]  ;;  %v8308_v13 = vor.u32 %v9827_v61, %v8307_v60  ;;  %v10953_v23 = vpack.c.b16 %v847_v3, %v847_v3  ;;  %5022 = vmatpush.bf16.msrb.mxu2 %v7940_v7  ;;  %v10966_v31 = vpack.c.b16 %v848_v11, %v848_v11 }
  0x85   :  { %v8563_v1 = vld [vmem:[%s15076_s1 + $0x12e0] sm:$0xf]  ;;  %v9891_v2 = vld [vmem:[%s15076_s1 + $0x12ec] sm:$0xf0]  ;;  %v8436_v15 = vor.u32 %v9859_v0, %v8435_v62  ;;  %5035 = vmatpush.bf16.msrb.mxu3 %v8068_v12 }
  0x86   :  { %v8691_v8 = vld [vmem:[%s15076_s1 + $0x13e0] sm:$0xf]  ;;  %v9923_v9 = vld [vmem:[%s15076_s1 + $0x13ec] sm:$0xf0]  ;;  %v8564_v16 = vor.u32 %v9891_v2, %v8563_v1  ;;  %5041 = vmatpush.bf16.msra.mxu0 %v8308_v13  ;;  %5010 = vmatmul.bf16.vlgmr.msrb.gmra.mxu1 %v10966_v31 }
  0x87   :  { %v8291_v17 = vld [vmem:[%s15076_s1 + $0x10c0] sm:$0xf]  ;;  %v9823_v18 = vld [vmem:[%s15076_s1 + $0x10cc] sm:$0xf0]  ;;  %v8692_v22 = vor.u32 %v9923_v9, %v8691_v8  ;;  %5054 = vmatpush.bf16.msra.mxu1 %v8436_v15  ;;  %4997 = vmatmul.bf16.vlgmr.msrb.gmra.mxu0 %v10953_v23 }
  0x88   :  { %v8419_v19 = vld [vmem:[%s15076_s1 + $0x11c0] sm:$0xf]  ;;  %v9855_v24 = vld [vmem:[%s15076_s1 + $0x11cc] sm:$0xf0]  ;;  %v8292_v36 = vor.u32 %v9823_v18, %v8291_v17  ;;  %5067 = vmatpush.bf16.msra.mxu2 %v8564_v16  ;;  %5036 = vmatmul.bf16.vlgmr.msrb.gmra.mxu3 %v10974_v35 }
  0x89   :  { %v8547_v26 = vld [vmem:[%s15076_s1 + $0x12c0] sm:$0xf]  ;;  %v9887_v27 = vld [vmem:[%s15076_s1 + $0x12cc] sm:$0xf0]  ;;  %v8420_v37 = vor.u32 %v9855_v24, %v8419_v19  ;;  %5080 = vmatpush.bf16.msra.mxu3 %v8692_v22  ;;  %5023 = vmatmul.bf16.vlgmr.msrb.gmra.mxu2 %v10964_v28 }
  0x8a   :  { %v8675_v32 = vld [vmem:[%s15076_s1 + $0x13c0] sm:$0xf]  ;;  %v9919_v34 = vld [vmem:[%s15076_s1 + $0x13cc] sm:$0xf0]  ;;  %v8548_v39 = vor.u32 %v9887_v27, %v8547_v26  ;;  %5042 = vmatpush.bf16.msra.mxu0 %v8292_v36 }
  0x8b   :  { %v8275_v40 = vld [vmem:[%s15076_s1 + $0x10a0] sm:$0xf]  ;;  %v9819_v43 = vld [vmem:[%s15076_s1 + $0x10ac] sm:$0xf0]  ;;  %v8676_v46 = vor.u32 %v9919_v34, %v8675_v32  ;;  %5055 = vmatpush.bf16.msra.mxu1 %v8420_v37 }
  0x8c   :  { %v8403_v45 = vld [vmem:[%s15076_s1 + $0x11a0] sm:$0xf]  ;;  %v9851_v47 = vld [vmem:[%s15076_s1 + $0x11ac] sm:$0xf0]  ;;  %v8276_v52 = vor.u32 %v9819_v43, %v8275_v40  ;;  %5068 = vmatpush.bf16.msra.mxu2 %v8548_v39 }
  0x8d   :  { %v8531_v48 = vld [vmem:[%s15076_s1 + $0x12a0] sm:$0xf]  ;;  %v9883_v49 = vld [vmem:[%s15076_s1 + $0x12ac] sm:$0xf0]  ;;  %v8404_v53 = vor.u32 %v9851_v47, %v8403_v45  ;;  %5081 = vmatpush.bf16.msra.mxu3 %v8676_v46 }
  0x8e   :  { %v8659_v50 = vld [vmem:[%s15076_s1 + $0x13a0] sm:$0xf]  ;;  %v9915_v51 = vld [vmem:[%s15076_s1 + $0x13ac] sm:$0xf0]  ;;  %v8532_v54 = vor.u32 %v9883_v49, %v8531_v48  ;;  %5043 = vmatpush.bf16.msra.mxu0 %v8276_v52 }
  0x8f   :  { %v8259_v55 = vld [vmem:[%s15076_s1 + $0x1080] sm:$0xf]  ;;  %v9815_v56 = vld [vmem:[%s15076_s1 + $0x108c] sm:$0xf0]  ;;  %v8660_v58 = vor.u32 %v9915_v51, %v8659_v50  ;;  %5056 = vmatpush.bf16.msra.mxu1 %v8404_v53 }
  0x90   :  { %v8387_v57 = vld [vmem:[%s15076_s1 + $0x1180] sm:$0xf]  ;;  %v9847_v59 = vld [vmem:[%s15076_s1 + $0x118c] sm:$0xf0]  ;;  %v8260_v0 = vor.u32 %v9815_v56, %v8259_v55  ;;  %5069 = vmatpush.bf16.msra.mxu2 %v8532_v54 }
  0x91   :  { %v8515_v60 = vld [vmem:[%s15076_s1 + $0x1280] sm:$0xf]  ;;  %v9879_v61 = vld [vmem:[%s15076_s1 + $0x128c] sm:$0xf0]  ;;  %v8388_v1 = vor.u32 %v9847_v59, %v8387_v57  ;;  %5082 = vmatpush.bf16.msra.mxu3 %v8660_v58 }
  0x92   :  { %v8643_v62 = vld [vmem:[%s15076_s1 + $0x1380] sm:$0xf]  ;;  %v9911_v63 = vld [vmem:[%s15076_s1 + $0x138c] sm:$0xf0]  ;;  %v8516_v2 = vor.u32 %v9879_v61, %v8515_v60  ;;  %5044 = vmatpush.bf16.msra.mxu0 %v8260_v0 }
  0x93   :  { %v8243_v3 = vld [vmem:[%s15076_s1 + $0x1060] sm:$0xf]  ;;  %v9811_v5 = vld [vmem:[%s15076_s1 + $0x106c] sm:$0xf0]  ;;  %v8644_v8 = vor.u32 %v9911_v63, %v8643_v62  ;;  %5057 = vmatpush.bf16.msra.mxu1 %v8388_v1  ;;  %v24_v1 = vld [vmem:[%s15077_s0 + $0x48] sm:$0xff] }
  0x94   :  { %v8371_v7 = vld [vmem:[%s15076_s1 + $0x1160] sm:$0xf]  ;;  %v9843_v9 = vld [vmem:[%s15076_s1 + $0x116c] sm:$0xf0]  ;;  %v8244_v14 = vor.u32 %v9811_v5, %v8243_v3  ;;  %5070 = vmatpush.bf16.msra.mxu2 %v8516_v2 }
  0x95   :  { %v8499_v10 = vld [vmem:[%s15076_s1 + $0x1260] sm:$0xf]  ;;  %v9875_v11 = vld [vmem:[%s15076_s1 + $0x126c] sm:$0xf0]  ;;  %v8372_v15 = vor.u32 %v9843_v9, %v8371_v7  ;;  %5083 = vmatpush.bf16.msra.mxu3 %v8644_v8 }
  0x96   :  { %v8627_v12 = vld [vmem:[%s15076_s1 + $0x1360] sm:$0xf]  ;;  %v9907_v13 = vld [vmem:[%s15076_s1 + $0x136c] sm:$0xf0]  ;;  %v8500_v16 = vor.u32 %v9875_v11, %v8499_v10  ;;  %5045 = vmatpush.bf16.msra.mxu0 %v8244_v14 }
  0x97   :  { %v8227_v17 = vld [vmem:[%s15076_s1 + $0x1040] sm:$0xf]  ;;  %v9807_v18 = vld [vmem:[%s15076_s1 + $0x104c] sm:$0xf0]  ;;  %v8628_v22 = vor.u32 %v9907_v13, %v8627_v12  ;;  %5058 = vmatpush.bf16.msra.mxu1 %v8372_v15 }
  0x98   :  { %v8355_v19 = vld [vmem:[%s15076_s1 + $0x1140] sm:$0xf]  ;;  %v9839_v24 = vld [vmem:[%s15076_s1 + $0x114c] sm:$0xf0]  ;;  %v8228_v36 = vor.u32 %v9807_v18, %v8227_v17  ;;  %5071 = vmatpush.bf16.msra.mxu2 %v8500_v16  ;;  %v853_v16 = vunpack.c.l.b16 %v24_v1 }
  0x99   :  { %v8483_v26 = vld [vmem:[%s15076_s1 + $0x1240] sm:$0xf]  ;;  %v9871_v27 = vld [vmem:[%s15076_s1 + $0x124c] sm:$0xf0]  ;;  %v8356_v37 = vor.u32 %v9839_v24, %v8355_v19  ;;  %5084 = vmatpush.bf16.msra.mxu3 %v8628_v22  ;;  %v854_v22 = vunpack.c.h.b16 %v24_v1 }
  0x9a   :  { %v8611_v32 = vld [vmem:[%s15076_s1 + $0x1340] sm:$0xf]  ;;  %v9903_v34 = vld [vmem:[%s15076_s1 + $0x134c] sm:$0xf0]  ;;  %v8484_v39 = vor.u32 %v9871_v27, %v8483_v26  ;;  %5046 = vmatpush.bf16.msra.mxu0 %v8228_v36 }
  0x9b   :  { %v8211_v40 = vld [vmem:[%s15076_s1 + $0x1020] sm:$0xf]  ;;  %v9803_v43 = vld [vmem:[%s15076_s1 + $0x102c] sm:$0xf0]  ;;  %v8612_v46 = vor.u32 %v9903_v34, %v8611_v32  ;;  %5059 = vmatpush.bf16.msra.mxu1 %v8356_v37 }
  0x9c   :  { %v8339_v45 = vld [vmem:[%s15076_s1 + $0x1120] sm:$0xf]  ;;  %v9835_v47 = vld [vmem:[%s15076_s1 + $0x112c] sm:$0xf0]  ;;  %v8212_v53 = vor.u32 %v9803_v43, %v8211_v40  ;;  %5072 = vmatpush.bf16.msra.mxu2 %v8484_v39 }
  0x9d   :  { %v8467_v48 = vld [vmem:[%s15076_s1 + $0x1220] sm:$0xf]  ;;  %v9867_v49 = vld [vmem:[%s15076_s1 + $0x122c] sm:$0xf0]  ;;  %v8340_v57 = vor.u32 %v9835_v47, %v8339_v45  ;;  %5085 = vmatpush.bf16.msra.mxu3 %v8612_v46  ;;  %v11174_v45 = vpack.c.b16 %v853_v16, %v853_v16 }
  0x9e   :  { %v8595_v50 = vld [vmem:[%s15076_s1 + $0x1320] sm:$0xf]  ;;  %v9899_v51 = vld [vmem:[%s15076_s1 + $0x132c] sm:$0xf0]  ;;  %v8468_v58 = vor.u32 %v9867_v49, %v8467_v48  ;;  %5047 = vmatpush.bf16.msra.mxu0 %v8212_v53  ;;  %v11184_v49 = vpack.c.b16 %v854_v22, %v854_v22 }
  0x9f   :  { %v8195_v52 = vld [vmem:[%s15076_s1 + $0x1000] sm:$0xf]  ;;  %v9799_v54 = vld [vmem:[%s15076_s1 + $0x100c] sm:$0xf0]  ;;  %v8596_v62 = vor.u32 %v9899_v51, %v8595_v50  ;;  %5060 = vmatpush.bf16.msra.mxu1 %v8340_v57 }
  0xa0   :  { %v8323_v55 = vld [vmem:[%s15076_s1 + $0x1100] sm:$0xf]  ;;  %v9831_v56 = vld [vmem:[%s15076_s1 + $0x110c] sm:$0xf0]  ;;  %v8196_v7 = vor.u32 %v9799_v54, %v8195_v52  ;;  %5073 = vmatpush.bf16.msra.mxu2 %v8468_v58 }
  0xa1   :  { %v8451_v59 = vld [vmem:[%s15076_s1 + $0x1200] sm:$0xf]  ;;  %v9863_v60 = vld [vmem:[%s15076_s1 + $0x120c] sm:$0xf0]  ;;  %v8324_v12 = vor.u32 %v9831_v56, %v8323_v55  ;;  %5086 = vmatpush.bf16.msra.mxu3 %v8596_v62 }
  0xa2   :  { %v23_v61 = vld [vmem:[%s15077_s0 + $0x40] sm:$0xff]  ;;  %v9895_v0 = vld [vmem:[%s15076_s1 + $0x130c] sm:$0xf0]  ;;  %v8452_v13 = vor.u32 %v9863_v60, %v8451_v59  ;;  %5048 = vmatpush.bf16.msra.mxu0 %v8196_v7 }
  0xa3   :  { %v8579_v63 = vld [vmem:[%s15076_s1 + $0x1300] sm:$0xf]  ;;  %v9955_v3 = vld [vmem:[%s15076_s1 + $0x14ec] sm:$0xf0]  ;;  %v851_v11 = vunpack.c.l.b16 %v23_v61  ;;  %v852_v17 = vunpack.c.h.b16 %v23_v61  ;;  %5061 = vmatpush.bf16.msra.mxu1 %v8324_v12 }
  0xa4   :  { %v8819_v2 = vld [vmem:[%s15076_s1 + $0x14e0] sm:$0xf]  ;;  %v9987_v8 = vld [vmem:[%s15076_s1 + $0x15ec] sm:$0xf0]  ;;  %v8580_v18 = vor.u32 %v9895_v0, %v8579_v63  ;;  %5074 = vmatpush.bf16.msra.mxu2 %v8452_v13 }
  0xa5   :  { %v8947_v5 = vld [vmem:[%s15076_s1 + $0x15e0] sm:$0xf]  ;;  %v10019_v10 = vld [vmem:[%s15076_s1 + $0x16ec] sm:$0xf0]  ;;  %v8820_v19 = vor.u32 %v9955_v3, %v8819_v2  ;;  %v11163_v37 = vpack.c.b16 %v851_v11, %v851_v11  ;;  %v11176_v46 = vpack.c.b16 %v852_v17, %v852_v17 }
  0xa6   :  { %v9075_v9 = vld [vmem:[%s15076_s1 + $0x16e0] sm:$0xf]  ;;  %v10051_v15 = vld [vmem:[%s15076_s1 + $0x17ec] sm:$0xf0]  ;;  %v8948_v24 = vor.u32 %v9987_v8, %v8947_v5  ;;  %5087 = vmatpush.bf16.msra.mxu3 %v8580_v18 }
  0xa7   :  { %v9203_v14 = vld [vmem:[%s15076_s1 + $0x17e0] sm:$0xf]  ;;  %v9076_v26 = vor.u32 %v10019_v10, %v9075_v9  ;;  %v9951_v32 = vld [vmem:[%s15076_s1 + $0x14cc] sm:$0xf0]  ;;  %5093 = vmatpush.bf16.msrb.mxu0 %v8820_v19  ;;  %5075 = vmatmul.bf16.vlgmr.msra.gmra.mxu2 %v11174_v45 }
  0xa8   :  { %v8803_v27 = vld [vmem:[%s15076_s1 + $0x14c0] sm:$0xf]  ;;  %v9204_v36 = vor.u32 %v10051_v15, %v9203_v14  ;;  %v9983_v39 = vld [vmem:[%s15076_s1 + $0x15cc] sm:$0xf0]  ;;  %5106 = vmatpush.bf16.msrb.mxu1 %v8948_v24  ;;  %5049 = vmatmul.bf16.vlgmr.msra.gmra.mxu0 %v11163_v37 }
  0xa9   :  { %v8931_v34 = vld [vmem:[%s15076_s1 + $0x15c0] sm:$0xf]  ;;  %v10015_v43 = vld [vmem:[%s15076_s1 + $0x16cc] sm:$0xf0]  ;;  %v8804_v50 = vor.u32 %v9951_v32, %v8803_v27  ;;  %5119 = vmatpush.bf16.msrb.mxu2 %v9076_v26  ;;  %5062 = vmatmul.bf16.vlgmr.msra.gmra.mxu1 %v11176_v46 }
  0xaa   :  { %v9059_v40 = vld [vmem:[%s15076_s1 + $0x16c0] sm:$0xf]  ;;  %v10047_v48 = vld [vmem:[%s15076_s1 + $0x17cc] sm:$0xf0]  ;;  %v8932_v51 = vor.u32 %v9983_v39, %v8931_v34  ;;  %5132 = vmatpush.bf16.msrb.mxu3 %v9204_v36 }
  0xab   :  { %v9187_v47 = vld [vmem:[%s15076_s1 + $0x17c0] sm:$0xf]  ;;  %v9060_v52 = vor.u32 %v10015_v43, %v9059_v40  ;;  %v9947_v54 = vld [vmem:[%s15076_s1 + $0x14ac] sm:$0xf0]  ;;  %5088 = vmatmul.bf16.vlgmr.msra.gmra.mxu3 %v11184_v49  ;;  %5094 = vmatpush.bf16.msrb.mxu0 %v8804_v50 }
  0xac   :  { %v8787_v53 = vld [vmem:[%s15076_s1 + $0x14a0] sm:$0xf]  ;;  %v9188_v56 = vor.u32 %v10047_v48, %v9187_v47  ;;  %v9979_v57 = vld [vmem:[%s15076_s1 + $0x15ac] sm:$0xf0]  ;;  %5107 = vmatpush.bf16.msrb.mxu1 %v8932_v51 }
  0xad   :  { %v8915_v55 = vld [vmem:[%s15076_s1 + $0x15a0] sm:$0xf]  ;;  %v10011_v59 = vld [vmem:[%s15076_s1 + $0x16ac] sm:$0xf0]  ;;  %v8788_v62 = vor.u32 %v9947_v54, %v8787_v53  ;;  %5120 = vmatpush.bf16.msrb.mxu2 %v9060_v52 }
  0xae   :  { %v9043_v58 = vld [vmem:[%s15076_s1 + $0x16a0] sm:$0xf]  ;;  %v10043_v61 = vld [vmem:[%s15076_s1 + $0x17ac] sm:$0xf0]  ;;  %v8916_v63 = vor.u32 %v9979_v57, %v8915_v55  ;;  %5133 = vmatpush.bf16.msrb.mxu3 %v9188_v56 }
  0xaf   :  { %v9171_v60 = vld [vmem:[%s15076_s1 + $0x17a0] sm:$0xf]  ;;  %v9044_v0 = vor.u32 %v10011_v59, %v9043_v58  ;;  %v9943_v2 = vld [vmem:[%s15076_s1 + $0x148c] sm:$0xf0]  ;;  %5095 = vmatpush.bf16.msrb.mxu0 %v8788_v62  ;;  %v4842_v56 = vpop.f32.mrf.mxu0  ;;  %v4855_v59 = vpop.f32.mrf.mxu1 }
  0xb0   :  { %v8771_v1 = vld [vmem:[%s15076_s1 + $0x1480] sm:$0xf]  ;;  %v9172_v5 = vor.u32 %v10043_v61, %v9171_v60  ;;  %v9975_v7 = vld [vmem:[%s15076_s1 + $0x158c] sm:$0xf0]  ;;  %5108 = vmatpush.bf16.msrb.mxu1 %v8916_v63 }
  0xb1   :  { %v8899_v3 = vld [vmem:[%s15076_s1 + $0x1580] sm:$0xf]  ;;  %v10007_v9 = vld [vmem:[%s15076_s1 + $0x168c] sm:$0xf0]  ;;  %v8772_v12 = vor.u32 %v9943_v2, %v8771_v1  ;;  %5121 = vmatpush.bf16.msrb.mxu2 %v9044_v0  ;;  %v4868_v1 = vpop.f32.mrf.mxu2 }
  0xb2   :  { %v9027_v8 = vld [vmem:[%s15076_s1 + $0x1680] sm:$0xf]  ;;  %v10039_v11 = vld [vmem:[%s15076_s1 + $0x178c] sm:$0xf0]  ;;  %v8900_v14 = vor.u32 %v9975_v7, %v8899_v3  ;;  %5134 = vmatpush.bf16.msrb.mxu3 %v9172_v5 }
  0xb3   :  { %v9155_v10 = vld [vmem:[%s15076_s1 + $0x1780] sm:$0xf]  ;;  %v9028_v15 = vor.u32 %v10007_v9, %v9027_v8  ;;  %v9939_v16 = vld [vmem:[%s15076_s1 + $0x146c] sm:$0xf0]  ;;  %5096 = vmatpush.bf16.msrb.mxu0 %v8772_v12  ;;  %v4881_v9 = vpop.f32.mrf.mxu3 }
  0xb4   :  { %v8755_v13 = vld [vmem:[%s15076_s1 + $0x1460] sm:$0xf]  ;;  %v9156_v19 = vor.u32 %v10039_v11, %v9155_v10  ;;  %v9971_v22 = vld [vmem:[%s15076_s1 + $0x156c] sm:$0xf0]  ;;  %5109 = vmatpush.bf16.msrb.mxu1 %v8900_v14 }
  0xb5   :  { %v8883_v17 = vld [vmem:[%s15076_s1 + $0x1560] sm:$0xf]  ;;  %v10003_v26 = vld [vmem:[%s15076_s1 + $0x166c] sm:$0xf0]  ;;  %v8756_v34 = vor.u32 %v9939_v16, %v8755_v13  ;;  %5122 = vmatpush.bf16.msrb.mxu2 %v9028_v15 }
  0xb6   :  { %v812_v18 = vld [vmem:[%s15078_s2] sm:$0xf]  ;;  %v10035_v32 = vld [vmem:[%s15076_s1 + $0x176c] sm:$0xf0]  ;;  %v8884_v39 = vor.u32 %v9971_v22, %v8883_v17  ;;  %5135 = vmatpush.bf16.msrb.mxu3 %v9156_v19 }
  0xb7   :  { %v9011_v24 = vld [vmem:[%s15076_s1 + $0x1660] sm:$0xf]  ;;  %v814_v36 = vperm.slane %v812_v18, 0  ;;  %v9935_v47 = vld [vmem:[%s15076_s1 + $0x144c] sm:$0xf0]  ;;  %5097 = vmatpush.bf16.msrb.mxu0 %v8756_v34 }
  0xb8   :  { %v9139_v27 = vld [vmem:[%s15076_s1 + $0x1760] sm:$0xf]  ;;  %v9012_v40 = vor.u32 %v10003_v26, %v9011_v24  ;;  %v9967_v51 = vld [vmem:[%s15076_s1 + $0x154c] sm:$0xf0]  ;;  %5110 = vmatpush.bf16.msrb.mxu1 %v8884_v39 }
  0xb9   :  { %v8739_v43 = vld [vmem:[%s15076_s1 + $0x1440] sm:$0xf]  ;;  %v9140_v50 = vor.u32 %v10035_v32, %v9139_v27  ;;  %v9999_v53 = vld [vmem:[%s15076_s1 + $0x164c] sm:$0xf0]  ;;  %v4843_v58 = vadd.f32 %v4842_v56, %v814_v36  ;;  %v26_v36 = vld [vmem:[%s15077_s0 + $0x58] sm:$0xff] }
  0xba   :  { %v8867_v48 = vld [vmem:[%s15076_s1 + $0x1540] sm:$0xf]  ;;  %v10031_v55 = vld [vmem:[%s15076_s1 + $0x174c] sm:$0xf0]  ;;  %v8740_v57 = vor.u32 %v9935_v47, %v8739_v43  ;;  %5123 = vmatpush.bf16.msrb.mxu2 %v9012_v40  ;;  %v9313_v47 = vld [vmem:[%s15076_s1 + $0xe4] sm:$0xf] }
  0xbb   :  { %v8995_v52 = vld [vmem:[%s15076_s1 + $0x1640] sm:$0xf]  ;;  %v8868_v60 = vor.u32 %v9967_v51, %v8867_v48  ;;  %v9931_v63 = vld [vmem:[%s15076_s1 + $0x142c] sm:$0xf0]  ;;  %5136 = vmatpush.bf16.msrb.mxu3 %v9140_v50  ;;  %v4856_v8 = vadd.f32 %v4855_v59, %v4843_v58  ;;  %v4844_v48 = vpop.f32.mrf.mxu0  ;;  %v6261_v51 = vld [vmem:[%s15076_s1 + $0xf0] sm:$0xf0] }
  0xbc   :  { %v9123_v54 = vld [vmem:[%s15076_s1 + $0x1740] sm:$0xf]  ;;  %v8996_v61 = vor.u32 %v9999_v53, %v8995_v52  ;;  %v9963_v3 = vld [vmem:[%s15076_s1 + $0x152c] sm:$0xf0]  ;;  %5098 = vmatpush.bf16.msrb.mxu0 %v8740_v57  ;;  %v9345_v52 = vld [vmem:[%s15076_s1 + $0x1e4] sm:$0xf] }
  0xbd   :  { %v8723_v62 = vld [vmem:[%s15076_s1 + $0x1420] sm:$0xf]  ;;  %v9124_v2 = vor.u32 %v10031_v55, %v9123_v54  ;;  %v9995_v7 = vld [vmem:[%s15076_s1 + $0x162c] sm:$0xf0]  ;;  %v4869_v17 = vadd.f32 %v4868_v1, %v4856_v8  ;;  %5111 = vmatpush.bf16.msrb.mxu1 %v8868_v60  ;;  %v6389_v53 = vld [vmem:[%s15076_s1 + $0x1f0] sm:$0xf0]  ;;  %v4857_v55 = vpop.f32.mrf.mxu1  ;;  %v857_v60 = vunpack.c.l.b16 %v26_v36  ;;  %v858_v1 = vunpack.c.h.b16 %v26_v36 }
  0xbe   :  { %v8851_v0 = vld [vmem:[%s15076_s1 + $0x1520] sm:$0xf]  ;;  %v10027_v11 = vld [vmem:[%s15076_s1 + $0x172c] sm:$0xf0]  ;;  %v8724_v13 = vor.u32 %v9931_v63, %v8723_v62  ;;  %5124 = vmatpush.bf16.msrb.mxu2 %v8996_v61  ;;  %v9377_v58 = vld [vmem:[%s15076_s1 + $0x2e4] sm:$0xf]  ;;  %v4870_v62 = vpop.f32.mrf.mxu2 }
  0xbf   :  { %v8979_v5 = vld [vmem:[%s15076_s1 + $0x1620] sm:$0xf]  ;;  %v9927_v14 = vld [vmem:[%s15076_s1 + $0x140c] sm:$0xf0]  ;;  %v8852_v18 = vor.u32 %v9963_v3, %v8851_v0  ;;  %5137 = vmatpush.bf16.msrb.mxu3 %v9124_v2  ;;  %v11343_v39 = vadd.f32 %v4881_v9, %v4869_v17  ;;  %v6517_v59 = vld [vmem:[%s15076_s1 + $0x2f0] sm:$0xf0]  ;;  %v4883_v2 = vpop.f32.mrf.mxu3  ;;  %v6264_v3 = vor.u32 %v9313_v47, %v6261_v51 }
  0xc0   :  { %v9107_v10 = vld [vmem:[%s15076_s1 + $0x1720] sm:$0xf]  ;;  %v9959_v16 = vld [vmem:[%s15076_s1 + $0x150c] sm:$0xf0]  ;;  %v8980_v19 = vor.u32 %v9995_v7, %v8979_v5  ;;  %5099 = vmatpush.bf16.msrb.mxu0 %v8724_v13  ;;  %v6392_v5 = vor.u32 %v9345_v52, %v6389_v53  ;;  %v9309_v9 = vld [vmem:[%s15076_s1 + $0xc4] sm:$0xf] }
  0xc1   :  { %v8707_v12 = vld [vmem:[%s15076_s1 + $0x1400] sm:$0xf]  ;;  %v9991_v24 = vld [vmem:[%s15076_s1 + $0x160c] sm:$0xf0]  ;;  %v9108_v27 = vor.u32 %v10027_v11, %v9107_v10  ;;  %5112 = vmatpush.bf16.msrb.mxu1 %v8852_v18  ;;  %v6520_v10 = vor.u32 %v9377_v58, %v6517_v59  ;;  %v9341_v13 = vld [vmem:[%s15076_s1 + $0x1c4] sm:$0xf] }
  0xc2   :  { %v8835_v15 = vld [vmem:[%s15076_s1 + $0x1500] sm:$0xf]  ;;  %v25_v26 = vld [vmem:[%s15077_s0 + $0x50] sm:$0xff]  ;;  %v8708_v50 = vor.u32 %v9927_v14, %v8707_v12  ;;  %5125 = vmatpush.bf16.msrb.mxu2 %v8980_v19  ;;  %v9373_v17 = vld [vmem:[%s15076_s1 + $0x2c4] sm:$0xf]  ;;  %v11399_v19 = vpack.c.b16 %v858_v1, %v858_v1 }
  0xc3   :  { %v8963_v22 = vld [vmem:[%s15076_s1 + $0x1600] sm:$0xf]  ;;  %v10023_v34 = vld [vmem:[%s15076_s1 + $0x170c] sm:$0xf0]  ;;  %v855_v54 = vunpack.c.l.b16 %v25_v26  ;;  %v8836_v56 = vor.u32 %v9959_v16, %v8835_v15  ;;  %v856_v61 = vunpack.c.h.b16 %v25_v26  ;;  %5138 = vmatpush.bf16.msrb.mxu3 %v9108_v27  ;;  %v6245_v12 = vld [vmem:[%s15076_s1 + $0xd0] sm:$0xf0]  ;;  %v11389_v15 = vpack.c.b16 %v857_v60, %v857_v60  ;;  %v4894_v2 = vpop.f32.mrf.mxu0 }
  0xc4   :  { %v9091_v32 = vld [vmem:[%s15076_s1 + $0x1700] sm:$0xf]  ;;  %v10067_v43 = vld [vmem:[%s15076_s1 + $0x186c] sm:$0xf0]  ;;  %v8964_v57 = vor.u32 %v9991_v24, %v8963_v22  ;;  %5100 = vmatpush.bf16.msrb.mxu0 %v8708_v50  ;;  %v6373_v14 = vld [vmem:[%s15076_s1 + $0x1d0] sm:$0xf0]  ;;  %v6248_v24 = vor.u32 %v9309_v9, %v6245_v12 }
  0xc5   :  { %v9267_v40 = vld [vmem:[%s15076_s1 + $0x1860] sm:$0xf]  ;;  %v9092_v63 = vor.u32 %v10023_v34, %v9091_v32  ;;  %v10063_v8 = vld [vmem:[%s15076_s1 + $0x184c] sm:$0xf0]  ;;  %v11378_v11 = vpack.c.b16 %v855_v54, %v855_v54  ;;  %5113 = vmatpush.bf16.msrb.mxu1 %v8836_v56  ;;  %v11391_v16 = vpack.c.b16 %v856_v61, %v856_v61  ;;  %v6501_v18 = vld [vmem:[%s15076_s1 + $0x2d0] sm:$0xf0]  ;;  %v6376_v26 = vor.u32 %v9341_v13, %v6373_v14  ;;  %v4907_v12 = vpop.f32.mrf.mxu1 }
  0xc6   :  { %v9268_v0 = vor.u32 %v10067_v43, %v9267_v40  ;;  %v9251_v7 = vld [vmem:[%s15076_s1 + $0x1840] sm:$0xf]  ;;  %5126 = vmatpush.bf16.msrb.mxu2 %v8964_v57  ;;  %v10059_v32 = vld [vmem:[%s15076_s1 + $0x182c] sm:$0xf0]  ;;  %v9305_v34 = vld [vmem:[%s15076_s1 + $0xa4] sm:$0xf]  ;;  %v6504_v36 = vor.u32 %v9373_v17, %v6501_v18 }
  0xc7   :  { %5139 = vmatpush.bf16.msrb.mxu3 %v9092_v63  ;;  %v9252_v22 = vor.u32 %v10063_v8, %v9251_v7  ;;  %v9235_v27 = vld [vmem:[%s15076_s1 + $0x1820] sm:$0xf]  ;;  %5101 = vmatmul.bf16.vlgmr.msrb.gmra.mxu0 %v11378_v11  ;;  %v6229_v40 = vld [vmem:[%s15076_s1 + $0xb0] sm:$0xf0]  ;;  %v9337_v43 = vld [vmem:[%s15076_s1 + $0x1a4] sm:$0xf] }
  0xc8   :  { %5149 = vmatpush.bf16.msra.mxu0 %v9268_v0  ;;  %v6357_v47 = vld [vmem:[%s15076_s1 + $0x1b0] sm:$0xf0]  ;;  %5114 = vmatmul.bf16.vlgmr.msrb.gmra.mxu1 %v11391_v16  ;;  %v9369_v48 = vld [vmem:[%s15076_s1 + $0x2a4] sm:$0xf]  ;;  %v9236_v51 = vor.u32 %v10059_v32, %v9235_v27  ;;  %v9219_v52 = vld [vmem:[%s15076_s1 + $0x1800] sm:$0xf]  ;;  %v6232_v53 = vor.u32 %v9305_v34, %v6229_v40 }
  0xc9   :  { %5158 = vmatpush.bf16.msra.mxu1 %v6264_v3  ;;  %5127 = vmatmul.bf16.vlgmr.msrb.gmra.mxu2 %v11389_v15  ;;  %v6485_v50 = vld [vmem:[%s15076_s1 + $0x2b0] sm:$0xf0]  ;;  %v6360_v54 = vor.u32 %v9337_v43, %v6357_v47  ;;  %v10055_v55 = vld [vmem:[%s15076_s1 + $0x180c] sm:$0xf0]  ;;  %v9301_v56 = vld [vmem:[%s15076_s1 + $0x84] sm:$0xf]  ;;  %v4920_v47 = vpop.f32.mrf.mxu2 }
  0xca   :  { %5171 = vmatpush.bf16.msra.mxu2 %v6392_v5  ;;  %5140 = vmatmul.bf16.vlgmr.msrb.gmra.mxu3 %v11399_v19  ;;  %v6213_v57 = vld [vmem:[%s15076_s1 + $0x90] sm:$0xf0]  ;;  %v6488_v58 = vor.u32 %v9369_v48, %v6485_v50  ;;  %v9333_v59 = vld [vmem:[%s15076_s1 + $0x184] sm:$0xf]  ;;  %v9220_v1 = vor.u32 %v10055_v55, %v9219_v52  ;;  %v27_v3 = vld [vmem:[%s15077_s0 + $0x60] sm:$0xf] }
  0xcb   :  { %5184 = vmatpush.bf16.msra.mxu3 %v6520_v10  ;;  %v6341_v60 = vld [vmem:[%s15076_s1 + $0x190] sm:$0xf0]  ;;  %v9365_v61 = vld [vmem:[%s15076_s1 + $0x284] sm:$0xf]  ;;  %v6216_v5 = vor.u32 %v9301_v56, %v6213_v57  ;;  %v4895_v10 = vadd.f32 %v4894_v2, %v11343_v39  ;;  %v859_v27 = vunpack.c.l.b16 %v27_v3 }
  0xcc   :  { %5150 = vmatpush.bf16.msra.mxu0 %v9252_v22  ;;  %v6469_v62 = vld [vmem:[%s15076_s1 + $0x290] sm:$0xf0]  ;;  %v9409_v63 = vld [vmem:[%s15076_s1 + $0x3e4] sm:$0xf]  ;;  %v6344_v7 = vor.u32 %v9333_v59, %v6341_v60  ;;  %v4933_v55 = vpop.f32.mrf.mxu3 }
  0xcd   :  { %5159 = vmatpush.bf16.msra.mxu1 %v6248_v24  ;;  %v6645_v0 = vld [vmem:[%s15076_s1 + $0x3f0] sm:$0xf0]  ;;  %v9297_v8 = vld [vmem:[%s15076_s1 + $0x64] sm:$0xf]  ;;  %v6472_v13 = vor.u32 %v9365_v61, %v6469_v62  ;;  %v4908_v32 = vadd.f32 %v4907_v12, %v4895_v10  ;;  %v11502_v56 = vpack.c.b16 %v859_v27, %v859_v27  ;;  %v4896_v61 = vpop.f32.mrf.mxu0  ;;  %v4909_v2 = vpop.f32.mrf.mxu1 }
  0xce   :  { %5172 = vmatpush.bf16.msra.mxu2 %v6376_v26  ;;  %v6197_v9 = vld [vmem:[%s15076_s1 + $0x70] sm:$0xf0]  ;;  %v6648_v14 = vor.u32 %v9409_v63, %v6645_v0  ;;  %v9329_v17 = vld [vmem:[%s15076_s1 + $0x164] sm:$0xf] }
  0xcf   :  { %5185 = vmatpush.bf16.msra.mxu3 %v6504_v36  ;;  %v6325_v18 = vld [vmem:[%s15076_s1 + $0x170] sm:$0xf0]  ;;  %v9361_v22 = vld [vmem:[%s15076_s1 + $0x264] sm:$0xf]  ;;  %v6200_v34 = vor.u32 %v9297_v8, %v6197_v9 }
  0xd0   :  { %5151 = vmatpush.bf16.msra.mxu0 %v9236_v51  ;;  %v6453_v39 = vld [vmem:[%s15076_s1 + $0x270] sm:$0xf0]  ;;  %v9405_v24 = vld [vmem:[%s15076_s1 + $0x3c4] sm:$0xf]  ;;  %v6328_v36 = vor.u32 %v9329_v17, %v6325_v18 }
  0xd1   :  { %5160 = vmatpush.bf16.msra.mxu1 %v6232_v53  ;;  %v6629_v26 = vld [vmem:[%s15076_s1 + $0x3d0] sm:$0xf0]  ;;  %v9293_v40 = vld [vmem:[%s15076_s1 + $0x44] sm:$0xf]  ;;  %v6456_v48 = vor.u32 %v9361_v22, %v6453_v39 }
  0xd2   :  { %5173 = vmatpush.bf16.msra.mxu2 %v6360_v54  ;;  %v6181_v43 = vld [vmem:[%s15076_s1 + $0x50] sm:$0xf0]  ;;  %v6632_v50 = vor.u32 %v9405_v24, %v6629_v26  ;;  %v9325_v51 = vld [vmem:[%s15076_s1 + $0x144] sm:$0xf]  ;;  %v4921_v54 = vadd.f32 %v4920_v47, %v4908_v32  ;;  %v4922_v24 = vpop.f32.mrf.mxu2 }
  0xd3   :  { %5186 = vmatpush.bf16.msra.mxu3 %v6488_v58  ;;  %v6309_v52 = vld [vmem:[%s15076_s1 + $0x150] sm:$0xf0]  ;;  %v9357_v53 = vld [vmem:[%s15076_s1 + $0x244] sm:$0xf]  ;;  %v6184_v62 = vor.u32 %v9293_v40, %v6181_v43 }
  0xd4   :  { %5152 = vmatpush.bf16.msra.mxu0 %v9220_v1  ;;  %v6437_v57 = vld [vmem:[%s15076_s1 + $0x250] sm:$0xf0]  ;;  %v9401_v58 = vld [vmem:[%s15076_s1 + $0x3a4] sm:$0xf]  ;;  %v11513_v60 = vadd.f32 %v4933_v55, %v4921_v54  ;;  %v6312_v63 = vor.u32 %v9325_v51, %v6309_v52  ;;  %v4935_v40 = vpop.f32.mrf.mxu3 }
  0xd5   :  { %5161 = vmatpush.bf16.msra.mxu1 %v6216_v5  ;;  %v6613_v59 = vld [vmem:[%s15076_s1 + $0x3b0] sm:$0xf0]  ;;  %v9289_v0 = vld [vmem:[%s15076_s1 + $0x24] sm:$0xf]  ;;  %v6440_v3 = vor.u32 %v9357_v53, %v6437_v57 }
  0xd6   :  { %5174 = vmatpush.bf16.msra.mxu2 %v6344_v7  ;;  %v6165_v1 = vld [vmem:[%s15076_s1 + $0x30] sm:$0xf0]  ;;  %v6616_v5 = vor.u32 %v9401_v58, %v6613_v59  ;;  %v9321_v7 = vld [vmem:[%s15076_s1 + $0x124] sm:$0xf] }
  0xd7   :  { %5187 = vmatpush.bf16.msra.mxu3 %v6472_v13  ;;  %v6293_v8 = vld [vmem:[%s15076_s1 + $0x130] sm:$0xf0]  ;;  %v9353_v9 = vld [vmem:[%s15076_s1 + $0x224] sm:$0xf]  ;;  %9281 = vmatmul.msk.bf16.vlgmr.msra.gmra.mxu0 %vm4829_vm0, %v11502_v56 }
  0xd8   :  { %5197 = vmatpush.bf16.msrb.mxu0 %v6648_v14  ;;  %v6421_v10 = vld [vmem:[%s15076_s1 + $0x230] sm:$0xf0]  ;;  %v9397_v12 = vld [vmem:[%s15076_s1 + $0x384] sm:$0xf]  ;;  %v6168_v14 = vor.u32 %v9289_v0, %v6165_v1  ;;  %v6296_v17 = vor.u32 %v9321_v7, %v6293_v8 }
  0xd9   :  { %5162 = vmatpush.bf16.msra.mxu1 %v6200_v34  ;;  %v6597_v13 = vld [vmem:[%s15076_s1 + $0x390] sm:$0xf0]  ;;  %v9285_v18 = vld [vmem:[%s15076_s1 + $0x4] sm:$0xf]  ;;  %v6424_v26 = vor.u32 %v9353_v9, %v6421_v10 }
  0xda   :  { %5175 = vmatpush.bf16.msra.mxu2 %v6328_v36  ;;  %v6149_v22 = vld [vmem:[%s15076_s1 + $0x10] sm:$0xf0]  ;;  %v9317_v39 = vld [vmem:[%s15076_s1 + $0x104] sm:$0xf]  ;;  %v6600_v27 = vor.u32 %v9397_v12, %v6597_v13 }
  0xdb   :  { %5188 = vmatpush.bf16.msra.mxu3 %v6456_v48  ;;  %v6277_v32 = vld [vmem:[%s15076_s1 + $0x110] sm:$0xf0]  ;;  %v9349_v34 = vld [vmem:[%s15076_s1 + $0x204] sm:$0xf]  ;;  %v6152_v53 = vor.u32 %v9285_v18, %v6149_v22 }
  0xdc   :  { %5198 = vmatpush.bf16.msrb.mxu0 %v6632_v50  ;;  %v6405_v36 = vld [vmem:[%s15076_s1 + $0x210] sm:$0xf0]  ;;  %v9393_v43 = vld [vmem:[%s15076_s1 + $0x364] sm:$0xf]  ;;  %v6280_v54 = vor.u32 %v9317_v39, %v6277_v32 }
  0xdd   :  { %5163 = vmatpush.bf16.msra.mxu1 %v6184_v62  ;;  %v6581_v47 = vld [vmem:[%s15076_s1 + $0x370] sm:$0xf0]  ;;  %v9441_v48 = vld [vmem:[%s15076_s1 + $0x4e4] sm:$0xf]  ;;  %v6408_v58 = vor.u32 %v9349_v34, %v6405_v36 }
  0xde   :  { %5176 = vmatpush.bf16.msra.mxu2 %v6312_v63  ;;  %v6773_v50 = vld [vmem:[%s15076_s1 + $0x4f0] sm:$0xf0]  ;;  %v9473_v51 = vld [vmem:[%s15076_s1 + $0x5e4] sm:$0xf]  ;;  %v6584_v59 = vor.u32 %v9393_v43, %v6581_v47 }
  0xdf   :  { %5189 = vmatpush.bf16.msra.mxu3 %v6440_v3  ;;  %v6901_v52 = vld [vmem:[%s15076_s1 + $0x5f0] sm:$0xf0]  ;;  %v9505_v55 = vld [vmem:[%s15076_s1 + $0x6e4] sm:$0xf]  ;;  %v6776_v61 = vor.u32 %v9441_v48, %v6773_v50 }
  0xe0   :  { %5199 = vmatpush.bf16.msrb.mxu0 %v6616_v5  ;;  %v7029_v57 = vld [vmem:[%s15076_s1 + $0x6f0] sm:$0xf0]  ;;  %v6904_v62 = vor.u32 %v9473_v51, %v6901_v52  ;;  %v9389_v63 = vld [vmem:[%s15076_s1 + $0x344] sm:$0xf] }
  0xe1   :  { %5164 = vmatpush.bf16.msra.mxu1 %v6168_v14  ;;  %v6565_v0 = vld [vmem:[%s15076_s1 + $0x350] sm:$0xf0]  ;;  %v9437_v1 = vld [vmem:[%s15076_s1 + $0x4c4] sm:$0xf]  ;;  %v7032_v2 = vor.u32 %v9505_v55, %v7029_v57 }
  0xe2   :  { %5177 = vmatpush.bf16.msra.mxu2 %v6296_v17  ;;  %v6757_v3 = vld [vmem:[%s15076_s1 + $0x4d0] sm:$0xf0]  ;;  %v9469_v5 = vld [vmem:[%s15076_s1 + $0x5c4] sm:$0xf]  ;;  %v6568_v10 = vor.u32 %v9389_v63, %v6565_v0 }
  0xe3   :  { %5190 = vmatpush.bf16.msra.mxu3 %v6424_v26  ;;  %v6885_v7 = vld [vmem:[%s15076_s1 + $0x5d0] sm:$0xf0]  ;;  %v9501_v8 = vld [vmem:[%s15076_s1 + $0x6c4] sm:$0xf]  ;;  %v6760_v12 = vor.u32 %v9437_v1, %v6757_v3 }
  0xe4   :  { %5200 = vmatpush.bf16.msrb.mxu0 %v6600_v27  ;;  %v7013_v9 = vld [vmem:[%s15076_s1 + $0x6d0] sm:$0xf0]  ;;  %v6888_v13 = vor.u32 %v9469_v5, %v6885_v7  ;;  %v9385_v14 = vld [vmem:[%s15076_s1 + $0x324] sm:$0xf]  ;;  %v4946_v55 = vpop.f32.mrf.mxu0 }
  0xe5   :  { %5165 = vmatpush.bf16.msra.mxu1 %v6152_v53  ;;  %v6549_v17 = vld [vmem:[%s15076_s1 + $0x330] sm:$0xf0]  ;;  %v9433_v18 = vld [vmem:[%s15076_s1 + $0x4a4] sm:$0xf]  ;;  %v7016_v22 = vor.u32 %v9501_v8, %v7013_v9  ;;  %v4959_v63 = vpop.f32.mrf.mxu1 }
  0xe6   :  { %5178 = vmatpush.bf16.msra.mxu2 %v6280_v54  ;;  %v6741_v39 = vld [vmem:[%s15076_s1 + $0x4b0] sm:$0xf0]  ;;  %v9465_v24 = vld [vmem:[%s15076_s1 + $0x5a4] sm:$0xf]  ;;  %v6552_v34 = vor.u32 %v9385_v14, %v6549_v17 }
  0xe7   :  { %5191 = vmatpush.bf16.msra.mxu3 %v6408_v58  ;;  %v6869_v26 = vld [vmem:[%s15076_s1 + $0x5b0] sm:$0xf0]  ;;  %v9497_v27 = vld [vmem:[%s15076_s1 + $0x6a4] sm:$0xf]  ;;  %v6744_v40 = vor.u32 %v9433_v18, %v6741_v39 }
  0xe8   :  { %5201 = vmatpush.bf16.msrb.mxu0 %v6584_v59  ;;  %v6997_v32 = vld [vmem:[%s15076_s1 + $0x6b0] sm:$0xf0]  ;;  %5166 = vmatmul.bf16.vlgmr.msra.gmra.mxu1 %v10391_v20  ;;  %v9381_v36 = vld [vmem:[%s15076_s1 + $0x304] sm:$0xf]  ;;  %v6872_v43 = vor.u32 %v9465_v24, %v6869_v26 }
  0xe9   :  { %5210 = vmatpush.bf16.msrb.mxu1 %v6776_v61  ;;  %5179 = vmatmul.bf16.vlgmr.msra.gmra.mxu2 %v10394_v21  ;;  %v6533_v47 = vld [vmem:[%s15076_s1 + $0x310] sm:$0xf0]  ;;  %v9429_v48 = vld [vmem:[%s15076_s1 + $0x484] sm:$0xf]  ;;  %v7000_v51 = vor.u32 %v9497_v27, %v6997_v32  ;;  %v4947_v61 = vadd.f32 %v4946_v55, %v11513_v60  ;;  %v4972_v26 = vpop.f32.mrf.mxu2 }
  0xea   :  { %5223 = vmatpush.bf16.msrb.mxu2 %v6904_v62  ;;  %5192 = vmatmul.bf16.vlgmr.msra.gmra.mxu3 %v10359_v4  ;;  %v6725_v50 = vld [vmem:[%s15076_s1 + $0x490] sm:$0xf0]  ;;  %v9461_v52 = vld [vmem:[%s15076_s1 + $0x584] sm:$0xf]  ;;  %v6536_v62 = vor.u32 %v9381_v36, %v6533_v47 }
  0xeb   :  { %5236 = vmatpush.bf16.msrb.mxu3 %v7032_v2  ;;  %v6853_v53 = vld [vmem:[%s15076_s1 + $0x590] sm:$0xf0]  ;;  %v9493_v54 = vld [vmem:[%s15076_s1 + $0x684] sm:$0xf]  ;;  %v6728_v0 = vor.u32 %v9429_v48, %v6725_v50  ;;  %v4960_v7 = vadd.f32 %v4959_v63, %v4947_v61 }
  0xec   :  { %5202 = vmatpush.bf16.msrb.mxu0 %v6568_v10  ;;  %v6981_v57 = vld [vmem:[%s15076_s1 + $0x690] sm:$0xf0]  ;;  %v9537_v58 = vld [vmem:[%s15076_s1 + $0x7e4] sm:$0xf]  ;;  %v6856_v1 = vor.u32 %v9461_v52, %v6853_v53 }
  0xed   :  { %5211 = vmatpush.bf16.msrb.mxu1 %v6760_v12  ;;  %v7157_v59 = vld [vmem:[%s15076_s1 + $0x7f0] sm:$0xf0]  ;;  %v9425_v2 = vld [vmem:[%s15076_s1 + $0x464] sm:$0xf]  ;;  %v6984_v5 = vor.u32 %v9493_v54, %v6981_v57  ;;  %v4961_v52 = vpop.f32.mrf.mxu1 }
  0xee   :  { %5224 = vmatpush.bf16.msrb.mxu2 %v6888_v13  ;;  %v6709_v3 = vld [vmem:[%s15076_s1 + $0x470] sm:$0xf0]  ;;  %v7160_v8 = vor.u32 %v9537_v58, %v7157_v59  ;;  %v9457_v60 = vld [vmem:[%s15076_s1 + $0x564] sm:$0xf] }
  0xef   :  { %5237 = vmatpush.bf16.msrb.mxu3 %v7016_v22  ;;  %v6837_v9 = vld [vmem:[%s15076_s1 + $0x570] sm:$0xf0]  ;;  %v9489_v10 = vld [vmem:[%s15076_s1 + $0x664] sm:$0xf]  ;;  %v6712_v17 = vor.u32 %v9425_v2, %v6709_v3 }
  0xf0   :  { %5203 = vmatpush.bf16.msrb.mxu0 %v6552_v34  ;;  %v6965_v12 = vld [vmem:[%s15076_s1 + $0x670] sm:$0xf0]  ;;  %v9533_v13 = vld [vmem:[%s15076_s1 + $0x7c4] sm:$0xf]  ;;  %v6840_v18 = vor.u32 %v9457_v60, %v6837_v9 }
  0xf1   :  { %5212 = vmatpush.bf16.msrb.mxu1 %v6744_v40  ;;  %v7141_v14 = vld [vmem:[%s15076_s1 + $0x7d0] sm:$0xf0]  ;;  %v9421_v22 = vld [vmem:[%s15076_s1 + $0x444] sm:$0xf]  ;;  %v6968_v24 = vor.u32 %v9489_v10, %v6965_v12  ;;  %v4973_v40 = vadd.f32 %v4972_v26, %v4960_v7 }
  0xf2   :  { %5225 = vmatpush.bf16.msrb.mxu2 %v6872_v43  ;;  %v6693_v39 = vld [vmem:[%s15076_s1 + $0x450] sm:$0xf0]  ;;  %v7144_v27 = vor.u32 %v9533_v13, %v7141_v14  ;;  %v9453_v32 = vld [vmem:[%s15076_s1 + $0x544] sm:$0xf]  ;;  %v4985_v43 = vpop.f32.mrf.mxu3 }
  0xf3   :  { %5238 = vmatpush.bf16.msrb.mxu3 %v7000_v51  ;;  %v6821_v34 = vld [vmem:[%s15076_s1 + $0x550] sm:$0xf0]  ;;  %v9485_v36 = vld [vmem:[%s15076_s1 + $0x644] sm:$0xf]  ;;  %v4948_v51 = vpop.f32.mrf.mxu0  ;;  %v11714_v53 = vadd.f32 %v4985_v43, %v4973_v40  ;;  %v6696_v54 = vor.u32 %v9421_v22, %v6693_v39 }
  0xf4   :  { %5204 = vmatpush.bf16.msrb.mxu0 %v6536_v62  ;;  %v6949_v47 = vld [vmem:[%s15076_s1 + $0x650] sm:$0xf0]  ;;  %v9529_v48 = vld [vmem:[%s15076_s1 + $0x7a4] sm:$0xf]  ;;  %v6824_v55 = vor.u32 %v9453_v32, %v6821_v34 }
  0xf5   :  { %5213 = vmatpush.bf16.msrb.mxu1 %v6728_v0  ;;  %v7125_v50 = vld [vmem:[%s15076_s1 + $0x7b0] sm:$0xf0]  ;;  %v9417_v57 = vld [vmem:[%s15076_s1 + $0x424] sm:$0xf]  ;;  %v6952_v59 = vor.u32 %v9485_v36, %v6949_v47 }
  0xf6   :  { %5226 = vmatpush.bf16.msrb.mxu2 %v6856_v1  ;;  %v6677_v58 = vld [vmem:[%s15076_s1 + $0x430] sm:$0xf0]  ;;  %v7128_v61 = vor.u32 %v9529_v48, %v7125_v50  ;;  %v9449_v62 = vld [vmem:[%s15076_s1 + $0x524] sm:$0xf] }
  0xf7   :  { %5239 = vmatpush.bf16.msrb.mxu3 %v6984_v5  ;;  %5205 = vmatmul.bf16.vlgmr.msrb.gmra.mxu0 %v10364_v6  ;;  %v6805_v63 = vld [vmem:[%s15076_s1 + $0x530] sm:$0xf0]  ;;  %v9481_v0 = vld [vmem:[%s15076_s1 + $0x624] sm:$0xf]  ;;  %v6680_v5 = vor.u32 %v9417_v57, %v6677_v58 }
  0xf8   :  { %5249 = vmatpush.bf16.msra.mxu0 %v7160_v8  ;;  %v6933_v1 = vld [vmem:[%s15076_s1 + $0x630] sm:$0xf0]  ;;  %v9525_v2 = vld [vmem:[%s15076_s1 + $0x784] sm:$0xf]  ;;  %v6808_v7 = vor.u32 %v9449_v62, %v6805_v63 }
  0xf9   :  { %5214 = vmatpush.bf16.msrb.mxu1 %v6712_v17  ;;  %v7109_v3 = vld [vmem:[%s15076_s1 + $0x790] sm:$0xf0]  ;;  %v9413_v8 = vld [vmem:[%s15076_s1 + $0x404] sm:$0xf]  ;;  %v6936_v10 = vor.u32 %v9481_v0, %v6933_v1 }
  0xfa   :  { %5227 = vmatpush.bf16.msrb.mxu2 %v6840_v18  ;;  %v6661_v60 = vld [vmem:[%s15076_s1 + $0x410] sm:$0xf0]  ;;  %v9445_v9 = vld [vmem:[%s15076_s1 + $0x504] sm:$0xf]  ;;  %v7112_v12 = vor.u32 %v9525_v2, %v7109_v3  ;;  %v4974_v18 = vpop.f32.mrf.mxu2  ;;  %v4987_v26 = vpop.f32.mrf.mxu3 }
  0xfb   :  { %5240 = vmatpush.bf16.msrb.mxu3 %v6968_v24  ;;  %v6789_v13 = vld [vmem:[%s15076_s1 + $0x510] sm:$0xf0]  ;;  %v9477_v14 = vld [vmem:[%s15076_s1 + $0x604] sm:$0xf]  ;;  %v6664_v36 = vor.u32 %v9413_v8, %v6661_v60 }
  0xfc   :  { %5250 = vmatpush.bf16.msra.mxu0 %v7144_v27  ;;  %v6917_v17 = vld [vmem:[%s15076_s1 + $0x610] sm:$0xf0]  ;;  %v9521_v22 = vld [vmem:[%s15076_s1 + $0x764] sm:$0xf]  ;;  %v6792_v40 = vor.u32 %v9445_v9, %v6789_v13 }
  0xfd   :  { %5215 = vmatpush.bf16.msrb.mxu1 %v6696_v54  ;;  %v7093_v39 = vld [vmem:[%s15076_s1 + $0x770] sm:$0xf0]  ;;  %v9569_v24 = vld [vmem:[%s15076_s1 + $0x8e4] sm:$0xf]  ;;  %v6920_v48 = vor.u32 %v9477_v14, %v6917_v17 }
  0xfe   :  { %5228 = vmatpush.bf16.msrb.mxu2 %v6824_v55  ;;  %v7285_v27 = vld [vmem:[%s15076_s1 + $0x8f0] sm:$0xf0]  ;;  %v9601_v32 = vld [vmem:[%s15076_s1 + $0x9e4] sm:$0xf]  ;;  %v7096_v50 = vor.u32 %v9521_v22, %v7093_v39 }
  0xff   :  { %5241 = vmatpush.bf16.msrb.mxu3 %v6952_v59  ;;  %v7413_v34 = vld [vmem:[%s15076_s1 + $0x9f0] sm:$0xf0]  ;;  %v9633_v43 = vld [vmem:[%s15076_s1 + $0xae4] sm:$0xf]  ;;  %v7288_v51 = vor.u32 %v9569_v24, %v7285_v27 }
 0x100   :  { %5251 = vmatpush.bf16.msra.mxu0 %v7128_v61  ;;  %v7541_v47 = vld [vmem:[%s15076_s1 + $0xaf0] sm:$0xf0]  ;;  %v7416_v52 = vor.u32 %v9601_v32, %v7413_v34  ;;  %v9517_v54 = vld [vmem:[%s15076_s1 + $0x744] sm:$0xf] }
 0x101   :  { %5216 = vmatpush.bf16.msrb.mxu1 %v6680_v5  ;;  %v7077_v55 = vld [vmem:[%s15076_s1 + $0x750] sm:$0xf0]  ;;  %v9565_v57 = vld [vmem:[%s15076_s1 + $0x8c4] sm:$0xf]  ;;  %v7544_v58 = vor.u32 %v9633_v43, %v7541_v47 }
 0x102   :  { %5229 = vmatpush.bf16.msrb.mxu2 %v6808_v7  ;;  %v7269_v59 = vld [vmem:[%s15076_s1 + $0x8d0] sm:$0xf0]  ;;  %v9597_v61 = vld [vmem:[%s15076_s1 + $0x9c4] sm:$0xf]  ;;  %v7080_v1 = vor.u32 %v9517_v54, %v7077_v55 }
 0x103   :  { %5242 = vmatpush.bf16.msrb.mxu3 %v6936_v10  ;;  %v7397_v62 = vld [vmem:[%s15076_s1 + $0x9d0] sm:$0xf0]  ;;  %v9629_v63 = vld [vmem:[%s15076_s1 + $0xac4] sm:$0xf]  ;;  %v7272_v2 = vor.u32 %v9565_v57, %v7269_v59  ;;  %v5011_v54 = vpop.f32.mrf.mxu1 }
 0x104   :  { %5252 = vmatpush.bf16.msra.mxu0 %v7112_v12  ;;  %v7525_v0 = vld [vmem:[%s15076_s1 + $0xad0] sm:$0xf0]  ;;  %v7400_v3 = vor.u32 %v9597_v61, %v7397_v62  ;;  %v9513_v5 = vld [vmem:[%s15076_s1 + $0x724] sm:$0xf]  ;;  %v4998_v43 = vpop.f32.mrf.mxu0 }
 0x105   :  { %5217 = vmatpush.bf16.msrb.mxu1 %v6664_v36  ;;  %v7061_v7 = vld [vmem:[%s15076_s1 + $0x730] sm:$0xf0]  ;;  %v9561_v8 = vld [vmem:[%s15076_s1 + $0x8a4] sm:$0xf]  ;;  %v7528_v60 = vor.u32 %v9629_v63, %v7525_v0 }
 0x106   :  { %5230 = vmatpush.bf16.msrb.mxu2 %v6792_v40  ;;  %v7253_v9 = vld [vmem:[%s15076_s1 + $0x8b0] sm:$0xf0]  ;;  %v9593_v10 = vld [vmem:[%s15076_s1 + $0x9a4] sm:$0xf]  ;;  %v7064_v17 = vor.u32 %v9513_v5, %v7061_v7 }
 0x107   :  { %5243 = vmatpush.bf16.msrb.mxu3 %v6920_v48  ;;  %v7381_v12 = vld [vmem:[%s15076_s1 + $0x9b0] sm:$0xf0]  ;;  %v9625_v13 = vld [vmem:[%s15076_s1 + $0xaa4] sm:$0xf]  ;;  %v7256_v22 = vor.u32 %v9561_v8, %v7253_v9 }
 0x108   :  { %5253 = vmatpush.bf16.msra.mxu0 %v7096_v50  ;;  %v7509_v14 = vld [vmem:[%s15076_s1 + $0xab0] sm:$0xf0]  ;;  %5218 = vmatmul.bf16.vlgmr.msrb.gmra.mxu1 %v10550_v41  ;;  %v9509_v18 = vld [vmem:[%s15076_s1 + $0x704] sm:$0xf]  ;;  %v7384_v39 = vor.u32 %v9593_v10, %v7381_v12 }
 0x109   :  { %5262 = vmatpush.bf16.msra.mxu1 %v7288_v51  ;;  %5231 = vmatmul.bf16.vlgmr.msrb.gmra.mxu2 %v10554_v44  ;;  %v7045_v24 = vld [vmem:[%s15076_s1 + $0x710] sm:$0xf0]  ;;  %v9557_v26 = vld [vmem:[%s15076_s1 + $0x884] sm:$0xf]  ;;  %v7512_v32 = vor.u32 %v9625_v13, %v7509_v14  ;;  %v4999_v51 = vadd.f32 %v4998_v43, %v11714_v53 }
 0x10a   :  { %5275 = vmatpush.bf16.msra.mxu2 %v7416_v52  ;;  %5244 = vmatmul.bf16.vlgmr.msrb.gmra.mxu3 %v10542_v38  ;;  %v7237_v27 = vld [vmem:[%s15076_s1 + $0x890] sm:$0xf0]  ;;  %v9589_v34 = vld [vmem:[%s15076_s1 + $0x984] sm:$0xf]  ;;  %v7048_v52 = vor.u32 %v9509_v18, %v7045_v24 }
 0x10b   :  { %5288 = vmatpush.bf16.msra.mxu3 %v7544_v58  ;;  %v7365_v36 = vld [vmem:[%s15076_s1 + $0x990] sm:$0xf0]  ;;  %v9621_v40 = vld [vmem:[%s15076_s1 + $0xa84] sm:$0xf]  ;;  %v7240_v55 = vor.u32 %v9557_v26, %v7237_v27  ;;  %v5012_v62 = vadd.f32 %v5011_v54, %v4999_v51 }
 0x10c   :  { %5254 = vmatpush.bf16.msra.mxu0 %v7080_v1  ;;  %v7493_v47 = vld [vmem:[%s15076_s1 + $0xa90] sm:$0xf0]  ;;  %v9665_v48 = vld [vmem:[%s15076_s1 + $0xbe4] sm:$0xf]  ;;  %v7368_v57 = vor.u32 %v9589_v34, %v7365_v36  ;;  %v5024_v12 = vpop.f32.mrf.mxu2  ;;  %v5013_v34 = vpop.f32.mrf.mxu1 }
 0x10d   :  { %5263 = vmatpush.bf16.msra.mxu1 %v7272_v2  ;;  %v7669_v50 = vld [vmem:[%s15076_s1 + $0xbf0] sm:$0xf0]  ;;  %v9553_v58 = vld [vmem:[%s15076_s1 + $0x864] sm:$0xf]  ;;  %v7496_v61 = vor.u32 %v9621_v40, %v7493_v47 }
 0x10e   :  { %5276 = vmatpush.bf16.msra.mxu2 %v7400_v3  ;;  %v7221_v59 = vld [vmem:[%s15076_s1 + $0x870] sm:$0xf0]  ;;  %v7672_v63 = vor.u32 %v9665_v48, %v7669_v50  ;;  %v9585_v53 = vld [vmem:[%s15076_s1 + $0x964] sm:$0xf] }
 0x10f   :  { %5289 = vmatpush.bf16.msra.mxu3 %v7528_v60  ;;  %v7349_v0 = vld [vmem:[%s15076_s1 + $0x970] sm:$0xf0]  ;;  %v9617_v1 = vld [vmem:[%s15076_s1 + $0xa64] sm:$0xf]  ;;  %v7224_v7 = vor.u32 %v9553_v58, %v7221_v59 }
 0x110   :  { %5255 = vmatpush.bf16.msra.mxu0 %v7064_v17  ;;  %v7477_v2 = vld [vmem:[%s15076_s1 + $0xa70] sm:$0xf0]  ;;  %v9661_v3 = vld [vmem:[%s15076_s1 + $0xbc4] sm:$0xf]  ;;  %v7352_v8 = vor.u32 %v9585_v53, %v7349_v0 }
 0x111   :  { %5264 = vmatpush.bf16.msra.mxu1 %v7256_v22  ;;  %v7653_v5 = vld [vmem:[%s15076_s1 + $0xbd0] sm:$0xf0]  ;;  %v9549_v60 = vld [vmem:[%s15076_s1 + $0x844] sm:$0xf]  ;;  %v7480_v10 = vor.u32 %v9617_v1, %v7477_v2  ;;  %v5025_v22 = vadd.f32 %v5024_v12, %v5012_v62 }
 0x112   :  { %5277 = vmatpush.bf16.msra.mxu2 %v7384_v39  ;;  %v7205_v9 = vld [vmem:[%s15076_s1 + $0x850] sm:$0xf0]  ;;  %v7656_v13 = vor.u32 %v9661_v3, %v7653_v5  ;;  %v9581_v14 = vld [vmem:[%s15076_s1 + $0x944] sm:$0xf]  ;;  %v5037_v39 = vpop.f32.mrf.mxu3 }
 0x113   :  { %5290 = vmatpush.bf16.msra.mxu3 %v7512_v32  ;;  %v7333_v17 = vld [vmem:[%s15076_s1 + $0x950] sm:$0xf0]  ;;  %v9613_v18 = vld [vmem:[%s15076_s1 + $0xa44] sm:$0xf]  ;;  %v5000_v32 = vpop.f32.mrf.mxu0  ;;  %v11913_v36 = vadd.f32 %v5037_v39, %v5025_v22  ;;  %v7208_v40 = vor.u32 %v9549_v60, %v7205_v9 }
 0x114   :  { %5256 = vmatpush.bf16.msra.mxu0 %v7048_v52  ;;  %v7461_v24 = vld [vmem:[%s15076_s1 + $0xa50] sm:$0xf0]  ;;  %v9657_v26 = vld [vmem:[%s15076_s1 + $0xba4] sm:$0xf]  ;;  %v7336_v43 = vor.u32 %v9581_v14, %v7333_v17 }
 0x115   :  { %5265 = vmatpush.bf16.msra.mxu1 %v7240_v55  ;;  %v7637_v27 = vld [vmem:[%s15076_s1 + $0xbb0] sm:$0xf0]  ;;  %v9545_v47 = vld [vmem:[%s15076_s1 + $0x824] sm:$0xf]  ;;  %v7464_v50 = vor.u32 %v9613_v18, %v7461_v24 }
 0x116   :  { %5278 = vmatpush.bf16.msra.mxu2 %v7368_v57  ;;  %v7189_v48 = vld [vmem:[%s15076_s1 + $0x830] sm:$0xf0]  ;;  %v7640_v51 = vor.u32 %v9657_v26, %v7637_v27  ;;  %v9577_v52 = vld [vmem:[%s15076_s1 + $0x924] sm:$0xf] }
 0x117   :  { %5291 = vmatpush.bf16.msra.mxu3 %v7496_v61  ;;  %5257 = vmatmul.bf16.vlgmr.msra.gmra.mxu0 %v10552_v42  ;;  %v7317_v54 = vld [vmem:[%s15076_s1 + $0x930] sm:$0xf0]  ;;  %v9609_v55 = vld [vmem:[%s15076_s1 + $0xa24] sm:$0xf]  ;;  %v7192_v61 = vor.u32 %v9545_v47, %v7189_v48 }
 0x118   :  { %5301 = vmatpush.bf16.msrb.mxu0 %v7672_v63  ;;  %v7445_v57 = vld [vmem:[%s15076_s1 + $0xa30] sm:$0xf0]  ;;  %v9653_v58 = vld [vmem:[%s15076_s1 + $0xb84] sm:$0xf]  ;;  %v7320_v62 = vor.u32 %v9577_v52, %v7317_v54 }
 0x119   :  { %5266 = vmatpush.bf16.msra.mxu1 %v7224_v7  ;;  %v7621_v59 = vld [vmem:[%s15076_s1 + $0xb90] sm:$0xf0]  ;;  %v9541_v63 = vld [vmem:[%s15076_s1 + $0x804] sm:$0xf]  ;;  %v7448_v1 = vor.u32 %v9609_v55, %v7445_v57 }
 0x11a   :  { %5279 = vmatpush.bf16.msra.mxu2 %v7352_v8  ;;  %v7173_v53 = vld [vmem:[%s15076_s1 + $0x810] sm:$0xf0]  ;;  %v9573_v0 = vld [vmem:[%s15076_s1 + $0x904] sm:$0xf]  ;;  %v7624_v2 = vor.u32 %v9653_v58, %v7621_v59  ;;  %v5026_v8 = vpop.f32.mrf.mxu2  ;;  %v5039_v12 = vpop.f32.mrf.mxu3 }
 0x11b   :  { %5292 = vmatpush.bf16.msra.mxu3 %v7480_v10  ;;  %v7301_v3 = vld [vmem:[%s15076_s1 + $0x910] sm:$0xf0]  ;;  %v9605_v5 = vld [vmem:[%s15076_s1 + $0xa04] sm:$0xf]  ;;  %v7176_v18 = vor.u32 %v9541_v63, %v7173_v53 }
 0x11c   :  { %5302 = vmatpush.bf16.msrb.mxu0 %v7656_v13  ;;  %v7429_v7 = vld [vmem:[%s15076_s1 + $0xa10] sm:$0xf0]  ;;  %v9649_v60 = vld [vmem:[%s15076_s1 + $0xb64] sm:$0xf]  ;;  %v7304_v22 = vor.u32 %v9573_v0, %v7301_v3 }
 0x11d   :  { %5267 = vmatpush.bf16.msra.mxu1 %v7208_v40  ;;  %v7605_v9 = vld [vmem:[%s15076_s1 + $0xb70] sm:$0xf0]  ;;  %v9697_v10 = vld [vmem:[%s15076_s1 + $0xce4] sm:$0xf]  ;;  %v7432_v26 = vor.u32 %v9605_v5, %v7429_v7 }
 0x11e   :  { %5280 = vmatpush.bf16.msra.mxu2 %v7336_v43  ;;  %v7797_v13 = vld [vmem:[%s15076_s1 + $0xcf0] sm:$0xf0]  ;;  %v9729_v14 = vld [vmem:[%s15076_s1 + $0xde4] sm:$0xf]  ;;  %v7608_v27 = vor.u32 %v9649_v60, %v7605_v9 }
 0x11f   :  { %5293 = vmatpush.bf16.msra.mxu3 %v7464_v50  ;;  %v7925_v17 = vld [vmem:[%s15076_s1 + $0xdf0] sm:$0xf0]  ;;  %v9761_v39 = vld [vmem:[%s15076_s1 + $0xee4] sm:$0xf]  ;;  %v7800_v32 = vor.u32 %v9697_v10, %v7797_v13 }
 0x120   :  { %5303 = vmatpush.bf16.msrb.mxu0 %v7640_v51  ;;  %v8053_v24 = vld [vmem:[%s15076_s1 + $0xef0] sm:$0xf0]  ;;  %v7928_v34 = vor.u32 %v9729_v14, %v7925_v17  ;;  %v9645_v40 = vld [vmem:[%s15076_s1 + $0xb44] sm:$0xf] }
 0x121   :  { %5268 = vmatpush.bf16.msra.mxu1 %v7192_v61  ;;  %v7589_v43 = vld [vmem:[%s15076_s1 + $0xb50] sm:$0xf0]  ;;  %v9693_v47 = vld [vmem:[%s15076_s1 + $0xcc4] sm:$0xf]  ;;  %v8056_v48 = vor.u32 %v9761_v39, %v8053_v24 }
 0x122   :  { %5281 = vmatpush.bf16.msra.mxu2 %v7320_v62  ;;  %v7781_v50 = vld [vmem:[%s15076_s1 + $0xcd0] sm:$0xf0]  ;;  %v9725_v51 = vld [vmem:[%s15076_s1 + $0xdc4] sm:$0xf]  ;;  %v7592_v57 = vor.u32 %v9645_v40, %v7589_v43 }
 0x123   :  { %5294 = vmatpush.bf16.msra.mxu3 %v7448_v1  ;;  %v7909_v52 = vld [vmem:[%s15076_s1 + $0xdd0] sm:$0xf0]  ;;  %v9757_v54 = vld [vmem:[%s15076_s1 + $0xec4] sm:$0xf]  ;;  %v7784_v58 = vor.u32 %v9693_v47, %v7781_v50 }
 0x124   :  { %5304 = vmatpush.bf16.msrb.mxu0 %v7624_v2  ;;  %v8037_v55 = vld [vmem:[%s15076_s1 + $0xed0] sm:$0xf0]  ;;  %v7912_v59 = vor.u32 %v9725_v51, %v7909_v52  ;;  %v9641_v61 = vld [vmem:[%s15076_s1 + $0xb24] sm:$0xf] }
 0x125   :  { %5269 = vmatpush.bf16.msra.mxu1 %v7176_v18  ;;  %v7573_v62 = vld [vmem:[%s15076_s1 + $0xb30] sm:$0xf0]  ;;  %v9689_v63 = vld [vmem:[%s15076_s1 + $0xca4] sm:$0xf]  ;;  %v8040_v53 = vor.u32 %v9757_v54, %v8037_v55  ;;  %v5050_v39 = vpop.f32.mrf.mxu0 }
 0x126   :  { %5282 = vmatpush.bf16.msra.mxu2 %v7304_v22  ;;  %v7765_v0 = vld [vmem:[%s15076_s1 + $0xcb0] sm:$0xf0]  ;;  %v9721_v1 = vld [vmem:[%s15076_s1 + $0xda4] sm:$0xf]  ;;  %v7576_v7 = vor.u32 %v9641_v61, %v7573_v62  ;;  %v5063_v40 = vpop.f32.mrf.mxu1 }
 0x127   :  { %5295 = vmatpush.bf16.msra.mxu3 %v7432_v26  ;;  %v7893_v2 = vld [vmem:[%s15076_s1 + $0xdb0] sm:$0xf0]  ;;  %v9753_v3 = vld [vmem:[%s15076_s1 + $0xea4] sm:$0xf]  ;;  %v7768_v60 = vor.u32 %v9689_v63, %v7765_v0 }
 0x128   :  { %5305 = vmatpush.bf16.msrb.mxu0 %v7608_v27  ;;  %5270 = vmatmul.bf16.vlgmr.msra.gmra.mxu1 %v10743_v25  ;;  %v8021_v5 = vld [vmem:[%s15076_s1 + $0xeb0] sm:$0xf0]  ;;  %v9637_v8 = vld [vmem:[%s15076_s1 + $0xb04] sm:$0xf]  ;;  %v7896_v9 = vor.u32 %v9721_v1, %v7893_v2 }
 0x129   :  { %5314 = vmatpush.bf16.msrb.mxu1 %v7800_v32  ;;  %5283 = vmatmul.bf16.vlgmr.msra.gmra.mxu2 %v10756_v30  ;;  %v7557_v10 = vld [vmem:[%s15076_s1 + $0xb10] sm:$0xf0]  ;;  %v9685_v12 = vld [vmem:[%s15076_s1 + $0xc84] sm:$0xf]  ;;  %v8024_v14 = vor.u32 %v9753_v3, %v8021_v5  ;;  %v5051_v32 = vadd.f32 %v5050_v39, %v11913_v36 }
 0x12a   :  { %5327 = vmatpush.bf16.msrb.mxu2 %v7928_v34  ;;  %5296 = vmatmul.bf16.vlgmr.msra.gmra.mxu3 %v10754_v29  ;;  %v7749_v13 = vld [vmem:[%s15076_s1 + $0xc90] sm:$0xf0]  ;;  %v9717_v17 = vld [vmem:[%s15076_s1 + $0xd84] sm:$0xf]  ;;  %v7560_v34 = vor.u32 %v9637_v8, %v7557_v10  ;;  %v5076_v2 = vpop.f32.mrf.mxu2 }
 0x12b   :  { %5340 = vmatpush.bf16.msrb.mxu3 %v8056_v48  ;;  %v7877_v18 = vld [vmem:[%s15076_s1 + $0xd90] sm:$0xf0]  ;;  %v9749_v22 = vld [vmem:[%s15076_s1 + $0xe84] sm:$0xf]  ;;  %v7752_v43 = vor.u32 %v9685_v12, %v7749_v13  ;;  %v5064_v52 = vadd.f32 %v5063_v40, %v5051_v32 }
 0x12c   :  { %5306 = vmatpush.bf16.msrb.mxu0 %v7592_v57  ;;  %v8005_v24 = vld [vmem:[%s15076_s1 + $0xe90] sm:$0xf0]  ;;  %v9793_v26 = vld [vmem:[%s15076_s1 + $0xfe4] sm:$0xf]  ;;  %v7880_v47 = vor.u32 %v9717_v17, %v7877_v18 }
 0x12d   :  { %5315 = vmatpush.bf16.msrb.mxu1 %v7784_v58  ;;  %v8181_v27 = vld [vmem:[%s15076_s1 + $0xff0] sm:$0xf0]  ;;  %v9681_v48 = vld [vmem:[%s15076_s1 + $0xc64] sm:$0xf]  ;;  %v8008_v51 = vor.u32 %v9749_v22, %v8005_v24 }
 0x12e   :  { %5328 = vmatpush.bf16.msrb.mxu2 %v7912_v59  ;;  %v7733_v50 = vld [vmem:[%s15076_s1 + $0xc70] sm:$0xf0]  ;;  %v8184_v54 = vor.u32 %v9793_v26, %v8181_v27  ;;  %v9713_v36 = vld [vmem:[%s15076_s1 + $0xd64] sm:$0xf]  ;;  %v5065_v17 = vpop.f32.mrf.mxu1 }
 0x12f   :  { %5341 = vmatpush.bf16.msrb.mxu3 %v8040_v53  ;;  %v7861_v55 = vld [vmem:[%s15076_s1 + $0xd70] sm:$0xf0]  ;;  %v9745_v57 = vld [vmem:[%s15076_s1 + $0xe64] sm:$0xf]  ;;  %v7736_v62 = vor.u32 %v9681_v48, %v7733_v50 }
 0x130   :  { %5307 = vmatpush.bf16.msrb.mxu0 %v7576_v7  ;;  %v7989_v58 = vld [vmem:[%s15076_s1 + $0xe70] sm:$0xf0]  ;;  %v9789_v59 = vld [vmem:[%s15076_s1 + $0xfc4] sm:$0xf]  ;;  %v7864_v63 = vor.u32 %v9713_v36, %v7861_v55 }
 0x131   :  { %5316 = vmatpush.bf16.msrb.mxu1 %v7768_v60  ;;  %v8165_v61 = vld [vmem:[%s15076_s1 + $0xfd0] sm:$0xf0]  ;;  %v9677_v53 = vld [vmem:[%s15076_s1 + $0xc44] sm:$0xf]  ;;  %v7992_v1 = vor.u32 %v9745_v57, %v7989_v58  ;;  %v5077_v60 = vadd.f32 %v5076_v2, %v5064_v52 }
 0x132   :  { %5329 = vmatpush.bf16.msrb.mxu2 %v7896_v9  ;;  %v7717_v0 = vld [vmem:[%s15076_s1 + $0xc50] sm:$0xf0]  ;;  %v8168_v3 = vor.u32 %v9789_v59, %v8165_v61  ;;  %v9709_v5 = vld [vmem:[%s15076_s1 + $0xd44] sm:$0xf]  ;;  %v5089_v9 = vpop.f32.mrf.mxu3 }
 0x133   :  { %5342 = vmatpush.bf16.msrb.mxu3 %v8024_v14  ;;  %v7845_v7 = vld [vmem:[%s15076_s1 + $0xd50] sm:$0xf0]  ;;  %v9741_v8 = vld [vmem:[%s15076_s1 + $0xe44] sm:$0xf]  ;;  %v5052_v14 = vpop.f32.mrf.mxu0  ;;  %v12112_v18 = vadd.f32 %v5089_v9, %v5077_v60  ;;  %v7720_v22 = vor.u32 %v9677_v53, %v7717_v0 }
 0x134   :  { %5308 = vmatpush.bf16.msrb.mxu0 %v7560_v34  ;;  %v7973_v10 = vld [vmem:[%s15076_s1 + $0xe50] sm:$0xf0]  ;;  %v9785_v12 = vld [vmem:[%s15076_s1 + $0xfa4] sm:$0xf]  ;;  %v7848_v39 = vor.u32 %v9709_v5, %v7845_v7 }
 0x135   :  { %5317 = vmatpush.bf16.msrb.mxu1 %v7752_v43  ;;  %v8149_v13 = vld [vmem:[%s15076_s1 + $0xfb0] sm:$0xf0]  ;;  %v9673_v24 = vld [vmem:[%s15076_s1 + $0xc24] sm:$0xf]  ;;  %v7976_v27 = vor.u32 %v9741_v8, %v7973_v10 }
 0x136   :  { %5330 = vmatpush.bf16.msrb.mxu2 %v7880_v47  ;;  %v7701_v26 = vld [vmem:[%s15076_s1 + $0xc30] sm:$0xf0]  ;;  %v8152_v32 = vor.u32 %v9785_v12, %v8149_v13  ;;  %v9705_v34 = vld [vmem:[%s15076_s1 + $0xd24] sm:$0xf] }
 0x137   :  { %5343 = vmatpush.bf16.msrb.mxu3 %v8008_v51  ;;  %5309 = vmatmul.bf16.vlgmr.msrb.gmra.mxu0 %v10764_v33  ;;  %v7829_v40 = vld [vmem:[%s15076_s1 + $0xd30] sm:$0xf0]  ;;  %v9737_v43 = vld [vmem:[%s15076_s1 + $0xe24] sm:$0xf]  ;;  %v7704_v51 = vor.u32 %v9673_v24, %v7701_v26 }
 0x138   :  { %5353 = vmatpush.bf16.msra.mxu0 %v8184_v54  ;;  %v7957_v47 = vld [vmem:[%s15076_s1 + $0xe30] sm:$0xf0]  ;;  %v9781_v48 = vld [vmem:[%s15076_s1 + $0xf84] sm:$0xf]  ;;  %v7832_v52 = vor.u32 %v9705_v34, %v7829_v40 }
 0x139   :  { %5318 = vmatpush.bf16.msrb.mxu1 %v7736_v62  ;;  %v8133_v50 = vld [vmem:[%s15076_s1 + $0xf90] sm:$0xf0]  ;;  %v9669_v54 = vld [vmem:[%s15076_s1 + $0xc04] sm:$0xf]  ;;  %v7960_v57 = vor.u32 %v9737_v43, %v7957_v47 }
 0x13a   :  { %5331 = vmatpush.bf16.msrb.mxu2 %v7864_v63  ;;  %v7685_v36 = vld [vmem:[%s15076_s1 + $0xc10] sm:$0xf0]  ;;  %v9701_v55 = vld [vmem:[%s15076_s1 + $0xd04] sm:$0xf]  ;;  %v8136_v58 = vor.u32 %v9781_v48, %v8133_v50  ;;  %v5078_v63 = vpop.f32.mrf.mxu2  ;;  %v5091_v2 = vpop.f32.mrf.mxu3 }
 0x13b   :  { %5344 = vmatpush.bf16.msrb.mxu3 %v7992_v1  ;;  %v7813_v59 = vld [vmem:[%s15076_s1 + $0xd10] sm:$0xf0]  ;;  %v9733_v61 = vld [vmem:[%s15076_s1 + $0xe04] sm:$0xf]  ;;  %v7688_v8 = vor.u32 %v9669_v54, %v7685_v36 }
 0x13c   :  { %5354 = vmatpush.bf16.msra.mxu0 %v8168_v3  ;;  %v7941_v62 = vld [vmem:[%s15076_s1 + $0xe10] sm:$0xf0]  ;;  %v9777_v53 = vld [vmem:[%s15076_s1 + $0xf64] sm:$0xf]  ;;  %v7816_v60 = vor.u32 %v9701_v55, %v7813_v59 }
 0x13d   :  { %5319 = vmatpush.bf16.msrb.mxu1 %v7720_v22  ;;  %v8117_v0 = vld [vmem:[%s15076_s1 + $0xf70] sm:$0xf0]  ;;  %v9825_v1 = vld [vmem:[%s15076_s1 + $0x10e4] sm:$0xf]  ;;  %v7944_v12 = vor.u32 %v9733_v61, %v7941_v62 }
 0x13e   :  { %5332 = vmatpush.bf16.msrb.mxu2 %v7848_v39  ;;  %v8309_v3 = vld [vmem:[%s15076_s1 + $0x10f0] sm:$0xf0]  ;;  %v9857_v5 = vld [vmem:[%s15076_s1 + $0x11e4] sm:$0xf]  ;;  %v8120_v13 = vor.u32 %v9777_v53, %v8117_v0 }
 0x13f   :  { %5345 = vmatpush.bf16.msrb.mxu3 %v7976_v27  ;;  %v8437_v7 = vld [vmem:[%s15076_s1 + $0x11f0] sm:$0xf0]  ;;  %v9889_v9 = vld [vmem:[%s15076_s1 + $0x12e4] sm:$0xf]  ;;  %v8312_v14 = vor.u32 %v9825_v1, %v8309_v3 }
 0x140   :  { %5355 = vmatpush.bf16.msra.mxu0 %v8152_v32  ;;  %v8565_v10 = vld [vmem:[%s15076_s1 + $0x12f0] sm:$0xf0]  ;;  %v8440_v17 = vor.u32 %v9857_v5, %v8437_v7  ;;  %v9773_v22 = vld [vmem:[%s15076_s1 + $0xf44] sm:$0xf] }
 0x141   :  { %5320 = vmatpush.bf16.msrb.mxu1 %v7704_v51  ;;  %v8101_v39 = vld [vmem:[%s15076_s1 + $0xf50] sm:$0xf0]  ;;  %v9821_v24 = vld [vmem:[%s15076_s1 + $0x10c4] sm:$0xf]  ;;  %v8568_v26 = vor.u32 %v9889_v9, %v8565_v10 }
 0x142   :  { %5333 = vmatpush.bf16.msrb.mxu2 %v7832_v52  ;;  %v8293_v27 = vld [vmem:[%s15076_s1 + $0x10d0] sm:$0xf0]  ;;  %v9853_v32 = vld [vmem:[%s15076_s1 + $0x11c4] sm:$0xf]  ;;  %v8104_v47 = vor.u32 %v9773_v22, %v8101_v39 }
 0x143   :  { %5346 = vmatpush.bf16.msrb.mxu3 %v7960_v57  ;;  %v8421_v34 = vld [vmem:[%s15076_s1 + $0x11d0] sm:$0xf0]  ;;  %v9885_v40 = vld [vmem:[%s15076_s1 + $0x12c4] sm:$0xf]  ;;  %v8296_v48 = vor.u32 %v9821_v24, %v8293_v27 }
 0x144   :  { %5356 = vmatpush.bf16.msra.mxu0 %v8136_v58  ;;  %v8549_v43 = vld [vmem:[%s15076_s1 + $0x12d0] sm:$0xf0]  ;;  %v8424_v50 = vor.u32 %v9853_v32, %v8421_v34  ;;  %v9769_v51 = vld [vmem:[%s15076_s1 + $0xf24] sm:$0xf]  ;;  %v5102_v9 = vpop.f32.mrf.mxu0 }
 0x145   :  { %5321 = vmatpush.bf16.msrb.mxu1 %v7688_v8  ;;  %v8085_v52 = vld [vmem:[%s15076_s1 + $0xf30] sm:$0xf0]  ;;  %v9817_v54 = vld [vmem:[%s15076_s1 + $0x10a4] sm:$0xf]  ;;  %v8552_v36 = vor.u32 %v9885_v40, %v8549_v43  ;;  %v5115_v22 = vpop.f32.mrf.mxu1 }
 0x146   :  { %5334 = vmatpush.bf16.msrb.mxu2 %v7816_v60  ;;  %v8277_v55 = vld [vmem:[%s15076_s1 + $0x10b0] sm:$0xf0]  ;;  %v9849_v57 = vld [vmem:[%s15076_s1 + $0x11a4] sm:$0xf]  ;;  %v8088_v62 = vor.u32 %v9769_v51, %v8085_v52 }
 0x147   :  { %5347 = vmatpush.bf16.msrb.mxu3 %v7944_v12  ;;  %v8405_v58 = vld [vmem:[%s15076_s1 + $0x11b0] sm:$0xf0]  ;;  %v9881_v59 = vld [vmem:[%s15076_s1 + $0x12a4] sm:$0xf]  ;;  %v8280_v53 = vor.u32 %v9817_v54, %v8277_v55 }
 0x148   :  { %5357 = vmatpush.bf16.msra.mxu0 %v8120_v13  ;;  %5322 = vmatmul.bf16.vlgmr.msrb.gmra.mxu1 %v10953_v23  ;;  %v8533_v61 = vld [vmem:[%s15076_s1 + $0x12b0] sm:$0xf0]  ;;  %v9765_v63 = vld [vmem:[%s15076_s1 + $0xf04] sm:$0xf]  ;;  %v8408_v0 = vor.u32 %v9849_v57, %v8405_v58 }
 0x149   :  { %5366 = vmatpush.bf16.msra.mxu1 %v8312_v14  ;;  %5335 = vmatmul.bf16.vlgmr.msrb.gmra.mxu2 %v10966_v31  ;;  %v8069_v1 = vld [vmem:[%s15076_s1 + $0xf10] sm:$0xf0]  ;;  %v9813_v2 = vld [vmem:[%s15076_s1 + $0x1084] sm:$0xf]  ;;  %v8536_v5 = vor.u32 %v9881_v59, %v8533_v61  ;;  %v5103_v14 = vadd.f32 %v5102_v9, %v12112_v18 }
 0x14a   :  { %5379 = vmatpush.bf16.msra.mxu2 %v8440_v17  ;;  %5348 = vmatmul.bf16.vlgmr.msrb.gmra.mxu3 %v10964_v28  ;;  %v8261_v3 = vld [vmem:[%s15076_s1 + $0x1090] sm:$0xf0]  ;;  %v9845_v7 = vld [vmem:[%s15076_s1 + $0x1184] sm:$0xf]  ;;  %v8072_v17 = vor.u32 %v9765_v63, %v8069_v1 }
 0x14b   :  { %5392 = vmatpush.bf16.msra.mxu3 %v8568_v26  ;;  %v8389_v8 = vld [vmem:[%s15076_s1 + $0x1190] sm:$0xf0]  ;;  %v9877_v60 = vld [vmem:[%s15076_s1 + $0x1284] sm:$0xf]  ;;  %v8264_v39 = vor.u32 %v9813_v2, %v8261_v3  ;;  %v5116_v34 = vadd.f32 %v5115_v22, %v5103_v14 }
 0x14c   :  { %5358 = vmatpush.bf16.msra.mxu0 %v8104_v47  ;;  %v8517_v10 = vld [vmem:[%s15076_s1 + $0x1290] sm:$0xf0]  ;;  %v9921_v12 = vld [vmem:[%s15076_s1 + $0x13e4] sm:$0xf]  ;;  %v8392_v24 = vor.u32 %v9845_v7, %v8389_v8  ;;  %v5128_v58 = vpop.f32.mrf.mxu2 }
 0x14d   :  { %5367 = vmatpush.bf16.msra.mxu1 %v8296_v48  ;;  %v8693_v13 = vld [vmem:[%s15076_s1 + $0x13f0] sm:$0xf0]  ;;  %v9809_v26 = vld [vmem:[%s15076_s1 + $0x1064] sm:$0xf]  ;;  %v8520_v32 = vor.u32 %v9877_v60, %v8517_v10  ;;  %v5141_v1 = vpop.f32.mrf.mxu3  ;;  %v5117_v7 = vpop.f32.mrf.mxu1 }
 0x14e   :  { %5380 = vmatpush.bf16.msra.mxu2 %v8424_v50  ;;  %v8245_v27 = vld [vmem:[%s15076_s1 + $0x1070] sm:$0xf0]  ;;  %v8696_v40 = vor.u32 %v9921_v12, %v8693_v13  ;;  %v9841_v18 = vld [vmem:[%s15076_s1 + $0x1164] sm:$0xf] }
 0x14f   :  { %5393 = vmatpush.bf16.msra.mxu3 %v8552_v36  ;;  %v8373_v43 = vld [vmem:[%s15076_s1 + $0x1170] sm:$0xf0]  ;;  %v9873_v47 = vld [vmem:[%s15076_s1 + $0x1264] sm:$0xf]  ;;  %v8248_v52 = vor.u32 %v9809_v26, %v8245_v27 }
 0x150   :  { %5359 = vmatpush.bf16.msra.mxu0 %v8088_v62  ;;  %v8501_v48 = vld [vmem:[%s15076_s1 + $0x1270] sm:$0xf0]  ;;  %v9917_v50 = vld [vmem:[%s15076_s1 + $0x13c4] sm:$0xf]  ;;  %v8376_v54 = vor.u32 %v9841_v18, %v8373_v43 }
 0x151   :  { %5368 = vmatpush.bf16.msra.mxu1 %v8280_v53  ;;  %v8677_v51 = vld [vmem:[%s15076_s1 + $0x13d0] sm:$0xf0]  ;;  %v9805_v36 = vld [vmem:[%s15076_s1 + $0x1044] sm:$0xf]  ;;  %v8504_v57 = vor.u32 %v9873_v47, %v8501_v48  ;;  %v5129_v53 = vadd.f32 %v5128_v58, %v5116_v34 }
 0x152   :  { %5381 = vmatpush.bf16.msra.mxu2 %v8408_v0  ;;  %v8229_v55 = vld [vmem:[%s15076_s1 + $0x1050] sm:$0xf0]  ;;  %v8680_v59 = vor.u32 %v9917_v50, %v8677_v51  ;;  %v9837_v61 = vld [vmem:[%s15076_s1 + $0x1144] sm:$0xf]  ;;  %v5104_v0 = vpop.f32.mrf.mxu0 }
 0x153   :  { %5394 = vmatpush.bf16.msra.mxu3 %v8536_v5  ;;  %v8357_v62 = vld [vmem:[%s15076_s1 + $0x1150] sm:$0xf0]  ;;  %v9869_v63 = vld [vmem:[%s15076_s1 + $0x1244] sm:$0xf]  ;;  %v5142_v8 = vadd.f32 %v5141_v1, %v5129_v53  ;;  %v8232_v60 = vor.u32 %v9805_v36, %v8229_v55 }
 0x154   :  { %5360 = vmatpush.bf16.msra.mxu0 %v8072_v17  ;;  %v8485_v2 = vld [vmem:[%s15076_s1 + $0x1250] sm:$0xf0]  ;;  %v9913_v3 = vld [vmem:[%s15076_s1 + $0x13a4] sm:$0xf]  ;;  %v8360_v9 = vor.u32 %v9837_v61, %v8357_v62 }
 0x155   :  { %5369 = vmatpush.bf16.msra.mxu1 %v8264_v39  ;;  %v8661_v5 = vld [vmem:[%s15076_s1 + $0x13b0] sm:$0xf0]  ;;  %v9801_v10 = vld [vmem:[%s15076_s1 + $0x1024] sm:$0xf]  ;;  %v8488_v13 = vor.u32 %v9869_v63, %v8485_v2  ;;  %v5143_v58 = vpop.f32.mrf.mxu3 }
 0x156   :  { %5382 = vmatpush.bf16.msra.mxu2 %v8392_v24  ;;  %v8213_v12 = vld [vmem:[%s15076_s1 + $0x1030] sm:$0xf0]  ;;  %v8664_v14 = vor.u32 %v9913_v3, %v8661_v5  ;;  %v9833_v17 = vld [vmem:[%s15076_s1 + $0x1124] sm:$0xf] }
 0x157   :  { %5395 = vmatpush.bf16.msra.mxu3 %v8520_v32  ;;  %5361 = vmatmul.bf16.vlgmr.msra.gmra.mxu0 %v10974_v35  ;;  %v8341_v22 = vld [vmem:[%s15076_s1 + $0x1130] sm:$0xf0]  ;;  %v9865_v39 = vld [vmem:[%s15076_s1 + $0x1224] sm:$0xf]  ;;  %v8216_v32 = vor.u32 %v9801_v10, %v8213_v12 }
 0x158   :  { %5405 = vmatpush.bf16.msrb.mxu0 %v8696_v40  ;;  %v8469_v24 = vld [vmem:[%s15076_s1 + $0x1230] sm:$0xf0]  ;;  %v9909_v26 = vld [vmem:[%s15076_s1 + $0x1384] sm:$0xf]  ;;  %v8344_v34 = vor.u32 %v9833_v17, %v8341_v22 }
 0x159   :  { %5370 = vmatpush.bf16.msra.mxu1 %v8248_v52  ;;  %v8645_v27 = vld [vmem:[%s15076_s1 + $0x1390] sm:$0xf0]  ;;  %v9797_v40 = vld [vmem:[%s15076_s1 + $0x1004] sm:$0xf]  ;;  %v8472_v47 = vor.u32 %v9865_v39, %v8469_v24 }
 0x15a   :  { %5383 = vmatpush.bf16.msra.mxu2 %v8376_v54  ;;  %v8197_v18 = vld [vmem:[%s15076_s1 + $0x1010] sm:$0xf0]  ;;  %v9829_v43 = vld [vmem:[%s15076_s1 + $0x1104] sm:$0xf]  ;;  %v8648_v48 = vor.u32 %v9909_v26, %v8645_v27  ;;  %v5130_v54 = vpop.f32.mrf.mxu2 }
 0x15b   :  { %5396 = vmatpush.bf16.msra.mxu3 %v8504_v57  ;;  %v8325_v50 = vld [vmem:[%s15076_s1 + $0x1110] sm:$0xf0]  ;;  %v9861_v51 = vld [vmem:[%s15076_s1 + $0x1204] sm:$0xf]  ;;  %v8200_v0 = vor.u32 %v9797_v40, %v8197_v18 }
 0x15c   :  { %5406 = vmatpush.bf16.msrb.mxu0 %v8680_v59  ;;  %v8453_v52 = vld [vmem:[%s15076_s1 + $0x1210] sm:$0xf0]  ;;  %v9905_v36 = vld [vmem:[%s15076_s1 + $0x1364] sm:$0xf]  ;;  %v5154_v59 = vpop.f32.mrf.mxu0  ;;  %v8328_v1 = vor.u32 %v9829_v43, %v8325_v50 }
 0x15d   :  { %5371 = vmatpush.bf16.msra.mxu1 %v8232_v60  ;;  %v8629_v55 = vld [vmem:[%s15076_s1 + $0x1370] sm:$0xf0]  ;;  %v9953_v57 = vld [vmem:[%s15076_s1 + $0x14e4] sm:$0xf]  ;;  %v12371_v53 = vadd.f32 %v5154_v59, %v5142_v8  ;;  %v8456_v5 = vor.u32 %v9861_v51, %v8453_v52 }
 0x15e   :  { %5384 = vmatpush.bf16.msra.mxu2 %v8360_v9  ;;  %v8821_v61 = vld [vmem:[%s15076_s1 + $0x14f0] sm:$0xf0]  ;;  %v9985_v62 = vld [vmem:[%s15076_s1 + $0x15e4] sm:$0xf]  ;;  %v8632_v7 = vor.u32 %v9905_v36, %v8629_v55 }
 0x15f   :  { %5397 = vmatpush.bf16.msra.mxu3 %v8488_v13  ;;  %v8949_v63 = vld [vmem:[%s15076_s1 + $0x15f0] sm:$0xf0]  ;;  %v10017_v2 = vld [vmem:[%s15076_s1 + $0x16e4] sm:$0xf]  ;;  %v8824_v60 = vor.u32 %v9953_v57, %v8821_v61 }
 0x160   :  { %5407 = vmatpush.bf16.msrb.mxu0 %v8664_v14  ;;  %v9077_v3 = vld [vmem:[%s15076_s1 + $0x16f0] sm:$0xf0]  ;;  %v8952_v9 = vor.u32 %v9985_v62, %v8949_v63  ;;  %v9901_v8 = vld [vmem:[%s15076_s1 + $0x1344] sm:$0xf] }
 0x161   :  { %5372 = vmatpush.bf16.msra.mxu1 %v8216_v32  ;;  %v8613_v10 = vld [vmem:[%s15076_s1 + $0x1350] sm:$0xf0]  ;;  %v9949_v12 = vld [vmem:[%s15076_s1 + $0x14c4] sm:$0xf]  ;;  %v9080_v13 = vor.u32 %v10017_v2, %v9077_v3  ;;  %v10069_v3 = vld [vmem:[%s15078_s2] sm:$0xf] }
 0x162   :  { %5385 = vmatpush.bf16.msra.mxu2 %v8344_v34  ;;  %v8805_v14 = vld [vmem:[%s15076_s1 + $0x14d0] sm:$0xf0]  ;;  %v9981_v17 = vld [vmem:[%s15076_s1 + $0x15c4] sm:$0xf]  ;;  %v8616_v26 = vor.u32 %v9901_v8, %v8613_v10 }
 0x163   :  { %5398 = vmatpush.bf16.msra.mxu3 %v8472_v47  ;;  %v8933_v22 = vld [vmem:[%s15076_s1 + $0x15d0] sm:$0xf0]  ;;  %v10013_v39 = vld [vmem:[%s15076_s1 + $0x16c4] sm:$0xf]  ;;  %v8808_v27 = vor.u32 %v9949_v12, %v8805_v14 }
 0x164   :  { %5408 = vmatpush.bf16.msrb.mxu0 %v8648_v48  ;;  %v9061_v24 = vld [vmem:[%s15076_s1 + $0x16d0] sm:$0xf0]  ;;  %v8936_v32 = vor.u32 %v9981_v17, %v8933_v22  ;;  %v9897_v34 = vld [vmem:[%s15076_s1 + $0x1324] sm:$0xf]  ;;  %v5156_v51 = vpop.f32.mrf.mxu0 }
 0x165   :  { %5373 = vmatpush.bf16.msra.mxu1 %v8200_v0  ;;  %v8597_v40 = vld [vmem:[%s15076_s1 + $0x1330] sm:$0xf0]  ;;  %v9945_v18 = vld [vmem:[%s15076_s1 + $0x14a4] sm:$0xf]  ;;  %v9064_v43 = vor.u32 %v10013_v39, %v9061_v24  ;;  %v5167_v10 = vpop.f32.mrf.mxu1 }
 0x166   :  { %5386 = vmatpush.bf16.msra.mxu2 %v8328_v1  ;;  %v8789_v47 = vld [vmem:[%s15076_s1 + $0x14b0] sm:$0xf0]  ;;  %v9977_v48 = vld [vmem:[%s15076_s1 + $0x15a4] sm:$0xf]  ;;  %v8600_v36 = vor.u32 %v9897_v34, %v8597_v40 }
 0x167   :  { %5399 = vmatpush.bf16.msra.mxu3 %v8456_v5  ;;  %v8917_v50 = vld [vmem:[%s15076_s1 + $0x15b0] sm:$0xf0]  ;;  %v10009_v52 = vld [vmem:[%s15076_s1 + $0x16a4] sm:$0xf]  ;;  %v8792_v58 = vor.u32 %v9945_v18, %v8789_v47  ;;  %v815_v5 = vperm.slane %v10069_v3, 1 }
 0x168   :  { %5409 = vmatpush.bf16.msrb.mxu0 %v8632_v7  ;;  %5374 = vmatmul.bf16.vlgmr.msra.gmra.mxu1 %v11163_v37  ;;  %v9045_v54 = vld [vmem:[%s15076_s1 + $0x16b0] sm:$0xf0]  ;;  %v9893_v55 = vld [vmem:[%s15076_s1 + $0x1304] sm:$0xf]  ;;  %v8920_v59 = vor.u32 %v9977_v48, %v8917_v50 }
 0x169   :  { %5418 = vmatpush.bf16.msrb.mxu1 %v8824_v60  ;;  %5387 = vmatmul.bf16.vlgmr.msra.gmra.mxu2 %v11176_v46  ;;  %v8581_v57 = vld [vmem:[%s15076_s1 + $0x1310] sm:$0xf0]  ;;  %v9941_v61 = vld [vmem:[%s15076_s1 + $0x1484] sm:$0xf]  ;;  %v9048_v0 = vor.u32 %v10009_v52, %v9045_v54 }
 0x16a   :  { %5431 = vmatpush.bf16.msrb.mxu2 %v8952_v9  ;;  %5400 = vmatmul.bf16.vlgmr.msra.gmra.mxu3 %v11174_v45  ;;  %v8773_v62 = vld [vmem:[%s15076_s1 + $0x1490] sm:$0xf0]  ;;  %v9973_v63 = vld [vmem:[%s15076_s1 + $0x1584] sm:$0xf]  ;;  %v8584_v8 = vor.u32 %v9893_v55, %v8581_v57 }
 0x16b   :  { %5444 = vmatpush.bf16.msrb.mxu3 %v9080_v13  ;;  %v8901_v1 = vld [vmem:[%s15076_s1 + $0x1590] sm:$0xf0]  ;;  %v10005_v2 = vld [vmem:[%s15076_s1 + $0x1684] sm:$0xf]  ;;  %v8776_v12 = vor.u32 %v9941_v61, %v8773_v62 }
 0x16c   :  { %5410 = vmatpush.bf16.msrb.mxu0 %v8616_v26  ;;  %v9029_v7 = vld [vmem:[%s15076_s1 + $0x1690] sm:$0xf0]  ;;  %v10049_v60 = vld [vmem:[%s15076_s1 + $0x17e4] sm:$0xf]  ;;  %v8904_v13 = vor.u32 %v9973_v63, %v8901_v1  ;;  %v5180_v51 = vpop.f32.mrf.mxu2 }
 0x16d   :  { %5419 = vmatpush.bf16.msrb.mxu1 %v8808_v27  ;;  %v9205_v9 = vld [vmem:[%s15076_s1 + $0x17f0] sm:$0xf0]  ;;  %v9937_v14 = vld [vmem:[%s15076_s1 + $0x1464] sm:$0xf]  ;;  %v9032_v22 = vor.u32 %v10005_v2, %v9029_v7  ;;  %v5169_v1 = vpop.f32.mrf.mxu1 }
 0x16e   :  { %5432 = vmatpush.bf16.msrb.mxu2 %v8936_v32  ;;  %v8757_v17 = vld [vmem:[%s15076_s1 + $0x1470] sm:$0xf0]  ;;  %v9208_v39 = vor.u32 %v10049_v60, %v9205_v9  ;;  %v9969_v24 = vld [vmem:[%s15076_s1 + $0x1564] sm:$0xf]  ;;  %v5168_v32 = vadd.f32 %v5167_v10, %v815_v5 }
 0x16f   :  { %5445 = vmatpush.bf16.msrb.mxu3 %v9064_v43  ;;  %v8885_v26 = vld [vmem:[%s15076_s1 + $0x1570] sm:$0xf0]  ;;  %v10001_v27 = vld [vmem:[%s15076_s1 + $0x1664] sm:$0xf]  ;;  %v8760_v43 = vor.u32 %v9937_v14, %v8757_v17 }
 0x170   :  { %5411 = vmatpush.bf16.msrb.mxu0 %v8600_v36  ;;  %v9013_v34 = vld [vmem:[%s15076_s1 + $0x1670] sm:$0xf0]  ;;  %v10045_v40 = vld [vmem:[%s15076_s1 + $0x17c4] sm:$0xf]  ;;  %v8888_v47 = vor.u32 %v9969_v24, %v8885_v26 }
 0x171   :  { %5420 = vmatpush.bf16.msrb.mxu1 %v8792_v58  ;;  %v9189_v18 = vld [vmem:[%s15076_s1 + $0x17d0] sm:$0xf0]  ;;  %v9933_v48 = vld [vmem:[%s15076_s1 + $0x1444] sm:$0xf]  ;;  %v9016_v52 = vor.u32 %v10001_v27, %v9013_v34  ;;  %v5181_v58 = vadd.f32 %v5180_v51, %v5168_v32 }
 0x172   :  { %5433 = vmatpush.bf16.msrb.mxu2 %v8920_v59  ;;  %v8741_v50 = vld [vmem:[%s15076_s1 + $0x1450] sm:$0xf0]  ;;  %v9192_v54 = vor.u32 %v10045_v40, %v9189_v18  ;;  %v9965_v36 = vld [vmem:[%s15076_s1 + $0x1544] sm:$0xf]  ;;  %v5193_v59 = vpop.f32.mrf.mxu3 }
 0x173   :  { %5446 = vmatpush.bf16.msrb.mxu3 %v9048_v0  ;;  %v8869_v55 = vld [vmem:[%s15076_s1 + $0x1550] sm:$0xf0]  ;;  %v9997_v57 = vld [vmem:[%s15076_s1 + $0x1644] sm:$0xf]  ;;  %v5194_v0 = vadd.f32 %v5193_v59, %v5181_v58  ;;  %v8744_v2 = vor.u32 %v9933_v48, %v8741_v50  ;;  %v9316_v58 = vld [vmem:[%s15076_s1 + $0xf4] sm:$0xf0] }
 0x174   :  { %5412 = vmatpush.bf16.msrb.mxu0 %v8584_v8  ;;  %v8997_v61 = vld [vmem:[%s15076_s1 + $0x1650] sm:$0xf0]  ;;  %v10041_v62 = vld [vmem:[%s15076_s1 + $0x17a4] sm:$0xf]  ;;  %v8872_v3 = vor.u32 %v9965_v36, %v8869_v55  ;;  %v5182_v40 = vpop.f32.mrf.mxu2 }
 0x175   :  { %5421 = vmatpush.bf16.msrb.mxu1 %v8776_v12  ;;  %v9173_v63 = vld [vmem:[%s15076_s1 + $0x17b0] sm:$0xf0]  ;;  %v9929_v5 = vld [vmem:[%s15076_s1 + $0x1424] sm:$0xf]  ;;  %v9000_v60 = vor.u32 %v9997_v57, %v8997_v61  ;;  %v6267_v57 = vld [vmem:[%s15076_s1 + $0xe8] sm:$0xf] }
 0x176   :  { %5434 = vmatpush.bf16.msrb.mxu2 %v8904_v13  ;;  %v8725_v7 = vld [vmem:[%s15076_s1 + $0x1430] sm:$0xf0]  ;;  %v9176_v9 = vor.u32 %v10041_v62, %v9173_v63  ;;  %v9961_v8 = vld [vmem:[%s15076_s1 + $0x1524] sm:$0xf]  ;;  %v6395_v62 = vld [vmem:[%s15076_s1 + $0x1e8] sm:$0xf] }
 0x177   :  { %5447 = vmatpush.bf16.msrb.mxu3 %v9032_v22  ;;  %5413 = vmatmul.bf16.vlgmr.msrb.gmra.mxu0 %v11184_v49  ;;  %v8853_v10 = vld [vmem:[%s15076_s1 + $0x1530] sm:$0xf0]  ;;  %v9993_v12 = vld [vmem:[%s15076_s1 + $0x1624] sm:$0xf]  ;;  %v5206_v22 = vpop.f32.mrf.mxu0  ;;  %v9348_v63 = vld [vmem:[%s15076_s1 + $0x1f4] sm:$0xf0] }
 0x178   :  { %5457 = vmatpush.bf16.msra.mxu0 %v9208_v39  ;;  %v8981_v13 = vld [vmem:[%s15076_s1 + $0x1630] sm:$0xf0]  ;;  %v10037_v14 = vld [vmem:[%s15076_s1 + $0x1784] sm:$0xf]  ;;  %v8728_v39 = vor.u32 %v9929_v5, %v8725_v7  ;;  %v8856_v24 = vor.u32 %v9961_v8, %v8853_v10  ;;  %v12545_v34 = vadd.f32 %v5206_v22, %v5194_v0  ;;  %v6251_v10 = vld [vmem:[%s15076_s1 + $0xc8] sm:$0xf] }
 0x179   :  { %5422 = vmatpush.bf16.msrb.mxu1 %v8760_v43  ;;  %v9157_v17 = vld [vmem:[%s15076_s1 + $0x1790] sm:$0xf0]  ;;  %v9925_v26 = vld [vmem:[%s15076_s1 + $0x1404] sm:$0xf]  ;;  %v8984_v18 = vor.u32 %v9993_v12, %v8981_v13  ;;  %v9312_v12 = vld [vmem:[%s15076_s1 + $0xd4] sm:$0xf0] }
 0x17a   :  { %5435 = vmatpush.bf16.msrb.mxu2 %v8888_v47  ;;  %v8709_v27 = vld [vmem:[%s15076_s1 + $0x1410] sm:$0xf0]  ;;  %v9957_v32 = vld [vmem:[%s15076_s1 + $0x1504] sm:$0xf]  ;;  %v9160_v43 = vor.u32 %v10037_v14, %v9157_v17  ;;  %v5195_v51 = vpop.f32.mrf.mxu3  ;;  %v6379_v14 = vld [vmem:[%s15076_s1 + $0x1c8] sm:$0xf] }
 0x17b   :  { %5448 = vmatpush.bf16.msrb.mxu3 %v9016_v52  ;;  %v8837_v47 = vld [vmem:[%s15076_s1 + $0x1510] sm:$0xf0]  ;;  %v9989_v48 = vld [vmem:[%s15076_s1 + $0x1604] sm:$0xf]  ;;  %v8712_v59 = vor.u32 %v9925_v26, %v8709_v27  ;;  %v9344_v17 = vld [vmem:[%s15076_s1 + $0x1d4] sm:$0xf0] }
 0x17c   :  { %5458 = vmatpush.bf16.msra.mxu0 %v9192_v54  ;;  %v8965_v50 = vld [vmem:[%s15076_s1 + $0x1610] sm:$0xf0]  ;;  %v10033_v52 = vld [vmem:[%s15076_s1 + $0x1764] sm:$0xf]  ;;  %v8840_v61 = vor.u32 %v9957_v32, %v8837_v47  ;;  %v6380_v40 = vor.u32 %v9344_v17, %v6379_v14  ;;  %v9308_v47 = vld [vmem:[%s15076_s1 + $0xb4] sm:$0xf0] }
 0x17d   :  { %5423 = vmatpush.bf16.msrb.mxu1 %v8744_v2  ;;  %v9141_v54 = vld [vmem:[%s15076_s1 + $0x1770] sm:$0xf0]  ;;  %v10065_v36 = vld [vmem:[%s15076_s1 + $0x1864] sm:$0xf]  ;;  %v8968_v0 = vor.u32 %v9989_v48, %v8965_v50  ;;  %v6363_v48 = vld [vmem:[%s15076_s1 + $0x1a8] sm:$0xf] }
 0x17e   :  { %5436 = vmatpush.bf16.msrb.mxu2 %v8872_v3  ;;  %v9269_v55 = vld [vmem:[%s15076_s1 + $0x1870] sm:$0xf0]  ;;  %v9144_v1 = vor.u32 %v10033_v52, %v9141_v54  ;;  %v6268_v3 = vor.u32 %v9316_v58, %v6267_v57  ;;  %v10029_v5 = vld [vmem:[%s15076_s1 + $0x1744] sm:$0xf]  ;;  %v9340_v50 = vld [vmem:[%s15076_s1 + $0x1b4] sm:$0xf0] }
 0x17f   :  { %5449 = vmatpush.bf16.msrb.mxu3 %v9000_v60  ;;  %v9272_v2 = vor.u32 %v10065_v36, %v9269_v55  ;;  %v9125_v7 = vld [vmem:[%s15076_s1 + $0x1750] sm:$0xf0]  ;;  %v10061_v60 = vld [vmem:[%s15076_s1 + $0x1844] sm:$0xf]  ;;  %v5208_v13 = vpop.f32.mrf.mxu0  ;;  %v6203_v14 = vld [vmem:[%s15076_s1 + $0x68] sm:$0xf] }
 0x180   :  { %5459 = vmatpush.bf16.msra.mxu0 %v9176_v9  ;;  %v6396_v9 = vor.u32 %v9348_v63, %v6395_v62  ;;  %v9253_v8 = vld [vmem:[%s15076_s1 + $0x1850] sm:$0xf0]  ;;  %v9128_v22 = vor.u32 %v10029_v5, %v9125_v7  ;;  %v10025_v26 = vld [vmem:[%s15076_s1 + $0x1724] sm:$0xf]  ;;  %v9304_v62 = vld [vmem:[%s15076_s1 + $0x94] sm:$0xf0] }
 0x181   :  { %5424 = vmatpush.bf16.msrb.mxu1 %v8728_v39  ;;  %v9256_v39 = vor.u32 %v10061_v60, %v9253_v8  ;;  %v9109_v27 = vld [vmem:[%s15076_s1 + $0x1730] sm:$0xf0]  ;;  %v10057_v32 = vld [vmem:[%s15076_s1 + $0x1824] sm:$0xf]  ;;  %v6347_v63 = vld [vmem:[%s15076_s1 + $0x188] sm:$0xf] }
 0x182   :  { %5437 = vmatpush.bf16.msrb.mxu2 %v8856_v24  ;;  %v6252_v24 = vor.u32 %v9312_v12, %v6251_v10  ;;  %v9112_v51 = vor.u32 %v10025_v26, %v9109_v27  ;;  %v10021_v52 = vld [vmem:[%s15076_s1 + $0x1704] sm:$0xf]  ;;  %v9093_v55 = vld [vmem:[%s15076_s1 + $0x1710] sm:$0xf0]  ;;  %v6651_v5 = vld [vmem:[%s15076_s1 + $0x3e8] sm:$0xf] }
 0x183   :  { %5450 = vmatpush.bf16.msrb.mxu3 %v8984_v18  ;;  %v9237_v18 = vld [vmem:[%s15076_s1 + $0x1830] sm:$0xf0]  ;;  %v10053_v57 = vld [vmem:[%s15076_s1 + $0x1804] sm:$0xf]  ;;  %v9412_v7 = vld [vmem:[%s15076_s1 + $0x3f4] sm:$0xf0] }
 0x184   :  { %5460 = vmatpush.bf16.msra.mxu0 %v9160_v43  ;;  %v6235_v43 = vld [vmem:[%s15076_s1 + $0xa8] sm:$0xf]  ;;  %v9240_v54 = vor.u32 %v10057_v32, %v9237_v18  ;;  %v9221_v58 = vld [vmem:[%s15076_s1 + $0x1810] sm:$0xf0]  ;;  %v9300_v17 = vld [vmem:[%s15076_s1 + $0x74] sm:$0xf0] }
 0x185   :  { %5425 = vmatpush.bf16.msrb.mxu1 %v8712_v59  ;;  %v6236_v36 = vor.u32 %v9308_v47, %v6235_v43  ;;  %v6364_v59 = vor.u32 %v9340_v50, %v6363_v48  ;;  %v5219_v60 = vpop.f32.mrf.mxu1  ;;  %v9376_v26 = vld [vmem:[%s15076_s1 + $0x2d4] sm:$0xf0]  ;;  %v6635_v27 = vld [vmem:[%s15076_s1 + $0x3c8] sm:$0xf] }
 0x186   :  { %5438 = vmatpush.bf16.msrb.mxu2 %v8840_v61  ;;  %v6219_v61 = vld [vmem:[%s15076_s1 + $0x88] sm:$0xf]  ;;  %v5220_v10 = vadd.f32 %v5219_v60, %v12545_v34  ;;  %v9332_v34 = vld [vmem:[%s15076_s1 + $0x174] sm:$0xf0] }
 0x187   :  { %5451 = vmatpush.bf16.msrb.mxu3 %v8968_v0  ;;  %v9336_v0 = vld [vmem:[%s15076_s1 + $0x194] sm:$0xf0]  ;;  %v6220_v8 = vor.u32 %v9304_v62, %v6219_v61  ;;  %v6187_v48 = vld [vmem:[%s15076_s1 + $0x48] sm:$0xf] }
 0x188   :  { %5461 = vmatpush.bf16.msra.mxu0 %v9144_v1  ;;  %5426 = vmatmul.bf16.vlgmr.msrb.gmra.mxu1 %v11378_v11  ;;  %v6523_v1 = vld [vmem:[%s15076_s1 + $0x2e8] sm:$0xf]  ;;  %v6348_v12 = vor.u32 %v9336_v0, %v6347_v63  ;;  %v9408_v32 = vld [vmem:[%s15076_s1 + $0x3d4] sm:$0xf0] }
 0x189   :  { %5474 = vmatpush.bf16.msra.mxu1 %v9272_v2  ;;  %5439 = vmatmul.bf16.vlgmr.msrb.gmra.mxu2 %v11391_v16  ;;  %v9380_v2 = vld [vmem:[%s15076_s1 + $0x2f4] sm:$0xf0] }
 0x18a   :  { %5483 = vmatpush.bf16.msra.mxu2 %v6268_v3  ;;  %5452 = vmatmul.bf16.vlgmr.msrb.gmra.mxu3 %v11389_v15  ;;  %v9096_v3 = vor.u32 %v10021_v52, %v9093_v55  ;;  %v6524_v13 = vor.u32 %v9380_v2, %v6523_v1  ;;  %v9296_v50 = vld [vmem:[%s15076_s1 + $0x54] sm:$0xf0] }
 0x18b   :  { %5496 = vmatpush.bf16.msra.mxu3 %v6396_v9  ;;  %v9224_v9 = vor.u32 %v10053_v57, %v9221_v58  ;;  %v9328_v55 = vld [vmem:[%s15076_s1 + $0x154] sm:$0xf0]  ;;  %v6491_v57 = vld [vmem:[%s15076_s1 + $0x2a8] sm:$0xf]  ;;  %v6188_v0 = vor.u32 %v9296_v50, %v6187_v48 }
 0x18c   :  { %5462 = vmatpush.bf16.msra.mxu0 %v9128_v22  ;;  %v6331_v22 = vld [vmem:[%s15076_s1 + $0x168] sm:$0xf]  ;;  %v5232_v18 = vpop.f32.mrf.mxu2  ;;  %v9372_v58 = vld [vmem:[%s15076_s1 + $0x2b4] sm:$0xf0] }
 0x18d   :  { %5475 = vmatpush.bf16.msra.mxu1 %v9256_v39  ;;  %v6652_v39 = vor.u32 %v9412_v7, %v6651_v5  ;;  %v6332_v43 = vor.u32 %v9332_v34, %v6331_v22  ;;  %v5233_v52 = vadd.f32 %v5232_v18, %v5220_v10  ;;  %v9404_v61 = vld [vmem:[%s15076_s1 + $0x3b4] sm:$0xf0]  ;;  %v5221_v63 = vpop.f32.mrf.mxu1  ;;  %v6492_v2 = vor.u32 %v9372_v58, %v6491_v57  ;;  %v6299_v7 = vld [vmem:[%s15076_s1 + $0x128] sm:$0xf] }
 0x18e   :  { %5484 = vmatpush.bf16.msra.mxu2 %v6252_v24  ;;  %v6507_v24 = vld [vmem:[%s15076_s1 + $0x2c8] sm:$0xf]  ;;  %v9292_v5 = vld [vmem:[%s15076_s1 + $0x34] sm:$0xf0] }
 0x18f   :  { %5497 = vmatpush.bf16.msra.mxu3 %v6380_v40  ;;  %v6204_v40 = vor.u32 %v9300_v17, %v6203_v14  ;;  %v6508_v47 = vor.u32 %v9376_v26, %v6507_v24  ;;  %v9368_v10 = vld [vmem:[%s15076_s1 + $0x294] sm:$0xf0]  ;;  %v6587_v50 = vld [vmem:[%s15076_s1 + $0x368] sm:$0xf] }
 0x190   :  { %5463 = vmatpush.bf16.msra.mxu0 %v9112_v51  ;;  %v6315_v51 = vld [vmem:[%s15076_s1 + $0x148] sm:$0xf]  ;;  %v9400_v14 = vld [vmem:[%s15076_s1 + $0x394] sm:$0xf0] }
 0x191   :  { %5476 = vmatpush.bf16.msra.mxu1 %v9240_v54  ;;  %v5245_v54 = vpop.f32.mrf.mxu3  ;;  %v6316_v1 = vor.u32 %v9328_v55, %v6315_v51  ;;  %v9364_v48 = vld [vmem:[%s15076_s1 + $0x274] sm:$0xf0]  ;;  %v6907_v55 = vld [vmem:[%s15076_s1 + $0x5e8] sm:$0xf] }
 0x192   :  { %5485 = vmatpush.bf16.msra.mxu2 %v6236_v36  ;;  %v6636_v36 = vor.u32 %v9408_v32, %v6635_v27  ;;  %v5246_v62 = vadd.f32 %v5245_v54, %v5233_v52  ;;  %v9288_v27 = vld [vmem:[%s15076_s1 + $0x14] sm:$0xf0]  ;;  %v6283_v32 = vld [vmem:[%s15076_s1 + $0x108] sm:$0xf] }
 0x193   :  { %5498 = vmatpush.bf16.msra.mxu3 %v6364_v59  ;;  %v6619_v59 = vld [vmem:[%s15076_s1 + $0x3a8] sm:$0xf]  ;;  %v9396_v51 = vld [vmem:[%s15076_s1 + $0x374] sm:$0xf0] }
 0x194   :  { %5464 = vmatpush.bf16.msra.mxu0 %v9096_v3  ;;  %v6171_v3 = vld [vmem:[%s15076_s1 + $0x28] sm:$0xf]  ;;  %v6620_v60 = vor.u32 %v9404_v61, %v6619_v59  ;;  %v5234_v34 = vpop.f32.mrf.mxu2  ;;  %v9444_v54 = vld [vmem:[%s15076_s1 + $0x4f4] sm:$0xf0]  ;;  %v6588_v61 = vor.u32 %v9396_v51, %v6587_v50 }
 0x195   :  { %5477 = vmatpush.bf16.msra.mxu1 %v9224_v9  ;;  %v9324_v9 = vld [vmem:[%s15076_s1 + $0x134] sm:$0xf0]  ;;  %v6172_v17 = vor.u32 %v9292_v5, %v6171_v3  ;;  %v6779_v52 = vld [vmem:[%s15076_s1 + $0x4e8] sm:$0xf] }
 0x196   :  { %5486 = vmatpush.bf16.msra.mxu2 %v6220_v8  ;;  %v6475_v8 = vld [vmem:[%s15076_s1 + $0x288] sm:$0xf]  ;;  %v6300_v24 = vor.u32 %v9324_v9, %v6299_v7  ;;  %v9476_v57 = vld [vmem:[%s15076_s1 + $0x5f4] sm:$0xf0] }
 0x197   :  { %5499 = vmatpush.bf16.msra.mxu3 %v6348_v12  ;;  %5465 = vmatmul.bf16.vlgmr.msra.gmra.mxu0 %v11399_v19  ;;  %v5258_v12 = vpop.f32.mrf.mxu0  ;;  %v6476_v26 = vor.u32 %v9368_v10, %v6475_v8  ;;  %v6443_v63 = vld [vmem:[%s15076_s1 + $0x248] sm:$0xf]  ;;  %v9392_v3 = vld [vmem:[%s15076_s1 + $0x354] sm:$0xf0] }
 0x198   :  { %5509 = vmatpush.bf16.msrb.mxu0 %v6524_v13  ;;  %9282 = vmatmul.msk.bf16.vlgmr.msra.gmra.mxu1 %vm4829_vm0, %v11502_v56  ;;  %v6603_v13 = vld [vmem:[%s15076_s1 + $0x388] sm:$0xf]  ;;  %v12743_v22 = vadd.f32 %v5258_v12, %v5246_v62  ;;  %v6780_v62 = vor.u32 %v9444_v54, %v6779_v52  ;;  %v9440_v7 = vld [vmem:[%s15076_s1 + $0x4d4] sm:$0xf0] }
 0x199   :  { %5522 = vmatpush.bf16.msrb.mxu1 %v6652_v39  ;;  %v6155_v39 = vld [vmem:[%s15076_s1 + $0x8] sm:$0xf]  ;;  %v5247_v18 = vpop.f32.mrf.mxu3  ;;  %v9472_v8 = vld [vmem:[%s15076_s1 + $0x5d4] sm:$0xf0] }
 0x19a   :  { %5487 = vmatpush.bf16.msra.mxu2 %v6204_v40  ;;  %v9320_v40 = vld [vmem:[%s15076_s1 + $0x114] sm:$0xf0]  ;;  %v6763_v5 = vld [vmem:[%s15076_s1 + $0x4c8] sm:$0xf] }
 0x19b   :  { %5500 = vmatpush.bf16.msra.mxu3 %v6332_v43  ;;  %v6604_v43 = vor.u32 %v9400_v14, %v6603_v13  ;;  %v6284_v58 = vor.u32 %v9320_v40, %v6283_v32  ;;  %v6891_v9 = vld [vmem:[%s15076_s1 + $0x5c8] sm:$0xf]  ;;  %v6764_v13 = vor.u32 %v9440_v7, %v6763_v5  ;;  %v9468_v40 = vld [vmem:[%s15076_s1 + $0x5b4] sm:$0xf0] }
 0x19c   :  { %5510 = vmatpush.bf16.msrb.mxu0 %v6508_v47  ;;  %v6459_v47 = vld [vmem:[%s15076_s1 + $0x268] sm:$0xf]  ;;  %v6892_v34 = vor.u32 %v9472_v8, %v6891_v9  ;;  %v9352_v50 = vld [vmem:[%s15076_s1 + $0x214] sm:$0xf0] }
 0x19d   :  { %5523 = vmatpush.bf16.msrb.mxu1 %v6636_v36  ;;  %v6156_v36 = vor.u32 %v9288_v27, %v6155_v39  ;;  %v6460_v59 = vor.u32 %v9364_v48, %v6459_v47  ;;  %v6427_v14 = vld [vmem:[%s15076_s1 + $0x228] sm:$0xf]  ;;  %v9436_v27 = vld [vmem:[%s15076_s1 + $0x4b4] sm:$0xf0] }
 0x19e   :  { %5488 = vmatpush.bf16.msra.mxu2 %v6188_v0  ;;  %v9360_v0 = vld [vmem:[%s15076_s1 + $0x254] sm:$0xf0]  ;;  %v6555_v39 = vld [vmem:[%s15076_s1 + $0x328] sm:$0xf] }
 0x19f   :  { %5501 = vmatpush.bf16.msra.mxu3 %v6316_v1  ;;  %v6571_v1 = vld [vmem:[%s15076_s1 + $0x348] sm:$0xf]  ;;  %v6444_v10 = vor.u32 %v9360_v0, %v6443_v63  ;;  %v9384_v52 = vld [vmem:[%s15076_s1 + $0x314] sm:$0xf0] }
 0x1a0   :  { %5511 = vmatpush.bf16.msrb.mxu0 %v6492_v2  ;;  %v6908_v2 = vor.u32 %v9476_v57, %v6907_v55  ;;  %v6572_v12 = vor.u32 %v9392_v3, %v6571_v1  ;;  %v6875_v32 = vld [vmem:[%s15076_s1 + $0x5a8] sm:$0xf]  ;;  %v9432_v55 = vld [vmem:[%s15076_s1 + $0x494] sm:$0xf0] }
 0x1a1   :  { %5524 = vmatpush.bf16.msrb.mxu1 %v6620_v60  ;;  %v5260_v60 = vpop.f32.mrf.mxu0  ;;  %v6539_v51 = vld [vmem:[%s15076_s1 + $0x308] sm:$0xf]  ;;  %v6876_v54 = vor.u32 %v9468_v40, %v6875_v32  ;;  %v9428_v9 = vld [vmem:[%s15076_s1 + $0x474] sm:$0xf0] }
 0x1a2   :  { %5489 = vmatpush.bf16.msra.mxu2 %v6172_v17  ;;  %v9356_v17 = vld [vmem:[%s15076_s1 + $0x234] sm:$0xf0]  ;;  %v6859_v57 = vld [vmem:[%s15076_s1 + $0x588] sm:$0xf]  ;;  %v6540_v3 = vor.u32 %v9384_v52, %v6539_v51 }
 0x1a3   :  { %5502 = vmatpush.bf16.msra.mxu3 %v6300_v24  ;;  %v9388_v24 = vld [vmem:[%s15076_s1 + $0x334] sm:$0xf0]  ;;  %v6428_v18 = vor.u32 %v9356_v17, %v6427_v14  ;;  %v7163_v1 = vld [vmem:[%s15076_s1 + $0x7e8] sm:$0xf] }
 0x1a4   :  { %5512 = vmatpush.bf16.msrb.mxu0 %v6476_v26  ;;  %v6747_v26 = vld [vmem:[%s15076_s1 + $0x4a8] sm:$0xf]  ;;  %v6556_v47 = vor.u32 %v9388_v24, %v6555_v39  ;;  %v9504_v14 = vld [vmem:[%s15076_s1 + $0x6d4] sm:$0xf0] }
 0x1a5   :  { %5525 = vmatpush.bf16.msrb.mxu1 %v6604_v43  ;;  %v6411_v43 = vld [vmem:[%s15076_s1 + $0x208] sm:$0xf]  ;;  %v6748_v48 = vor.u32 %v9436_v27, %v6747_v26  ;;  %v9536_v39 = vld [vmem:[%s15076_s1 + $0x7d4] sm:$0xf0] }
 0x1a6   :  { %5490 = vmatpush.bf16.msra.mxu2 %v6156_v36  ;;  %v6731_v36 = vld [vmem:[%s15076_s1 + $0x488] sm:$0xf]  ;;  %v6412_v0 = vor.u32 %v9352_v50, %v6411_v43  ;;  %v9456_v50 = vld [vmem:[%s15076_s1 + $0x554] sm:$0xf0] }
 0x1a7   :  { %5503 = vmatpush.bf16.msra.mxu3 %v6284_v58  ;;  %v5271_v58 = vpop.f32.mrf.mxu1  ;;  %v6732_v5 = vor.u32 %v9432_v55, %v6731_v36  ;;  %v6843_v8 = vld [vmem:[%s15076_s1 + $0x568] sm:$0xf]  ;;  %v9500_v52 = vld [vmem:[%s15076_s1 + $0x6b4] sm:$0xf0] }
 0x1a8   :  { %5513 = vmatpush.bf16.msrb.mxu0 %v6460_v59  ;;  %v9464_v59 = vld [vmem:[%s15076_s1 + $0x594] sm:$0xf0]  ;;  %v5272_v63 = vadd.f32 %v5271_v58, %v12743_v22  ;;  %v6715_v22 = vld [vmem:[%s15076_s1 + $0x468] sm:$0xf] }
 0x1a9   :  { %5526 = vmatpush.bf16.msrb.mxu1 %v6588_v61  ;;  %5491 = vmatmul.bf16.vlgmr.msra.gmra.mxu2 %v10391_v20  ;;  %v7035_v61 = vld [vmem:[%s15076_s1 + $0x6e8] sm:$0xf]  ;;  %v6860_v7 = vor.u32 %v9464_v59, %v6859_v57  ;;  %v9532_v55 = vld [vmem:[%s15076_s1 + $0x7b4] sm:$0xf0] }
 0x1aa   :  { %5535 = vmatpush.bf16.msrb.mxu2 %v6780_v62  ;;  %5504 = vmatmul.bf16.vlgmr.msra.gmra.mxu3 %v10394_v21  ;;  %v9508_v62 = vld [vmem:[%s15076_s1 + $0x6f4] sm:$0xf0]  ;;  %v7147_v17 = vld [vmem:[%s15076_s1 + $0x7c8] sm:$0xf] }
 0x1ab   :  { %5548 = vmatpush.bf16.msrb.mxu3 %v6908_v2  ;;  %v9540_v2 = vld [vmem:[%s15076_s1 + $0x7f4] sm:$0xf0]  ;;  %v7036_v60 = vor.u32 %v9508_v62, %v7035_v61  ;;  %v6699_v40 = vld [vmem:[%s15076_s1 + $0x448] sm:$0xf] }
 0x1ac   :  { %5514 = vmatpush.bf16.msrb.mxu0 %v6444_v10  ;;  %v7164_v10 = vor.u32 %v9540_v2, %v7163_v1  ;;  %v5284_v26 = vpop.f32.mrf.mxu2  ;;  %v6827_v43 = vld [vmem:[%s15076_s1 + $0x548] sm:$0xf]  ;;  %v9452_v2 = vld [vmem:[%s15076_s1 + $0x534] sm:$0xf0] }
 0x1ad   :  { %5527 = vmatpush.bf16.msrb.mxu1 %v6572_v12  ;;  %v9460_v12 = vld [vmem:[%s15076_s1 + $0x574] sm:$0xf0]  ;;  %v5297_v32 = vpop.f32.mrf.mxu3  ;;  %v7003_v51 = vld [vmem:[%s15076_s1 + $0x6a8] sm:$0xf]  ;;  %v6828_v59 = vor.u32 %v9456_v50, %v6827_v43 }
 0x1ae   :  { %5536 = vmatpush.bf16.msrb.mxu2 %v6764_v13  ;;  %v7019_v13 = vld [vmem:[%s15076_s1 + $0x6c8] sm:$0xf]  ;;  %v6844_v24 = vor.u32 %v9460_v12, %v6843_v8  ;;  %v7004_v61 = vor.u32 %v9500_v52, %v7003_v51  ;;  %v9604_v51 = vld [vmem:[%s15076_s1 + $0x9f4] sm:$0xf0] }
 0x1af   :  { %5549 = vmatpush.bf16.msrb.mxu3 %v6892_v34  ;;  %v6716_v34 = vor.u32 %v9428_v9, %v6715_v22  ;;  %v7020_v27 = vor.u32 %v9504_v14, %v7019_v13  ;;  %v7131_v36 = vld [vmem:[%s15076_s1 + $0x7a8] sm:$0xf]  ;;  %v9528_v22 = vld [vmem:[%s15076_s1 + $0x794] sm:$0xf0] }
 0x1b0   :  { %5515 = vmatpush.bf16.msrb.mxu0 %v6428_v18  ;;  %v9424_v18 = vld [vmem:[%s15076_s1 + $0x454] sm:$0xf0]  ;;  %v6683_v62 = vld [vmem:[%s15076_s1 + $0x428] sm:$0xf]  ;;  %v7132_v1 = vor.u32 %v9532_v55, %v7131_v36 }
 0x1b1   :  { %5528 = vmatpush.bf16.msrb.mxu1 %v6556_v47  ;;  %v5285_v47 = vadd.f32 %v5284_v26, %v5272_v63  ;;  %v6700_v58 = vor.u32 %v9424_v18, %v6699_v40  ;;  %v9420_v63 = vld [vmem:[%s15076_s1 + $0x434] sm:$0xf0]  ;;  %v7099_v40 = vld [vmem:[%s15076_s1 + $0x768] sm:$0xf] }
 0x1b2   :  { %5537 = vmatpush.bf16.msrb.mxu2 %v6748_v48  ;;  %v7148_v48 = vor.u32 %v9536_v39, %v7147_v17  ;;  %v6684_v8 = vor.u32 %v9420_v63, %v6683_v62  ;;  %v9416_v14 = vld [vmem:[%s15076_s1 + $0x414] sm:$0xf0]  ;;  %v6795_v17 = vld [vmem:[%s15076_s1 + $0x508] sm:$0xf] }
 0x1b3   :  { %5550 = vmatpush.bf16.msrb.mxu3 %v6876_v54  ;;  %v5273_v54 = vpop.f32.mrf.mxu1  ;;  %v5298_v57 = vadd.f32 %v5297_v32, %v5285_v47  ;;  %v9448_v39 = vld [vmem:[%s15076_s1 + $0x514] sm:$0xf0]  ;;  %v7291_v43 = vld [vmem:[%s15076_s1 + $0x8e8] sm:$0xf] }
 0x1b4   :  { %5516 = vmatpush.bf16.msrb.mxu0 %v6412_v0  ;;  %v6811_v0 = vld [vmem:[%s15076_s1 + $0x528] sm:$0xf]  ;;  %v9492_v32 = vld [vmem:[%s15076_s1 + $0x674] sm:$0xf0]  ;;  %v6796_v52 = vor.u32 %v9448_v39, %v6795_v17 }
 0x1b5   :  { %5529 = vmatpush.bf16.msrb.mxu1 %v6540_v3  ;;  %v6987_v3 = vld [vmem:[%s15076_s1 + $0x688] sm:$0xf]  ;;  %v6812_v12 = vor.u32 %v9452_v2, %v6811_v0  ;;  %v9524_v18 = vld [vmem:[%s15076_s1 + $0x774] sm:$0xf0] }
 0x1b6   :  { %5538 = vmatpush.bf16.msrb.mxu2 %v6732_v5  ;;  %v9496_v5 = vld [vmem:[%s15076_s1 + $0x694] sm:$0xf0]  ;;  %v7419_v50 = vld [vmem:[%s15076_s1 + $0x9e8] sm:$0xf]  ;;  %v7100_v36 = vor.u32 %v9524_v18, %v7099_v40 }
 0x1b7   :  { %5551 = vmatpush.bf16.msrb.mxu3 %v6860_v7  ;;  %5517 = vmatmul.bf16.vlgmr.msrb.gmra.mxu0 %v10359_v4  ;;  %v5310_v7 = vpop.f32.mrf.mxu0  ;;  %v6988_v13 = vor.u32 %v9496_v5, %v6987_v3  ;;  %v9572_v47 = vld [vmem:[%s15076_s1 + $0x8f4] sm:$0xf0]  ;;  %v7275_v63 = vld [vmem:[%s15076_s1 + $0x8c8] sm:$0xf] }
 0x1b8   :  { %5561 = vmatpush.bf16.msra.mxu0 %v7036_v60  ;;  %5530 = vmatmul.bf16.vlgmr.msrb.gmra.mxu1 %v10364_v6  ;;  %v7115_v60 = vld [vmem:[%s15076_s1 + $0x788] sm:$0xf]  ;;  %v12942_v9 = vadd.f32 %v5310_v7, %v5298_v57  ;;  %v7292_v55 = vor.u32 %v9572_v47, %v7291_v43  ;;  %v9520_v62 = vld [vmem:[%s15076_s1 + $0x754] sm:$0xf0] }
 0x1b9   :  { %5574 = vmatpush.bf16.msra.mxu1 %v7164_v10  ;;  %v6667_v10 = vld [vmem:[%s15076_s1 + $0x408] sm:$0xf]  ;;  %v7116_v26 = vor.u32 %v9528_v22, %v7115_v60  ;;  %v9568_v0 = vld [vmem:[%s15076_s1 + $0x8d4] sm:$0xf0] }
 0x1ba   :  { %5539 = vmatpush.bf16.msrb.mxu2 %v6716_v34  ;;  %v5286_v34 = vpop.f32.mrf.mxu2  ;;  %v6955_v57 = vld [vmem:[%s15076_s1 + $0x648] sm:$0xf]  ;;  %v9600_v3 = vld [vmem:[%s15076_s1 + $0x9d4] sm:$0xf0]  ;;  %v7276_v60 = vor.u32 %v9568_v0, %v7275_v63 }
 0x1bb   :  { %5552 = vmatpush.bf16.msrb.mxu3 %v6844_v24  ;;  %v5299_v24 = vpop.f32.mrf.mxu3  ;;  %v7403_v2 = vld [vmem:[%s15076_s1 + $0x9c8] sm:$0xf]  ;;  %v9564_v17 = vld [vmem:[%s15076_s1 + $0x8b4] sm:$0xf0] }
 0x1bc   :  { %5562 = vmatpush.bf16.msra.mxu0 %v7020_v27  ;;  %v6971_v27 = vld [vmem:[%s15076_s1 + $0x668] sm:$0xf]  ;;  %v9596_v34 = vld [vmem:[%s15076_s1 + $0x9b4] sm:$0xf0] }
 0x1bd   :  { %5575 = vmatpush.bf16.msra.mxu1 %v7148_v48  ;;  %v6668_v48 = vor.u32 %v9416_v14, %v6667_v10  ;;  %v6972_v54 = vor.u32 %v9492_v32, %v6971_v27  ;;  %v6939_v22 = vld [vmem:[%s15076_s1 + $0x628] sm:$0xf]  ;;  %v9480_v40 = vld [vmem:[%s15076_s1 + $0x614] sm:$0xf0] }
 0x1be   :  { %5540 = vmatpush.bf16.msrb.mxu2 %v6700_v58  ;;  %v9488_v58 = vld [vmem:[%s15076_s1 + $0x654] sm:$0xf0]  ;;  %v7067_v10 = vld [vmem:[%s15076_s1 + $0x728] sm:$0xf] }
 0x1bf   :  { %5553 = vmatpush.bf16.msrb.mxu3 %v6828_v59  ;;  %v7083_v59 = vld [vmem:[%s15076_s1 + $0x748] sm:$0xf]  ;;  %v6956_v5 = vor.u32 %v9488_v58, %v6955_v57  ;;  %v9512_v43 = vld [vmem:[%s15076_s1 + $0x714] sm:$0xf0] }
 0x1c0   :  { %5563 = vmatpush.bf16.msra.mxu0 %v7004_v61  ;;  %v7420_v61 = vor.u32 %v9604_v51, %v7419_v50  ;;  %v7084_v7 = vor.u32 %v9520_v62, %v7083_v59  ;;  %v7259_v14 = vld [vmem:[%s15076_s1 + $0x8a8] sm:$0xf]  ;;  %v9560_v50 = vld [vmem:[%s15076_s1 + $0x894] sm:$0xf0] }
 0x1c1   :  { %5576 = vmatpush.bf16.msra.mxu1 %v7132_v1  ;;  %v5312_v1 = vpop.f32.mrf.mxu0  ;;  %v7387_v39 = vld [vmem:[%s15076_s1 + $0x9a8] sm:$0xf]  ;;  %v7260_v32 = vor.u32 %v9564_v17, %v7259_v14  ;;  %v9668_v59 = vld [vmem:[%s15076_s1 + $0xbf4] sm:$0xf0] }
 0x1c2   :  { %5541 = vmatpush.bf16.msrb.mxu2 %v6684_v8  ;;  %v9484_v8 = vld [vmem:[%s15076_s1 + $0x634] sm:$0xf0]  ;;  %v7051_v18 = vld [vmem:[%s15076_s1 + $0x708] sm:$0xf]  ;;  %v7388_v47 = vor.u32 %v9596_v34, %v7387_v39 }
 0x1c3   :  { %5554 = vmatpush.bf16.msrb.mxu3 %v6812_v12  ;;  %v7404_v12 = vor.u32 %v9600_v3, %v7403_v2  ;;  %v6940_v24 = vor.u32 %v9484_v8, %v6939_v22  ;;  %v7371_v51 = vld [vmem:[%s15076_s1 + $0x988] sm:$0xf]  ;;  %v9556_v2 = vld [vmem:[%s15076_s1 + $0x874] sm:$0xf0] }
 0x1c4   :  { %5564 = vmatpush.bf16.msra.mxu0 %v6988_v13  ;;  %v9516_v13 = vld [vmem:[%s15076_s1 + $0x734] sm:$0xf0]  ;;  %v7675_v58 = vld [vmem:[%s15076_s1 + $0xbe8] sm:$0xf] }
 0x1c5   :  { %5577 = vmatpush.bf16.msra.mxu1 %v7116_v26  ;;  %v6923_v26 = vld [vmem:[%s15076_s1 + $0x608] sm:$0xf]  ;;  %v7068_v27 = vor.u32 %v9516_v13, %v7067_v10  ;;  %v9632_v22 = vld [vmem:[%s15076_s1 + $0xad4] sm:$0xf0] }
 0x1c6   :  { %5542 = vmatpush.bf16.msrb.mxu2 %v6668_v48  ;;  %v7243_v48 = vld [vmem:[%s15076_s1 + $0x888] sm:$0xf]  ;;  %v6924_v57 = vor.u32 %v9480_v40, %v6923_v26  ;;  %v9664_v10 = vld [vmem:[%s15076_s1 + $0xbd4] sm:$0xf0] }
 0x1c7   :  { %5555 = vmatpush.bf16.msrb.mxu3 %v6796_v52  ;;  %v13051_v52 = vpop.f32.mrf.mxu1  ;;  %v7244_v62 = vor.u32 %v9560_v50, %v7243_v48  ;;  %v7227_v1 = vld [vmem:[%s15076_s1 + $0x868] sm:$0xf]  ;;  %v9660_v48 = vld [vmem:[%s15076_s1 + $0xbb4] sm:$0xf0] }
 0x1c8   :  { %5565 = vmatpush.bf16.msra.mxu0 %v6972_v54  ;;  %v9592_v54 = vld [vmem:[%s15076_s1 + $0x994] sm:$0xf0]  ;;  %v7355_v3 = vld [vmem:[%s15076_s1 + $0x968] sm:$0xf] }
 0x1c9   :  { %5578 = vmatpush.bf16.msra.mxu1 %v7100_v36  ;;  %5543 = vmatmul.bf16.vlgmr.msrb.gmra.mxu2 %v10550_v41  ;;  %v7547_v36 = vld [vmem:[%s15076_s1 + $0xae8] sm:$0xf]  ;;  %v7372_v63 = vor.u32 %v9592_v54, %v7371_v51 }
 0x1ca   :  { %5587 = vmatpush.bf16.msra.mxu2 %v7292_v55  ;;  %5556 = vmatmul.bf16.vlgmr.msrb.gmra.mxu3 %v10554_v44  ;;  %v9636_v55 = vld [vmem:[%s15076_s1 + $0xaf4] sm:$0xf0]  ;;  %v7659_v8 = vld [vmem:[%s15076_s1 + $0xbc8] sm:$0xf] }
 0x1cb   :  { %5600 = vmatpush.bf16.msra.mxu3 %v7420_v61  ;;  %v7052_v61 = vor.u32 %v9512_v43, %v7051_v18  ;;  %v7548_v0 = vor.u32 %v9636_v55, %v7547_v36  ;;  %v7211_v34 = vld [vmem:[%s15076_s1 + $0x848] sm:$0xf]  ;;  %v9628_v18 = vld [vmem:[%s15076_s1 + $0xab4] sm:$0xf0] }
 0x1cc   :  { %5566 = vmatpush.bf16.msra.mxu0 %v6956_v5  ;;  %v7676_v5 = vor.u32 %v9668_v59, %v7675_v58  ;;  %v13092_v14 = vpop.f32.mrf.mxu2  ;;  %v7339_v26 = vld [vmem:[%s15076_s1 + $0x948] sm:$0xf]  ;;  %v9548_v55 = vld [vmem:[%s15076_s1 + $0x834] sm:$0xf0] }
 0x1cd   :  { %5579 = vmatpush.bf16.msra.mxu1 %v7084_v7  ;;  %v9588_v7 = vld [vmem:[%s15076_s1 + $0x974] sm:$0xf0]  ;;  %v13094_v39 = vpop.f32.mrf.mxu3  ;;  %v7515_v40 = vld [vmem:[%s15076_s1 + $0xaa8] sm:$0xf] }
 0x1ce   :  { %5588 = vmatpush.bf16.msra.mxu2 %v7276_v60  ;;  %v7531_v60 = vld [vmem:[%s15076_s1 + $0xac8] sm:$0xf]  ;;  %v7356_v13 = vor.u32 %v9588_v7, %v7355_v3  ;;  %v7516_v54 = vor.u32 %v9628_v18, %v7515_v40  ;;  %v9580_v59 = vld [vmem:[%s15076_s1 + $0x934] sm:$0xf0] }
 0x1cf   :  { %5601 = vmatpush.bf16.msra.mxu3 %v7404_v12  ;;  %v7228_v12 = vor.u32 %v9556_v2, %v7227_v1  ;;  %v7532_v17 = vor.u32 %v9632_v22, %v7531_v60  ;;  %v5325_v43 = vpop.f32.mrf.mxu1  ;;  %v7195_v36 = vld [vmem:[%s15076_s1 + $0x828] sm:$0xf]  ;;  %v9656_v1 = vld [vmem:[%s15076_s1 + $0xb94] sm:$0xf0] }
 0x1d0   :  { %5567 = vmatpush.bf16.msra.mxu0 %v6940_v24  ;;  %v9552_v24 = vld [vmem:[%s15076_s1 + $0x854] sm:$0xf0]  ;;  %v7196_v2 = vor.u32 %v9548_v55, %v7195_v36  ;;  %v7179_v3 = vld [vmem:[%s15076_s1 + $0x808] sm:$0xf] }
 0x1d1   :  { %5580 = vmatpush.bf16.msra.mxu1 %v7068_v27  ;;  %v7660_v27 = vor.u32 %v9664_v10, %v7659_v8  ;;  %v7212_v50 = vor.u32 %v9552_v24, %v7211_v34  ;;  %v9544_v60 = vld [vmem:[%s15076_s1 + $0x814] sm:$0xf0]  ;;  %v7307_v22 = vld [vmem:[%s15076_s1 + $0x908] sm:$0xf] }
 0x1d2   :  { %5589 = vmatpush.bf16.msra.mxu2 %v7260_v32  ;;  %v9584_v32 = vld [vmem:[%s15076_s1 + $0x954] sm:$0xf0]  ;;  %v7611_v24 = vld [vmem:[%s15076_s1 + $0xb68] sm:$0xf]  ;;  %v7180_v40 = vor.u32 %v9544_v60, %v7179_v3 }
 0x1d3   :  { %5602 = vmatpush.bf16.msra.mxu3 %v7388_v47  ;;  %v7643_v47 = vld [vmem:[%s15076_s1 + $0xba8] sm:$0xf]  ;;  %v7340_v51 = vor.u32 %v9584_v32, %v7339_v26  ;;  %v9576_v8 = vld [vmem:[%s15076_s1 + $0x914] sm:$0xf0] }
 0x1d4   :  { %5568 = vmatpush.bf16.msra.mxu0 %v6924_v57  ;;  %v7323_v57 = vld [vmem:[%s15076_s1 + $0x928] sm:$0xf]  ;;  %v7644_v58 = vor.u32 %v9660_v48, %v7643_v47  ;;  %v5338_v10 = vpop.f32.mrf.mxu2  ;;  %v9620_v34 = vld [vmem:[%s15076_s1 + $0xa74] sm:$0xf0]  ;;  %v7308_v47 = vor.u32 %v9576_v8, %v7307_v22 }
 0x1d5   :  { %5581 = vmatpush.bf16.msra.mxu1 %v7052_v61  ;;  %v7499_v61 = vld [vmem:[%s15076_s1 + $0xa88] sm:$0xf]  ;;  %v9652_v26 = vld [vmem:[%s15076_s1 + $0xb74] sm:$0xf0] }
 0x1d6   :  { %5590 = vmatpush.bf16.msra.mxu2 %v7244_v62  ;;  %v9624_v62 = vld [vmem:[%s15076_s1 + $0xa94] sm:$0xf0]  ;;  %v7931_v18 = vld [vmem:[%s15076_s1 + $0xde8] sm:$0xf] }
 0x1d7   :  { %5603 = vmatpush.bf16.msra.mxu3 %v7372_v63  ;;  %5569 = vmatmul.bf16.vlgmr.msra.gmra.mxu0 %v10542_v38  ;;  %v13140_v63 = vpop.f32.mrf.mxu0  ;;  %v7500_v7 = vor.u32 %v9624_v62, %v7499_v61  ;;  %v9700_v32 = vld [vmem:[%s15076_s1 + $0xcf4] sm:$0xf0]  ;;  %v7595_v55 = vld [vmem:[%s15076_s1 + $0xb48] sm:$0xf] }
 0x1d8   :  { %5613 = vmatpush.bf16.msrb.mxu0 %v7548_v0  ;;  %5582 = vmatmul.bf16.vlgmr.msra.gmra.mxu1 %v10552_v42  ;;  %v7627_v0 = vld [vmem:[%s15076_s1 + $0xb88] sm:$0xf]  ;;  %v9732_v43 = vld [vmem:[%s15076_s1 + $0xdf4] sm:$0xf0] }
 0x1d9   :  { %5626 = vmatpush.bf16.msrb.mxu1 %v7676_v5  ;;  %v7324_v5 = vor.u32 %v9580_v59, %v7323_v57  ;;  %v9616_v36 = vld [vmem:[%s15076_s1 + $0xa54] sm:$0xf0]  ;;  %v7932_v57 = vor.u32 %v9732_v43, %v7931_v18  ;;  %v7787_v59 = vld [vmem:[%s15076_s1 + $0xcc8] sm:$0xf] }
 0x1da   :  { %5591 = vmatpush.bf16.msra.mxu2 %v7228_v12  ;;  %v5351_v12 = vpop.f32.mrf.mxu3  ;;  %v9696_v61 = vld [vmem:[%s15076_s1 + $0xcd4] sm:$0xf0]  ;;  %v7579_v22 = vld [vmem:[%s15076_s1 + $0xb28] sm:$0xf] }
 0x1db   :  { %5604 = vmatpush.bf16.msra.mxu3 %v7356_v13  ;;  %v7628_v13 = vor.u32 %v9656_v1, %v7627_v0  ;;  %v7915_v0 = vld [vmem:[%s15076_s1 + $0xdc8] sm:$0xf]  ;;  %v9728_v1 = vld [vmem:[%s15076_s1 + $0xdd4] sm:$0xf0] }
 0x1dc   :  { %5614 = vmatpush.bf16.msrb.mxu0 %v7532_v17  ;;  %v7483_v17 = vld [vmem:[%s15076_s1 + $0xa68] sm:$0xf]  ;;  %v9612_v60 = vld [vmem:[%s15076_s1 + $0xa34] sm:$0xf0]  ;;  %v7916_v8 = vor.u32 %v9728_v1, %v7915_v0 }
 0x1dd   :  { %5627 = vmatpush.bf16.msrb.mxu1 %v7660_v27  ;;  %v7803_v27 = vld [vmem:[%s15076_s1 + $0xce8] sm:$0xf]  ;;  %v7484_v48 = vor.u32 %v9620_v34, %v7483_v17  ;;  %v9644_v10 = vld [vmem:[%s15076_s1 + $0xb34] sm:$0xf0] }
 0x1de   :  { %5592 = vmatpush.bf16.msra.mxu2 %v7212_v50  ;;  %v7612_v50 = vor.u32 %v9652_v26, %v7611_v24  ;;  %v7771_v12 = vld [vmem:[%s15076_s1 + $0xca8] sm:$0xf]  ;;  %v9724_v34 = vld [vmem:[%s15076_s1 + $0xdb4] sm:$0xf0] }
 0x1df   :  { %5605 = vmatpush.bf16.msra.mxu3 %v7340_v51  ;;  %v7804_v51 = vor.u32 %v9700_v32, %v7803_v27  ;;  %v5364_v62 = vpop.f32.mrf.mxu0  ;;  %v7899_v17 = vld [vmem:[%s15076_s1 + $0xda8] sm:$0xf]  ;;  %v7580_v27 = vor.u32 %v9644_v10, %v7579_v22  ;;  %v9640_v43 = vld [vmem:[%s15076_s1 + $0xb14] sm:$0xf0] }
 0x1e0   :  { %5615 = vmatpush.bf16.msrb.mxu0 %v7516_v54  ;;  %v7467_v54 = vld [vmem:[%s15076_s1 + $0xa48] sm:$0xf]  ;;  %v9716_v22 = vld [vmem:[%s15076_s1 + $0xd74] sm:$0xf0] }
 0x1e1   :  { %5628 = vmatpush.bf16.msrb.mxu1 %v7644_v58  ;;  %v9648_v58 = vld [vmem:[%s15076_s1 + $0xb54] sm:$0xf0]  ;;  %v7435_v26 = vld [vmem:[%s15076_s1 + $0xa08] sm:$0xf] }
 0x1e2   :  { %5593 = vmatpush.bf16.msra.mxu2 %v7196_v2  ;;  %v7468_v2 = vor.u32 %v9616_v36, %v7467_v54  ;;  %v7596_v3 = vor.u32 %v9648_v58, %v7595_v55  ;;  %v7563_v18 = vld [vmem:[%s15076_s1 + $0xb08] sm:$0xf]  ;;  %v9720_v36 = vld [vmem:[%s15076_s1 + $0xd94] sm:$0xf0] }
 0x1e3   :  { %5606 = vmatpush.bf16.msra.mxu3 %v7324_v5  ;;  %v7788_v5 = vor.u32 %v9696_v61, %v7787_v59  ;;  %v8059_v55 = vld [vmem:[%s15076_s1 + $0xee8] sm:$0xf]  ;;  %v9796_v61 = vld [vmem:[%s15076_s1 + $0xff4] sm:$0xf0]  ;;  %v7564_v62 = vor.u32 %v9640_v43, %v7563_v18 }
 0x1e4   :  { %5616 = vmatpush.bf16.msrb.mxu0 %v7500_v7  ;;  %v7451_v7 = vld [vmem:[%s15076_s1 + $0xa28] sm:$0xf]  ;;  %v9760_v10 = vld [vmem:[%s15076_s1 + $0xed4] sm:$0xf0] }
 0x1e5   :  { %5629 = vmatpush.bf16.msrb.mxu1 %v7628_v13  ;;  %v9692_v13 = vld [vmem:[%s15076_s1 + $0xcb4] sm:$0xf0]  ;;  %v7452_v24 = vor.u32 %v9612_v60, %v7451_v7  ;;  %v13255_v54 = vpop.f32.mrf.mxu1  ;;  %v8187_v59 = vld [vmem:[%s15076_s1 + $0xfe8] sm:$0xf] }
 0x1e6   :  { %5594 = vmatpush.bf16.msra.mxu2 %v7180_v40  ;;  %v7772_v32 = vor.u32 %v9692_v13, %v7771_v12  ;;  %v9608_v40 = vld [vmem:[%s15076_s1 + $0xa14] sm:$0xf0]  ;;  %v7867_v7 = vld [vmem:[%s15076_s1 + $0xd68] sm:$0xf]  ;;  %v8188_v60 = vor.u32 %v9796_v61, %v8187_v59 }
 0x1e7   :  { %5607 = vmatpush.bf16.msra.mxu3 %v7308_v47  ;;  %v7900_v47 = vor.u32 %v9724_v34, %v7899_v17  ;;  %v7436_v58 = vor.u32 %v9608_v40, %v7435_v26  ;;  %v8171_v12 = vld [vmem:[%s15076_s1 + $0xfc8] sm:$0xf]  ;;  %v9792_v13 = vld [vmem:[%s15076_s1 + $0xfd4] sm:$0xf0]  ;;  %v7868_v34 = vor.u32 %v9716_v22, %v7867_v7 }
 0x1e8   :  { %5617 = vmatpush.bf16.msrb.mxu0 %v7484_v48  ;;  %v7755_v48 = vld [vmem:[%s15076_s1 + $0xc88] sm:$0xf]  ;;  %v9680_v40 = vld [vmem:[%s15076_s1 + $0xc54] sm:$0xf0]  ;;  %v8172_v43 = vor.u32 %v9792_v13, %v8171_v12 }
 0x1e9   :  { %5630 = vmatpush.bf16.msrb.mxu1 %v7612_v50  ;;  %5595 = vmatmul.bf16.vlgmr.msra.gmra.mxu2 %v10743_v25  ;;  %v9688_v50 = vld [vmem:[%s15076_s1 + $0xc94] sm:$0xf0]  ;;  %v7851_v18 = vld [vmem:[%s15076_s1 + $0xd48] sm:$0xf] }
 0x1ea   :  { %5639 = vmatpush.bf16.msrb.mxu2 %v7804_v51  ;;  %5608 = vmatmul.bf16.vlgmr.msra.gmra.mxu3 %v10756_v30  ;;  %v7883_v51 = vld [vmem:[%s15076_s1 + $0xd88] sm:$0xf]  ;;  %v7756_v0 = vor.u32 %v9688_v50, %v7755_v48  ;;  %v9756_v50 = vld [vmem:[%s15076_s1 + $0xeb4] sm:$0xf0] }
 0x1eb   :  { %5652 = vmatpush.bf16.msrb.mxu3 %v7932_v57  ;;  %v9764_v57 = vld [vmem:[%s15076_s1 + $0xef4] sm:$0xf0]  ;;  %v7884_v1 = vor.u32 %v9720_v36, %v7883_v51  ;;  %v8027_v48 = vld [vmem:[%s15076_s1 + $0xea8] sm:$0xf] }
 0x1ec   :  { %5618 = vmatpush.bf16.msrb.mxu0 %v7468_v2  ;;  %v8060_v2 = vor.u32 %v9764_v57, %v8059_v55  ;;  %v8155_v36 = vld [vmem:[%s15076_s1 + $0xfa8] sm:$0xf]  ;;  %v9788_v55 = vld [vmem:[%s15076_s1 + $0xfb4] sm:$0xf0]  ;;  %v8028_v59 = vor.u32 %v9756_v50, %v8027_v48  ;;  %v5324_v50 = vadd.f32 %v13051_v52, %v12942_v9 }
 0x1ed   :  { %5631 = vmatpush.bf16.msrb.mxu1 %v7596_v3  ;;  %v7739_v3 = vld [vmem:[%s15076_s1 + $0xc68] sm:$0xf]  ;;  %v5377_v51 = vpop.f32.mrf.mxu1  ;;  %v9784_v22 = vld [vmem:[%s15076_s1 + $0xf94] sm:$0xf0] }
 0x1ee   :  { %5640 = vmatpush.bf16.msrb.mxu2 %v7788_v5  ;;  %v9684_v5 = vld [vmem:[%s15076_s1 + $0xc74] sm:$0xf0]  ;;  %v7707_v61 = vld [vmem:[%s15076_s1 + $0xc28] sm:$0xf]  ;;  %v5337_v52 = vadd.f32 %v13092_v14, %v5324_v50 }
 0x1ef   :  { %5653 = vmatpush.bf16.msrb.mxu3 %v7916_v8  ;;  %v8043_v8 = vld [vmem:[%s15076_s1 + $0xec8] sm:$0xf]  ;;  %v7740_v17 = vor.u32 %v9684_v5, %v7739_v3  ;;  %v9752_v5 = vld [vmem:[%s15076_s1 + $0xe94] sm:$0xf0] }
 0x1f0   :  { %5619 = vmatpush.bf16.msrb.mxu0 %v7452_v24  ;;  %v13296_v24 = vpop.f32.mrf.mxu2  ;;  %v8044_v26 = vor.u32 %v9760_v10, %v8043_v8  ;;  %v8011_v3 = vld [vmem:[%s15076_s1 + $0xe88] sm:$0xf]  ;;  %v9780_v51 = vld [vmem:[%s15076_s1 + $0xf74] sm:$0xf0] }
 0x1f1   :  { %5632 = vmatpush.bf16.msrb.mxu1 %v7580_v27  ;;  %v13298_v27 = vpop.f32.mrf.mxu3  ;;  %v7691_v10 = vld [vmem:[%s15076_s1 + $0xc08] sm:$0xf]  ;;  %v8012_v13 = vor.u32 %v9752_v5, %v8011_v3  ;;  %v9860_v9 = vld [vmem:[%s15076_s1 + $0x11f4] sm:$0xf0] }
 0x1f2   :  { %5641 = vmatpush.bf16.msrb.mxu2 %v7772_v32  ;;  %v7723_v32 = vld [vmem:[%s15076_s1 + $0xc48] sm:$0xf]  ;;  %v9776_v5 = vld [vmem:[%s15076_s1 + $0xf54] sm:$0xf0] }
 0x1f3   :  { %5654 = vmatpush.bf16.msrb.mxu3 %v7900_v47  ;;  %v9712_v47 = vld [vmem:[%s15076_s1 + $0xd54] sm:$0xf0]  ;;  %v7724_v57 = vor.u32 %v9680_v40, %v7723_v32  ;;  %v8123_v48 = vld [vmem:[%s15076_s1 + $0xf68] sm:$0xf] }
 0x1f4   :  { %5620 = vmatpush.bf16.msrb.mxu0 %v7436_v58  ;;  %v7852_v58 = vor.u32 %v9712_v47, %v7851_v18  ;;  %v13344_v7 = vpop.f32.mrf.mxu0  ;;  %v9748_v47 = vld [vmem:[%s15076_s1 + $0xe74] sm:$0xf0]  ;;  %v8107_v3 = vld [vmem:[%s15076_s1 + $0xf48] sm:$0xf] }
 0x1f5   :  { %5633 = vmatpush.bf16.msrb.mxu1 %v7564_v62  ;;  %v9676_v62 = vld [vmem:[%s15076_s1 + $0xc34] sm:$0xf0] }
 0x1f6   :  { %5642 = vmatpush.bf16.msrb.mxu2 %v7756_v0  ;;  %v7835_v0 = vld [vmem:[%s15076_s1 + $0xd28] sm:$0xf]  ;;  %v7708_v8 = vor.u32 %v9676_v62, %v7707_v61  ;;  %v8124_v62 = vor.u32 %v9780_v51, %v8123_v48  ;;  %v9820_v50 = vld [vmem:[%s15076_s1 + $0x10b4] sm:$0xf0] }
 0x1f7   :  { %5655 = vmatpush.bf16.msrb.mxu3 %v7884_v1  ;;  %5621 = vmatmul.bf16.vlgmr.msrb.gmra.mxu0 %v10754_v29  ;;  %v8156_v1 = vor.u32 %v9788_v55, %v8155_v36  ;;  %v8315_v36 = vld [vmem:[%s15076_s1 + $0x10e8] sm:$0xf]  ;;  %v9828_v55 = vld [vmem:[%s15076_s1 + $0x10f4] sm:$0xf0] }
 0x1f8   :  { %5665 = vmatpush.bf16.msra.mxu0 %v8060_v2  ;;  %5634 = vmatmul.bf16.vlgmr.msrb.gmra.mxu1 %v10764_v33  ;;  %v9708_v2 = vld [vmem:[%s15076_s1 + $0xd34] sm:$0xf0]  ;;  %v5390_v32 = vpop.f32.mrf.mxu2  ;;  %v8283_v48 = vld [vmem:[%s15076_s1 + $0x10a8] sm:$0xf] }
 0x1f9   :  { %5678 = vmatpush.bf16.msra.mxu1 %v8188_v60  ;;  %v8139_v60 = vld [vmem:[%s15076_s1 + $0xf88] sm:$0xf]  ;;  %v7836_v12 = vor.u32 %v9708_v2, %v7835_v0  ;;  %v5403_v40 = vpop.f32.mrf.mxu3  ;;  %v8316_v0 = vor.u32 %v9828_v55, %v8315_v36  ;;  %v9744_v2 = vld [vmem:[%s15076_s1 + $0xe54] sm:$0xf0] }
 0x1fa   :  { %5643 = vmatpush.bf16.msrb.mxu2 %v7740_v17  ;;  %v9672_v17 = vld [vmem:[%s15076_s1 + $0xc14] sm:$0xf0]  ;;  %v8140_v18 = vor.u32 %v9784_v22, %v8139_v60  ;;  %v8299_v60 = vld [vmem:[%s15076_s1 + $0x10c8] sm:$0xf] }
 0x1fb   :  { %5656 = vmatpush.bf16.msrb.mxu3 %v7868_v34  ;;  %v7819_v34 = vld [vmem:[%s15076_s1 + $0xd08] sm:$0xf]  ;;  %v9824_v22 = vld [vmem:[%s15076_s1 + $0x10d4] sm:$0xf0] }
 0x1fc   :  { %5666 = vmatpush.bf16.msra.mxu0 %v8044_v26  ;;  %v9704_v26 = vld [vmem:[%s15076_s1 + $0xd14] sm:$0xf0]  ;;  %v7963_v32 = vld [vmem:[%s15076_s1 + $0xe28] sm:$0xf] }
 0x1fd   :  { %5679 = vmatpush.bf16.msra.mxu1 %v8172_v43  ;;  %v7995_v43 = vld [vmem:[%s15076_s1 + $0xe68] sm:$0xf]  ;;  %v9740_v40 = vld [vmem:[%s15076_s1 + $0xe34] sm:$0xf0] }
 0x1fe   :  { %5644 = vmatpush.bf16.msrb.mxu2 %v7724_v57  ;;  %v7692_v57 = vor.u32 %v9672_v17, %v7691_v10  ;;  %v7996_v61 = vor.u32 %v9748_v47, %v7995_v43  ;;  %v8427_v10 = vld [vmem:[%s15076_s1 + $0x11c8] sm:$0xf]  ;;  %v9772_v47 = vld [vmem:[%s15076_s1 + $0xf34] sm:$0xf0]  ;;  %v7964_v55 = vor.u32 %v9740_v40, %v7963_v32 }
 0x1ff   :  { %5657 = vmatpush.bf16.msrb.mxu3 %v7852_v58  ;;  %v8443_v58 = vld [vmem:[%s15076_s1 + $0x11e8] sm:$0xf]  ;;  %v9852_v51 = vld [vmem:[%s15076_s1 + $0x11b4] sm:$0xf0] }
 0x200   :  { %5667 = vmatpush.bf16.msra.mxu0 %v8028_v59  ;;  %v7820_v59 = vor.u32 %v9704_v26, %v7819_v34  ;;  %v8444_v14 = vor.u32 %v9860_v9, %v8443_v58  ;;  %v8108_v34 = vor.u32 %v9776_v5, %v8107_v3  ;;  %v8300_v26 = vor.u32 %v9824_v22, %v8299_v60  ;;  %v9892_v5 = vld [vmem:[%s15076_s1 + $0x12f4] sm:$0xf0]  ;;  %v8699_v22 = vld [vmem:[%s15076_s1 + $0x13e8] sm:$0xf] }
 0x201   :  { %5680 = vmatpush.bf16.msra.mxu1 %v8156_v1  ;;  %v7979_v1 = vld [vmem:[%s15076_s1 + $0xe48] sm:$0xf]  ;;  %v8284_v9 = vor.u32 %v9820_v50, %v8283_v48  ;;  %v9812_v32 = vld [vmem:[%s15076_s1 + $0x1074] sm:$0xf0] }
 0x202   :  { %5645 = vmatpush.bf16.msrb.mxu2 %v7708_v8  ;;  %v5416_v8 = vpop.f32.mrf.mxu0  ;;  %v7980_v17 = vor.u32 %v9744_v2, %v7979_v1  ;;  %v9816_v1 = vld [vmem:[%s15076_s1 + $0x1094] sm:$0xf0]  ;;  %v8395_v2 = vld [vmem:[%s15076_s1 + $0x1188] sm:$0xf] }
 0x203   :  { %5658 = vmatpush.bf16.msrb.mxu3 %v7836_v12  ;;  %v9856_v12 = vld [vmem:[%s15076_s1 + $0x11d4] sm:$0xf0]  ;;  %v8379_v40 = vld [vmem:[%s15076_s1 + $0x1168] sm:$0xf] }
 0x204   :  { %5668 = vmatpush.bf16.msra.mxu0 %v8012_v13  ;;  %v5350_v13 = vadd.f32 %v13094_v39, %v5337_v52  ;;  %v8428_v43 = vor.u32 %v9856_v12, %v8427_v10  ;;  %v9736_v52 = vld [vmem:[%s15076_s1 + $0xe14] sm:$0xf0]  ;;  %v8683_v48 = vld [vmem:[%s15076_s1 + $0x13c8] sm:$0xf] }
 0x205   :  { %5681 = vmatpush.bf16.msra.mxu1 %v8140_v18  ;;  %v8091_v18 = vld [vmem:[%s15076_s1 + $0xf28] sm:$0xf]  ;;  %v5427_v3 = vpop.f32.mrf.mxu1  ;;  %v9924_v8 = vld [vmem:[%s15076_s1 + $0x13f4] sm:$0xf0] }
 0x206   :  { %5646 = vmatpush.bf16.msrb.mxu2 %v7692_v57  ;;  %v5363_v39 = vadd.f32 %v13140_v63, %v5350_v13  ;;  %v8411_v63 = vld [vmem:[%s15076_s1 + $0x11a8] sm:$0xf]  ;;  %v8092_v58 = vor.u32 %v9772_v47, %v8091_v18  ;;  %v8700_v18 = vor.u32 %v9924_v8, %v8699_v22  ;;  %v9920_v50 = vld [vmem:[%s15076_s1 + $0x13d4] sm:$0xf0] }
 0x207   :  { %5659 = vmatpush.bf16.msrb.mxu3 %v7820_v59  ;;  %v7947_v57 = vld [vmem:[%s15076_s1 + $0xe08] sm:$0xf]  ;;  %v9804_v22 = vld [vmem:[%s15076_s1 + $0x1034] sm:$0xf0] }
 0x208   :  { %5669 = vmatpush.bf16.msra.mxu0 %v7996_v61  ;;  %v5376_v36 = vadd.f32 %v13255_v54, %v5363_v39  ;;  %v8075_v59 = vld [vmem:[%s15076_s1 + $0xf08] sm:$0xf]  ;;  %v9768_v54 = vld [vmem:[%s15076_s1 + $0xf14] sm:$0xf0]  ;;  %v7948_v60 = vor.u32 %v9736_v52, %v7947_v57 }
 0x209   :  { %5682 = vmatpush.bf16.msra.mxu1 %v8124_v62  ;;  %5647 = vmatmul.bf16.vlgmr.msrb.gmra.mxu2 %v10953_v23  ;;  %v8412_v62 = vor.u32 %v9852_v51, %v8411_v63  ;;  %v8076_v10 = vor.u32 %v9768_v54, %v8075_v59  ;;  %v8555_v39 = vld [vmem:[%s15076_s1 + $0x12c8] sm:$0xf]  ;;  %v8684_v59 = vor.u32 %v9920_v50, %v8683_v48  ;;  %v9800_v48 = vld [vmem:[%s15076_s1 + $0x1014] sm:$0xf0] }
 0x20a   :  { %5691 = vmatpush.bf16.msra.mxu2 %v8316_v0  ;;  %5660 = vmatmul.bf16.vlgmr.msrb.gmra.mxu3 %v10966_v31  ;;  %v5389_v61 = vadd.f32 %v13296_v24, %v5376_v36  ;;  %v8267_v0 = vld [vmem:[%s15076_s1 + $0x1088] sm:$0xf] }
 0x20b   :  { %5704 = vmatpush.bf16.msra.mxu3 %v8444_v14  ;;  %v9848_v14 = vld [vmem:[%s15076_s1 + $0x1194] sm:$0xf0]  ;;  %v8571_v24 = vld [vmem:[%s15076_s1 + $0x12e8] sm:$0xf]  ;;  %v8268_v12 = vor.u32 %v9816_v1, %v8267_v0 }
 0x20c   :  { %5670 = vmatpush.bf16.msra.mxu0 %v7980_v17  ;;  %v5402_v13 = vadd.f32 %v13298_v27, %v5389_v61  ;;  %v8396_v17 = vor.u32 %v9848_v14, %v8395_v2  ;;  %v9844_v27 = vld [vmem:[%s15076_s1 + $0x1174] sm:$0xf0]  ;;  %v8363_v52 = vld [vmem:[%s15076_s1 + $0x1148] sm:$0xf] }
 0x20d   :  { %5683 = vmatpush.bf16.msra.mxu1 %v8108_v34  ;;  %v8572_v34 = vor.u32 %v9892_v5, %v8571_v24  ;;  %v8380_v36 = vor.u32 %v9844_v27, %v8379_v40  ;;  %v5429_v54 = vpop.f32.mrf.mxu1  ;;  %v9840_v61 = vld [vmem:[%s15076_s1 + $0x1154] sm:$0xf0]  ;;  %v8667_v2 = vld [vmem:[%s15076_s1 + $0x13a8] sm:$0xf] }
 0x20e   :  { %5692 = vmatpush.bf16.msra.mxu2 %v8300_v26  ;;  %v8251_v26 = vld [vmem:[%s15076_s1 + $0x1068] sm:$0xf]  ;;  %v5415_v47 = vadd.f32 %v13344_v7, %v5402_v13  ;;  %v9884_v0 = vld [vmem:[%s15076_s1 + $0x12b4] sm:$0xf0]  ;;  %v8364_v24 = vor.u32 %v9840_v61, %v8363_v52 }
 0x20f   :  { %5705 = vmatpush.bf16.msra.mxu3 %v8428_v43  ;;  %v9888_v43 = vld [vmem:[%s15076_s1 + $0x12d4] sm:$0xf0]  ;;  %v8252_v63 = vor.u32 %v9812_v32, %v8251_v26  ;;  %v8235_v7 = vld [vmem:[%s15076_s1 + $0x1048] sm:$0xf] }
 0x210   :  { %5671 = vmatpush.bf16.msra.mxu0 %v7964_v55  ;;  %v5428_v51 = vadd.f32 %v5427_v3, %v5415_v47  ;;  %v5440_v55 = vpop.f32.mrf.mxu2  ;;  %v8556_v57 = vor.u32 %v9888_v43, %v8555_v39  ;;  %v9916_v3 = vld [vmem:[%s15076_s1 + $0x13b4] sm:$0xf0]  ;;  %v8347_v8 = vld [vmem:[%s15076_s1 + $0x1128] sm:$0xf] }
 0x211   :  { %5684 = vmatpush.bf16.msra.mxu1 %v8092_v58  ;;  %v5453_v58 = vpop.f32.mrf.mxu3  ;;  %v8523_v13 = vld [vmem:[%s15076_s1 + $0x1288] sm:$0xf]  ;;  %v9912_v40 = vld [vmem:[%s15076_s1 + $0x1394] sm:$0xf0] }
 0x212   :  { %5693 = vmatpush.bf16.msra.mxu2 %v8284_v9  ;;  %v9808_v9 = vld [vmem:[%s15076_s1 + $0x1054] sm:$0xf0]  ;;  %v5441_v1 = vadd.f32 %v5440_v55, %v5428_v51  ;;  %v8651_v32 = vld [vmem:[%s15076_s1 + $0x1388] sm:$0xf] }
 0x213   :  { %5706 = vmatpush.bf16.msra.mxu3 %v8412_v62  ;;  %v8539_v62 = vld [vmem:[%s15076_s1 + $0x12a8] sm:$0xf]  ;;  %v8236_v14 = vor.u32 %v9808_v9, %v8235_v7  ;;  %v8652_v55 = vor.u32 %v9912_v40, %v8651_v32  ;;  %v9908_v9 = vld [vmem:[%s15076_s1 + $0x1374] sm:$0xf0] }
 0x214   :  { %5672 = vmatpush.bf16.msra.mxu0 %v7948_v60  ;;  %v8540_v5 = vor.u32 %v9884_v0, %v8539_v62  ;;  %v8219_v60 = vld [vmem:[%s15076_s1 + $0x1028] sm:$0xf]  ;;  %v5466_v26 = vpop.f32.mrf.mxu0  ;;  %v9988_v0 = vld [vmem:[%s15076_s1 + $0x15f4] sm:$0xf0] }
 0x215   :  { %5685 = vmatpush.bf16.msra.mxu1 %v8076_v10  ;;  %v8668_v10 = vor.u32 %v9916_v3, %v8667_v2  ;;  %v8203_v27 = vld [vmem:[%s15076_s1 + $0x1008] sm:$0xf]  ;;  %v5479_v54 = vpop.f32.mrf.mxu1 }
 0x216   :  { %5694 = vmatpush.bf16.msra.mxu2 %v8268_v12  ;;  %v9836_v12 = vld [vmem:[%s15076_s1 + $0x1134] sm:$0xf0]  ;;  %v8331_v50 = vld [vmem:[%s15076_s1 + $0x1108] sm:$0xf]  ;;  %v8204_v61 = vor.u32 %v9800_v48, %v8203_v27 }
 0x217   :  { %5707 = vmatpush.bf16.msra.mxu3 %v8396_v17  ;;  %5673 = vmatmul.bf16.vlgmr.msra.gmra.mxu0 %v10964_v28  ;;  %v9880_v17 = vld [vmem:[%s15076_s1 + $0x1294] sm:$0xf0]  ;;  %v8348_v43 = vor.u32 %v9836_v12, %v8347_v8  ;;  %v8635_v7 = vld [vmem:[%s15076_s1 + $0x1368] sm:$0xf] }
 0x218   :  { %5717 = vmatpush.bf16.msrb.mxu0 %v8572_v34  ;;  %5686 = vmatmul.bf16.vlgmr.msra.gmra.mxu1 %v10974_v35  ;;  %v5454_v34 = vadd.f32 %v5453_v58, %v5441_v1  ;;  %v8524_v47 = vor.u32 %v9880_v17, %v8523_v13  ;;  %v9876_v58 = vld [vmem:[%s15076_s1 + $0x1274] sm:$0xf0]  ;;  %v8827_v52 = vld [vmem:[%s15076_s1 + $0x14e8] sm:$0xf] }
 0x219   :  { %5730 = vmatpush.bf16.msrb.mxu1 %v8700_v18  ;;  %v8220_v18 = vor.u32 %v9804_v22, %v8219_v60  ;;  %v5455_v51 = vpop.f32.mrf.mxu3  ;;  %v8955_v62 = vld [vmem:[%s15076_s1 + $0x15e8] sm:$0xf]  ;;  %v9872_v60 = vld [vmem:[%s15076_s1 + $0x1254] sm:$0xf0] }
 0x21a   :  { %5695 = vmatpush.bf16.msra.mxu2 %v8252_v63  ;;  %v5467_v39 = vadd.f32 %v5466_v26, %v5454_v34  ;;  %v9832_v63 = vld [vmem:[%s15076_s1 + $0x1114] sm:$0xf0]  ;;  %v8619_v22 = vld [vmem:[%s15076_s1 + $0x1348] sm:$0xf]  ;;  %v8956_v13 = vor.u32 %v9988_v0, %v8955_v62 }
 0x21b   :  { %5708 = vmatpush.bf16.msra.mxu3 %v8380_v36  ;;  %v5442_v36 = vpop.f32.mrf.mxu2  ;;  %v8332_v2 = vor.u32 %v9832_v63, %v8331_v50  ;;  %v9904_v8 = vld [vmem:[%s15076_s1 + $0x1354] sm:$0xf0]  ;;  %v8811_v17 = vld [vmem:[%s15076_s1 + $0x14c8] sm:$0xf] }
 0x21c   :  { %5718 = vmatpush.bf16.msrb.mxu0 %v8556_v57  ;;  %v8507_v57 = vld [vmem:[%s15076_s1 + $0x1268] sm:$0xf]  ;;  %v5480_v1 = vadd.f32 %v5479_v54, %v5467_v39  ;;  %v9952_v34 = vld [vmem:[%s15076_s1 + $0x14d4] sm:$0xf0]  ;;  %v5468_v26 = vpop.f32.mrf.mxu0  ;;  %v8620_v27 = vor.u32 %v9904_v8, %v8619_v22 }
 0x21d   :  { %5731 = vmatpush.bf16.msrb.mxu1 %v8684_v59  ;;  %v9956_v59 = vld [vmem:[%s15076_s1 + $0x14f4] sm:$0xf0]  ;;  %v8508_v3 = vor.u32 %v9876_v58, %v8507_v57  ;;  %v8939_v32 = vld [vmem:[%s15076_s1 + $0x15c8] sm:$0xf]  ;;  %v8812_v39 = vor.u32 %v9952_v34, %v8811_v17  ;;  %v5481_v58 = vpop.f32.mrf.mxu1 }
 0x21e   :  { %5696 = vmatpush.bf16.msra.mxu2 %v8236_v14  ;;  %v8491_v14 = vld [vmem:[%s15076_s1 + $0x1248] sm:$0xf]  ;;  %v6134_v12 = vmax.f32 %v5480_v1, 0.0  ;;  %v9900_v63 = vld [vmem:[%s15076_s1 + $0x1334] sm:$0xf0] }
 0x21f   :  { %5709 = vmatpush.bf16.msra.mxu3 %v8364_v24  ;;  %v8636_v24 = vor.u32 %v9908_v9, %v8635_v7  ;;  %v8603_v48 = vld [vmem:[%s15076_s1 + $0x1328] sm:$0xf]  ;;  %v9948_v36 = vld [vmem:[%s15076_s1 + $0x14b4] sm:$0xf0] }
 0x220   :  { %5719 = vmatpush.bf16.msrb.mxu0 %v8540_v5  ;;  %v8828_v5 = vor.u32 %v9956_v59, %v8827_v52  ;;  %v8795_v51 = vld [vmem:[%s15076_s1 + $0x14a8] sm:$0xf]  ;;  %v9980_v57 = vld [vmem:[%s15076_s1 + $0x15b4] sm:$0xf0]  ;;  %v8604_v52 = vor.u32 %v9900_v63, %v8603_v48 }
 0x221   :  { %5732 = vmatpush.bf16.msrb.mxu1 %v8668_v10  ;;  %v6133_v10 = vmax.f32 %v12371_v53, 0.0  ;;  %v9984_v53 = vld [vmem:[%s15076_s1 + $0x15d4] sm:$0xf0]  ;;  %v8459_v9 = vld [vmem:[%s15076_s1 + $0x1208] sm:$0xf]  ;;  %v8796_v59 = vor.u32 %v9948_v36, %v8795_v51 }
 0x222   :  { %5697 = vmatpush.bf16.msra.mxu2 %v8220_v18  ;;  %v8492_v18 = vor.u32 %v9872_v60, %v8491_v14  ;;  %v8940_v50 = vor.u32 %v9984_v53, %v8939_v32  ;;  %v9864_v54 = vld [vmem:[%s15076_s1 + $0x1214] sm:$0xf0]  ;;  %v8779_v1 = vld [vmem:[%s15076_s1 + $0x1488] sm:$0xf]  ;;  %v10070_v53 = vld [vmem:[%s15078_s2] sm:$0xf] }
 0x223   :  { %5710 = vmatpush.bf16.msra.mxu3 %v8348_v43  ;;  %v6137_v40 = vpack.c.bf16 %v6134_v12, %v6133_v10  ;;  %v8475_v43 = vld [vmem:[%s15076_s1 + $0x1228] sm:$0xf]  ;;  %v9896_v62 = vld [vmem:[%s15076_s1 + $0x1314] sm:$0xf0]  ;;  %v8460_v60 = vor.u32 %v9864_v54, %v8459_v9 }
 0x224   :  { %5720 = vmatpush.bf16.msrb.mxu0 %v8524_v47  ;;  %v9868_v47 = vld [vmem:[%s15076_s1 + $0x1234] sm:$0xf0]  ;;  %v9211_v22 = vld [vmem:[%s15076_s1 + $0x17e8] sm:$0xf] }
 0x225   :  { %5733 = vmatpush.bf16.msrb.mxu1 %v8652_v55  ;;  %6139 = vst [vmem:[%s15079_s3] sm:$0xff] %v6137_v40  ;;  %v8923_v55 = vld [vmem:[%s15076_s1 + $0x15a8] sm:$0xf]  ;;  %v8476_v7 = vor.u32 %v9868_v47, %v8475_v43  ;;  %v9976_v14 = vld [vmem:[%s15076_s1 + $0x1594] sm:$0xf0]  ;;  %v816_v40 = vperm.slane %v10070_v53, 2 }
 0x226   :  { %5698 = vmatpush.bf16.msra.mxu2 %v8204_v61  ;;  %v8587_v61 = vld [vmem:[%s15076_s1 + $0x1308] sm:$0xf]  ;;  %v8924_v0 = vor.u32 %v9980_v57, %v8923_v55  ;;  %v10052_v8 = vld [vmem:[%s15076_s1 + $0x17f4] sm:$0xf0] }
 0x227   :  { %5711 = vmatpush.bf16.msra.mxu3 %v8332_v2  ;;  %v9944_v2 = vld [vmem:[%s15076_s1 + $0x1494] sm:$0xf0]  ;;  %v8588_v10 = vor.u32 %v9896_v62, %v8587_v61  ;;  %v8891_v32 = vld [vmem:[%s15076_s1 + $0x1568] sm:$0xf] }
 0x228   :  { %5721 = vmatpush.bf16.msrb.mxu0 %v8508_v3  ;;  %v8907_v3 = vld [vmem:[%s15076_s1 + $0x1588] sm:$0xf]  ;;  %v8780_v12 = vor.u32 %v9944_v2, %v8779_v1  ;;  %v9940_v26 = vld [vmem:[%s15076_s1 + $0x1474] sm:$0xf0] }
 0x229   :  { %5734 = vmatpush.bf16.msrb.mxu1 %v8636_v24  ;;  %5699 = vmatmul.bf16.vlgmr.msra.gmra.mxu2 %v11163_v37  ;;  %v9083_v24 = vld [vmem:[%s15076_s1 + $0x16e8] sm:$0xf]  ;;  %v8908_v17 = vor.u32 %v9976_v14, %v8907_v3  ;;  %v10016_v43 = vld [vmem:[%s15076_s1 + $0x16d4] sm:$0xf0] }
 0x22a   :  { %5743 = vmatpush.bf16.msrb.mxu2 %v8828_v5  ;;  %5712 = vmatmul.bf16.vlgmr.msra.gmra.mxu3 %v11176_v46  ;;  %v10020_v5 = vld [vmem:[%s15076_s1 + $0x16f4] sm:$0xf0]  ;;  %v9195_v47 = vld [vmem:[%s15076_s1 + $0x17c8] sm:$0xf] }
 0x22b   :  { %5756 = vmatpush.bf16.msrb.mxu3 %v8956_v13  ;;  %v8763_v13 = vld [vmem:[%s15076_s1 + $0x1468] sm:$0xf]  ;;  %v9084_v34 = vor.u32 %v10020_v5, %v9083_v24  ;;  %v10048_v48 = vld [vmem:[%s15076_s1 + $0x17d4] sm:$0xf0] }
 0x22c   :  { %5722 = vmatpush.bf16.msrb.mxu0 %v8492_v18  ;;  %v9212_v18 = vor.u32 %v10052_v8, %v9211_v22  ;;  %v5492_v63 = vpop.f32.mrf.mxu2  ;;  %v8747_v55 = vld [vmem:[%s15076_s1 + $0x1448] sm:$0xf]  ;;  %v9936_v57 = vld [vmem:[%s15076_s1 + $0x1454] sm:$0xf0] }
 0x22d   :  { %5735 = vmatpush.bf16.msrb.mxu1 %v8620_v27  ;;  %v9972_v27 = vld [vmem:[%s15076_s1 + $0x1574] sm:$0xf0]  ;;  %v8875_v58 = vld [vmem:[%s15076_s1 + $0x1548] sm:$0xf]  ;;  %v5505_v9 = vpop.f32.mrf.mxu3  ;;  %v8748_v2 = vor.u32 %v9936_v57, %v8747_v55 }
 0x22e   :  { %5744 = vmatpush.bf16.msrb.mxu2 %v8812_v39  ;;  %v9067_v39 = vld [vmem:[%s15076_s1 + $0x16c8] sm:$0xf]  ;;  %v8892_v51 = vor.u32 %v9972_v27, %v8891_v32  ;;  %v10012_v61 = vld [vmem:[%s15076_s1 + $0x16b4] sm:$0xf0] }
 0x22f   :  { %5757 = vmatpush.bf16.msrb.mxu3 %v8940_v50  ;;  %v8764_v50 = vor.u32 %v9940_v26, %v8763_v13  ;;  %v9068_v36 = vor.u32 %v10016_v43, %v9067_v39  ;;  %v9051_v54 = vld [vmem:[%s15076_s1 + $0x16a8] sm:$0xf]  ;;  %v9932_v5 = vld [vmem:[%s15076_s1 + $0x1434] sm:$0xf0] }
 0x230   :  { %5723 = vmatpush.bf16.msrb.mxu0 %v8476_v7  ;;  %v5493_v7 = vadd.f32 %v5492_v63, %v816_v40  ;;  %v9179_v62 = vld [vmem:[%s15076_s1 + $0x17a8] sm:$0xf]  ;;  %v9052_v14 = vor.u32 %v10012_v61, %v9051_v54  ;;  %v9964_v8 = vld [vmem:[%s15076_s1 + $0x1534] sm:$0xf0]  ;;  %v6269_v54 = vld [vmem:[%s15076_s1 + $0xf8] sm:$0xf0] }
 0x231   :  { %5736 = vmatpush.bf16.msrb.mxu1 %v8604_v52  ;;  %v9196_v52 = vor.u32 %v10048_v48, %v9195_v47  ;;  %v8731_v24 = vld [vmem:[%s15076_s1 + $0x1428] sm:$0xf]  ;;  %v9928_v43 = vld [vmem:[%s15076_s1 + $0x1414] sm:$0xf0] }
 0x232   :  { %5745 = vmatpush.bf16.msrb.mxu2 %v8796_v59  ;;  %v9968_v59 = vld [vmem:[%s15076_s1 + $0x1554] sm:$0xf0]  ;;  %v5506_v1 = vadd.f32 %v5505_v9, %v5493_v7  ;;  %v9163_v13 = vld [vmem:[%s15076_s1 + $0x1788] sm:$0xf]  ;;  %v8732_v26 = vor.u32 %v9932_v5, %v8731_v24 }
 0x233   :  { %5758 = vmatpush.bf16.msrb.mxu3 %v8924_v0  ;;  %v10044_v0 = vld [vmem:[%s15076_s1 + $0x17b4] sm:$0xf0]  ;;  %v8876_v3 = vor.u32 %v9968_v59, %v8875_v58  ;;  %v8715_v32 = vld [vmem:[%s15076_s1 + $0x1408] sm:$0xf]  ;;  %v9314_v59 = vld [vmem:[%s15076_s1 + $0xec] sm:$0xf] }
 0x234   :  { %5724 = vmatpush.bf16.msrb.mxu0 %v8460_v60  ;;  %v8859_v60 = vld [vmem:[%s15076_s1 + $0x1528] sm:$0xf]  ;;  %v9180_v22 = vor.u32 %v10044_v0, %v9179_v62  ;;  %v9960_v48 = vld [vmem:[%s15076_s1 + $0x1514] sm:$0xf0]  ;;  %v6272_v24 = vor.u32 %v9314_v59, %v6269_v54  ;;  %v9302_v54 = vld [vmem:[%s15076_s1 + $0x8c] sm:$0xf] }
 0x235   :  { %5737 = vmatpush.bf16.msrb.mxu1 %v8588_v10  ;;  %v9035_v10 = vld [vmem:[%s15076_s1 + $0x1688] sm:$0xf]  ;;  %v5531_v40 = vpop.f32.mrf.mxu1  ;;  %v8860_v27 = vor.u32 %v9964_v8, %v8859_v60  ;;  %v10036_v58 = vld [vmem:[%s15076_s1 + $0x1774] sm:$0xf0] }
 0x236   :  { %5746 = vmatpush.bf16.msrb.mxu2 %v8780_v12  ;;  %v10008_v12 = vld [vmem:[%s15076_s1 + $0x1694] sm:$0xf0]  ;;  %v8843_v47 = vld [vmem:[%s15076_s1 + $0x1508] sm:$0xf] }
 0x237   :  { %5759 = vmatpush.bf16.msrb.mxu3 %v8908_v17  ;;  %5725 = vmatmul.bf16.vlgmr.msrb.gmra.mxu0 %v11174_v45  ;;  %v10040_v17 = vld [vmem:[%s15076_s1 + $0x1794] sm:$0xf0]  ;;  %v9036_v39 = vor.u32 %v10008_v12, %v9035_v10  ;;  %v9147_v55 = vld [vmem:[%s15076_s1 + $0x1768] sm:$0xf]  ;;  %v8844_v61 = vor.u32 %v9960_v48, %v8843_v47  ;;  %v9310_v10 = vld [vmem:[%s15076_s1 + $0xcc] sm:$0xf] }
 0x238   :  { %5769 = vmatpush.bf16.msra.mxu0 %v9084_v34  ;;  %5738 = vmatmul.bf16.vlgmr.msrb.gmra.mxu1 %v11184_v49  ;;  %v5518_v34 = vpop.f32.mrf.mxu0  ;;  %v9164_v63 = vor.u32 %v10040_v17, %v9163_v13  ;;  %v9275_v7 = vld [vmem:[%s15076_s1 + $0x1868] sm:$0xf]  ;;  %v10068_v9 = vld [vmem:[%s15076_s1 + $0x1874] sm:$0xf0]  ;;  %v9148_v0 = vor.u32 %v10036_v58, %v9147_v55  ;;  %v6253_v12 = vld [vmem:[%s15076_s1 + $0xd8] sm:$0xf0] }
 0x239   :  { %5782 = vmatpush.bf16.msra.mxu1 %v9212_v18  ;;  %v5519_v53 = vadd.f32 %v5518_v34, %v5506_v1  ;;  %v5494_v18 = vpop.f32.mrf.mxu2  ;;  %v9276_v1 = vor.u32 %v10068_v9, %v9275_v7  ;;  %v10032_v5 = vld [vmem:[%s15076_s1 + $0x1754] sm:$0xf0]  ;;  %v9259_v60 = vld [vmem:[%s15076_s1 + $0x1848] sm:$0xf]  ;;  %v9306_v47 = vld [vmem:[%s15076_s1 + $0xac] sm:$0xf] }
 0x23a   :  { %5747 = vmatpush.bf16.msrb.mxu2 %v8764_v50  ;;  %v5507_v50 = vpop.f32.mrf.mxu3  ;;  %v6256_v18 = vor.u32 %v9310_v10, %v6253_v12  ;;  %v6237_v48 = vld [vmem:[%s15076_s1 + $0xb8] sm:$0xf0]  ;;  %v9099_v58 = vld [vmem:[%s15076_s1 + $0x1708] sm:$0xf]  ;;  %v10024_v7 = vld [vmem:[%s15076_s1 + $0x1714] sm:$0xf0] }
 0x23b   :  { %5760 = vmatpush.bf16.msrb.mxu3 %v8892_v51  ;;  %v9019_v51 = vld [vmem:[%s15076_s1 + $0x1668] sm:$0xf]  ;;  %v13781_v57 = vadd.f32 %v5531_v40, %v5519_v53  ;;  %v9996_v53 = vld [vmem:[%s15076_s1 + $0x1634] sm:$0xf0]  ;;  %v9298_v10 = vld [vmem:[%s15076_s1 + $0x6c] sm:$0xf] }
 0x23c   :  { %5770 = vmatpush.bf16.msra.mxu0 %v9068_v36  ;;  %v10004_v36 = vld [vmem:[%s15076_s1 + $0x1674] sm:$0xf0]  ;;  %v9115_v40 = vld [vmem:[%s15076_s1 + $0x1728] sm:$0xf]  ;;  %v6205_v12 = vld [vmem:[%s15076_s1 + $0x78] sm:$0xf0] }
 0x23d   :  { %5783 = vmatpush.bf16.msra.mxu1 %v9196_v52  ;;  %v8716_v52 = vor.u32 %v9928_v43, %v8715_v32  ;;  %v9020_v62 = vor.u32 %v10004_v36, %v9019_v51  ;;  %v5533_v13 = vpop.f32.mrf.mxu1  ;;  %v8987_v32 = vld [vmem:[%s15076_s1 + $0x1628] sm:$0xf]  ;;  %v10060_v43 = vld [vmem:[%s15076_s1 + $0x1834] sm:$0xf0] }
 0x23e   :  { %5748 = vmatpush.bf16.msrb.mxu2 %v8748_v2  ;;  %v9003_v2 = vld [vmem:[%s15076_s1 + $0x1648] sm:$0xf]  ;;  %v8988_v50 = vor.u32 %v9996_v53, %v8987_v32  ;;  %v9992_v51 = vld [vmem:[%s15076_s1 + $0x1614] sm:$0xf0]  ;;  %v9374_v32 = vld [vmem:[%s15076_s1 + $0x2cc] sm:$0xf] }
 0x23f   :  { %5761 = vmatpush.bf16.msrb.mxu3 %v8876_v3  ;;  %v10000_v3 = vld [vmem:[%s15076_s1 + $0x1654] sm:$0xf0]  ;;  %v9227_v9 = vld [vmem:[%s15076_s1 + $0x1808] sm:$0xf]  ;;  %v6509_v53 = vld [vmem:[%s15076_s1 + $0x2d8] sm:$0xf0] }
 0x240   :  { %5771 = vmatpush.bf16.msra.mxu0 %v9052_v14  ;;  %v9131_v14 = vld [vmem:[%s15076_s1 + $0x1748] sm:$0xf]  ;;  %v5520_v8 = vpop.f32.mrf.mxu0  ;;  %v9004_v17 = vor.u32 %v10000_v3, %v9003_v2  ;;  %v10056_v59 = vld [vmem:[%s15076_s1 + $0x1814] sm:$0xf0]  ;;  %v6525_v3 = vld [vmem:[%s15076_s1 + $0x2f8] sm:$0xf0] }
 0x241   :  { %5784 = vmatpush.bf16.msra.mxu1 %v9180_v22  ;;  %v10064_v22 = vld [vmem:[%s15076_s1 + $0x1854] sm:$0xf0]  ;;  %v9132_v34 = vor.u32 %v10032_v5, %v9131_v14  ;;  %v9410_v14 = vld [vmem:[%s15076_s1 + $0x3ec] sm:$0xf]  ;;  %v9100_v5 = vor.u32 %v10024_v7, %v9099_v58  ;;  %v6365_v58 = vld [vmem:[%s15076_s1 + $0x1b8] sm:$0xf0] }
 0x242   :  { %5749 = vmatpush.bf16.msrb.mxu2 %v8732_v26  ;;  %v9260_v26 = vor.u32 %v10064_v22, %v9259_v60  ;;  %v9228_v60 = vor.u32 %v10056_v59, %v9227_v9  ;;  %v9370_v7 = vld [vmem:[%s15076_s1 + $0x2ac] sm:$0xf] }
 0x243   :  { %5762 = vmatpush.bf16.msrb.mxu3 %v8860_v27  ;;  %v10028_v27 = vld [vmem:[%s15076_s1 + $0x1734] sm:$0xf0]  ;;  %v9402_v9 = vld [vmem:[%s15076_s1 + $0x3ac] sm:$0xf] }
 0x244   :  { %5772 = vmatpush.bf16.msra.mxu0 %v9036_v39  ;;  %v9243_v39 = vld [vmem:[%s15076_s1 + $0x1828] sm:$0xf]  ;;  %v9116_v36 = vor.u32 %v10028_v27, %v9115_v40  ;;  %v9406_v40 = vld [vmem:[%s15076_s1 + $0x3cc] sm:$0xf] }
 0x245   :  { %5785 = vmatpush.bf16.msra.mxu1 %v9164_v63  ;;  %v8971_v63 = vld [vmem:[%s15076_s1 + $0x1608] sm:$0xf]  ;;  %v9244_v55 = vor.u32 %v10060_v43, %v9243_v39  ;;  %v6208_v39 = vor.u32 %v9298_v10, %v6205_v12 }
 0x246   :  { %5750 = vmatpush.bf16.msrb.mxu2 %v8716_v52  ;;  %v6240_v52 = vor.u32 %v9306_v47, %v6237_v48  ;;  %v8972_v2 = vor.u32 %v9992_v51, %v8971_v63  ;;  %v9294_v47 = vld [vmem:[%s15076_s1 + $0x4c] sm:$0xf]  ;;  %v6189_v48 = vld [vmem:[%s15076_s1 + $0x58] sm:$0xf0]  ;;  %v6512_v51 = vor.u32 %v9374_v32, %v6509_v53 }
 0x247   :  { %5763 = vmatpush.bf16.msrb.mxu3 %v8844_v61  ;;  %v6221_v61 = vld [vmem:[%s15076_s1 + $0x98] sm:$0xf0] }
 0x248   :  { %5773 = vmatpush.bf16.msra.mxu0 %v9020_v62  ;;  %v9346_v62 = vld [vmem:[%s15076_s1 + $0x1ec] sm:$0xf]  ;;  %v6224_v22 = vor.u32 %v9302_v54, %v6221_v61  ;;  %v6192_v54 = vor.u32 %v9294_v47, %v6189_v48  ;;  %v6157_v32 = vld [vmem:[%s15076_s1 + $0x18] sm:$0xf0] }
 0x249   :  { %5786 = vmatpush.bf16.msra.mxu1 %v9148_v0  ;;  %5751 = vmatmul.bf16.vlgmr.msrb.gmra.mxu2 %v11378_v11  ;;  %v6397_v0 = vld [vmem:[%s15076_s1 + $0x1f8] sm:$0xf0]  ;;  %v9362_v47 = vld [vmem:[%s15076_s1 + $0x26c] sm:$0xf] }
 0x24a   :  { %5799 = vmatpush.bf16.msra.mxu2 %v9276_v1  ;;  %5764 = vmatmul.bf16.vlgmr.msrb.gmra.mxu3 %v11391_v16  ;;  %v9378_v1 = vld [vmem:[%s15076_s1 + $0x2ec] sm:$0xf]  ;;  %v6400_v8 = vor.u32 %v9346_v62, %v6397_v0  ;;  %v6173_v0 = vld [vmem:[%s15076_s1 + $0x38] sm:$0xf0] }
 0x24b   :  { %5808 = vmatpush.bf16.msra.mxu3 %v6272_v24  ;;  %v6653_v24 = vld [vmem:[%s15076_s1 + $0x3f8] sm:$0xf0]  ;;  %v6528_v13 = vor.u32 %v9378_v1, %v6525_v3  ;;  %v9290_v62 = vld [vmem:[%s15076_s1 + $0x2c] sm:$0xf] }
 0x24c   :  { %5774 = vmatpush.bf16.msra.mxu0 %v9004_v17  ;;  %v6656_v17 = vor.u32 %v9410_v14, %v6653_v24  ;;  %v5544_v27 = vpop.f32.mrf.mxu2  ;;  %v9334_v3 = vld [vmem:[%s15076_s1 + $0x18c] sm:$0xf]  ;;  %v6349_v14 = vld [vmem:[%s15076_s1 + $0x198] sm:$0xf0] }
 0x24d   :  { %5787 = vmatpush.bf16.msra.mxu1 %v9132_v34  ;;  %v9342_v34 = vld [vmem:[%s15076_s1 + $0x1cc] sm:$0xf]  ;;  %v5557_v63 = vpop.f32.mrf.mxu3  ;;  %v6461_v48 = vld [vmem:[%s15076_s1 + $0x278] sm:$0xf0] }
 0x24e   :  { %5800 = vmatpush.bf16.msra.mxu2 %v9260_v26  ;;  %v6381_v26 = vld [vmem:[%s15076_s1 + $0x1d8] sm:$0xf0]  ;;  %v9366_v24 = vld [vmem:[%s15076_s1 + $0x28c] sm:$0xf] }
 0x24f   :  { %5809 = vmatpush.bf16.msra.mxu3 %v6256_v18  ;;  %v6637_v18 = vld [vmem:[%s15076_s1 + $0x3d8] sm:$0xf0]  ;;  %v6384_v43 = vor.u32 %v9342_v34, %v6381_v26  ;;  %v6352_v34 = vor.u32 %v9334_v3, %v6349_v14  ;;  %v9286_v26 = vld [vmem:[%s15076_s1 + $0xc] sm:$0xf] }
 0x250   :  { %5775 = vmatpush.bf16.msra.mxu0 %v8988_v50  ;;  %v5545_v50 = vadd.f32 %v5544_v27, %v13781_v57  ;;  %v6493_v57 = vld [vmem:[%s15076_s1 + $0x2b8] sm:$0xf0] }
 0x251   :  { %5788 = vmatpush.bf16.msra.mxu1 %v9116_v36  ;;  %v6640_v36 = vor.u32 %v9406_v40, %v6637_v18  ;;  %v6496_v1 = vor.u32 %v9370_v7, %v6493_v57  ;;  %v6464_v7 = vor.u32 %v9362_v47, %v6461_v48  ;;  %v6765_v3 = vld [vmem:[%s15076_s1 + $0x4d8] sm:$0xf0]  ;;  %v9350_v47 = vld [vmem:[%s15076_s1 + $0x20c] sm:$0xf] }
 0x252   :  { %5801 = vmatpush.bf16.msra.mxu2 %v9244_v55  ;;  %v9338_v55 = vld [vmem:[%s15076_s1 + $0x1ac] sm:$0xf]  ;;  %v5558_v59 = vadd.f32 %v5557_v63, %v5545_v50  ;;  %v6589_v63 = vld [vmem:[%s15076_s1 + $0x378] sm:$0xf0] }
 0x253   :  { %5810 = vmatpush.bf16.msra.mxu3 %v6240_v52  ;;  %v6621_v52 = vld [vmem:[%s15076_s1 + $0x3b8] sm:$0xf0]  ;;  %v6368_v61 = vor.u32 %v9338_v55, %v6365_v58  ;;  %v9394_v50 = vld [vmem:[%s15076_s1 + $0x36c] sm:$0xf]  ;;  %v6160_v55 = vor.u32 %v9286_v26, %v6157_v32 }
 0x254   :  { %5776 = vmatpush.bf16.msra.mxu0 %v8972_v2  ;;  %v6624_v2 = vor.u32 %v9402_v9, %v6621_v52  ;;  %v6592_v57 = vor.u32 %v9394_v50, %v6589_v63  ;;  %v9326_v9 = vld [vmem:[%s15076_s1 + $0x14c] sm:$0xf]  ;;  %v6317_v52 = vld [vmem:[%s15076_s1 + $0x158] sm:$0xf0] }
 0x255   :  { %5789 = vmatpush.bf16.msra.mxu1 %v9100_v5  ;;  %v5570_v5 = vpop.f32.mrf.mxu0  ;;  %v5583_v12 = vpop.f32.mrf.mxu1  ;;  %v9434_v26 = vld [vmem:[%s15076_s1 + $0x4ac] sm:$0xf]  ;;  %v6749_v32 = vld [vmem:[%s15076_s1 + $0x4b8] sm:$0xf0] }
 0x256   :  { %5802 = vmatpush.bf16.msra.mxu2 %v9228_v60  ;;  %v6477_v60 = vld [vmem:[%s15076_s1 + $0x298] sm:$0xf0]  ;;  %v5571_v10 = vadd.f32 %v5570_v5, %v5558_v59  ;;  %v5559_v53 = vpop.f32.mrf.mxu3  ;;  %v9358_v59 = vld [vmem:[%s15076_s1 + $0x24c] sm:$0xf]  ;;  %v6752_v50 = vor.u32 %v9434_v26, %v6749_v32 }
 0x257   :  { %5811 = vmatpush.bf16.msra.mxu3 %v6224_v22  ;;  %5777 = vmatmul.bf16.vlgmr.msra.gmra.mxu0 %v11389_v15  ;;  %v9398_v22 = vld [vmem:[%s15076_s1 + $0x38c] sm:$0xf]  ;;  %v6480_v40 = vor.u32 %v9366_v24, %v6477_v60  ;;  %v6320_v24 = vor.u32 %v9326_v9, %v6317_v52  ;;  %v6541_v63 = vld [vmem:[%s15076_s1 + $0x318] sm:$0xf0] }
 0x258   :  { %5821 = vmatpush.bf16.msrb.mxu0 %v6400_v8  ;;  %5790 = vmatmul.bf16.vlgmr.msra.gmra.mxu1 %v11399_v19  ;;  %v6605_v8 = vld [vmem:[%s15076_s1 + $0x398] sm:$0xf0]  ;;  %v13973_v27 = vadd.f32 %v5583_v12, %v5571_v10  ;;  %v9354_v10 = vld [vmem:[%s15076_s1 + $0x22c] sm:$0xf] }
 0x259   :  { %5834 = vmatpush.bf16.msrb.mxu1 %v6528_v13  ;;  %9283 = vmatmul.msk.bf16.vlgmr.msra.gmra.mxu2 %vm4829_vm0, %v11502_v56  ;;  %v5546_v13 = vpop.f32.mrf.mxu2  ;;  %v6608_v18 = vor.u32 %v9398_v22, %v6605_v8  ;;  %v9322_v22 = vld [vmem:[%s15076_s1 + $0x12c] sm:$0xf]  ;;  %v6301_v8 = vld [vmem:[%s15076_s1 + $0x138] sm:$0xf0] }
 0x25a   :  { %5847 = vmatpush.bf16.msrb.mxu2 %v6656_v17  ;;  %v6176_v17 = vor.u32 %v9290_v62, %v6173_v0  ;;  %v9390_v62 = vld [vmem:[%s15076_s1 + $0x34c] sm:$0xf]  ;;  %v6573_v0 = vld [vmem:[%s15076_s1 + $0x358] sm:$0xf0]  ;;  %v6304_v53 = vor.u32 %v9322_v22, %v6301_v8 }
 0x25b   :  { %5812 = vmatpush.bf16.msra.mxu3 %v6208_v39  ;;  %v9330_v39 = vld [vmem:[%s15076_s1 + $0x16c] sm:$0xf]  ;;  %v6576_v60 = vor.u32 %v9390_v62, %v6573_v0  ;;  %v6429_v13 = vld [vmem:[%s15076_s1 + $0x238] sm:$0xf0] }
 0x25c   :  { %5822 = vmatpush.bf16.msrb.mxu0 %v6384_v43  ;;  %v6333_v43 = vld [vmem:[%s15076_s1 + $0x178] sm:$0xf0]  ;;  %v9382_v48 = vld [vmem:[%s15076_s1 + $0x30c] sm:$0xf] }
 0x25d   :  { %5835 = vmatpush.bf16.msrb.mxu1 %v6512_v51  ;;  %v9442_v51 = vld [vmem:[%s15076_s1 + $0x4ec] sm:$0xf]  ;;  %v6336_v58 = vor.u32 %v9330_v39, %v6333_v43  ;;  %v5585_v14 = vpop.f32.mrf.mxu1  ;;  %v6432_v39 = vor.u32 %v9354_v10, %v6429_v13  ;;  %v7037_v9 = vld [vmem:[%s15076_s1 + $0x6f8] sm:$0xf0] }
 0x25e   :  { %5848 = vmatpush.bf16.msrb.mxu2 %v6640_v36  ;;  %v6781_v36 = vld [vmem:[%s15076_s1 + $0x4f8] sm:$0xf0]  ;;  %v9538_v52 = vld [vmem:[%s15076_s1 + $0x7ec] sm:$0xf] }
 0x25f   :  { %5813 = vmatpush.bf16.msra.mxu3 %v6192_v54  ;;  %v6784_v54 = vor.u32 %v9442_v51, %v6781_v36  ;;  %v9430_v51 = vld [vmem:[%s15076_s1 + $0x48c] sm:$0xf]  ;;  %v6733_v36 = vld [vmem:[%s15076_s1 + $0x498] sm:$0xf0] }
 0x260   :  { %5823 = vmatpush.bf16.msrb.mxu0 %v6368_v61  ;;  %v6445_v61 = vld [vmem:[%s15076_s1 + $0x258] sm:$0xf0]  ;;  %v6736_v62 = vor.u32 %v9430_v51, %v6733_v36  ;;  %v9534_v8 = vld [vmem:[%s15076_s1 + $0x7cc] sm:$0xf] }
 0x261   :  { %5836 = vmatpush.bf16.msrb.mxu1 %v6496_v1  ;;  %v5572_v1 = vpop.f32.mrf.mxu0  ;;  %v6448_v5 = vor.u32 %v9358_v59, %v6445_v61  ;;  %v7165_v59 = vld [vmem:[%s15076_s1 + $0x7f8] sm:$0xf0]  ;;  %v6544_v61 = vor.u32 %v9382_v48, %v6541_v63  ;;  %v9422_v32 = vld [vmem:[%s15076_s1 + $0x44c] sm:$0xf] }
 0x262   :  { %5849 = vmatpush.bf16.msrb.mxu2 %v6624_v2  ;;  %v9438_v2 = vld [vmem:[%s15076_s1 + $0x4cc] sm:$0xf]  ;;  %v7168_v14 = vor.u32 %v9538_v52, %v7165_v59  ;;  %v7021_v22 = vld [vmem:[%s15076_s1 + $0x6d8] sm:$0xf0] }
 0x263   :  { %5814 = vmatpush.bf16.msra.mxu3 %v6176_v17  ;;  %v6768_v12 = vor.u32 %v9438_v2, %v6765_v3  ;;  %v9386_v17 = vld [vmem:[%s15076_s1 + $0x32c] sm:$0xf]  ;;  %v6717_v2 = vld [vmem:[%s15076_s1 + $0x478] sm:$0xf0] }
 0x264   :  { %5824 = vmatpush.bf16.msrb.mxu0 %v6352_v34  ;;  %v6557_v34 = vld [vmem:[%s15076_s1 + $0x338] sm:$0xf0]  ;;  %v9426_v1 = vld [vmem:[%s15076_s1 + $0x46c] sm:$0xf] }
 0x265   :  { %5837 = vmatpush.bf16.msrb.mxu1 %v6480_v40  ;;  %v9318_v40 = vld [vmem:[%s15076_s1 + $0x10c] sm:$0xf]  ;;  %v6560_v43 = vor.u32 %v9386_v17, %v6557_v34  ;;  %v7149_v10 = vld [vmem:[%s15076_s1 + $0x7d8] sm:$0xf0]  ;;  %v6720_v13 = vor.u32 %v9426_v1, %v6717_v2 }
 0x266   :  { %5850 = vmatpush.bf16.msrb.mxu2 %v6608_v18  ;;  %v6285_v18 = vld [vmem:[%s15076_s1 + $0x118] sm:$0xf0]  ;;  %v9530_v48 = vld [vmem:[%s15076_s1 + $0x7ac] sm:$0xf] }
 0x267   :  { %5815 = vmatpush.bf16.msra.mxu3 %v6160_v55  ;;  %v9474_v55 = vld [vmem:[%s15076_s1 + $0x5ec] sm:$0xf]  ;;  %v7117_v59 = vld [vmem:[%s15076_s1 + $0x798] sm:$0xf0] }
 0x268   :  { %5825 = vmatpush.bf16.msrb.mxu0 %v6336_v58  ;;  %v6909_v58 = vld [vmem:[%s15076_s1 + $0x5f8] sm:$0xf0]  ;;  %v9418_v36 = vld [vmem:[%s15076_s1 + $0x42c] sm:$0xf] }
 0x269   :  { %5838 = vmatpush.bf16.msrb.mxu1 %v6464_v7  ;;  %v9506_v7 = vld [vmem:[%s15076_s1 + $0x6ec] sm:$0xf]  ;;  %v6912_v0 = vor.u32 %v9474_v55, %v6909_v58  ;;  %v6685_v55 = vld [vmem:[%s15076_s1 + $0x438] sm:$0xf0] }
 0x26a   :  { %5851 = vmatpush.bf16.msrb.mxu2 %v6592_v57  ;;  %5816 = vmatmul.bf16.vlgmr.msra.gmra.mxu3 %v10391_v20  ;;  %v6413_v20 = vld [vmem:[%s15076_s1 + $0x218] sm:$0xf0]  ;;  %v6288_v57 = vor.u32 %v9318_v40, %v6285_v18  ;;  %v7040_v3 = vor.u32 %v9506_v7, %v7037_v9  ;;  %v7152_v18 = vor.u32 %v9534_v8, %v7149_v10  ;;  %v9494_v7 = vld [vmem:[%s15076_s1 + $0x68c] sm:$0xf] }
 0x26b   :  { %5860 = vmatpush.bf16.msrb.mxu3 %v6784_v54  ;;  %v6416_v54 = vor.u32 %v9350_v47, %v6413_v20  ;;  %v7005_v20 = vld [vmem:[%s15076_s1 + $0x6b8] sm:$0xf0]  ;;  %v9526_v52 = vld [vmem:[%s15076_s1 + $0x78c] sm:$0xf] }
 0x26c   :  { %5826 = vmatpush.bf16.msrb.mxu0 %v6320_v24  ;;  %v9470_v24 = vld [vmem:[%s15076_s1 + $0x5cc] sm:$0xf]  ;;  %v6989_v9 = vld [vmem:[%s15076_s1 + $0x698] sm:$0xf0] }
 0x26d   :  { %5839 = vmatpush.bf16.msrb.mxu1 %v6448_v5  ;;  %v6893_v5 = vld [vmem:[%s15076_s1 + $0x5d8] sm:$0xf0]  ;;  %v5609_v26 = vpop.f32.mrf.mxu3  ;;  %v9414_v2 = vld [vmem:[%s15076_s1 + $0x40c] sm:$0xf] }
 0x26e   :  { %5852 = vmatpush.bf16.msrb.mxu2 %v6576_v60  ;;  %v9502_v60 = vld [vmem:[%s15076_s1 + $0x6cc] sm:$0xf]  ;;  %v6896_v34 = vor.u32 %v9470_v24, %v6893_v5  ;;  %v6992_v24 = vor.u32 %v9494_v7, %v6989_v9  ;;  %v7120_v5 = vor.u32 %v9526_v52, %v7117_v59  ;;  %v6845_v8 = vld [vmem:[%s15076_s1 + $0x578] sm:$0xf0] }
 0x26f   :  { %5861 = vmatpush.bf16.msrb.mxu3 %v6768_v12  ;;  %v5596_v12 = vpop.f32.mrf.mxu2  ;;  %v7024_v40 = vor.u32 %v9502_v60, %v7021_v22  ;;  %v9458_v22 = vld [vmem:[%s15076_s1 + $0x56c] sm:$0xf]  ;;  %v6813_v7 = vld [vmem:[%s15076_s1 + $0x538] sm:$0xf0] }
 0x270   :  { %5827 = vmatpush.bf16.msrb.mxu0 %v6304_v53  ;;  %v5597_v17 = vadd.f32 %v5596_v12, %v13973_v27  ;;  %v6701_v53 = vld [vmem:[%s15076_s1 + $0x458] sm:$0xf0]  ;;  %v9490_v10 = vld [vmem:[%s15076_s1 + $0x66c] sm:$0xf] }
 0x271   :  { %5840 = vmatpush.bf16.msrb.mxu1 %v6432_v39  ;;  %v9466_v39 = vld [vmem:[%s15076_s1 + $0x5ac] sm:$0xf]  ;;  %v6877_v27 = vld [vmem:[%s15076_s1 + $0x5b8] sm:$0xf0]  ;;  %v6704_v63 = vor.u32 %v9422_v32, %v6701_v53  ;;  %v6848_v53 = vor.u32 %v9458_v22, %v6845_v8 }
 0x272   :  { %5853 = vmatpush.bf16.msrb.mxu2 %v6560_v43  ;;  %v9498_v43 = vld [vmem:[%s15076_s1 + $0x6ac] sm:$0xf]  ;;  %v5610_v47 = vadd.f32 %v5609_v26, %v5597_v17  ;;  %v6880_v51 = vor.u32 %v9466_v39, %v6877_v27  ;;  %v6973_v12 = vld [vmem:[%s15076_s1 + $0x678] sm:$0xf0] }
 0x273   :  { %5862 = vmatpush.bf16.msrb.mxu3 %v6752_v50  ;;  %v7133_v50 = vld [vmem:[%s15076_s1 + $0x7b8] sm:$0xf0]  ;;  %v7008_v58 = vor.u32 %v9498_v43, %v7005_v20  ;;  %v9454_v39 = vld [vmem:[%s15076_s1 + $0x54c] sm:$0xf] }
 0x274   :  { %5828 = vmatpush.bf16.msrb.mxu0 %v6288_v57  ;;  %v5622_v57 = vpop.f32.mrf.mxu0  ;;  %v7101_v17 = vld [vmem:[%s15076_s1 + $0x778] sm:$0xf0]  ;;  %v9486_v43 = vld [vmem:[%s15076_s1 + $0x64c] sm:$0xf] }
 0x275   :  { %5841 = vmatpush.bf16.msrb.mxu1 %v6416_v54  ;;  %v5623_v54 = vadd.f32 %v5622_v57, %v5610_v47  ;;  %v7293_v26 = vld [vmem:[%s15076_s1 + $0x8f8] sm:$0xf0]  ;;  %v9482_v57 = vld [vmem:[%s15076_s1 + $0x62c] sm:$0xf] }
 0x276   :  { %5854 = vmatpush.bf16.msrb.mxu2 %v6544_v61  ;;  %v5635_v61 = vpop.f32.mrf.mxu1  ;;  %v6829_v27 = vld [vmem:[%s15076_s1 + $0x558] sm:$0xf0]  ;;  %v9514_v59 = vld [vmem:[%s15076_s1 + $0x72c] sm:$0xf] }
 0x277   :  { %5863 = vmatpush.bf16.msrb.mxu3 %v6736_v62  ;;  %5829 = vmatmul.bf16.vlgmr.msrb.gmra.mxu0 %v10394_v21  ;;  %v6861_v21 = vld [vmem:[%s15076_s1 + $0x598] sm:$0xf0]  ;;  %v5598_v62 = vpop.f32.mrf.mxu2  ;;  %v14172_v60 = vadd.f32 %v5635_v61, %v5623_v54  ;;  %v9562_v61 = vld [vmem:[%s15076_s1 + $0x8ac] sm:$0xf] }
 0x278   :  { %5873 = vmatpush.bf16.msra.mxu0 %v6912_v0  ;;  %5842 = vmatmul.bf16.vlgmr.msrb.gmra.mxu1 %v10359_v4  ;;  %v9462_v4 = vld [vmem:[%s15076_s1 + $0x58c] sm:$0xf]  ;;  %v6688_v0 = vor.u32 %v9418_v36, %v6685_v55  ;;  %v6957_v20 = vld [vmem:[%s15076_s1 + $0x658] sm:$0xf0] }
 0x279   :  { %5886 = vmatpush.bf16.msra.mxu1 %v7040_v3  ;;  %5855 = vmatmul.bf16.vlgmr.msrb.gmra.mxu2 %v10364_v6  ;;  %v7136_v6 = vor.u32 %v9530_v48, %v7133_v50  ;;  %v6864_v1 = vor.u32 %v9462_v4, %v6861_v21  ;;  %v6669_v3 = vld [vmem:[%s15076_s1 + $0x418] sm:$0xf0]  ;;  %v9518_v48 = vld [vmem:[%s15076_s1 + $0x74c] sm:$0xf] }
 0x27a   :  { %5899 = vmatpush.bf16.msra.mxu2 %v7168_v14  ;;  %v5611_v14 = vpop.f32.mrf.mxu3  ;;  %v6672_v32 = vor.u32 %v9414_v2, %v6669_v3  ;;  %v7085_v50 = vld [vmem:[%s15076_s1 + $0x758] sm:$0xf0]  ;;  %v9450_v21 = vld [vmem:[%s15076_s1 + $0x52c] sm:$0xf] }
 0x27b   :  { %5864 = vmatpush.bf16.msrb.mxu3 %v6720_v13  ;;  %v9522_v13 = vld [vmem:[%s15076_s1 + $0x76c] sm:$0xf]  ;;  %v7277_v36 = vld [vmem:[%s15076_s1 + $0x8d8] sm:$0xf0]  ;;  %v7088_v4 = vor.u32 %v9518_v48, %v7085_v50 }
 0x27c   :  { %5874 = vmatpush.bf16.msra.mxu0 %v6896_v34  ;;  %v9570_v34 = vld [vmem:[%s15076_s1 + $0x8ec] sm:$0xf]  ;;  %v6941_v52 = vld [vmem:[%s15076_s1 + $0x638] sm:$0xf0] }
 0x27d   :  { %5887 = vmatpush.bf16.msra.mxu1 %v7024_v40  ;;  %v6976_v40 = vor.u32 %v9490_v10, %v6973_v12  ;;  %v7296_v47 = vor.u32 %v9570_v34, %v7293_v26  ;;  %v7069_v54 = vld [vmem:[%s15076_s1 + $0x738] sm:$0xf0]  ;;  %v9478_v14 = vld [vmem:[%s15076_s1 + $0x60c] sm:$0xf] }
 0x27e   :  { %5900 = vmatpush.bf16.msra.mxu2 %v7152_v18  ;;  %v7104_v18 = vor.u32 %v9522_v13, %v7101_v17  ;;  %v5637_v55 = vpop.f32.mrf.mxu1  ;;  %v7261_v62 = vld [vmem:[%s15076_s1 + $0x8b8] sm:$0xf0]  ;;  %v7072_v3 = vor.u32 %v9514_v59, %v7069_v54  ;;  %v9558_v10 = vld [vmem:[%s15076_s1 + $0x88c] sm:$0xf] }
 0x27f   :  { %5865 = vmatpush.bf16.msrb.mxu3 %v6704_v63  ;;  %v5624_v63 = vpop.f32.mrf.mxu0  ;;  %v6797_v2 = vld [vmem:[%s15076_s1 + $0x518] sm:$0xf0]  ;;  %v7264_v22 = vor.u32 %v9562_v61, %v7261_v62  ;;  %v9602_v13 = vld [vmem:[%s15076_s1 + $0x9ec] sm:$0xf] }
 0x280   :  { %5875 = vmatpush.bf16.msra.mxu0 %v6880_v51  ;;  %v9566_v51 = vld [vmem:[%s15076_s1 + $0x8cc] sm:$0xf]  ;;  %v7053_v8 = vld [vmem:[%s15076_s1 + $0x718] sm:$0xf0] }
 0x281   :  { %5888 = vmatpush.bf16.msra.mxu1 %v7008_v58  ;;  %v6832_v58 = vor.u32 %v9454_v39, %v6829_v27  ;;  %v7280_v9 = vor.u32 %v9566_v51, %v7277_v36  ;;  %v7245_v12 = vld [vmem:[%s15076_s1 + $0x898] sm:$0xf0]  ;;  %v9634_v34 = vld [vmem:[%s15076_s1 + $0xaec] sm:$0xf] }
 0x282   :  { %5901 = vmatpush.bf16.msra.mxu2 %v7136_v6  ;;  %v6960_v6 = vor.u32 %v9486_v43, %v6957_v20  ;;  %v7421_v17 = vld [vmem:[%s15076_s1 + $0x9f8] sm:$0xf0]  ;;  %v7248_v27 = vor.u32 %v9558_v10, %v7245_v12  ;;  %v9598_v63 = vld [vmem:[%s15076_s1 + $0x9cc] sm:$0xf] }
 0x283   :  { %5866 = vmatpush.bf16.msrb.mxu3 %v6688_v0  ;;  %v6816_v0 = vor.u32 %v9450_v21, %v6813_v7  ;;  %v7424_v43 = vor.u32 %v9602_v13, %v7421_v17  ;;  %v7229_v20 = vld [vmem:[%s15076_s1 + $0x878] sm:$0xf0]  ;;  %v9630_v36 = vld [vmem:[%s15076_s1 + $0xacc] sm:$0xf] }
 0x284   :  { %5876 = vmatpush.bf16.msra.mxu0 %v6864_v1  ;;  %v9446_v1 = vld [vmem:[%s15076_s1 + $0x50c] sm:$0xf]  ;;  %v7405_v51 = vld [vmem:[%s15076_s1 + $0x9d8] sm:$0xf0] }
 0x285   :  { %5889 = vmatpush.bf16.msra.mxu1 %v6992_v24  ;;  %v6925_v24 = vld [vmem:[%s15076_s1 + $0x618] sm:$0xf0]  ;;  %v6800_v26 = vor.u32 %v9446_v1, %v6797_v2  ;;  %v9594_v62 = vld [vmem:[%s15076_s1 + $0x9ac] sm:$0xf] }
 0x286   :  { %5902 = vmatpush.bf16.msra.mxu2 %v7120_v5  ;;  %v9510_v5 = vld [vmem:[%s15076_s1 + $0x70c] sm:$0xf]  ;;  %v7533_v55 = vld [vmem:[%s15076_s1 + $0xad8] sm:$0xf0] }
 0x287   :  { %5867 = vmatpush.bf16.msrb.mxu3 %v6672_v32  ;;  %v7549_v32 = vld [vmem:[%s15076_s1 + $0xaf8] sm:$0xf0]  ;;  %v7056_v39 = vor.u32 %v9510_v5, %v7053_v8  ;;  %v7536_v54 = vor.u32 %v9630_v36, %v7533_v55  ;;  %v9622_v10 = vld [vmem:[%s15076_s1 + $0xa8c] sm:$0xf] }
 0x288   :  { %5877 = vmatpush.bf16.msra.mxu0 %v6848_v53  ;;  %v9666_v53 = vld [vmem:[%s15076_s1 + $0xbec] sm:$0xf]  ;;  %v7552_v48 = vor.u32 %v9634_v34, %v7549_v32  ;;  %v7213_v59 = vld [vmem:[%s15076_s1 + $0x858] sm:$0xf0] }
 0x289   :  { %5890 = vmatpush.bf16.msra.mxu1 %v6976_v40  ;;  %v7677_v40 = vld [vmem:[%s15076_s1 + $0xbf8] sm:$0xf0]  ;;  %v9654_v17 = vld [vmem:[%s15076_s1 + $0xb8c] sm:$0xf] }
 0x28a   :  { %5903 = vmatpush.bf16.msra.mxu2 %v7104_v18  ;;  %5868 = vmatmul.bf16.vlgmr.msrb.gmra.mxu3 %v10550_v41  ;;  %v6944_v41 = vor.u32 %v9482_v57, %v6941_v52  ;;  %v6928_v18 = vor.u32 %v9478_v14, %v6925_v24  ;;  %v7680_v50 = vor.u32 %v9666_v53, %v7677_v40  ;;  %v9550_v52 = vld [vmem:[%s15076_s1 + $0x84c] sm:$0xf]  ;;  %v7517_v2 = vld [vmem:[%s15076_s1 + $0xab8] sm:$0xf0] }
 0x28b   :  { %5912 = vmatpush.bf16.msra.mxu3 %v7296_v47  ;;  %v9554_v47 = vld [vmem:[%s15076_s1 + $0x86c] sm:$0xf]  ;;  %v7408_v57 = vor.u32 %v9598_v63, %v7405_v51  ;;  %v7197_v24 = vld [vmem:[%s15076_s1 + $0x838] sm:$0xf0] }
 0x28c   :  { %5878 = vmatpush.bf16.msra.mxu0 %v6832_v58  ;;  %v9662_v58 = vld [vmem:[%s15076_s1 + $0xbcc] sm:$0xf]  ;;  %v7232_v21 = vor.u32 %v9554_v47, %v7229_v20  ;;  %v7373_v8 = vld [vmem:[%s15076_s1 + $0x998] sm:$0xf0] }
 0x28d   :  { %5891 = vmatpush.bf16.msra.mxu1 %v6960_v6  ;;  %v7661_v6 = vld [vmem:[%s15076_s1 + $0xbd8] sm:$0xf0]  ;;  %v9618_v51 = vld [vmem:[%s15076_s1 + $0xa6c] sm:$0xf] }
 0x28e   :  { %5904 = vmatpush.bf16.msra.mxu2 %v7088_v4  ;;  %v5648_v4 = vpop.f32.mrf.mxu2  ;;  %v7664_v61 = vor.u32 %v9662_v58, %v7661_v6  ;;  %v7501_v13 = vld [vmem:[%s15076_s1 + $0xa98] sm:$0xf0]  ;;  %v9650_v55 = vld [vmem:[%s15076_s1 + $0xb6c] sm:$0xf] }
 0x28f   :  { %5913 = vmatpush.bf16.msra.mxu3 %v7280_v9  ;;  %v5649_v7 = vadd.f32 %v5648_v4, %v14172_v60  ;;  %v5661_v9 = vpop.f32.mrf.mxu3  ;;  %v7389_v60 = vld [vmem:[%s15076_s1 + $0x9b8] sm:$0xf0]  ;;  %v7504_v47 = vor.u32 %v9622_v10, %v7501_v13  ;;  %v9698_v6 = vld [vmem:[%s15076_s1 + $0xcec] sm:$0xf] }
 0x290   :  { %5879 = vmatpush.bf16.msra.mxu0 %v6816_v0  ;;  %v9626_v0 = vld [vmem:[%s15076_s1 + $0xaac] sm:$0xf]  ;;  %v7392_v14 = vor.u32 %v9594_v62, %v7389_v60  ;;  %v7629_v34 = vld [vmem:[%s15076_s1 + $0xb98] sm:$0xf0] }
 0x291   :  { %5892 = vmatpush.bf16.msra.mxu1 %v6944_v41  ;;  %v5662_v1 = vadd.f32 %v5661_v9, %v5649_v7  ;;  %v9658_v41 = vld [vmem:[%s15076_s1 + $0xbac] sm:$0xf]  ;;  %v7520_v5 = vor.u32 %v9626_v0, %v7517_v2  ;;  %v7632_v20 = vor.u32 %v9654_v17, %v7629_v34  ;;  %v7357_v63 = vld [vmem:[%s15076_s1 + $0x978] sm:$0xf0] }
 0x292   :  { %5905 = vmatpush.bf16.msra.mxu2 %v7072_v3  ;;  %v7645_v3 = vld [vmem:[%s15076_s1 + $0xbb8] sm:$0xf0]  ;;  %v9646_v60 = vld [vmem:[%s15076_s1 + $0xb4c] sm:$0xf] }
 0x293   :  { %5914 = vmatpush.bf16.msra.mxu3 %v7264_v22  ;;  %v7648_v22 = vor.u32 %v9658_v41, %v7645_v3  ;;  %v7485_v36 = vld [vmem:[%s15076_s1 + $0xa78] sm:$0xf0]  ;;  %v9694_v2 = vld [vmem:[%s15076_s1 + $0xccc] sm:$0xf] }
 0x294   :  { %5880 = vmatpush.bf16.msra.mxu0 %v6800_v26  ;;  %v5674_v12 = vpop.f32.mrf.mxu0  ;;  %v7613_v58 = vld [vmem:[%s15076_s1 + $0xb78] sm:$0xf0]  ;;  %v9642_v10 = vld [vmem:[%s15076_s1 + $0xb2c] sm:$0xf] }
 0x295   :  { %5893 = vmatpush.bf16.msra.mxu1 %v6928_v18  ;;  %v5675_v26 = vadd.f32 %v5674_v12, %v5662_v1  ;;  %v5687_v32 = vpop.f32.mrf.mxu1  ;;  %v7805_v4 = vld [vmem:[%s15076_s1 + $0xcf8] sm:$0xf0]  ;;  %v7616_v9 = vor.u32 %v9650_v55, %v7613_v58  ;;  %v9690_v13 = vld [vmem:[%s15076_s1 + $0xcac] sm:$0xf] }
 0x296   :  { %5906 = vmatpush.bf16.msra.mxu2 %v7056_v39  ;;  %v5650_v53 = vpop.f32.mrf.mxu2  ;;  %v9542_v39 = vld [vmem:[%s15076_s1 + $0x80c] sm:$0xf]  ;;  %v7469_v62 = vld [vmem:[%s15076_s1 + $0xa58] sm:$0xf0] }
 0x297   :  { %5915 = vmatpush.bf16.msra.mxu3 %v7248_v27  ;;  %5881 = vmatmul.bf16.vlgmr.msra.gmra.mxu0 %v10554_v44  ;;  %v9546_v44 = vld [vmem:[%s15076_s1 + $0x82c] sm:$0xf]  ;;  %v7181_v27 = vld [vmem:[%s15076_s1 + $0x818] sm:$0xf0] }
 0x298   :  { %5925 = vmatpush.bf16.msrb.mxu0 %v7424_v43  ;;  %5894 = vmatmul.bf16.vlgmr.msra.gmra.mxu1 %v10542_v38  ;;  %v9590_v38 = vld [vmem:[%s15076_s1 + $0x98c] sm:$0xf]  ;;  %v7200_v40 = vor.u32 %v9546_v44, %v7197_v24  ;;  %v5663_v43 = vpop.f32.mrf.mxu3  ;;  %v7597_v0 = vld [vmem:[%s15076_s1 + $0xb58] sm:$0xf0] }
 0x299   :  { %5938 = vmatpush.bf16.msrb.mxu1 %v7552_v48  ;;  %5907 = vmatmul.bf16.vlgmr.msra.gmra.mxu2 %v10552_v42  ;;  %v7216_v42 = vor.u32 %v9550_v52, %v7213_v59  ;;  %v7376_v18 = vor.u32 %v9590_v38, %v7373_v8  ;;  %v14371_v48 = vadd.f32 %v5687_v32, %v5675_v26  ;;  %v9582_v52 = vld [vmem:[%s15076_s1 + $0x94c] sm:$0xf]  ;;  %v7341_v59 = vld [vmem:[%s15076_s1 + $0x958] sm:$0xf0] }
 0x29a   :  { %5951 = vmatpush.bf16.msrb.mxu2 %v7680_v50  ;;  %v9586_v50 = vld [vmem:[%s15076_s1 + $0x96c] sm:$0xf]  ;;  %v7789_v41 = vld [vmem:[%s15076_s1 + $0xcd8] sm:$0xf0]  ;;  %v7600_v44 = vor.u32 %v9646_v60, %v7597_v0 }
 0x29b   :  { %5916 = vmatpush.bf16.msra.mxu3 %v7232_v21  ;;  %v7184_v21 = vor.u32 %v9542_v39, %v7181_v27  ;;  %v7360_v7 = vor.u32 %v9586_v50, %v7357_v63  ;;  %v9578_v24 = vld [vmem:[%s15076_s1 + $0x92c] sm:$0xf]  ;;  %v7792_v38 = vor.u32 %v9694_v2, %v7789_v41  ;;  %v7453_v8 = vld [vmem:[%s15076_s1 + $0xa38] sm:$0xf0] }
 0x29c   :  { %5926 = vmatpush.bf16.msrb.mxu0 %v7408_v57  ;;  %v7488_v57 = vor.u32 %v9618_v51, %v7485_v36  ;;  %v5676_v1 = vpop.f32.mrf.mxu0  ;;  %v7581_v12 = vld [vmem:[%s15076_s1 + $0xb38] sm:$0xf0]  ;;  %v9574_v26 = vld [vmem:[%s15076_s1 + $0x90c] sm:$0xf] }
 0x29d   :  { %5939 = vmatpush.bf16.msrb.mxu1 %v7536_v54  ;;  %v9614_v54 = vld [vmem:[%s15076_s1 + $0xa4c] sm:$0xf]  ;;  %v5689_v3 = vpop.f32.mrf.mxu1  ;;  %v7773_v17 = vld [vmem:[%s15076_s1 + $0xcb8] sm:$0xf0]  ;;  %v7584_v53 = vor.u32 %v9642_v10, %v7581_v12 }
 0x29e   :  { %5952 = vmatpush.bf16.msrb.mxu2 %v7664_v61  ;;  %v7808_v61 = vor.u32 %v9698_v6, %v7805_v4  ;;  %v7309_v32 = vld [vmem:[%s15076_s1 + $0x918] sm:$0xf0]  ;;  %v9638_v39 = vld [vmem:[%s15076_s1 + $0xb0c] sm:$0xf]  ;;  %v7776_v27 = vor.u32 %v9690_v13, %v7773_v17 }
 0x29f   :  { %5917 = vmatpush.bf16.msra.mxu3 %v7216_v42  ;;  %v7344_v42 = vor.u32 %v9582_v52, %v7341_v59  ;;  %v7565_v43 = vld [vmem:[%s15076_s1 + $0xb18] sm:$0xf0]  ;;  %v9730_v50 = vld [vmem:[%s15076_s1 + $0xdec] sm:$0xf]  ;;  %v7312_v36 = vor.u32 %v9574_v26, %v7309_v32 }
 0x2a0   :  { %5927 = vmatpush.bf16.msrb.mxu0 %v7392_v14  ;;  %v7472_v14 = vor.u32 %v9614_v54, %v7469_v62  ;;  %v7933_v63 = vld [vmem:[%s15076_s1 + $0xdf8] sm:$0xf0]  ;;  %v9762_v51 = vld [vmem:[%s15076_s1 + $0xeec] sm:$0xf] }
 0x2a1   :  { %5940 = vmatpush.bf16.msrb.mxu1 %v7520_v5  ;;  %v7325_v5 = vld [vmem:[%s15076_s1 + $0x938] sm:$0xf0]  ;;  %v9794_v58 = vld [vmem:[%s15076_s1 + $0xfec] sm:$0xf] }
 0x2a2   :  { %5953 = vmatpush.bf16.msrb.mxu2 %v7648_v22  ;;  %v9610_v22 = vld [vmem:[%s15076_s1 + $0xa2c] sm:$0xf]  ;;  %v7328_v34 = vor.u32 %v9578_v24, %v7325_v5  ;;  %v8061_v55 = vld [vmem:[%s15076_s1 + $0xef8] sm:$0xf0] }
 0x2a3   :  { %5918 = vmatpush.bf16.msra.mxu3 %v7200_v40  ;;  %v9606_v40 = vld [vmem:[%s15076_s1 + $0xa0c] sm:$0xf]  ;;  %v8189_v6 = vld [vmem:[%s15076_s1 + $0xff8] sm:$0xf0]  ;;  %v8064_v59 = vor.u32 %v9762_v51, %v8061_v55 }
 0x2a4   :  { %5928 = vmatpush.bf16.msrb.mxu0 %v7376_v18  ;;  %v7437_v18 = vld [vmem:[%s15076_s1 + $0xa18] sm:$0xf0]  ;;  %v8192_v54 = vor.u32 %v9794_v58, %v8189_v6  ;;  %v9758_v60 = vld [vmem:[%s15076_s1 + $0xecc] sm:$0xf] }
 0x2a5   :  { %5941 = vmatpush.bf16.msrb.mxu1 %v7504_v47  ;;  %v9686_v47 = vld [vmem:[%s15076_s1 + $0xc8c] sm:$0xf]  ;;  %v7440_v4 = vor.u32 %v9606_v40, %v7437_v18  ;;  %v7741_v52 = vld [vmem:[%s15076_s1 + $0xc78] sm:$0xf0] }
 0x2a6   :  { %5954 = vmatpush.bf16.msrb.mxu2 %v7632_v20  ;;  %v7757_v20 = vld [vmem:[%s15076_s1 + $0xc98] sm:$0xf0]  ;;  %v9790_v1 = vld [vmem:[%s15076_s1 + $0xfcc] sm:$0xf] }
 0x2a7   :  { %5919 = vmatpush.bf16.msra.mxu3 %v7184_v21  ;;  %v7568_v21 = vor.u32 %v9638_v39, %v7565_v43  ;;  %v7917_v62 = vld [vmem:[%s15076_s1 + $0xdd8] sm:$0xf0]  ;;  %v9678_v24 = vld [vmem:[%s15076_s1 + $0xc4c] sm:$0xf] }
 0x2a8   :  { %5929 = vmatpush.bf16.msrb.mxu0 %v7360_v7  ;;  %v7760_v7 = vor.u32 %v9686_v47, %v7757_v20  ;;  %v8045_v0 = vld [vmem:[%s15076_s1 + $0xed8] sm:$0xf0]  ;;  %v9754_v10 = vld [vmem:[%s15076_s1 + $0xeac] sm:$0xf] }
 0x2a9   :  { %5942 = vmatpush.bf16.msrb.mxu1 %v7488_v57  ;;  %v7936_v57 = vor.u32 %v9730_v50, %v7933_v63  ;;  %v8173_v2 = vld [vmem:[%s15076_s1 + $0xfd8] sm:$0xf0]  ;;  %v9786_v17 = vld [vmem:[%s15076_s1 + $0xfac] sm:$0xf] }
 0x2aa   :  { %5955 = vmatpush.bf16.msrb.mxu2 %v7616_v9  ;;  %5920 = vmatmul.bf16.vlgmr.msra.gmra.mxu3 %v10743_v25  ;;  %v7456_v25 = vor.u32 %v9610_v22, %v7453_v8  ;;  %v9682_v9 = vld [vmem:[%s15076_s1 + $0xc6c] sm:$0xf]  ;;  %v7725_v5 = vld [vmem:[%s15076_s1 + $0xc58] sm:$0xf0]  ;;  %v8048_v22 = vor.u32 %v9758_v60, %v8045_v0 }
 0x2ab   :  { %5964 = vmatpush.bf16.msrb.mxu3 %v7808_v61  ;;  %v9726_v61 = vld [vmem:[%s15076_s1 + $0xdcc] sm:$0xf]  ;;  %v7744_v3 = vor.u32 %v9682_v9, %v7741_v52  ;;  %v8029_v13 = vld [vmem:[%s15076_s1 + $0xeb8] sm:$0xf0] }
 0x2ac   :  { %5930 = vmatpush.bf16.msrb.mxu0 %v7344_v42  ;;  %v5700_v41 = vpop.f32.mrf.mxu2  ;;  %v9722_v8 = vld [vmem:[%s15076_s1 + $0xdac] sm:$0xf]  ;;  %v7709_v32 = vld [vmem:[%s15076_s1 + $0xc38] sm:$0xf0] }
 0x2ad   :  { %5943 = vmatpush.bf16.msrb.mxu1 %v7472_v14  ;;  %v5701_v42 = vadd.f32 %v5700_v41, %v14371_v48  ;;  %v7920_v14 = vor.u32 %v9726_v61, %v7917_v62  ;;  %v7901_v48 = vld [vmem:[%s15076_s1 + $0xdb8] sm:$0xf0]  ;;  %v9750_v18 = vld [vmem:[%s15076_s1 + $0xe8c] sm:$0xf] }
 0x2ae   :  { %5956 = vmatpush.bf16.msrb.mxu2 %v7600_v44  ;;  %v5713_v44 = vpop.f32.mrf.mxu3  ;;  %v7904_v26 = vor.u32 %v9722_v8, %v7901_v48  ;;  %v7885_v40 = vld [vmem:[%s15076_s1 + $0xd98] sm:$0xf0]  ;;  %v9782_v43 = vld [vmem:[%s15076_s1 + $0xf8c] sm:$0xf] }
 0x2af   :  { %5965 = vmatpush.bf16.msrb.mxu3 %v7792_v38  ;;  %v8176_v38 = vor.u32 %v9790_v1, %v8173_v2  ;;  %v5714_v12 = vadd.f32 %v5713_v44, %v5701_v42  ;;  %v8141_v47 = vld [vmem:[%s15076_s1 + $0xf98] sm:$0xf0]  ;;  %v9670_v55 = vld [vmem:[%s15076_s1 + $0xc0c] sm:$0xf] }
 0x2b0   :  { %5931 = vmatpush.bf16.msrb.mxu0 %v7328_v34  ;;  %v8157_v34 = vld [vmem:[%s15076_s1 + $0xfb8] sm:$0xf0]  ;;  %v9746_v52 = vld [vmem:[%s15076_s1 + $0xe6c] sm:$0xf] }
 0x2b1   :  { %5944 = vmatpush.bf16.msrb.mxu1 %v7456_v25  ;;  %v8032_v25 = vor.u32 %v9754_v10, %v8029_v13  ;;  %v7693_v58 = vld [vmem:[%s15076_s1 + $0xc18] sm:$0xf0]  ;;  %v9826_v62 = vld [vmem:[%s15076_s1 + $0x10ec] sm:$0xf] }
 0x2b2   :  { %5957 = vmatpush.bf16.msrb.mxu2 %v7584_v53  ;;  %v8160_v53 = vor.u32 %v9786_v17, %v8157_v34  ;;  %v7869_v9 = vld [vmem:[%s15076_s1 + $0xd78] sm:$0xf0]  ;;  %v7696_v0 = vor.u32 %v9670_v55, %v7693_v58  ;;  %v9822_v8 = vld [vmem:[%s15076_s1 + $0x10cc] sm:$0xf] }
 0x2b3   :  { %5966 = vmatpush.bf16.msrb.mxu3 %v7776_v27  ;;  %v8013_v27 = vld [vmem:[%s15076_s1 + $0xe98] sm:$0xf0]  ;;  %v9706_v34 = vld [vmem:[%s15076_s1 + $0xd2c] sm:$0xf] }
 0x2b4   :  { %5932 = vmatpush.bf16.msrb.mxu0 %v7312_v36  ;;  %v5726_v39 = vpop.f32.mrf.mxu0  ;;  %v5702_v63 = vpop.f32.mrf.mxu2  ;;  %v8125_v61 = vld [vmem:[%s15076_s1 + $0xf78] sm:$0xf0]  ;;  %v9858_v58 = vld [vmem:[%s15076_s1 + $0x11ec] sm:$0xf] }
 0x2b5   :  { %5945 = vmatpush.bf16.msrb.mxu1 %v7440_v4  ;;  %v5727_v20 = vadd.f32 %v5726_v39, %v5714_v12  ;;  %v5739_v50 = vpop.f32.mrf.mxu1  ;;  %v8016_v4 = vor.u32 %v9750_v18, %v8013_v27  ;;  %v8317_v60 = vld [vmem:[%s15076_s1 + $0x10f8] sm:$0xf0]  ;;  %v9702_v39 = vld [vmem:[%s15076_s1 + $0xd0c] sm:$0xf] }
 0x2b6   :  { %5958 = vmatpush.bf16.msrb.mxu2 %v7568_v21  ;;  %v5715_v6 = vpop.f32.mrf.mxu3  ;;  %v8144_v21 = vor.u32 %v9782_v43, %v8141_v47  ;;  %v7853_v42 = vld [vmem:[%s15076_s1 + $0xd58] sm:$0xf0]  ;;  %v8320_v44 = vor.u32 %v9826_v62, %v8317_v60  ;;  %v9734_v47 = vld [vmem:[%s15076_s1 + $0xe0c] sm:$0xf] }
 0x2b7   :  { %5967 = vmatpush.bf16.msrb.mxu3 %v7760_v7  ;;  %5933 = vmatmul.bf16.vlgmr.msrb.gmra.mxu0 %v10756_v30  ;;  %v7728_v30 = vor.u32 %v9678_v24, %v7725_v5  ;;  %v14570_v7 = vadd.f32 %v5739_v50, %v5727_v20  ;;  %v7981_v24 = vld [vmem:[%s15076_s1 + $0xe58] sm:$0xf0]  ;;  %v9774_v5 = vld [vmem:[%s15076_s1 + $0xf4c] sm:$0xf] }
 0x2b8   :  { %5977 = vmatpush.bf16.msra.mxu0 %v7936_v57  ;;  %5946 = vmatmul.bf16.vlgmr.msrb.gmra.mxu1 %v10754_v29  ;;  %v9718_v29 = vld [vmem:[%s15076_s1 + $0xd8c] sm:$0xf]  ;;  %v8301_v48 = vld [vmem:[%s15076_s1 + $0x10d8] sm:$0xf0] }
 0x2b9   :  { %5990 = vmatpush.bf16.msra.mxu1 %v8064_v59  ;;  %5959 = vmatmul.bf16.vlgmr.msrb.gmra.mxu2 %v10764_v33  ;;  %v9674_v33 = vld [vmem:[%s15076_s1 + $0xc2c] sm:$0xf]  ;;  %v7888_v36 = vor.u32 %v9718_v29, %v7885_v40  ;;  %v7997_v59 = vld [vmem:[%s15076_s1 + $0xe78] sm:$0xf0] }
 0x2ba   :  { %6003 = vmatpush.bf16.msra.mxu2 %v8192_v54  ;;  %v7712_v51 = vor.u32 %v9674_v33, %v7709_v32  ;;  %v9714_v57 = vld [vmem:[%s15076_s1 + $0xd6c] sm:$0xf]  ;;  %v8000_v2 = vor.u32 %v9746_v52, %v7997_v59  ;;  %v8304_v33 = vor.u32 %v9822_v8, %v8301_v48  ;;  %v7965_v32 = vld [vmem:[%s15076_s1 + $0xe38] sm:$0xf0] }
 0x2bb   :  { %5968 = vmatpush.bf16.msrb.mxu3 %v7744_v3  ;;  %v9778_v54 = vld [vmem:[%s15076_s1 + $0xf6c] sm:$0xf]  ;;  %v7872_v1 = vor.u32 %v9714_v57, %v7869_v9  ;;  %v8285_v40 = vld [vmem:[%s15076_s1 + $0x10b8] sm:$0xf0] }
 0x2bc   :  { %5978 = vmatpush.bf16.msra.mxu0 %v7920_v14  ;;  %v8128_v41 = vor.u32 %v9778_v54, %v8125_v61  ;;  %v9710_v3 = vld [vmem:[%s15076_s1 + $0xd4c] sm:$0xf]  ;;  %v7821_v27 = vld [vmem:[%s15076_s1 + $0xd18] sm:$0xf0] }
 0x2bd   :  { %5991 = vmatpush.bf16.msra.mxu1 %v8048_v22  ;;  %v9742_v14 = vld [vmem:[%s15076_s1 + $0xe4c] sm:$0xf]  ;;  %v8109_v22 = vld [vmem:[%s15076_s1 + $0xf58] sm:$0xf0]  ;;  %v5741_v10 = vpop.f32.mrf.mxu1  ;;  %v7856_v12 = vor.u32 %v9710_v3, %v7853_v42 }
 0x2be   :  { %6004 = vmatpush.bf16.msra.mxu2 %v8176_v38  ;;  %v5728_v38 = vpop.f32.mrf.mxu0  ;;  %v7984_v13 = vor.u32 %v9742_v14, %v7981_v24  ;;  %v8112_v17 = vor.u32 %v9774_v5, %v8109_v22  ;;  %v9818_v29 = vld [vmem:[%s15076_s1 + $0x10ac] sm:$0xf]  ;;  %v7949_v20 = vld [vmem:[%s15076_s1 + $0xe18] sm:$0xf0] }
 0x2bf   :  { %5969 = vmatpush.bf16.msrb.mxu3 %v7728_v30  ;;  %v7837_v30 = vld [vmem:[%s15076_s1 + $0xd38] sm:$0xf0]  ;;  %v9766_v50 = vld [vmem:[%s15076_s1 + $0xf0c] sm:$0xf]  ;;  %v8288_v63 = vor.u32 %v9818_v29, %v8285_v40  ;;  %v7952_v59 = vor.u32 %v9734_v47, %v7949_v20 }
 0x2c0   :  { %5979 = vmatpush.bf16.msra.mxu0 %v7904_v26  ;;  %v9738_v26 = vld [vmem:[%s15076_s1 + $0xe2c] sm:$0xf]  ;;  %v7840_v18 = vor.u32 %v9706_v34, %v7837_v30  ;;  %v8269_v55 = vld [vmem:[%s15076_s1 + $0x1098] sm:$0xf0] }
 0x2c1   :  { %5992 = vmatpush.bf16.msra.mxu1 %v8032_v25  ;;  %v9770_v25 = vld [vmem:[%s15076_s1 + $0xf2c] sm:$0xf]  ;;  %v8445_v6 = vld [vmem:[%s15076_s1 + $0x11f8] sm:$0xf0] }
 0x2c2   :  { %6005 = vmatpush.bf16.msra.mxu2 %v8160_v53  ;;  %v8093_v53 = vld [vmem:[%s15076_s1 + $0xf38] sm:$0xf0]  ;;  %v9922_v9 = vld [vmem:[%s15076_s1 + $0x13ec] sm:$0xf]  ;;  %v8448_v62 = vor.u32 %v9858_v58, %v8445_v6 }
 0x2c3   :  { %5970 = vmatpush.bf16.msrb.mxu3 %v7712_v51  ;;  %v8096_v43 = vor.u32 %v9770_v25, %v8093_v53  ;;  %v8077_v51 = vld [vmem:[%s15076_s1 + $0xf18] sm:$0xf0]  ;;  %v9810_v60 = vld [vmem:[%s15076_s1 + $0x106c] sm:$0xf] }
 0x2c4   :  { %5980 = vmatpush.bf16.msra.mxu0 %v7888_v36  ;;  %v9814_v36 = vld [vmem:[%s15076_s1 + $0x108c] sm:$0xf]  ;;  %v8573_v57 = vld [vmem:[%s15076_s1 + $0x12f8] sm:$0xf0]  ;;  %v8080_v54 = vor.u32 %v9766_v50, %v8077_v51 }
 0x2c5   :  { %5993 = vmatpush.bf16.msra.mxu1 %v8016_v4  ;;  %v9890_v4 = vld [vmem:[%s15076_s1 + $0x12ec] sm:$0xf]  ;;  %v8701_v52 = vld [vmem:[%s15076_s1 + $0x13f8] sm:$0xf0]  ;;  %v8272_v61 = vor.u32 %v9814_v36, %v8269_v55 }
 0x2c6   :  { %6006 = vmatpush.bf16.msra.mxu2 %v8144_v21  ;;  %v7824_v21 = vor.u32 %v9702_v39, %v7821_v27  ;;  %v8429_v3 = vld [vmem:[%s15076_s1 + $0x11d8] sm:$0xf0]  ;;  %v9886_v42 = vld [vmem:[%s15076_s1 + $0x12cc] sm:$0xf] }
 0x2c7   :  { %5971 = vmatpush.bf16.msrb.mxu3 %v7696_v0  ;;  %v8253_v0 = vld [vmem:[%s15076_s1 + $0x1078] sm:$0xf0]  ;;  %v9806_v10 = vld [vmem:[%s15076_s1 + $0x104c] sm:$0xf] }
 0x2c8   :  { %5981 = vmatpush.bf16.msra.mxu0 %v7872_v1  ;;  %v8576_v1 = vor.u32 %v9890_v4, %v8573_v57  ;;  %v8557_v14 = vld [vmem:[%s15076_s1 + $0x12d8] sm:$0xf0]  ;;  %v8256_v22 = vor.u32 %v9810_v60, %v8253_v0  ;;  %v9850_v34 = vld [vmem:[%s15076_s1 + $0x11ac] sm:$0xf] }
 0x2c9   :  { %5994 = vmatpush.bf16.msra.mxu1 %v8000_v2  ;;  %v8704_v2 = vor.u32 %v9922_v9, %v8701_v52  ;;  %v8685_v24 = vld [vmem:[%s15076_s1 + $0x13d8] sm:$0xf0]  ;;  %v9882_v30 = vld [vmem:[%s15076_s1 + $0x12ac] sm:$0xf] }
 0x2ca   :  { %6007 = vmatpush.bf16.msra.mxu2 %v8128_v41  ;;  %5972 = vmatmul.bf16.vlgmr.msrb.gmra.mxu3 %v10953_v23  ;;  %v7968_v23 = vor.u32 %v9738_v26, %v7965_v32  ;;  %v9854_v41 = vld [vmem:[%s15076_s1 + $0x11cc] sm:$0xf]  ;;  %v8669_v25 = vld [vmem:[%s15076_s1 + $0x13b8] sm:$0xf0] }
 0x2cb   :  { %6016 = vmatpush.bf16.msra.mxu3 %v8320_v44  ;;  %v9918_v44 = vld [vmem:[%s15076_s1 + $0x13cc] sm:$0xf]  ;;  %v8432_v8 = vor.u32 %v9854_v41, %v8429_v3  ;;  %v8221_v29 = vld [vmem:[%s15076_s1 + $0x1038] sm:$0xf0] }
 0x2cc   :  { %5982 = vmatpush.bf16.msra.mxu0 %v7856_v12  ;;  %v5752_v5 = vpop.f32.mrf.mxu2  ;;  %v8237_v12 = vld [vmem:[%s15076_s1 + $0x1058] sm:$0xf0]  ;;  %v9914_v32 = vld [vmem:[%s15076_s1 + $0x13ac] sm:$0xf] }
 0x2cd   :  { %5995 = vmatpush.bf16.msra.mxu1 %v7984_v13  ;;  %v5753_v38 = vadd.f32 %v5752_v5, %v14570_v7  ;;  %v5765_v48 = vpop.f32.mrf.mxu3  ;;  %v8560_v13 = vor.u32 %v9886_v42, %v8557_v14  ;;  %v8413_v7 = vld [vmem:[%s15076_s1 + $0x11b8] sm:$0xf0]  ;;  %v9878_v27 = vld [vmem:[%s15076_s1 + $0x128c] sm:$0xf] }
 0x2ce   :  { %6008 = vmatpush.bf16.msra.mxu2 %v8112_v17  ;;  %v8688_v17 = vor.u32 %v9918_v44, %v8685_v24  ;;  %v8416_v53 = vor.u32 %v9850_v34, %v8413_v7  ;;  %v8397_v39 = vld [vmem:[%s15076_s1 + $0x1198] sm:$0xf0]  ;;  %v9798_v58 = vld [vmem:[%s15076_s1 + $0x100c] sm:$0xf] }
 0x2cf   :  { %6017 = vmatpush.bf16.msra.mxu3 %v8304_v33  ;;  %v5766_v26 = vadd.f32 %v5765_v48, %v5753_v38  ;;  %v8541_v33 = vld [vmem:[%s15076_s1 + $0x12b8] sm:$0xf0]  ;;  %v9842_v9 = vld [vmem:[%s15076_s1 + $0x116c] sm:$0xf] }
 0x2d0   :  { %5983 = vmatpush.bf16.msra.mxu0 %v7840_v18  ;;  %v8544_v40 = vor.u32 %v9882_v30, %v8541_v33  ;;  %v8672_v18 = vor.u32 %v9914_v32, %v8669_v25  ;;  %v8653_v47 = vld [vmem:[%s15076_s1 + $0x1398] sm:$0xf0]  ;;  %v9954_v0 = vld [vmem:[%s15076_s1 + $0x14ec] sm:$0xf] }
 0x2d1   :  { %5996 = vmatpush.bf16.msra.mxu1 %v7968_v23  ;;  %v8525_v23 = vld [vmem:[%s15076_s1 + $0x1298] sm:$0xf0]  ;;  %v9838_v14 = vld [vmem:[%s15076_s1 + $0x114c] sm:$0xf] }
 0x2d2   :  { %6009 = vmatpush.bf16.msra.mxu2 %v8096_v43  ;;  %v9910_v43 = vld [vmem:[%s15076_s1 + $0x138c] sm:$0xf]  ;;  %v8205_v6 = vld [vmem:[%s15076_s1 + $0x1018] sm:$0xf0] }
 0x2d3   :  { %6018 = vmatpush.bf16.msra.mxu3 %v8288_v63  ;;  %v8656_v57 = vor.u32 %v9910_v43, %v8653_v47  ;;  %v8381_v52 = vld [vmem:[%s15076_s1 + $0x1178] sm:$0xf0]  ;;  %v9870_v24 = vld [vmem:[%s15076_s1 + $0x124c] sm:$0xf] }
 0x2d4   :  { %5984 = vmatpush.bf16.msra.mxu0 %v7824_v21  ;;  %v5778_v20 = vpop.f32.mrf.mxu0  ;;  %v5754_v50 = vpop.f32.mrf.mxu2  ;;  %v8528_v21 = vor.u32 %v9878_v27, %v8525_v23  ;;  %v8637_v60 = vld [vmem:[%s15076_s1 + $0x1378] sm:$0xf0]  ;;  %v8384_v41 = vor.u32 %v9842_v9, %v8381_v52  ;;  %v9902_v38 = vld [vmem:[%s15076_s1 + $0x134c] sm:$0xf] }
 0x2d5   :  { %5997 = vmatpush.bf16.msra.mxu1 %v7952_v59  ;;  %v5779_v63 = vadd.f32 %v5778_v20, %v5766_v26  ;;  %v5791_v55 = vpop.f32.mrf.mxu1  ;;  %v5767_v4 = vpop.f32.mrf.mxu3  ;;  %v9874_v59 = vld [vmem:[%s15076_s1 + $0x126c] sm:$0xf]  ;;  %v8365_v44 = vld [vmem:[%s15076_s1 + $0x1158] sm:$0xf0] }
 0x2d6   :  { %6010 = vmatpush.bf16.msra.mxu2 %v8080_v54  ;;  %v9950_v48 = vld [vmem:[%s15076_s1 + $0x14cc] sm:$0xf]  ;;  %v8349_v33 = vld [vmem:[%s15076_s1 + $0x1138] sm:$0xf0] }
 0x2d7   :  { %6019 = vmatpush.bf16.msra.mxu3 %v8272_v61  ;;  %5985 = vmatmul.bf16.vlgmr.msra.gmra.mxu0 %v10966_v31  ;;  %v8240_v31 = vor.u32 %v9806_v10, %v8237_v12  ;;  %v5792_v54 = vadd.f32 %v5791_v55, %v5779_v63  ;;  %v8509_v61 = vld [vmem:[%s15076_s1 + $0x1278] sm:$0xf0]  ;;  %v9834_v26 = vld [vmem:[%s15076_s1 + $0x112c] sm:$0xf] }
 0x2d8   :  { %6029 = vmatpush.bf16.msrb.mxu0 %v8448_v62  ;;  %5998 = vmatmul.bf16.vlgmr.msra.gmra.mxu1 %v10964_v28  ;;  %v9846_v28 = vld [vmem:[%s15076_s1 + $0x118c] sm:$0xf]  ;;  %v8512_v3 = vor.u32 %v9874_v59, %v8509_v61  ;;  %v8813_v10 = vld [vmem:[%s15076_s1 + $0x14d8] sm:$0xf0] }
 0x2d9   :  { %6042 = vmatpush.bf16.msrb.mxu1 %v8576_v1  ;;  %6011 = vmatmul.bf16.vlgmr.msra.gmra.mxu2 %v10974_v35  ;;  %v9802_v35 = vld [vmem:[%s15076_s1 + $0x102c] sm:$0xf]  ;;  %v8400_v36 = vor.u32 %v9846_v28, %v8397_v39  ;;  %v8829_v1 = vld [vmem:[%s15076_s1 + $0x14f8] sm:$0xf0]  ;;  %v8352_v28 = vor.u32 %v9834_v26, %v8349_v33 }
 0x2da   :  { %6055 = vmatpush.bf16.msrb.mxu2 %v8704_v2  ;;  %v8224_v51 = vor.u32 %v9802_v35, %v8221_v29  ;;  %v9906_v62 = vld [vmem:[%s15076_s1 + $0x136c] sm:$0xf]  ;;  %v8208_v2 = vor.u32 %v9798_v58, %v8205_v6  ;;  %v8832_v5 = vor.u32 %v9954_v0, %v8829_v1  ;;  %v8605_v29 = vld [vmem:[%s15076_s1 + $0x1338] sm:$0xf0] }
 0x2db   :  { %6020 = vmatpush.bf16.msra.mxu3 %v8256_v22  ;;  %v8640_v42 = vor.u32 %v9906_v62, %v8637_v60  ;;  %v8493_v22 = vld [vmem:[%s15076_s1 + $0x1258] sm:$0xf0]  ;;  %v9866_v32 = vld [vmem:[%s15076_s1 + $0x122c] sm:$0xf] }
 0x2dc   :  { %6030 = vmatpush.bf16.msrb.mxu0 %v8432_v8  ;;  %v8621_v8 = vld [vmem:[%s15076_s1 + $0x1358] sm:$0xf0]  ;;  %v5780_v12 = vpop.f32.mrf.mxu0  ;;  %v5804_v34 = vpop.f32.mrf.mxu2  ;;  %v8496_v7 = vor.u32 %v9870_v24, %v8493_v22  ;;  %v9898_v35 = vld [vmem:[%s15076_s1 + $0x132c] sm:$0xf] }
 0x2dd   :  { %6043 = vmatpush.bf16.msrb.mxu1 %v8560_v13  ;;  %v8368_v13 = vor.u32 %v9838_v14, %v8365_v44  ;;  %v8624_v30 = vor.u32 %v9902_v38, %v8621_v8  ;;  %v14826_v25 = vadd.f32 %v5804_v34, %v5792_v54  ;;  %v9830_v39 = vld [vmem:[%s15076_s1 + $0x110c] sm:$0xf]  ;;  %v8333_v27 = vld [vmem:[%s15076_s1 + $0x1118] sm:$0xf0]  ;;  %v8608_v23 = vor.u32 %v9898_v35, %v8605_v29 }
 0x2de   :  { %6056 = vmatpush.bf16.msrb.mxu2 %v8688_v17  ;;  %v5793_v17 = vpop.f32.mrf.mxu1  ;;  %v9862_v43 = vld [vmem:[%s15076_s1 + $0x120c] sm:$0xf]  ;;  %v8461_v47 = vld [vmem:[%s15076_s1 + $0x1218] sm:$0xf0]  ;;  %v8336_v4 = vor.u32 %v9830_v39, %v8333_v27 }
 0x2df   :  { %6021 = vmatpush.bf16.msra.mxu3 %v8240_v31  ;;  %v8816_v31 = vor.u32 %v9950_v48, %v8813_v10  ;;  %v9894_v20 = vld [vmem:[%s15076_s1 + $0x130c] sm:$0xf]  ;;  %v8589_v63 = vld [vmem:[%s15076_s1 + $0x1318] sm:$0xf0]  ;;  %v8464_v52 = vor.u32 %v9862_v43, %v8461_v47  ;;  %v10071_v48 = vld [vmem:[%s15078_s2] sm:$0xf] }
 0x2e0   :  { %6031 = vmatpush.bf16.msrb.mxu0 %v8416_v53  ;;  %v8477_v53 = vld [vmem:[%s15076_s1 + $0x1238] sm:$0xf0]  ;;  %v9986_v55 = vld [vmem:[%s15076_s1 + $0x15ec] sm:$0xf]  ;;  %v8592_v59 = vor.u32 %v9894_v20, %v8589_v63  ;;  %v817_v10 = vperm.slane %v10071_v48, 3 }
 0x2e1   :  { %6044 = vmatpush.bf16.msrb.mxu1 %v8544_v40  ;;  %v9946_v40 = vld [vmem:[%s15076_s1 + $0x14ac] sm:$0xf]  ;;  %v8957_v58 = vld [vmem:[%s15076_s1 + $0x15f8] sm:$0xf0] }
 0x2e2   :  { %6057 = vmatpush.bf16.msrb.mxu2 %v8672_v18  ;;  %v8797_v18 = vld [vmem:[%s15076_s1 + $0x14b8] sm:$0xf0]  ;;  %v10018_v6 = vld [vmem:[%s15076_s1 + $0x16ec] sm:$0xf]  ;;  %v8960_v62 = vor.u32 %v9986_v55, %v8957_v58 }
 0x2e3   :  { %6022 = vmatpush.bf16.msra.mxu3 %v8224_v51  ;;  %v8800_v50 = vor.u32 %v9946_v40, %v8797_v18  ;;  %v9942_v51 = vld [vmem:[%s15076_s1 + $0x148c] sm:$0xf]  ;;  %v9213_v9 = vld [vmem:[%s15076_s1 + $0x17f8] sm:$0xf0] }
 0x2e4   :  { %6032 = vmatpush.bf16.msrb.mxu0 %v8400_v36  ;;  %v8781_v36 = vld [vmem:[%s15076_s1 + $0x1498] sm:$0xf0]  ;;  %v5806_v54 = vpop.f32.mrf.mxu2  ;;  %v9938_v60 = vld [vmem:[%s15076_s1 + $0x146c] sm:$0xf] }
 0x2e5   :  { %6045 = vmatpush.bf16.msrb.mxu1 %v8528_v21  ;;  %v9085_v21 = vld [vmem:[%s15076_s1 + $0x16f8] sm:$0xf0]  ;;  %v8784_v61 = vor.u32 %v9942_v51, %v8781_v36  ;;  %v10046_v44 = vld [vmem:[%s15076_s1 + $0x17cc] sm:$0xf] }
 0x2e6   :  { %6058 = vmatpush.bf16.msrb.mxu2 %v8656_v57  ;;  %v10050_v57 = vld [vmem:[%s15076_s1 + $0x17ec] sm:$0xf]  ;;  %v8765_v0 = vld [vmem:[%s15076_s1 + $0x1478] sm:$0xf0]  ;;  %v9088_v1 = vor.u32 %v10018_v6, %v9085_v21 }
 0x2e7   :  { %6023 = vmatpush.bf16.msra.mxu3 %v8208_v2  ;;  %v9216_v2 = vor.u32 %v10050_v57, %v9213_v9  ;;  %v9069_v14 = vld [vmem:[%s15076_s1 + $0x16d8] sm:$0xf0]  ;;  %v9934_v38 = vld [vmem:[%s15076_s1 + $0x144c] sm:$0xf] }
 0x2e8   :  { %6033 = vmatpush.bf16.msrb.mxu0 %v8384_v41  ;;  %v9982_v41 = vld [vmem:[%s15076_s1 + $0x15cc] sm:$0xf]  ;;  %v9197_v24 = vld [vmem:[%s15076_s1 + $0x17d8] sm:$0xf0] }
 0x2e9   :  { %6046 = vmatpush.bf16.msrb.mxu1 %v8512_v3  ;;  %v8941_v3 = vld [vmem:[%s15076_s1 + $0x15d8] sm:$0xf0]  ;;  %v9200_v17 = vor.u32 %v10046_v44, %v9197_v24  ;;  %v9978_v34 = vld [vmem:[%s15076_s1 + $0x15ac] sm:$0xf] }
 0x2ea   :  { %6059 = vmatpush.bf16.msrb.mxu2 %v8640_v42  ;;  %6024 = vmatmul.bf16.vlgmr.msra.gmra.mxu3 %v11163_v37  ;;  %v8480_v37 = vor.u32 %v9866_v32, %v8477_v53  ;;  %v10014_v42 = vld [vmem:[%s15076_s1 + $0x16cc] sm:$0xf]  ;;  %v8944_v22 = vor.u32 %v9982_v41, %v8941_v3  ;;  %v8749_v8 = vld [vmem:[%s15076_s1 + $0x1458] sm:$0xf0] }
 0x2eb   :  { %6068 = vmatpush.bf16.msrb.mxu3 %v8832_v5  ;;  %v8768_v5 = vor.u32 %v9938_v60, %v8765_v0  ;;  %v9053_v26 = vld [vmem:[%s15076_s1 + $0x16b8] sm:$0xf0]  ;;  %v10042_v33 = vld [vmem:[%s15076_s1 + $0x17ac] sm:$0xf] }
 0x2ec   :  { %6034 = vmatpush.bf16.msrb.mxu0 %v8368_v13  ;;  %v9072_v13 = vor.u32 %v10014_v42, %v9069_v14  ;;  %v9181_v32 = vld [vmem:[%s15076_s1 + $0x17b8] sm:$0xf0]  ;;  %v10038_v27 = vld [vmem:[%s15076_s1 + $0x178c] sm:$0xf] }
 0x2ed   :  { %6047 = vmatpush.bf16.msrb.mxu1 %v8496_v7  ;;  %v5817_v12 = vpop.f32.mrf.mxu3  ;;  %v8925_v7 = vld [vmem:[%s15076_s1 + $0x15b8] sm:$0xf0]  ;;  %v9184_v40 = vor.u32 %v10042_v33, %v9181_v32  ;;  %v9926_v20 = vld [vmem:[%s15076_s1 + $0x140c] sm:$0xf] }
 0x2ee   :  { %6060 = vmatpush.bf16.msrb.mxu2 %v8624_v30  ;;  %v10010_v30 = vld [vmem:[%s15076_s1 + $0x16ac] sm:$0xf]  ;;  %v8733_v53 = vld [vmem:[%s15076_s1 + $0x1438] sm:$0xf0]  ;;  %v5818_v35 = vadd.f32 %v5817_v12, %v817_v10 }
 0x2ef   :  { %6069 = vmatpush.bf16.msrb.mxu3 %v8816_v31  ;;  %v8752_v31 = vor.u32 %v9934_v38, %v8749_v8  ;;  %v9056_v29 = vor.u32 %v10010_v30, %v9053_v26  ;;  %v8909_v18 = vld [vmem:[%s15076_s1 + $0x1598] sm:$0xf0]  ;;  %v9970_v6 = vld [vmem:[%s15076_s1 + $0x156c] sm:$0xf] }
 0x2f0   :  { %6035 = vmatpush.bf16.msrb.mxu0 %v8352_v28  ;;  %v10006_v28 = vld [vmem:[%s15076_s1 + $0x168c] sm:$0xf]  ;;  %v9037_v39 = vld [vmem:[%s15076_s1 + $0x1698] sm:$0xf0] }
 0x2f1   :  { %6048 = vmatpush.bf16.msrb.mxu1 %v8480_v37  ;;  %v9165_v37 = vld [vmem:[%s15076_s1 + $0x1798] sm:$0xf0]  ;;  %v9040_v55 = vor.u32 %v10006_v28, %v9037_v39  ;;  %v10002_v21 = vld [vmem:[%s15076_s1 + $0x166c] sm:$0xf] }
 0x2f2   :  { %6061 = vmatpush.bf16.msrb.mxu2 %v8608_v23  ;;  %v9168_v58 = vor.u32 %v10038_v27, %v9165_v37  ;;  %v9021_v57 = vld [vmem:[%s15076_s1 + $0x1678] sm:$0xf0]  ;;  %v10034_v9 = vld [vmem:[%s15076_s1 + $0x176c] sm:$0xf] }
 0x2f3   :  { %6070 = vmatpush.bf16.msrb.mxu3 %v8800_v50  ;;  %v8717_v50 = vld [vmem:[%s15076_s1 + $0x1418] sm:$0xf0]  ;;  %v10066_v54 = vld [vmem:[%s15076_s1 + $0x186c] sm:$0xf]  ;;  %v9024_v0 = vor.u32 %v10002_v21, %v9021_v57 }
 0x2f4   :  { %6036 = vmatpush.bf16.msrb.mxu0 %v8336_v4  ;;  %v5830_v23 = vpop.f32.mrf.mxu0  ;;  %v8893_v4 = vld [vmem:[%s15076_s1 + $0x1578] sm:$0xf0]  ;;  %v9998_v3 = vld [vmem:[%s15076_s1 + $0x164c] sm:$0xf] }
 0x2f5   :  { %6049 = vmatpush.bf16.msrb.mxu1 %v8464_v52  ;;  %v5831_v63 = vadd.f32 %v5830_v23, %v5818_v35  ;;  %v5843_v51 = vpop.f32.mrf.mxu1  ;;  %v5819_v36 = vpop.f32.mrf.mxu3  ;;  %v9149_v52 = vld [vmem:[%s15076_s1 + $0x1778] sm:$0xf0]  ;;  %v8896_v60 = vor.u32 %v9970_v6, %v8893_v4  ;;  %v10030_v24 = vld [vmem:[%s15076_s1 + $0x174c] sm:$0xf] }
 0x2f6   :  { %6062 = vmatpush.bf16.msrb.mxu2 %v8592_v59  ;;  %v8877_v41 = vld [vmem:[%s15076_s1 + $0x1558] sm:$0xf0]  ;;  %v10062_v38 = vld [vmem:[%s15076_s1 + $0x184c] sm:$0xf] }
 0x2f7   :  { %6071 = vmatpush.bf16.msrb.mxu3 %v8784_v61  ;;  %6037 = vmatmul.bf16.vlgmr.msrb.gmra.mxu0 %v11176_v46  ;;  %v8928_v46 = vor.u32 %v9978_v34, %v8925_v7  ;;  %v5844_v59 = vadd.f32 %v5843_v51, %v5831_v63  ;;  %v9277_v61 = vld [vmem:[%s15076_s1 + $0x1878] sm:$0xf0]  ;;  %v9962_v34 = vld [vmem:[%s15076_s1 + $0x152c] sm:$0xf] }
 0x2f8   :  { %6081 = vmatpush.bf16.msra.mxu0 %v8960_v62  ;;  %6050 = vmatmul.bf16.vlgmr.msrb.gmra.mxu1 %v11174_v45  ;;  %v9974_v45 = vld [vmem:[%s15076_s1 + $0x158c] sm:$0xf]  ;;  %v8720_v62 = vor.u32 %v9926_v20, %v8717_v50  ;;  %v9280_v14 = vor.u32 %v10066_v54, %v9277_v61  ;;  %v9005_v44 = vld [vmem:[%s15076_s1 + $0x1658] sm:$0xf0] }
 0x2f9   :  { %6094 = vmatpush.bf16.msra.mxu1 %v9088_v1  ;;  %6063 = vmatmul.bf16.vlgmr.msrb.gmra.mxu2 %v11184_v49  ;;  %v9930_v49 = vld [vmem:[%s15076_s1 + $0x142c] sm:$0xf]  ;;  %v8912_v47 = vor.u32 %v9974_v45, %v8909_v18  ;;  %v9152_v1 = vor.u32 %v10034_v9, %v9149_v52  ;;  %v9261_v8 = vld [vmem:[%s15076_s1 + $0x1858] sm:$0xf0] }
 0x2fa   :  { %6107 = vmatpush.bf16.msra.mxu2 %v9216_v2  ;;  %v8736_v43 = vor.u32 %v9930_v49, %v8733_v53  ;;  %v9966_v2 = vld [vmem:[%s15076_s1 + $0x154c] sm:$0xf]  ;;  %v8861_v7 = vld [vmem:[%s15076_s1 + $0x1538] sm:$0xf0]  ;;  %v9264_v26 = vor.u32 %v10062_v38, %v9261_v8 }
 0x2fb   :  { %6072 = vmatpush.bf16.msrb.mxu3 %v8768_v5  ;;  %v9133_v5 = vld [vmem:[%s15076_s1 + $0x1758] sm:$0xf0]  ;;  %v8880_v10 = vor.u32 %v9966_v2, %v8877_v41  ;;  %v9994_v30 = vld [vmem:[%s15076_s1 + $0x162c] sm:$0xf]  ;;  %v8864_v53 = vor.u32 %v9962_v34, %v8861_v7 }
 0x2fc   :  { %6082 = vmatpush.bf16.msra.mxu0 %v8944_v22  ;;  %v5856_v42 = vpop.f32.mrf.mxu2  ;;  %v5832_v48 = vpop.f32.mrf.mxu0  ;;  %v8989_v33 = vld [vmem:[%s15076_s1 + $0x1638] sm:$0xf0]  ;;  %v10026_v32 = vld [vmem:[%s15076_s1 + $0x172c] sm:$0xf] }
 0x2fd   :  { %6095 = vmatpush.bf16.msra.mxu1 %v9072_v13  ;;  %v5857_v22 = vadd.f32 %v5856_v42, %v5844_v59  ;;  %v5845_v12 = vpop.f32.mrf.mxu1  ;;  %v9008_v13 = vor.u32 %v9998_v3, %v9005_v44  ;;  %v9245_v49 = vld [vmem:[%s15076_s1 + $0x1838] sm:$0xf0]  ;;  %v8992_v35 = vor.u32 %v9994_v30, %v8989_v33  ;;  %v9990_v45 = vld [vmem:[%s15076_s1 + $0x160c] sm:$0xf] }
 0x2fe   :  { %6108 = vmatpush.bf16.msra.mxu2 %v9200_v17  ;;  %v9136_v17 = vor.u32 %v10030_v24, %v9133_v5  ;;  %v8973_v39 = vld [vmem:[%s15076_s1 + $0x1618] sm:$0xf0]  ;;  %v10022_v27 = vld [vmem:[%s15076_s1 + $0x170c] sm:$0xf] }
 0x2ff   :  { %6073 = vmatpush.bf16.msrb.mxu3 %v8752_v31  ;;  %v9117_v31 = vld [vmem:[%s15076_s1 + $0x1738] sm:$0xf0]  ;;  %v10054_v23 = vld [vmem:[%s15076_s1 + $0x180c] sm:$0xf]  ;;  %v8976_v20 = vor.u32 %v9990_v45, %v8973_v39 }
 0x300   :  { %6083 = vmatpush.bf16.msra.mxu0 %v8928_v46  ;;  %v10058_v46 = vld [vmem:[%s15076_s1 + $0x182c] sm:$0xf]  ;;  %v9101_v37 = vld [vmem:[%s15076_s1 + $0x1718] sm:$0xf0] }
 0x301   :  { %6096 = vmatpush.bf16.msra.mxu1 %v9056_v29  ;;  %v9120_v29 = vor.u32 %v10026_v32, %v9117_v31  ;;  %v9248_v28 = vor.u32 %v10058_v46, %v9245_v49  ;;  %v9104_v50 = vor.u32 %v10022_v27, %v9101_v37 }
 0x302   :  { %6109 = vmatpush.bf16.msra.mxu2 %v9184_v40  ;;  %v9958_v40 = vld [vmem:[%s15076_s1 + $0x150c] sm:$0xf] }
 0x303   :  { %6074 = vmatpush.bf16.msrb.mxu3 %v8736_v43  ;;  %v9229_v43 = vld [vmem:[%s15076_s1 + $0x1818] sm:$0xf0] }
 0x304   :  { %6084 = vmatpush.bf16.msra.mxu0 %v8912_v47  ;;  %v5858_v18 = vpop.f32.mrf.mxu2  ;;  %v9232_v63 = vor.u32 %v10054_v23, %v9229_v43 }
 0x305   :  { %6097 = vmatpush.bf16.msra.mxu1 %v9040_v55 }
 0x306   :  { %6110 = vmatpush.bf16.msra.mxu2 %v9168_v58 }
 0x307   :  { %6075 = vmatpush.bf16.msrb.mxu3 %v8720_v62 }
 0x308   :  { %6085 = vmatpush.bf16.msra.mxu0 %v8896_v60 }
 0x309   :  { %6098 = vmatpush.bf16.msra.mxu1 %v9024_v0 }
 0x30a   :  { %6111 = vmatpush.bf16.msra.mxu2 %v9152_v1  ;;  %6076 = vmatmul.bf16.vlgmr.msrb.gmra.mxu3 %v11378_v11  ;;  %v8845_v11 = vld [vmem:[%s15076_s1 + $0x1518] sm:$0xf0] }
 0x30b   :  { %6124 = vmatpush.bf16.msra.mxu3 %v9280_v14  ;;  %v8848_v47 = vor.u32 %v9958_v40, %v8845_v11 }
 0x30c   :  { %6086 = vmatpush.bf16.msra.mxu0 %v8880_v10 }
 0x30d   :  { %6099 = vmatpush.bf16.msra.mxu1 %v9008_v13  ;;  %v5869_v51 = vpop.f32.mrf.mxu3 }
 0x30e   :  { %6112 = vmatpush.bf16.msra.mxu2 %v9136_v17  ;;  %v5870_v36 = vadd.f32 %v5869_v51, %v5857_v22 }
 0x30f   :  { %6125 = vmatpush.bf16.msra.mxu3 %v9264_v26 }
 0x310   :  { %6087 = vmatpush.bf16.msra.mxu0 %v8864_v53 }
 0x311   :  { %6100 = vmatpush.bf16.msra.mxu1 %v8992_v35 }
 0x312   :  { %6113 = vmatpush.bf16.msra.mxu2 %v9120_v29 }
 0x313   :  { %6126 = vmatpush.bf16.msra.mxu3 %v9248_v28 }
 0x314   :  { %6088 = vmatpush.bf16.msra.mxu0 %v8848_v47  ;;  %v5882_v55 = vpop.f32.mrf.mxu0 }
 0x315   :  { %6101 = vmatpush.bf16.msra.mxu1 %v8976_v20  ;;  %v5883_v58 = vadd.f32 %v5882_v55, %v5870_v36  ;;  %v5895_v6 = vpop.f32.mrf.mxu1  ;;  %v5871_v4 = vpop.f32.mrf.mxu3 }
 0x316   :  { %6114 = vmatpush.bf16.msra.mxu2 %v9104_v50  ;;  %v6135_v50 = vmax.f32 %v14826_v25, 0.0 }
 0x317   :  { %6127 = vmatpush.bf16.msra.mxu3 %v9232_v63  ;;  %6089 = vmatmul.bf16.vlgmr.msra.gmra.mxu0 %v11391_v16  ;;  %v5896_v21 = vadd.f32 %v5895_v6, %v5883_v58 }
 0x318   :  { %6102 = vmatmul.bf16.vlgmr.msra.gmra.mxu1 %v11389_v15 }
 0x319   :  { %6115 = vmatmul.bf16.vlgmr.msra.gmra.mxu2 %v11399_v19 }
 0x31a   :  { %9284 = vmatmul.msk.bf16.vlgmr.msra.gmra.mxu3 %vm4829_vm0, %v11502_v56 }
 0x31c   :  { %v5908_v57 = vpop.f32.mrf.mxu2  ;;  %v5884_v52 = vpop.f32.mrf.mxu0 }
 0x31d   :  { %v5909_v9 = vadd.f32 %v5908_v57, %v5896_v21  ;;  %v5897_v59 = vpop.f32.mrf.mxu1 }
 0x324   :  { %v5910_v54 = vpop.f32.mrf.mxu2 }
 0x32d   :  { %v5921_v61 = vpop.f32.mrf.mxu3 }
 0x32e   :  { %v5922_v16 = vadd.f32 %v5921_v61, %v5909_v9 }
 0x334   :  { %v5934_v62 = vpop.f32.mrf.mxu0 }
 0x335   :  { %v5935_v60 = vadd.f32 %v5934_v62, %v5922_v16  ;;  %v5947_v15 = vpop.f32.mrf.mxu1  ;;  %v5923_v0 = vpop.f32.mrf.mxu3 }
 0x337   :  { %v5948_v19 = vadd.f32 %v5947_v15, %v5935_v60 }
 0x33c   :  { %v5960_v1 = vpop.f32.mrf.mxu2  ;;  %v5936_v56 = vpop.f32.mrf.mxu0 }
 0x33d   :  { %v5961_v2 = vadd.f32 %v5960_v1, %v5948_v19  ;;  %v5949_v41 = vpop.f32.mrf.mxu1 }
 0x344   :  { %v5962_v3 = vpop.f32.mrf.mxu2 }
 0x34d   :  { %v5973_v42 = vpop.f32.mrf.mxu3 }
 0x34e   :  { %v5974_v7 = vadd.f32 %v5973_v42, %v5961_v2 }
 0x354   :  { %v5986_v14 = vpop.f32.mrf.mxu0 }
 0x355   :  { %v5999_v44 = vpop.f32.mrf.mxu1  ;;  %v5975_v24 = vpop.f32.mrf.mxu3  ;;  %v5987_v26 = vadd.f32 %v5986_v14, %v5974_v7 }
 0x357   :  { %v6000_v32 = vadd.f32 %v5999_v44, %v5987_v26 }
 0x35c   :  { %v6012_v5 = vpop.f32.mrf.mxu2  ;;  %v5988_v22 = vpop.f32.mrf.mxu0 }
 0x35d   :  { %v6001_v38 = vpop.f32.mrf.mxu1  ;;  %v6013_v31 = vadd.f32 %v6012_v5, %v6000_v32 }
 0x364   :  { %v6014_v8 = vpop.f32.mrf.mxu2 }
 0x36d   :  { %v6025_v48 = vpop.f32.mrf.mxu3 }
 0x36e   :  { %v6026_v46 = vadd.f32 %v6025_v48, %v6013_v31 }
 0x374   :  { %v6038_v10 = vpop.f32.mrf.mxu0 }
 0x375   :  { %v6051_v12 = vpop.f32.mrf.mxu1  ;;  %v6027_v13 = vpop.f32.mrf.mxu3  ;;  %v6039_v49 = vadd.f32 %v6038_v10, %v6026_v46 }
 0x377   :  { %v6052_v35 = vadd.f32 %v6051_v12, %v6039_v49 }
 0x37c   :  { %v6064_v17 = vpop.f32.mrf.mxu2  ;;  %v6040_v34 = vpop.f32.mrf.mxu0 }
 0x37d   :  { %v6053_v30 = vpop.f32.mrf.mxu1  ;;  %v6065_v29 = vadd.f32 %v6064_v17, %v6052_v35 }
 0x384   :  { %v6066_v33 = vpop.f32.mrf.mxu2 }
 0x38d   :  { %v6077_v53 = vpop.f32.mrf.mxu3 }
 0x38e   :  { %v6078_v40 = vadd.f32 %v6077_v53, %v6065_v29 }
 0x394   :  { %v6090_v11 = vpop.f32.mrf.mxu0 }
 0x395   :  { %v6103_v45 = vpop.f32.mrf.mxu1  ;;  %v6091_v18 = vadd.f32 %v6090_v11, %v6078_v40  ;;  %v6079_v28 = vpop.f32.mrf.mxu3 }
 0x397   :  { %v6104_v39 = vadd.f32 %v6103_v45, %v6091_v18 }
 0x39c   :  { %v6116_v27 = vpop.f32.mrf.mxu2  ;;  %v6092_v23 = vpop.f32.mrf.mxu0 }
 0x39d   :  { %v6117_v37 = vadd.f32 %v6116_v27, %v6104_v39  ;;  %v6105_v43 = vpop.f32.mrf.mxu1  ;;  %v6129_v47 = vpop.f32.mrf.mxu3 }
 0x39f   :  { %v6130_v20 = vadd.f32 %v6129_v47, %v6117_v37 }
 0x3a1   :  { %v6136_v63 = vmax.f32 %v6130_v20, 0.0 }
 0x3a3   :  { %v6138_v51 = vpack.c.bf16 %v6136_v63, %v6135_v50 }
 0x3a4   :  { %v6118_v36 = vpop.f32.mrf.mxu2 }
 0x3a5   :  { %6140 = vst [vmem:[%s15079_s3 + $0x8] sm:$0xff] %v6138_v51  ;;  %v6131_v55 = vpop.f32.mrf.mxu3 }

</bundles_post_ra>
